<compile_context>
chip_gen: v5e
topology: v5e:2x2
jax: 0.10.0
libtpu: 0.0.40
codegen_flags: <defaults>
</compile_context>

<pallas_src>
import functools

import jax
import jax.numpy as jnp
from jax.experimental import pallas as pl
from jax.experimental.pallas import tpu as pltpu

EPS = 1e-5          # PyTorch BatchNorm2d default
NEG_SLOPE = 0.1
LANE = 128


def _round_up(x, m):
    return (x + m - 1) // m * m


# ---------------------------------------------------------------------------
# Kernel 1: in-VMEM im2col conv (9 row-shifted MXU matmuls) + masked partial
#           per-channel sum / sum-of-squares for the BatchNorm batch stats.
# ---------------------------------------------------------------------------
def conv_stats_kernel(x_ref, w_ref, mask_ref, conv_ref, psum_ref, psumsq_ref,
                      *, imgs, pr, cout_pad, offsets):
    # x_ref    : (imgs, pr + tail, Cin)  bf16  -- padded image, (h,w) flattened
    # w_ref    : (9, Cin, cout_pad)      bf16  -- one (Cin, Cout) slab per tap
    # mask_ref : (pr, 1)                 f32   -- 1.0 on valid output rows
    # conv_ref : (imgs, pr, cout_pad)    f32
    # psum_ref / psumsq_ref : (8, cout_pad) f32 -- this grid step's partials
    mask = mask_ref[...]                                    # (pr, 1)
    s = jnp.zeros((1, cout_pad), jnp.float32)
    ss = jnp.zeros((1, cout_pad), jnp.float32)
    for img in range(imgs):
        acc = jnp.zeros((pr, cout_pad), jnp.float32)
        for tap, off in enumerate(offsets):
            lhs = x_ref[img, off:off + pr, :]               # (pr, Cin), static slice
            acc = acc + jnp.dot(lhs, w_ref[tap],
                                preferred_element_type=jnp.float32)
        conv_ref[img] = acc
        masked = acc * mask                                 # drop halo / pad rows
        s = s + jnp.sum(masked, axis=0, keepdims=True)
        ss = ss + jnp.sum(masked * acc, axis=0, keepdims=True)
    psum_ref[...] = jnp.broadcast_to(s, (8, cout_pad))      # full-tile store
    psumsq_ref[...] = jnp.broadcast_to(ss, (8, cout_pad))


# ---------------------------------------------------------------------------
# Kernel 2: fused BatchNorm affine + LeakyReLU(0.1), in place over conv_out.
# ---------------------------------------------------------------------------
def bn_lrelu_kernel(y_ref, scale_ref, shift_ref, o_ref):
    y = y_ref[...] * scale_ref[...] + shift_ref[...]
    o_ref[...] = jnp.where(y > 0, y, NEG_SLOPE * y)


def cnn_block(x_nchw, weight, gamma, beta):
    """Forward pass of CNNBlock (kernel_size=3, stride=1, padding=1).

    x_nchw : (N, Cin, H, W) f32;  weight : (Cout, Cin, 3, 3) f32 (bias=False)
    gamma, beta : (Cout,) f32 (BatchNorm2d affine).  Returns (N, Cout, H, W) f32.
    """
    N, Cin, H, W = x_nchw.shape
    Cout, _, KH, KW = weight.shape
    assert (KH, KW) == (3, 3), "this block uses kernel_size=3, stride=1, padding=1"

    cout_pad = _round_up(Cout, LANE)       # lane-dense matmul N-dim / stores
    Wp = W + 2
    P = (H + 2) * Wp                       # padded spatial positions per image
    PR = _round_up(P, 16)                  # rows per image (sublane friendly)
    TAIL = 2 * Wp + 2                      # largest tap offset (ky=2, kx=2)

    # ---- host-side layout prep (1x activation bytes, no patch duplication) ----
    x = jnp.transpose(x_nchw, (0, 2, 3, 1)).astype(jnp.bfloat16)        # NHWC bf16
    xp = jnp.pad(x, ((0, 0), (1, 1), (1, 1), (0, 0)))                   # (N,H+2,W+2,Cin)
    xr = xp.reshape(N, P, Cin)
    xr = jnp.pad(xr, ((0, 0), (0, PR + TAIL - P), (0, 0)))              # (N, PR+TAIL, Cin)

    # weights: (Cout,Cin,3,3) -> (9, Cin, cout_pad) bf16, zero-padded channels
    w_taps = jnp.transpose(weight, (2, 3, 1, 0)).reshape(KH * KW, Cin, Cout)
    w_taps = jnp.pad(w_taps, ((0, 0), (0, 0), (0, cout_pad - Cout))).astype(jnp.bfloat16)

    # validity mask over the PR flattened rows of one image
    p_idx = jnp.arange(PR)
    mask = ((p_idx % Wp < W) & (p_idx // Wp < H)).astype(jnp.float32).reshape(PR, 1)

    offsets = tuple(ky * Wp + kx for ky in range(KH) for kx in range(KW))

    # images per grid step: target ~1k output rows per step, must divide N
    imgs = max(1, min(N, 1024 // PR if PR <= 1024 else 1))
    while N % imgs:
        imgs -= 1
    grid1 = N // imgs

    # VMEM budget (double-buffered blocks) with per-generation-safe headroom
    blk_bytes = (imgs * (PR + TAIL) * Cin * 2        # x block (bf16)
                 + imgs * PR * cout_pad * 4          # conv block (f32)
                 + KH * KW * Cin * cout_pad * 2      # weights
                 + PR * LANE * 4                     # mask (lane-padded in VMEM)
                 + 2 * 8 * cout_pad * 4)             # stat partials
    vmem_limit = int(min(48 * 2**20, max(32 * 2**20, 4 * blk_bytes)))

    kernel1 = functools.partial(conv_stats_kernel, imgs=imgs, pr=PR,
                                cout_pad=cout_pad, offsets=offsets)

    conv_out, psum, psumsq = pl.pallas_call(
        kernel1,
        out_shape=(
            jax.ShapeDtypeStruct((N, PR, cout_pad), jnp.float32),
            jax.ShapeDtypeStruct((grid1 * 8, cout_pad), jnp.float32),
            jax.ShapeDtypeStruct((grid1 * 8, cout_pad), jnp.float32),
        ),
        grid=(grid1,),
        in_specs=[
            pl.BlockSpec((imgs, PR + TAIL, Cin), lambda i: (i, 0, 0)),
            pl.BlockSpec((KH * KW, Cin, cout_pad), lambda i: (0, 0, 0)),
            pl.BlockSpec((PR, 1), lambda i: (0, 0)),
        ],
        out_specs=(
            pl.BlockSpec((imgs, PR, cout_pad), lambda i: (i, 0, 0)),
            pl.BlockSpec((8, cout_pad), lambda i: (i, 0)),
            pl.BlockSpec((8, cout_pad), lambda i: (i, 0)),
        ),
        compiler_params=pltpu.CompilerParams(
            dimension_semantics=("parallel",),
            vmem_limit_bytes=vmem_limit),
    )(xr, w_taps, mask)

    # ---- batch statistics -> fused per-channel scale / shift (tiny, in XLA) ----
    m_count = float(N * H * W)
    col_sum = psum.reshape(grid1, 8, cout_pad)[:, 0, :].sum(axis=0)
    col_sumsq = psumsq.reshape(grid1, 8, cout_pad)[:, 0, :].sum(axis=0)
    mean = col_sum / m_count
    # TODO(synk): E[y^2]-E[y]^2 can cancel for strongly non-zero-mean activations;
    # a shifted/two-pass (Welford) variance would be more robust.
    var = jnp.maximum(col_sumsq / m_count - mean * mean, 0.0)
    inv_std = jax.lax.rsqrt(var + EPS)
    gamma_p = jnp.pad(gamma.astype(jnp.float32), (0, cout_pad - Cout))
    beta_p = jnp.pad(beta.astype(jnp.float32), (0, cout_pad - Cout))
    scale = (gamma_p * inv_std).reshape(1, 1, cout_pad)
    shift = (beta_p - mean * gamma_p * inv_std).reshape(1, 1, cout_pad)

    # ---- kernel 2: in-place fused BN affine + LeakyReLU (lane-dense) ----
    imgs2 = max(1, min(N, 2048 // PR if PR <= 2048 else 1))
    while N % imgs2:
        imgs2 -= 1
    grid2 = N // imgs2
    y = pl.pallas_call(
        bn_lrelu_kernel,
        out_shape=jax.ShapeDtypeStruct((N, PR, cout_pad), jnp.float32),
        grid=(grid2,),
        in_specs=[
            pl.BlockSpec((imgs2, PR, cout_pad), lambda i: (i, 0, 0)),
            pl.BlockSpec((1, 1, cout_pad), lambda i: (0, 0, 0)),
            pl.BlockSpec((1, 1, cout_pad), lambda i: (0, 0, 0)),
        ],
        out_specs=pl.BlockSpec((imgs2, PR, cout_pad), lambda i: (i, 0, 0)),
        input_output_aliases={0: 0},
        compiler_params=pltpu.CompilerParams(
            dimension_semantics=("parallel",),
            vmem_limit_bytes=vmem_limit),
    )(conv_out, scale, shift)

    # ---- strip halo/pad rows + channel padding, back to NCHW ----
    y = y[:, :P, :Cout].reshape(N, H + 2, W + 2, Cout)[:, :H, :W, :]
    return jnp.transpose(y, (0, 3, 1, 2))


def reference(x, weight, gamma, beta):
    """Pure-JAX reference matching PyTorch semantics (training-mode BN)."""
    conv = jax.lax.conv_general_dilated(
        x, weight, window_strides=(1, 1), padding=((1, 1), (1, 1)),
        dimension_numbers=("NCHW", "OIHW", "NCHW"))
    mean = conv.mean(axis=(0, 2, 3), keepdims=True)
    var = conv.var(axis=(0, 2, 3), keepdims=True)          # biased (ddof=0)
    xhat = (conv - mean) * jax.lax.rsqrt(var + EPS)
    y = xhat * gamma.reshape(1, -1, 1, 1) + beta.reshape(1, -1, 1, 1)
    return jnp.where(y > 0, y, NEG_SLOPE * y)


if __name__ == "__main__":
    key = jax.random.PRNGKey(0)
    k_x, k_w = jax.random.split(key)

    N, Cin, H, W, Cout = 2, 4, 16, 16, 8
    x = jax.random.normal(k_x, (N, Cin, H, W), dtype=jnp.float32)
    weight = 0.1 * jax.random.normal(k_w, (Cout, Cin, 3, 3), dtype=jnp.float32)
    gamma = 1.0 + 0.1 * jnp.arange(Cout, dtype=jnp.float32)   # BN weight
    beta = 0.05 * jnp.arange(Cout, dtype=jnp.float32)         # BN bias

    out = jax.block_until_ready(jax.jit(cnn_block)(x, weight, gamma, beta))
    ref = jax.block_until_ready(reference(x, weight, gamma, beta))

    assert out.shape == (N, Cout, H, W)
    # bf16 MXU inputs (f32 accumulate): compare with a mixed-precision tolerance.
    assert jnp.allclose(out, ref, atol=2e-2, rtol=2e-2), \
        float(jnp.max(jnp.abs(out - ref)))
    print("KERNEL_OK")
</pallas_src>

<mosaic_0001>
module attributes {stable_mosaic.version = 11 : i64} {
  func.func @conv_stats_kernel(%arg0: i32, %arg1: memref<2x374x4xbf16, #tpu.memory_space<vmem>>, %arg2: memref<9x4x128xbf16, #tpu.memory_space<vmem>>, %arg3: memref<336x1xf32, #tpu.memory_space<vmem>>, %arg4: memref<2x336x128xf32, #tpu.memory_space<vmem>>, %arg5: memref<8x128xf32, #tpu.memory_space<vmem>>, %arg6: memref<8x128xf32, #tpu.memory_space<vmem>>) attributes {dimension_semantics = [#tpu.dimension_semantics<parallel>], iteration_bounds = array<i64: 1>, scalar_prefetch = 0 : i64, scratch_operands = 0 : i64, tpu.core_type = #tpu.core_type<tc>, window_params = [{transform_indices = @transform_0, window_bounds = array<i64: 2, 374, 4>}, {pipeline_mode = #tpu.pipeline_mode<synchronous>, transform_indices = @transform_1, window_bounds = array<i64: 9, 4, 128>}, {pipeline_mode = #tpu.pipeline_mode<synchronous>, transform_indices = @transform_2, window_bounds = array<i64: 336, 1>}, {transform_indices = @transform_3, window_bounds = array<i64: 2, 336, 128>}, {transform_indices = @transform_4, window_bounds = array<i64: 8, 128>}, {transform_indices = @transform_5, window_bounds = array<i64: 8, 128>}]} {
    %c0 = arith.constant 0 : index
    %c0_0 = arith.constant 0 : index
    %0 = vector.load %arg3[%c0, %c0_0] : memref<336x1xf32, #tpu.memory_space<vmem>>, vector<336x1xf32>
    %cst = arith.constant 0.000000e+00 : f32
    %1 = vector.broadcast %cst : f32 to vector<1x128xf32>
    %cst_1 = arith.constant 0.000000e+00 : f32
    %2 = vector.broadcast %cst_1 : f32 to vector<1x128xf32>
    %cst_2 = arith.constant 0.000000e+00 : f32
    %3 = vector.broadcast %cst_2 : f32 to vector<336x128xf32>
    %c0_3 = arith.constant 0 : index
    %c0_4 = arith.constant 0 : index
    %c0_5 = arith.constant 0 : index
    %4 = vector.load %arg1[%c0_3, %c0_4, %c0_5] : memref<2x374x4xbf16, #tpu.memory_space<vmem>>, vector<1x336x4xbf16>
    %5 = vector.shape_cast %4 : vector<1x336x4xbf16> to vector<336x4xbf16>
    %c0_6 = arith.constant 0 : index
    %c0_7 = arith.constant 0 : index
    %c0_8 = arith.constant 0 : index
    %6 = vector.load %arg2[%c0_6, %c0_7, %c0_8] : memref<9x4x128xbf16, #tpu.memory_space<vmem>>, vector<1x4x128xbf16>
    %7 = vector.shape_cast %6 : vector<1x4x128xbf16> to vector<4x128xbf16>
    %cst_9 = arith.constant dense<0.000000e+00> : vector<336x128xf32>
    %8 = tpu.matmul %5, %7, %cst_9 {dimension_numbers = #tpu.dot_dimension_numbers<[1], [0], [0], [1], [0, 0, 1, 1], [], []>} : vector<336x4xbf16>, vector<4x128xbf16>, vector<336x128xf32> -> vector<336x128xf32>
    %9 = arith.addf %3, %8 : vector<336x128xf32>
    %c0_10 = arith.constant 0 : index
    %c1 = arith.constant 1 : index
    %c0_11 = arith.constant 0 : index
    %10 = vector.load %arg1[%c0_10, %c1, %c0_11] : memref<2x374x4xbf16, #tpu.memory_space<vmem>>, vector<1x336x4xbf16>
    %11 = vector.shape_cast %10 : vector<1x336x4xbf16> to vector<336x4xbf16>
    %c1_12 = arith.constant 1 : index
    %c0_13 = arith.constant 0 : index
    %c0_14 = arith.constant 0 : index
    %12 = vector.load %arg2[%c1_12, %c0_13, %c0_14] : memref<9x4x128xbf16, #tpu.memory_space<vmem>>, vector<1x4x128xbf16>
    %13 = vector.shape_cast %12 : vector<1x4x128xbf16> to vector<4x128xbf16>
    %cst_15 = arith.constant dense<0.000000e+00> : vector<336x128xf32>
    %14 = tpu.matmul %11, %13, %cst_15 {dimension_numbers = #tpu.dot_dimension_numbers<[1], [0], [0], [1], [0, 0, 1, 1], [], []>} : vector<336x4xbf16>, vector<4x128xbf16>, vector<336x128xf32> -> vector<336x128xf32>
    %15 = arith.addf %9, %14 : vector<336x128xf32>
    %c0_16 = arith.constant 0 : index
    %c2 = arith.constant 2 : index
    %c0_17 = arith.constant 0 : index
    %16 = vector.load %arg1[%c0_16, %c2, %c0_17] : memref<2x374x4xbf16, #tpu.memory_space<vmem>>, vector<1x336x4xbf16>
    %17 = vector.shape_cast %16 : vector<1x336x4xbf16> to vector<336x4xbf16>
    %c2_18 = arith.constant 2 : index
    %c0_19 = arith.constant 0 : index
    %c0_20 = arith.constant 0 : index
    %18 = vector.load %arg2[%c2_18, %c0_19, %c0_20] : memref<9x4x128xbf16, #tpu.memory_space<vmem>>, vector<1x4x128xbf16>
    %19 = vector.shape_cast %18 : vector<1x4x128xbf16> to vector<4x128xbf16>
    %cst_21 = arith.constant dense<0.000000e+00> : vector<336x128xf32>
    %20 = tpu.matmul %17, %19, %cst_21 {dimension_numbers = #tpu.dot_dimension_numbers<[1], [0], [0], [1], [0, 0, 1, 1], [], []>} : vector<336x4xbf16>, vector<4x128xbf16>, vector<336x128xf32> -> vector<336x128xf32>
    %21 = arith.addf %15, %20 : vector<336x128xf32>
    %c0_22 = arith.constant 0 : index
    %c18 = arith.constant 18 : index
    %c0_23 = arith.constant 0 : index
    %22 = vector.load %arg1[%c0_22, %c18, %c0_23] : memref<2x374x4xbf16, #tpu.memory_space<vmem>>, vector<1x336x4xbf16>
    %23 = vector.shape_cast %22 : vector<1x336x4xbf16> to vector<336x4xbf16>
    %c3 = arith.constant 3 : index
    %c0_24 = arith.constant 0 : index
    %c0_25 = arith.constant 0 : index
    %24 = vector.load %arg2[%c3, %c0_24, %c0_25] : memref<9x4x128xbf16, #tpu.memory_space<vmem>>, vector<1x4x128xbf16>
    %25 = vector.shape_cast %24 : vector<1x4x128xbf16> to vector<4x128xbf16>
    %cst_26 = arith.constant dense<0.000000e+00> : vector<336x128xf32>
    %26 = tpu.matmul %23, %25, %cst_26 {dimension_numbers = #tpu.dot_dimension_numbers<[1], [0], [0], [1], [0, 0, 1, 1], [], []>} : vector<336x4xbf16>, vector<4x128xbf16>, vector<336x128xf32> -> vector<336x128xf32>
    %27 = arith.addf %21, %26 : vector<336x128xf32>
    %c0_27 = arith.constant 0 : index
    %c19 = arith.constant 19 : index
    %c0_28 = arith.constant 0 : index
    %28 = vector.load %arg1[%c0_27, %c19, %c0_28] : memref<2x374x4xbf16, #tpu.memory_space<vmem>>, vector<1x336x4xbf16>
    %29 = vector.shape_cast %28 : vector<1x336x4xbf16> to vector<336x4xbf16>
    %c4 = arith.constant 4 : index
    %c0_29 = arith.constant 0 : index
    %c0_30 = arith.constant 0 : index
    %30 = vector.load %arg2[%c4, %c0_29, %c0_30] : memref<9x4x128xbf16, #tpu.memory_space<vmem>>, vector<1x4x128xbf16>
    %31 = vector.shape_cast %30 : vector<1x4x128xbf16> to vector<4x128xbf16>
    %cst_31 = arith.constant dense<0.000000e+00> : vector<336x128xf32>
    %32 = tpu.matmul %29, %31, %cst_31 {dimension_numbers = #tpu.dot_dimension_numbers<[1], [0], [0], [1], [0, 0, 1, 1], [], []>} : vector<336x4xbf16>, vector<4x128xbf16>, vector<336x128xf32> -> vector<336x128xf32>
    %33 = arith.addf %27, %32 : vector<336x128xf32>
    %c0_32 = arith.constant 0 : index
    %c20 = arith.constant 20 : index
    %c0_33 = arith.constant 0 : index
    %34 = vector.load %arg1[%c0_32, %c20, %c0_33] : memref<2x374x4xbf16, #tpu.memory_space<vmem>>, vector<1x336x4xbf16>
    %35 = vector.shape_cast %34 : vector<1x336x4xbf16> to vector<336x4xbf16>
    %c5 = arith.constant 5 : index
    %c0_34 = arith.constant 0 : index
    %c0_35 = arith.constant 0 : index
    %36 = vector.load %arg2[%c5, %c0_34, %c0_35] : memref<9x4x128xbf16, #tpu.memory_space<vmem>>, vector<1x4x128xbf16>
    %37 = vector.shape_cast %36 : vector<1x4x128xbf16> to vector<4x128xbf16>
    %cst_36 = arith.constant dense<0.000000e+00> : vector<336x128xf32>
    %38 = tpu.matmul %35, %37, %cst_36 {dimension_numbers = #tpu.dot_dimension_numbers<[1], [0], [0], [1], [0, 0, 1, 1], [], []>} : vector<336x4xbf16>, vector<4x128xbf16>, vector<336x128xf32> -> vector<336x128xf32>
    %39 = arith.addf %33, %38 : vector<336x128xf32>
    %c0_37 = arith.constant 0 : index
    %c36 = arith.constant 36 : index
    %c0_38 = arith.constant 0 : index
    %40 = vector.load %arg1[%c0_37, %c36, %c0_38] : memref<2x374x4xbf16, #tpu.memory_space<vmem>>, vector<1x336x4xbf16>
    %41 = vector.shape_cast %40 : vector<1x336x4xbf16> to vector<336x4xbf16>
    %c6 = arith.constant 6 : index
    %c0_39 = arith.constant 0 : index
    %c0_40 = arith.constant 0 : index
    %42 = vector.load %arg2[%c6, %c0_39, %c0_40] : memref<9x4x128xbf16, #tpu.memory_space<vmem>>, vector<1x4x128xbf16>
    %43 = vector.shape_cast %42 : vector<1x4x128xbf16> to vector<4x128xbf16>
    %cst_41 = arith.constant dense<0.000000e+00> : vector<336x128xf32>
    %44 = tpu.matmul %41, %43, %cst_41 {dimension_numbers = #tpu.dot_dimension_numbers<[1], [0], [0], [1], [0, 0, 1, 1], [], []>} : vector<336x4xbf16>, vector<4x128xbf16>, vector<336x128xf32> -> vector<336x128xf32>
    %45 = arith.addf %39, %44 : vector<336x128xf32>
    %c0_42 = arith.constant 0 : index
    %c37 = arith.constant 37 : index
    %c0_43 = arith.constant 0 : index
    %46 = vector.load %arg1[%c0_42, %c37, %c0_43] : memref<2x374x4xbf16, #tpu.memory_space<vmem>>, vector<1x336x4xbf16>
    %47 = vector.shape_cast %46 : vector<1x336x4xbf16> to vector<336x4xbf16>
    %c7 = arith.constant 7 : index
    %c0_44 = arith.constant 0 : index
    %c0_45 = arith.constant 0 : index
    %48 = vector.load %arg2[%c7, %c0_44, %c0_45] : memref<9x4x128xbf16, #tpu.memory_space<vmem>>, vector<1x4x128xbf16>
    %49 = vector.shape_cast %48 : vector<1x4x128xbf16> to vector<4x128xbf16>
    %cst_46 = arith.constant dense<0.000000e+00> : vector<336x128xf32>
    %50 = tpu.matmul %47, %49, %cst_46 {dimension_numbers = #tpu.dot_dimension_numbers<[1], [0], [0], [1], [0, 0, 1, 1], [], []>} : vector<336x4xbf16>, vector<4x128xbf16>, vector<336x128xf32> -> vector<336x128xf32>
    %51 = arith.addf %45, %50 : vector<336x128xf32>
    %c0_47 = arith.constant 0 : index
    %c38 = arith.constant 38 : index
    %c0_48 = arith.constant 0 : index
    %52 = vector.load %arg1[%c0_47, %c38, %c0_48] : memref<2x374x4xbf16, #tpu.memory_space<vmem>>, vector<1x336x4xbf16>
    %53 = vector.shape_cast %52 : vector<1x336x4xbf16> to vector<336x4xbf16>
    %c8 = arith.constant 8 : index
    %c0_49 = arith.constant 0 : index
    %c0_50 = arith.constant 0 : index
    %54 = vector.load %arg2[%c8, %c0_49, %c0_50] : memref<9x4x128xbf16, #tpu.memory_space<vmem>>, vector<1x4x128xbf16>
    %55 = vector.shape_cast %54 : vector<1x4x128xbf16> to vector<4x128xbf16>
    %cst_51 = arith.constant dense<0.000000e+00> : vector<336x128xf32>
    %56 = tpu.matmul %53, %55, %cst_51 {dimension_numbers = #tpu.dot_dimension_numbers<[1], [0], [0], [1], [0, 0, 1, 1], [], []>} : vector<336x4xbf16>, vector<4x128xbf16>, vector<336x128xf32> -> vector<336x128xf32>
    %57 = arith.addf %51, %56 : vector<336x128xf32>
    %c0_52 = arith.constant 0 : index
    %c0_53 = arith.constant 0 : index
    %c0_54 = arith.constant 0 : index
    %58 = vector.load %arg4[%c0_52, %c0_53, %c0_54] : memref<2x336x128xf32, #tpu.memory_space<vmem>>, vector<1x336x128xf32>
    %59 = vector.shape_cast %58 : vector<1x336x128xf32> to vector<336x128xf32>
    %60 = vector.shape_cast %57 : vector<336x128xf32> to vector<1x336x128xf32>
    tpu.vector_store %arg4[%c0_52, %c0_53, %c0_54], %60 {strides = array<i32>} : memref<2x336x128xf32, #tpu.memory_space<vmem>>, vector<1x336x128xf32>,
    %61 = vector.broadcast %0 : vector<336x1xf32> to vector<336x128xf32>
    %62 = arith.mulf %57, %61 : vector<336x128xf32>
    %cst_55 = arith.constant dense<0.000000e+00> : vector<128xf32>
    %63 = vector.multi_reduction <add>, %62, %cst_55 [0] : vector<336x128xf32> to vector<128xf32>
    %64 = vector.shape_cast %63 : vector<128xf32> to vector<1x128xf32>
    %65 = arith.addf %1, %64 : vector<1x128xf32>
    %66 = arith.mulf %62, %57 : vector<336x128xf32>
    %cst_56 = arith.constant dense<0.000000e+00> : vector<128xf32>
    %67 = vector.multi_reduction <add>, %66, %cst_56 [0] : vector<336x128xf32> to vector<128xf32>
    %68 = vector.shape_cast %67 : vector<128xf32> to vector<1x128xf32>
    %69 = arith.addf %2, %68 : vector<1x128xf32>
    %cst_57 = arith.constant 0.000000e+00 : f32
    %70 = vector.broadcast %cst_57 : f32 to vector<336x128xf32>
    %c1_58 = arith.constant 1 : index
    %c0_59 = arith.constant 0 : index
    %c0_60 = arith.constant 0 : index
    %71 = vector.load %arg1[%c1_58, %c0_59, %c0_60] : memref<2x374x4xbf16, #tpu.memory_space<vmem>>, vector<1x336x4xbf16>
    %72 = vector.shape_cast %71 : vector<1x336x4xbf16> to vector<336x4xbf16>
    %c0_61 = arith.constant 0 : index
    %c0_62 = arith.constant 0 : index
    %c0_63 = arith.constant 0 : index
    %73 = vector.load %arg2[%c0_61, %c0_62, %c0_63] : memref<9x4x128xbf16, #tpu.memory_space<vmem>>, vector<1x4x128xbf16>
    %74 = vector.shape_cast %73 : vector<1x4x128xbf16> to vector<4x128xbf16>
    %cst_64 = arith.constant dense<0.000000e+00> : vector<336x128xf32>
    %75 = tpu.matmul %72, %74, %cst_64 {dimension_numbers = #tpu.dot_dimension_numbers<[1], [0], [0], [1], [0, 0, 1, 1], [], []>} : vector<336x4xbf16>, vector<4x128xbf16>, vector<336x128xf32> -> vector<336x128xf32>
    %76 = arith.addf %70, %75 : vector<336x128xf32>
    %c1_65 = arith.constant 1 : index
    %c1_66 = arith.constant 1 : index
    %c0_67 = arith.constant 0 : index
    %77 = vector.load %arg1[%c1_65, %c1_66, %c0_67] : memref<2x374x4xbf16, #tpu.memory_space<vmem>>, vector<1x336x4xbf16>
    %78 = vector.shape_cast %77 : vector<1x336x4xbf16> to vector<336x4xbf16>
    %c1_68 = arith.constant 1 : index
    %c0_69 = arith.constant 0 : index
    %c0_70 = arith.constant 0 : index
    %79 = vector.load %arg2[%c1_68, %c0_69, %c0_70] : memref<9x4x128xbf16, #tpu.memory_space<vmem>>, vector<1x4x128xbf16>
    %80 = vector.shape_cast %79 : vector<1x4x128xbf16> to vector<4x128xbf16>
    %cst_71 = arith.constant dense<0.000000e+00> : vector<336x128xf32>
    %81 = tpu.matmul %78, %80, %cst_71 {dimension_numbers = #tpu.dot_dimension_numbers<[1], [0], [0], [1], [0, 0, 1, 1], [], []>} : vector<336x4xbf16>, vector<4x128xbf16>, vector<336x128xf32> -> vector<336x128xf32>
    %82 = arith.addf %76, %81 : vector<336x128xf32>
    %c1_72 = arith.constant 1 : index
    %c2_73 = arith.constant 2 : index
    %c0_74 = arith.constant 0 : index
    %83 = vector.load %arg1[%c1_72, %c2_73, %c0_74] : memref<2x374x4xbf16, #tpu.memory_space<vmem>>, vector<1x336x4xbf16>
    %84 = vector.shape_cast %83 : vector<1x336x4xbf16> to vector<336x4xbf16>
    %c2_75 = arith.constant 2 : index
    %c0_76 = arith.constant 0 : index
    %c0_77 = arith.constant 0 : index
    %85 = vector.load %arg2[%c2_75, %c0_76, %c0_77] : memref<9x4x128xbf16, #tpu.memory_space<vmem>>, vector<1x4x128xbf16>
    %86 = vector.shape_cast %85 : vector<1x4x128xbf16> to vector<4x128xbf16>
    %cst_78 = arith.constant dense<0.000000e+00> : vector<336x128xf32>
    %87 = tpu.matmul %84, %86, %cst_78 {dimension_numbers = #tpu.dot_dimension_numbers<[1], [0], [0], [1], [0, 0, 1, 1], [], []>} : vector<336x4xbf16>, vector<4x128xbf16>, vector<336x128xf32> -> vector<336x128xf32>
    %88 = arith.addf %82, %87 : vector<336x128xf32>
    %c1_79 = arith.constant 1 : index
    %c18_80 = arith.constant 18 : index
    %c0_81 = arith.constant 0 : index
    %89 = vector.load %arg1[%c1_79, %c18_80, %c0_81] : memref<2x374x4xbf16, #tpu.memory_space<vmem>>, vector<1x336x4xbf16>
    %90 = vector.shape_cast %89 : vector<1x336x4xbf16> to vector<336x4xbf16>
    %c3_82 = arith.constant 3 : index
    %c0_83 = arith.constant 0 : index
    %c0_84 = arith.constant 0 : index
    %91 = vector.load %arg2[%c3_82, %c0_83, %c0_84] : memref<9x4x128xbf16, #tpu.memory_space<vmem>>, vector<1x4x128xbf16>
    %92 = vector.shape_cast %91 : vector<1x4x128xbf16> to vector<4x128xbf16>
    %cst_85 = arith.constant dense<0.000000e+00> : vector<336x128xf32>
    %93 = tpu.matmul %90, %92, %cst_85 {dimension_numbers = #tpu.dot_dimension_numbers<[1], [0], [0], [1], [0, 0, 1, 1], [], []>} : vector<336x4xbf16>, vector<4x128xbf16>, vector<336x128xf32> -> vector<336x128xf32>
    %94 = arith.addf %88, %93 : vector<336x128xf32>
    %c1_86 = arith.constant 1 : index
    %c19_87 = arith.constant 19 : index
    %c0_88 = arith.constant 0 : index
    %95 = vector.load %arg1[%c1_86, %c19_87, %c0_88] : memref<2x374x4xbf16, #tpu.memory_space<vmem>>, vector<1x336x4xbf16>
    %96 = vector.shape_cast %95 : vector<1x336x4xbf16> to vector<336x4xbf16>
    %c4_89 = arith.constant 4 : index
    %c0_90 = arith.constant 0 : index
    %c0_91 = arith.constant 0 : index
    %97 = vector.load %arg2[%c4_89, %c0_90, %c0_91] : memref<9x4x128xbf16, #tpu.memory_space<vmem>>, vector<1x4x128xbf16>
    %98 = vector.shape_cast %97 : vector<1x4x128xbf16> to vector<4x128xbf16>
    %cst_92 = arith.constant dense<0.000000e+00> : vector<336x128xf32>
    %99 = tpu.matmul %96, %98, %cst_92 {dimension_numbers = #tpu.dot_dimension_numbers<[1], [0], [0], [1], [0, 0, 1, 1], [], []>} : vector<336x4xbf16>, vector<4x128xbf16>, vector<336x128xf32> -> vector<336x128xf32>
    %100 = arith.addf %94, %99 : vector<336x128xf32>
    %c1_93 = arith.constant 1 : index
    %c20_94 = arith.constant 20 : index
    %c0_95 = arith.constant 0 : index
    %101 = vector.load %arg1[%c1_93, %c20_94, %c0_95] : memref<2x374x4xbf16, #tpu.memory_space<vmem>>, vector<1x336x4xbf16>
    %102 = vector.shape_cast %101 : vector<1x336x4xbf16> to vector<336x4xbf16>
    %c5_96 = arith.constant 5 : index
    %c0_97 = arith.constant 0 : index
    %c0_98 = arith.constant 0 : index
    %103 = vector.load %arg2[%c5_96, %c0_97, %c0_98] : memref<9x4x128xbf16, #tpu.memory_space<vmem>>, vector<1x4x128xbf16>
    %104 = vector.shape_cast %103 : vector<1x4x128xbf16> to vector<4x128xbf16>
    %cst_99 = arith.constant dense<0.000000e+00> : vector<336x128xf32>
    %105 = tpu.matmul %102, %104, %cst_99 {dimension_numbers = #tpu.dot_dimension_numbers<[1], [0], [0], [1], [0, 0, 1, 1], [], []>} : vector<336x4xbf16>, vector<4x128xbf16>, vector<336x128xf32> -> vector<336x128xf32>
    %106 = arith.addf %100, %105 : vector<336x128xf32>
    %c1_100 = arith.constant 1 : index
    %c36_101 = arith.constant 36 : index
    %c0_102 = arith.constant 0 : index
    %107 = vector.load %arg1[%c1_100, %c36_101, %c0_102] : memref<2x374x4xbf16, #tpu.memory_space<vmem>>, vector<1x336x4xbf16>
    %108 = vector.shape_cast %107 : vector<1x336x4xbf16> to vector<336x4xbf16>
    %c6_103 = arith.constant 6 : index
    %c0_104 = arith.constant 0 : index
    %c0_105 = arith.constant 0 : index
    %109 = vector.load %arg2[%c6_103, %c0_104, %c0_105] : memref<9x4x128xbf16, #tpu.memory_space<vmem>>, vector<1x4x128xbf16>
    %110 = vector.shape_cast %109 : vector<1x4x128xbf16> to vector<4x128xbf16>
    %cst_106 = arith.constant dense<0.000000e+00> : vector<336x128xf32>
    %111 = tpu.matmul %108, %110, %cst_106 {dimension_numbers = #tpu.dot_dimension_numbers<[1], [0], [0], [1], [0, 0, 1, 1], [], []>} : vector<336x4xbf16>, vector<4x128xbf16>, vector<336x128xf32> -> vector<336x128xf32>
    %112 = arith.addf %106, %111 : vector<336x128xf32>
    %c1_107 = arith.constant 1 : index
    %c37_108 = arith.constant 37 : index
    %c0_109 = arith.constant 0 : index
    %113 = vector.load %arg1[%c1_107, %c37_108, %c0_109] : memref<2x374x4xbf16, #tpu.memory_space<vmem>>, vector<1x336x4xbf16>
    %114 = vector.shape_cast %113 : vector<1x336x4xbf16> to vector<336x4xbf16>
    %c7_110 = arith.constant 7 : index
    %c0_111 = arith.constant 0 : index
    %c0_112 = arith.constant 0 : index
    %115 = vector.load %arg2[%c7_110, %c0_111, %c0_112] : memref<9x4x128xbf16, #tpu.memory_space<vmem>>, vector<1x4x128xbf16>
    %116 = vector.shape_cast %115 : vector<1x4x128xbf16> to vector<4x128xbf16>
    %cst_113 = arith.constant dense<0.000000e+00> : vector<336x128xf32>
    %117 = tpu.matmul %114, %116, %cst_113 {dimension_numbers = #tpu.dot_dimension_numbers<[1], [0], [0], [1], [0, 0, 1, 1], [], []>} : vector<336x4xbf16>, vector<4x128xbf16>, vector<336x128xf32> -> vector<336x128xf32>
    %118 = arith.addf %112, %117 : vector<336x128xf32>
    %c1_114 = arith.constant 1 : index
    %c38_115 = arith.constant 38 : index
    %c0_116 = arith.constant 0 : index
    %119 = vector.load %arg1[%c1_114, %c38_115, %c0_116] : memref<2x374x4xbf16, #tpu.memory_space<vmem>>, vector<1x336x4xbf16>
    %120 = vector.shape_cast %119 : vector<1x336x4xbf16> to vector<336x4xbf16>
    %c8_117 = arith.constant 8 : index
    %c0_118 = arith.constant 0 : index
    %c0_119 = arith.constant 0 : index
    %121 = vector.load %arg2[%c8_117, %c0_118, %c0_119] : memref<9x4x128xbf16, #tpu.memory_space<vmem>>, vector<1x4x128xbf16>
    %122 = vector.shape_cast %121 : vector<1x4x128xbf16> to vector<4x128xbf16>
    %cst_120 = arith.constant dense<0.000000e+00> : vector<336x128xf32>
    %123 = tpu.matmul %120, %122, %cst_120 {dimension_numbers = #tpu.dot_dimension_numbers<[1], [0], [0], [1], [0, 0, 1, 1], [], []>} : vector<336x4xbf16>, vector<4x128xbf16>, vector<336x128xf32> -> vector<336x128xf32>
    %124 = arith.addf %118, %123 : vector<336x128xf32>
    %c1_121 = arith.constant 1 : index
    %c0_122 = arith.constant 0 : index
    %c0_123 = arith.constant 0 : index
    %125 = vector.load %arg4[%c1_121, %c0_122, %c0_123] : memref<2x336x128xf32, #tpu.memory_space<vmem>>, vector<1x336x128xf32>
    %126 = vector.shape_cast %125 : vector<1x336x128xf32> to vector<336x128xf32>
    %127 = vector.shape_cast %124 : vector<336x128xf32> to vector<1x336x128xf32>
    tpu.vector_store %arg4[%c1_121, %c0_122, %c0_123], %127 {strides = array<i32>} : memref<2x336x128xf32, #tpu.memory_space<vmem>>, vector<1x336x128xf32>,
    %128 = vector.broadcast %0 : vector<336x1xf32> to vector<336x128xf32>
    %129 = arith.mulf %124, %128 : vector<336x128xf32>
    %cst_124 = arith.constant dense<0.000000e+00> : vector<128xf32>
    %130 = vector.multi_reduction <add>, %129, %cst_124 [0] : vector<336x128xf32> to vector<128xf32>
    %131 = vector.shape_cast %130 : vector<128xf32> to vector<1x128xf32>
    %132 = arith.addf %65, %131 : vector<1x128xf32>
    %133 = arith.mulf %129, %124 : vector<336x128xf32>
    %cst_125 = arith.constant dense<0.000000e+00> : vector<128xf32>
    %134 = vector.multi_reduction <add>, %133, %cst_125 [0] : vector<336x128xf32> to vector<128xf32>
    %135 = vector.shape_cast %134 : vector<128xf32> to vector<1x128xf32>
    %136 = arith.addf %69, %135 : vector<1x128xf32>
    %137 = vector.shape_cast %132 : vector<1x128xf32> to vector<1x128xf32>
    %138 = vector.broadcast %137 : vector<1x128xf32> to vector<8x128xf32>
    %c0_126 = arith.constant 0 : index
    %c0_127 = arith.constant 0 : index
    %139 = vector.load %arg5[%c0_126, %c0_127] : memref<8x128xf32, #tpu.memory_space<vmem>>, vector<8x128xf32>
    tpu.vector_store %arg5[%c0_126, %c0_127], %138 {strides = array<i32>} : memref<8x128xf32, #tpu.memory_space<vmem>>, vector<8x128xf32>,
    %140 = vector.shape_cast %136 : vector<1x128xf32> to vector<1x128xf32>
    %141 = vector.broadcast %140 : vector<1x128xf32> to vector<8x128xf32>
    %c0_128 = arith.constant 0 : index
    %c0_129 = arith.constant 0 : index
    %142 = vector.load %arg6[%c0_128, %c0_129] : memref<8x128xf32, #tpu.memory_space<vmem>>, vector<8x128xf32>
    tpu.vector_store %arg6[%c0_128, %c0_129], %141 {strides = array<i32>} : memref<8x128xf32, #tpu.memory_space<vmem>>, vector<8x128xf32>,
    return
  }
  func.func @transform_0(%arg0: i32) -> (i32, i32, i32) {
    %c0_i32 = arith.constant 0 : i32
    %c0_i32_0 = arith.constant 0 : i32
    %c0_i32_1 = arith.constant 0 : i32
    return %arg0, %c0_i32, %c0_i32_0 : i32, i32, i32
  }
  func.func @transform_1(%arg0: i32) -> (i32, i32, i32) {
    %c0_i32 = arith.constant 0 : i32
    %c0_i32_0 = arith.constant 0 : i32
    %c0_i32_1 = arith.constant 0 : i32
    %c0_i32_2 = arith.constant 0 : i32
    return %c0_i32, %c0_i32_0, %c0_i32_1 : i32, i32, i32
  }
  func.func @transform_2(%arg0: i32) -> (i32, i32) {
    %c0_i32 = arith.constant 0 : i32
    %c0_i32_0 = arith.constant 0 : i32
    %c0_i32_1 = arith.constant 0 : i32
    return %c0_i32, %c0_i32_0 : i32, i32
  }
  func.func @transform_3(%arg0: i32) -> (i32, i32, i32) {
    %c0_i32 = arith.constant 0 : i32
    %c0_i32_0 = arith.constant 0 : i32
    %c0_i32_1 = arith.constant 0 : i32
    return %arg0, %c0_i32, %c0_i32_0 : i32, i32, i32
  }
  func.func @transform_4(%arg0: i32) -> (i32, i32) {
    %c0_i32 = arith.constant 0 : i32
    %c0_i32_0 = arith.constant 0 : i32
    return %arg0, %c0_i32 : i32, i32
  }
  func.func @transform_5(%arg0: i32) -> (i32, i32) {
    %c0_i32 = arith.constant 0 : i32
    %c0_i32_0 = arith.constant 0 : i32
    return %arg0, %c0_i32 : i32, i32
  }
}

module attributes {stable_mosaic.version = 11 : i64} {
  func.func @bn_lrelu_kernel(%arg0: i32, %arg1: memref<2x336x128xf32, #tpu.memory_space<vmem>>, %arg2: memref<1x1x128xf32, #tpu.memory_space<vmem>>, %arg3: memref<1x1x128xf32, #tpu.memory_space<vmem>>, %arg4: memref<2x336x128xf32, #tpu.memory_space<vmem>>) attributes {dimension_semantics = [#tpu.dimension_semantics<parallel>], iteration_bounds = array<i64: 1>, scalar_prefetch = 0 : i64, scratch_operands = 0 : i64, tpu.core_type = #tpu.core_type<tc>, window_params = [{transform_indices = @transform_0, window_bounds = array<i64: 2, 336, 128>}, {pipeline_mode = #tpu.pipeline_mode<synchronous>, transform_indices = @transform_1, window_bounds = array<i64: 1, 1, 128>}, {pipeline_mode = #tpu.pipeline_mode<synchronous>, transform_indices = @transform_2, window_bounds = array<i64: 1, 1, 128>}, {transform_indices = @transform_3, window_bounds = array<i64: 2, 336, 128>}]} {
    %c0 = arith.constant 0 : index
    %c0_0 = arith.constant 0 : index
    %c0_1 = arith.constant 0 : index
    %0 = vector.load %arg1[%c0, %c0_0, %c0_1] : memref<2x336x128xf32, #tpu.memory_space<vmem>>, vector<2x336x128xf32>
    %c0_2 = arith.constant 0 : index
    %c0_3 = arith.constant 0 : index
    %c0_4 = arith.constant 0 : index
    %1 = vector.load %arg2[%c0_2, %c0_3, %c0_4] : memref<1x1x128xf32, #tpu.memory_space<vmem>>, vector<1x1x128xf32>
    %2 = vector.broadcast %1 : vector<1x1x128xf32> to vector<2x336x128xf32>
    %3 = arith.mulf %0, %2 : vector<2x336x128xf32>
    %c0_5 = arith.constant 0 : index
    %c0_6 = arith.constant 0 : index
    %c0_7 = arith.constant 0 : index
    %4 = vector.load %arg3[%c0_5, %c0_6, %c0_7] : memref<1x1x128xf32, #tpu.memory_space<vmem>>, vector<1x1x128xf32>
    %5 = vector.broadcast %4 : vector<1x1x128xf32> to vector<2x336x128xf32>
    %6 = arith.addf %3, %5 : vector<2x336x128xf32>
    %cst = arith.constant 0.000000e+00 : f32
    %7 = vector.broadcast %cst : f32 to vector<2x336x128xf32>
    %8 = arith.cmpf ogt, %6, %7 : vector<2x336x128xf32>
    %cst_8 = arith.constant 1.000000e-01 : f32
    %9 = vector.broadcast %cst_8 : f32 to vector<2x336x128xf32>
    %10 = arith.mulf %9, %6 : vector<2x336x128xf32>
    %11 = arith.select %8, %6, %10 : vector<2x336x128xi1>, vector<2x336x128xf32>
    %c0_9 = arith.constant 0 : index
    %c0_10 = arith.constant 0 : index
    %c0_11 = arith.constant 0 : index
    %12 = vector.load %arg4[%c0_9, %c0_10, %c0_11] : memref<2x336x128xf32, #tpu.memory_space<vmem>>, vector<2x336x128xf32>
    tpu.vector_store %arg4[%c0_9, %c0_10, %c0_11], %11 {strides = array<i32>} : memref<2x336x128xf32, #tpu.memory_space<vmem>>, vector<2x336x128xf32>,
    return
  }
  func.func @transform_0(%arg0: i32) -> (i32, i32, i32) {
    %c0_i32 = arith.constant 0 : i32
    %c0_i32_0 = arith.constant 0 : i32
    %c0_i32_1 = arith.constant 0 : i32
    return %arg0, %c0_i32, %c0_i32_0 : i32, i32, i32
  }
  func.func @transform_1(%arg0: i32) -> (i32, i32, i32) {
    %c0_i32 = arith.constant 0 : i32
    %c0_i32_0 = arith.constant 0 : i32
    %c0_i32_1 = arith.constant 0 : i32
    %c0_i32_2 = arith.constant 0 : i32
    return %c0_i32, %c0_i32_0, %c0_i32_1 : i32, i32, i32
  }
  func.func @transform_2(%arg0: i32) -> (i32, i32, i32) {
    %c0_i32 = arith.constant 0 : i32
    %c0_i32_0 = arith.constant 0 : i32
    %c0_i32_1 = arith.constant 0 : i32
    %c0_i32_2 = arith.constant 0 : i32
    return %c0_i32, %c0_i32_0, %c0_i32_1 : i32, i32, i32
  }
  func.func @transform_3(%arg0: i32) -> (i32, i32, i32) {
    %c0_i32 = arith.constant 0 : i32
    %c0_i32_0 = arith.constant 0 : i32
    %c0_i32_1 = arith.constant 0 : i32
    return %arg0, %c0_i32, %c0_i32_0 : i32, i32, i32
  }
}

</mosaic_0001>

<bundles_post_ra>
// kernel: cnn_block.3
= control target key start
LH: loop header
LB: loop body
LE: loop exit
PB: predicated region body
PF: predicated region fallthrough
CT: control target
= control target key end

     0   :  { %s1309_s0 = inlined_call_operand.vmem [shape: f32[2,336,128], index: 0, kind: input, shape index: {}, may-alias: {0,3}]   ;;  %s1310_s1 = inlined_call_operand.vmem [shape: f32[1,1,128], index: 1, kind: input, shape index: {}]   ;;  %s1311_s2 = inlined_call_operand.vmem [shape: f32[1,1,128], index: 2, kind: input, shape index: {}]   ;;  %s1312_s3 = inlined_call_operand.vmem [shape: f32[2,336,128], index: 3, kind: output, shape index: {}, may-alias: {0,3}]  }
   0x1   :  { %v14_v0 = vld [vmem:[%s1309_s0] sm:$0xff]  ;;  %v15_v3 = vld [vmem:[%s1309_s0 + $0x8] sm:$0xff]  ;;  %v16_v6 = vld [vmem:[%s1309_s0 + $0x10] sm:$0xff] }
   0x2   :  { %v644_v1 = vld [vmem:[%s1310_s1] ss:$0 sm:$0xff]  ;;  %v17_v7 = vld [vmem:[%s1309_s0 + $0x18] sm:$0xff]  ;;  %v19_v12 = vld [vmem:[%s1309_s0 + $0x28] sm:$0xff] }
   0x3   :  { %v649_v2 = vld [vmem:[%s1311_s2] ss:$0 sm:$0xff]  ;;  %v102_v4 = vmul.f32 %v644_v1, %v14_v0  ;;  %v103_v5 = vmul.f32 %v644_v1, %v15_v3  ;;  %v104_v9 = vmul.f32 %v644_v1, %v16_v6  ;;  %v105_v10 = vmul.f32 %v644_v1, %v17_v7  ;;  %v20_v13 = vld [vmem:[%s1309_s0 + $0x30] sm:$0xff]  ;;  %v21_v14 = vld [vmem:[%s1309_s0 + $0x38] sm:$0xff] }
   0x4   :  { %v18_v8 = vld [vmem:[%s1309_s0 + $0x20] sm:$0xff]  ;;  %v107_v17 = vmul.f32 %v644_v1, %v19_v12  ;;  %v108_v18 = vmul.f32 %v644_v1, %v20_v13  ;;  %v109_v22 = vmul.f32 %v644_v1, %v21_v14  ;;  %v23_v24 = vld [vmem:[%s1309_s0 + $0x48] sm:$0xff]  ;;  %v24_v32 = vld [vmem:[%s1309_s0 + $0x50] sm:$0xff] }
   0x5   :  { %v106_v11 = vmul.f32 %v644_v1, %v18_v8  ;;  %v190_v15 = vadd.f32 %v649_v2, %v102_v4  ;;  %v191_v16 = vadd.f32 %v649_v2, %v103_v5  ;;  %v192_v19 = vadd.f32 %v649_v2, %v104_v9  ;;  %v22_v23 = vld [vmem:[%s1309_s0 + $0x40] sm:$0xff] }
   0x6   :  { %v193_v20 = vadd.f32 %v649_v2, %v105_v10  ;;  %v195_v35 = vadd.f32 %v649_v2, %v107_v17  ;;  %v196_v36 = vadd.f32 %v649_v2, %v108_v18  ;;  %v197_v38 = vadd.f32 %v649_v2, %v109_v22 }
   0x7   :  { %v194_v21 = vadd.f32 %v649_v2, %v106_v11  ;;  %vm274_vm0 = vcmp.gt.f32.partialorder %v190_v15, 0.0  ;;  %v358_v25 = vmul.f32 0.1, %v190_v15  ;;  %vm275_vm1 = vcmp.gt.f32.partialorder %v191_v16, 0.0 }
   0x8   :  { %v359_v26 = vmul.f32 0.1, %v191_v16  ;;  %vm276_vm2 = vcmp.gt.f32.partialorder %v192_v19, 0.0  ;;  %v360_v27 = vmul.f32 0.1, %v192_v19  ;;  %vm277_vm3 = vcmp.gt.f32.partialorder %v193_v20, 0.0 }
   0x9   :  { %v361_v28 = vmul.f32 0.1, %v193_v20  ;;  %v442_v29 = vsel %vm274_vm0, %v190_v15, %v358_v25  ;;  %vm278_vm4 = vcmp.gt.f32.partialorder %v194_v21, 0.0  ;;  %v362_v31 = vmul.f32 0.1, %v194_v21 }
   0xa   :  { %v443_v30 = vsel %vm275_vm1, %v191_v16, %v359_v26  ;;  %526 = vst [vmem:[%s1312_s3] sm:$0xff] %v442_v29  ;;  %v444_v33 = vsel %vm276_vm2, %v192_v19, %v360_v27  ;;  %v110_v39 = vmul.f32 %v644_v1, %v22_v23  ;;  %v111_v40 = vmul.f32 %v644_v1, %v23_v24 }
   0xb   :  { %v445_v34 = vsel %vm277_vm3, %v193_v20, %v361_v28  ;;  %527 = vst [vmem:[%s1312_s3 + $0x8] sm:$0xff] %v443_v30  ;;  %v446_v37 = vsel %vm278_vm4, %v194_v21, %v362_v31  ;;  %vm279_vm5 = vcmp.gt.f32.partialorder %v195_v35, 0.0  ;;  %v363_v42 = vmul.f32 0.1, %v195_v35 }
   0xc   :  { %vm280_vm6 = vcmp.gt.f32.partialorder %v196_v36, 0.0  ;;  %v112_v43 = vmul.f32 %v644_v1, %v24_v32  ;;  %v364_v44 = vmul.f32 0.1, %v196_v36  ;;  %vm281_vm7 = vcmp.gt.f32.partialorder %v197_v38, 0.0 }
   0xd   :  { %v365_v45 = vmul.f32 0.1, %v197_v38  ;;  %v198_v46 = vadd.f32 %v649_v2, %v110_v39  ;;  %v447_v47 = vsel %vm279_vm5, %v195_v35, %v363_v42  ;;  %v199_v48 = vadd.f32 %v649_v2, %v111_v40 }
   0xe   :  { %v200_v49 = vadd.f32 %v649_v2, %v112_v43  ;;  %v448_v53 = vsel %vm280_vm6, %v196_v36, %v364_v44 }
   0xf   :  { %v449_v54 = vsel %vm281_vm7, %v197_v38, %v365_v45  ;;  %vm282_vm8 = vcmp.gt.f32.partialorder %v198_v46, 0.0  ;;  %v366_v55 = vmul.f32 0.1, %v198_v46  ;;  %vm283_vm9 = vcmp.gt.f32.partialorder %v199_v48, 0.0 }
  0x10   :  { %v367_v57 = vmul.f32 0.1, %v199_v48  ;;  %vm284_vm10 = vcmp.gt.f32.partialorder %v200_v49, 0.0  ;;  %v368_v61 = vmul.f32 0.1, %v200_v49 }
  0x11   :  { %v450_v60 = vsel %vm282_vm8, %v198_v46, %v366_v55 }
  0x12   :  { %v25_v41 = vld [vmem:[%s1309_s0 + $0x58] sm:$0xff]  ;;  %v451_v4 = vsel %vm283_vm9, %v199_v48, %v367_v57  ;;  %v452_v7 = vsel %vm284_vm10, %v200_v49, %v368_v61 }
  0x13   :  { %528 = vst [vmem:[%s1312_s3 + $0x10] sm:$0xff] %v444_v33  ;;  %v113_v50 = vmul.f32 %v644_v1, %v25_v41 }
  0x14   :  { %529 = vst [vmem:[%s1312_s3 + $0x18] sm:$0xff] %v445_v34 }
  0x15   :  { %530 = vst [vmem:[%s1312_s3 + $0x20] sm:$0xff] %v446_v37  ;;  %v201_v58 = vadd.f32 %v649_v2, %v113_v50 }
  0x17   :  { %vm285_vm11 = vcmp.gt.f32.partialorder %v201_v58, 0.0  ;;  %v369_v5 = vmul.f32 0.1, %v201_v58 }
  0x19   :  { %v453_v11 = vsel %vm285_vm11, %v201_v58, %v369_v5 }
  0x1c   :  { %v26_v51 = vld [vmem:[%s1309_s0 + $0x60] sm:$0xff]  ;;  %v27_v52 = vld [vmem:[%s1309_s0 + $0x68] sm:$0xff] }
  0x1d   :  { %531 = vst [vmem:[%s1312_s3 + $0x28] sm:$0xff] %v447_v47  ;;  %v114_v62 = vmul.f32 %v644_v1, %v26_v51  ;;  %v115_v63 = vmul.f32 %v644_v1, %v27_v52 }
  0x1f   :  { %v202_v8 = vadd.f32 %v649_v2, %v114_v62  ;;  %v203_v9 = vadd.f32 %v649_v2, %v115_v63 }
  0x21   :  { %vm286_vm12 = vcmp.gt.f32.partialorder %v202_v8, 0.0  ;;  %v370_v15 = vmul.f32 0.1, %v202_v8  ;;  %vm287_vm13 = vcmp.gt.f32.partialorder %v203_v9, 0.0  ;;  %v371_v17 = vmul.f32 0.1, %v203_v9 }
  0x23   :  { %v454_v21 = vsel %vm286_vm12, %v202_v8, %v370_v15  ;;  %v455_v27 = vsel %vm287_vm13, %v203_v9, %v371_v17 }
  0x24   :  { %v28_v56 = vld [vmem:[%s1309_s0 + $0x70] sm:$0xff] }
  0x25   :  { %532 = vst [vmem:[%s1312_s3 + $0x30] sm:$0xff] %v448_v53  ;;  %v116_v6 = vmul.f32 %v644_v1, %v28_v56 }
  0x27   :  { %v204_v12 = vadd.f32 %v649_v2, %v116_v6 }
  0x29   :  { %vm288_vm14 = vcmp.gt.f32.partialorder %v204_v12, 0.0  ;;  %v372_v18 = vmul.f32 0.1, %v204_v12 }
  0x2b   :  { %v456_v28 = vsel %vm288_vm14, %v204_v12, %v372_v18 }
  0x2c   :  { %v29_v59 = vld [vmem:[%s1309_s0 + $0x78] sm:$0xff] }
  0x2d   :  { %533 = vst [vmem:[%s1312_s3 + $0x38] sm:$0xff] %v449_v54  ;;  %v117_v10 = vmul.f32 %v644_v1, %v29_v59 }
  0x2f   :  { %v205_v16 = vadd.f32 %v649_v2, %v117_v10 }
  0x31   :  { %vm289_vm15 = vcmp.gt.f32.partialorder %v205_v16, 0.0  ;;  %v373_v22 = vmul.f32 0.1, %v205_v16 }
  0x33   :  { %v457_v32 = vsel %vm289_vm15, %v205_v16, %v373_v22 }
  0x34   :  { %v30_v0 = vld [vmem:[%s1309_s0 + $0x80] sm:$0xff]  ;;  %v31_v3 = vld [vmem:[%s1309_s0 + $0x88] sm:$0xff] }
  0x35   :  { %534 = vst [vmem:[%s1312_s3 + $0x40] sm:$0xff] %v450_v60  ;;  %v118_v13 = vmul.f32 %v644_v1, %v30_v0  ;;  %v119_v14 = vmul.f32 %v644_v1, %v31_v3 }
  0x36   :  { %535 = vst [vmem:[%s1312_s3 + $0x48] sm:$0xff] %v451_v4 }
  0x37   :  { %536 = vst [vmem:[%s1312_s3 + $0x50] sm:$0xff] %v452_v7  ;;  %v206_v19 = vadd.f32 %v649_v2, %v118_v13  ;;  %v207_v23 = vadd.f32 %v649_v2, %v119_v14 }
  0x38   :  { %537 = vst [vmem:[%s1312_s3 + $0x58] sm:$0xff] %v453_v11 }
  0x39   :  { %vm290_vm0 = vcmp.gt.f32.partialorder %v206_v19, 0.0  ;;  %v374_v29 = vmul.f32 0.1, %v206_v19  ;;  %vm291_vm1 = vcmp.gt.f32.partialorder %v207_v23, 0.0  ;;  %v375_v33 = vmul.f32 0.1, %v207_v23 }
  0x3b   :  { %v458_v36 = vsel %vm290_vm0, %v206_v19, %v374_v29  ;;  %v459_v40 = vsel %vm291_vm1, %v207_v23, %v375_v33 }
  0x3f   :  { %v32_v20 = vld [vmem:[%s1309_s0 + $0x90] sm:$0xff]  ;;  %v33_v24 = vld [vmem:[%s1309_s0 + $0x98] sm:$0xff]  ;;  %v34_v25 = vld [vmem:[%s1309_s0 + $0xa0] sm:$0xff] }
  0x40   :  { %v35_v26 = vld [vmem:[%s1309_s0 + $0xa8] sm:$0xff]  ;;  %v120_v34 = vmul.f32 %v644_v1, %v32_v20  ;;  %v121_v37 = vmul.f32 %v644_v1, %v33_v24  ;;  %v122_v38 = vmul.f32 %v644_v1, %v34_v25 }
  0x41   :  { %538 = vst [vmem:[%s1312_s3 + $0x60] sm:$0xff] %v454_v21  ;;  %v123_v39 = vmul.f32 %v644_v1, %v35_v26 }
  0x42   :  { %v208_v41 = vadd.f32 %v649_v2, %v120_v34  ;;  %v209_v44 = vadd.f32 %v649_v2, %v121_v37  ;;  %v210_v45 = vadd.f32 %v649_v2, %v122_v38 }
  0x43   :  { %v211_v46 = vadd.f32 %v649_v2, %v123_v39 }
  0x44   :  { %vm292_vm2 = vcmp.gt.f32.partialorder %v208_v41, 0.0  ;;  %v376_v48 = vmul.f32 0.1, %v208_v41  ;;  %vm293_vm3 = vcmp.gt.f32.partialorder %v209_v44, 0.0  ;;  %v377_v53 = vmul.f32 0.1, %v209_v44 }
  0x45   :  { %vm294_vm4 = vcmp.gt.f32.partialorder %v210_v45, 0.0  ;;  %v378_v54 = vmul.f32 0.1, %v210_v45  ;;  %vm295_vm5 = vcmp.gt.f32.partialorder %v211_v46, 0.0  ;;  %v379_v56 = vmul.f32 0.1, %v211_v46 }
  0x46   :  { %v460_v55 = vsel %vm292_vm2, %v208_v41, %v376_v48  ;;  %v461_v59 = vsel %vm293_vm3, %v209_v44, %v377_v53 }
  0x47   :  { %v462_v60 = vsel %vm294_vm4, %v210_v45, %v378_v54  ;;  %v463_v62 = vsel %vm295_vm5, %v211_v46, %v379_v56 }
  0x48   :  { %v36_v30 = vld [vmem:[%s1309_s0 + $0xb0] sm:$0xff]  ;;  %v37_v31 = vld [vmem:[%s1309_s0 + $0xb8] sm:$0xff] }
  0x49   :  { %539 = vst [vmem:[%s1312_s3 + $0x68] sm:$0xff] %v455_v27  ;;  %v124_v42 = vmul.f32 %v644_v1, %v36_v30  ;;  %v125_v43 = vmul.f32 %v644_v1, %v37_v31 }
  0x4b   :  { %v212_v49 = vadd.f32 %v649_v2, %v124_v42  ;;  %v213_v50 = vadd.f32 %v649_v2, %v125_v43 }
  0x4d   :  { %vm296_vm6 = vcmp.gt.f32.partialorder %v212_v49, 0.0  ;;  %v380_v61 = vmul.f32 0.1, %v212_v49  ;;  %vm297_vm7 = vcmp.gt.f32.partialorder %v213_v50, 0.0  ;;  %v381_v63 = vmul.f32 0.1, %v213_v50 }
  0x4f   :  { %v464_v5 = vsel %vm296_vm6, %v212_v49, %v380_v61  ;;  %v465_v10 = vsel %vm297_vm7, %v213_v50, %v381_v63 }
  0x50   :  { %v38_v35 = vld [vmem:[%s1309_s0 + $0xc0] sm:$0xff] }
  0x51   :  { %540 = vst [vmem:[%s1312_s3 + $0x70] sm:$0xff] %v456_v28  ;;  %v126_v47 = vmul.f32 %v644_v1, %v38_v35 }
  0x52   :  { %541 = vst [vmem:[%s1312_s3 + $0x78] sm:$0xff] %v457_v32 }
  0x53   :  { %542 = vst [vmem:[%s1312_s3 + $0x80] sm:$0xff] %v458_v36  ;;  %v214_v0 = vadd.f32 %v649_v2, %v126_v47 }
  0x54   :  { %543 = vst [vmem:[%s1312_s3 + $0x88] sm:$0xff] %v459_v40 }
  0x55   :  { %vm298_vm8 = vcmp.gt.f32.partialorder %v214_v0, 0.0  ;;  %v382_v11 = vmul.f32 0.1, %v214_v0 }
  0x57   :  { %v466_v17 = vsel %vm298_vm8, %v214_v0, %v382_v11 }
  0x5b   :  { %v39_v51 = vld [vmem:[%s1309_s0 + $0xc8] sm:$0xff]  ;;  %v40_v52 = vld [vmem:[%s1309_s0 + $0xd0] sm:$0xff]  ;;  %v41_v57 = vld [vmem:[%s1309_s0 + $0xd8] sm:$0xff] }
  0x5c   :  { %v42_v58 = vld [vmem:[%s1309_s0 + $0xe0] sm:$0xff]  ;;  %v127_v3 = vmul.f32 %v644_v1, %v39_v51  ;;  %v128_v6 = vmul.f32 %v644_v1, %v40_v52  ;;  %v129_v7 = vmul.f32 %v644_v1, %v41_v57 }
  0x5d   :  { %544 = vst [vmem:[%s1312_s3 + $0x90] sm:$0xff] %v460_v55  ;;  %v130_v8 = vmul.f32 %v644_v1, %v42_v58 }
  0x5e   :  { %545 = vst [vmem:[%s1312_s3 + $0x98] sm:$0xff] %v461_v59  ;;  %v215_v12 = vadd.f32 %v649_v2, %v127_v3  ;;  %v216_v13 = vadd.f32 %v649_v2, %v128_v6  ;;  %v217_v14 = vadd.f32 %v649_v2, %v129_v7 }
  0x5f   :  { %v218_v15 = vadd.f32 %v649_v2, %v130_v8 }
  0x60   :  { %vm299_vm9 = vcmp.gt.f32.partialorder %v215_v12, 0.0  ;;  %v383_v18 = vmul.f32 0.1, %v215_v12  ;;  %vm300_vm10 = vcmp.gt.f32.partialorder %v216_v13, 0.0  ;;  %v384_v22 = vmul.f32 0.1, %v216_v13 }
  0x61   :  { %vm301_vm11 = vcmp.gt.f32.partialorder %v217_v14, 0.0  ;;  %vm302_vm12 = vcmp.gt.f32.partialorder %v218_v15, 0.0  ;;  %v385_v24 = vmul.f32 0.1, %v217_v14  ;;  %v386_v25 = vmul.f32 0.1, %v218_v15 }
  0x62   :  { %v467_v23 = vsel %vm299_vm9, %v215_v12, %v383_v18  ;;  %v468_v27 = vsel %vm300_vm10, %v216_v13, %v384_v22 }
  0x63   :  { %v469_v34 = vsel %vm301_vm11, %v217_v14, %v385_v24  ;;  %v470_v35 = vsel %vm302_vm12, %v218_v15, %v386_v25 }
  0x65   :  { %v43_v4 = vld [vmem:[%s1309_s0 + $0xe8] sm:$0xff] }
  0x66   :  { %546 = vst [vmem:[%s1312_s3 + $0xa0] sm:$0xff] %v462_v60  ;;  %v131_v16 = vmul.f32 %v644_v1, %v43_v4 }
  0x68   :  { %v219_v26 = vadd.f32 %v649_v2, %v131_v16 }
  0x6a   :  { %vm303_vm13 = vcmp.gt.f32.partialorder %v219_v26, 0.0  ;;  %v387_v36 = vmul.f32 0.1, %v219_v26 }
  0x6c   :  { %v471_v40 = vsel %vm303_vm13, %v219_v26, %v387_v36 }
  0x6d   :  { %v44_v9 = vld [vmem:[%s1309_s0 + $0xf0] sm:$0xff] }
  0x6e   :  { %547 = vst [vmem:[%s1312_s3 + $0xa8] sm:$0xff] %v463_v62  ;;  %v132_v19 = vmul.f32 %v644_v1, %v44_v9 }
  0x6f   :  { %548 = vst [vmem:[%s1312_s3 + $0xb0] sm:$0xff] %v464_v5 }
  0x70   :  { %549 = vst [vmem:[%s1312_s3 + $0xb8] sm:$0xff] %v465_v10  ;;  %v220_v28 = vadd.f32 %v649_v2, %v132_v19 }
  0x72   :  { %vm304_vm14 = vcmp.gt.f32.partialorder %v220_v28, 0.0  ;;  %v388_v37 = vmul.f32 0.1, %v220_v28 }
  0x74   :  { %v472_v47 = vsel %vm304_vm14, %v220_v28, %v388_v37 }
  0x77   :  { %v45_v20 = vld [vmem:[%s1309_s0 + $0xf8] sm:$0xff]  ;;  %v46_v21 = vld [vmem:[%s1309_s0 + $0x100] sm:$0xff] }
  0x78   :  { %550 = vst [vmem:[%s1312_s3 + $0xc0] sm:$0xff] %v466_v17  ;;  %v133_v29 = vmul.f32 %v644_v1, %v45_v20  ;;  %v134_v30 = vmul.f32 %v644_v1, %v46_v21 }
  0x79   :  { %551 = vst [vmem:[%s1312_s3 + $0xc8] sm:$0xff] %v467_v23 }
  0x7a   :  { %v221_v38 = vadd.f32 %v649_v2, %v133_v29  ;;  %v222_v39 = vadd.f32 %v649_v2, %v134_v30 }
  0x7c   :  { %vm305_vm15 = vcmp.gt.f32.partialorder %v221_v38, 0.0  ;;  %v389_v48 = vmul.f32 0.1, %v221_v38  ;;  %vm306_vm0 = vcmp.gt.f32.partialorder %v222_v39, 0.0  ;;  %v390_v49 = vmul.f32 0.1, %v222_v39 }
  0x7e   :  { %v473_v53 = vsel %vm305_vm15, %v221_v38, %v389_v48  ;;  %v474_v58 = vsel %vm306_vm0, %v222_v39, %v390_v49 }
  0x80   :  { %v47_v31 = vld [vmem:[%s1309_s0 + $0x108] sm:$0xff]  ;;  %v48_v32 = vld [vmem:[%s1309_s0 + $0x110] sm:$0xff]  ;;  %v49_v33 = vld [vmem:[%s1309_s0 + $0x118] sm:$0xff] }
  0x81   :  { %552 = vst [vmem:[%s1312_s3 + $0xd0] sm:$0xff] %v468_v27  ;;  %v135_v41 = vmul.f32 %v644_v1, %v47_v31  ;;  %v136_v42 = vmul.f32 %v644_v1, %v48_v32  ;;  %v137_v43 = vmul.f32 %v644_v1, %v49_v33 }
  0x82   :  { %553 = vst [vmem:[%s1312_s3 + $0xd8] sm:$0xff] %v469_v34 }
  0x83   :  { %554 = vst [vmem:[%s1312_s3 + $0xe0] sm:$0xff] %v470_v35  ;;  %v223_v50 = vadd.f32 %v649_v2, %v135_v41  ;;  %v224_v51 = vadd.f32 %v649_v2, %v136_v42  ;;  %v225_v52 = vadd.f32 %v649_v2, %v137_v43 }
  0x85   :  { %vm307_vm1 = vcmp.gt.f32.partialorder %v223_v50, 0.0  ;;  %v391_v59 = vmul.f32 0.1, %v223_v50  ;;  %vm308_vm2 = vcmp.gt.f32.partialorder %v224_v51, 0.0  ;;  %v392_v60 = vmul.f32 0.1, %v224_v51 }
  0x86   :  { %vm309_vm3 = vcmp.gt.f32.partialorder %v225_v52, 0.0  ;;  %v393_v61 = vmul.f32 0.1, %v225_v52 }
  0x87   :  { %v475_v63 = vsel %vm307_vm1, %v223_v50, %v391_v59  ;;  %v476_v7 = vsel %vm308_vm2, %v224_v51, %v392_v60 }
  0x88   :  { %v477_v8 = vsel %vm309_vm3, %v225_v52, %v393_v61 }
  0x8a   :  { %v50_v44 = vld [vmem:[%s1309_s0 + $0x120] sm:$0xff]  ;;  %v51_v45 = vld [vmem:[%s1309_s0 + $0x128] sm:$0xff]  ;;  %v52_v46 = vld [vmem:[%s1309_s0 + $0x130] sm:$0xff] }
  0x8b   :  { %555 = vst [vmem:[%s1312_s3 + $0xe8] sm:$0xff] %v471_v40  ;;  %v138_v54 = vmul.f32 %v644_v1, %v50_v44  ;;  %v139_v55 = vmul.f32 %v644_v1, %v51_v45  ;;  %v140_v56 = vmul.f32 %v644_v1, %v52_v46 }
  0x8c   :  { %556 = vst [vmem:[%s1312_s3 + $0xf0] sm:$0xff] %v472_v47 }
  0x8d   :  { %v226_v62 = vadd.f32 %v649_v2, %v138_v54  ;;  %v227_v0 = vadd.f32 %v649_v2, %v139_v55  ;;  %v228_v3 = vadd.f32 %v649_v2, %v140_v56 }
  0x8f   :  { %vm310_vm4 = vcmp.gt.f32.partialorder %v226_v62, 0.0  ;;  %v394_v9 = vmul.f32 0.1, %v226_v62  ;;  %vm311_vm5 = vcmp.gt.f32.partialorder %v227_v0, 0.0  ;;  %v395_v11 = vmul.f32 0.1, %v227_v0 }
  0x90   :  { %vm312_vm6 = vcmp.gt.f32.partialorder %v228_v3, 0.0  ;;  %v396_v15 = vmul.f32 0.1, %v228_v3 }
  0x91   :  { %v478_v14 = vsel %vm310_vm4, %v226_v62, %v394_v9  ;;  %v479_v20 = vsel %vm311_vm5, %v227_v0, %v395_v11 }
  0x92   :  { %v480_v23 = vsel %vm312_vm6, %v228_v3, %v396_v15 }
  0x93   :  { %v53_v57 = vld [vmem:[%s1309_s0 + $0x138] sm:$0xff] }
  0x94   :  { %557 = vst [vmem:[%s1312_s3 + $0xf8] sm:$0xff] %v473_v53  ;;  %v141_v4 = vmul.f32 %v644_v1, %v53_v57 }
  0x95   :  { %558 = vst [vmem:[%s1312_s3 + $0x100] sm:$0xff] %v474_v58 }
  0x96   :  { %v229_v12 = vadd.f32 %v649_v2, %v141_v4 }
  0x98   :  { %vm313_vm7 = vcmp.gt.f32.partialorder %v229_v12, 0.0  ;;  %v397_v21 = vmul.f32 0.1, %v229_v12 }
  0x9a   :  { %v481_v27 = vsel %vm313_vm7, %v229_v12, %v397_v21 }
  0x9c   :  { %v54_v5 = vld [vmem:[%s1309_s0 + $0x140] sm:$0xff]  ;;  %v55_v6 = vld [vmem:[%s1309_s0 + $0x148] sm:$0xff] }
  0x9d   :  { %559 = vst [vmem:[%s1312_s3 + $0x108] sm:$0xff] %v475_v63  ;;  %v142_v16 = vmul.f32 %v644_v1, %v54_v5  ;;  %v143_v17 = vmul.f32 %v644_v1, %v55_v6 }
  0x9f   :  { %v230_v24 = vadd.f32 %v649_v2, %v142_v16  ;;  %v231_v25 = vadd.f32 %v649_v2, %v143_v17 }
  0xa1   :  { %vm314_vm8 = vcmp.gt.f32.partialorder %v230_v24, 0.0  ;;  %v398_v31 = vmul.f32 0.1, %v230_v24  ;;  %vm315_vm9 = vcmp.gt.f32.partialorder %v231_v25, 0.0  ;;  %v399_v33 = vmul.f32 0.1, %v231_v25 }
  0xa3   :  { %v482_v37 = vsel %vm314_vm8, %v230_v24, %v398_v31  ;;  %v483_v43 = vsel %vm315_vm9, %v231_v25, %v399_v33 }
  0xa4   :  { %v56_v10 = vld [vmem:[%s1309_s0 + $0x150] sm:$0xff] }
  0xa5   :  { %560 = vst [vmem:[%s1312_s3 + $0x110] sm:$0xff] %v476_v7  ;;  %v144_v22 = vmul.f32 %v644_v1, %v56_v10 }
  0xa7   :  { %v232_v28 = vadd.f32 %v649_v2, %v144_v22 }
  0xa9   :  { %vm316_vm10 = vcmp.gt.f32.partialorder %v232_v28, 0.0  ;;  %v400_v34 = vmul.f32 0.1, %v232_v28 }
  0xab   :  { %v484_v44 = vsel %vm316_vm10, %v232_v28, %v400_v34 }
  0xac   :  { %v57_v13 = vld [vmem:[%s1309_s0 + $0x158] sm:$0xff] }
  0xad   :  { %561 = vst [vmem:[%s1312_s3 + $0x118] sm:$0xff] %v477_v8  ;;  %v145_v26 = vmul.f32 %v644_v1, %v57_v13 }
  0xaf   :  { %v233_v32 = vadd.f32 %v649_v2, %v145_v26 }
  0xb1   :  { %vm317_vm11 = vcmp.gt.f32.partialorder %v233_v32, 0.0  ;;  %v401_v38 = vmul.f32 0.1, %v233_v32 }
  0xb3   :  { %v485_v48 = vsel %vm317_vm11, %v233_v32, %v401_v38 }
  0xb4   :  { %v58_v18 = vld [vmem:[%s1309_s0 + $0x160] sm:$0xff]  ;;  %v59_v19 = vld [vmem:[%s1309_s0 + $0x168] sm:$0xff] }
  0xb5   :  { %562 = vst [vmem:[%s1312_s3 + $0x120] sm:$0xff] %v478_v14  ;;  %v146_v29 = vmul.f32 %v644_v1, %v58_v18  ;;  %v147_v30 = vmul.f32 %v644_v1, %v59_v19 }
  0xb6   :  { %563 = vst [vmem:[%s1312_s3 + $0x128] sm:$0xff] %v479_v20 }
  0xb7   :  { %564 = vst [vmem:[%s1312_s3 + $0x130] sm:$0xff] %v480_v23  ;;  %v234_v35 = vadd.f32 %v649_v2, %v146_v29  ;;  %v235_v39 = vadd.f32 %v649_v2, %v147_v30 }
  0xb8   :  { %565 = vst [vmem:[%s1312_s3 + $0x138] sm:$0xff] %v481_v27 }
  0xb9   :  { %vm318_vm12 = vcmp.gt.f32.partialorder %v234_v35, 0.0  ;;  %v402_v45 = vmul.f32 0.1, %v234_v35  ;;  %vm319_vm13 = vcmp.gt.f32.partialorder %v235_v39, 0.0  ;;  %v403_v49 = vmul.f32 0.1, %v235_v39 }
  0xbb   :  { %v486_v52 = vsel %vm318_vm12, %v234_v35, %v402_v45  ;;  %v487_v56 = vsel %vm319_vm13, %v235_v39, %v403_v49 }
  0xbf   :  { %v60_v36 = vld [vmem:[%s1309_s0 + $0x170] sm:$0xff]  ;;  %v61_v40 = vld [vmem:[%s1309_s0 + $0x178] sm:$0xff]  ;;  %v62_v41 = vld [vmem:[%s1309_s0 + $0x180] sm:$0xff] }
  0xc0   :  { %v63_v42 = vld [vmem:[%s1309_s0 + $0x188] sm:$0xff]  ;;  %v148_v50 = vmul.f32 %v644_v1, %v60_v36  ;;  %v149_v53 = vmul.f32 %v644_v1, %v61_v40  ;;  %v150_v54 = vmul.f32 %v644_v1, %v62_v41 }
  0xc1   :  { %566 = vst [vmem:[%s1312_s3 + $0x140] sm:$0xff] %v482_v37  ;;  %v151_v55 = vmul.f32 %v644_v1, %v63_v42 }
  0xc2   :  { %v236_v57 = vadd.f32 %v649_v2, %v148_v50  ;;  %v237_v60 = vadd.f32 %v649_v2, %v149_v53  ;;  %v238_v61 = vadd.f32 %v649_v2, %v150_v54 }
  0xc3   :  { %v239_v62 = vadd.f32 %v649_v2, %v151_v55 }
  0xc4   :  { %vm320_vm14 = vcmp.gt.f32.partialorder %v236_v57, 0.0  ;;  %v404_v0 = vmul.f32 0.1, %v236_v57  ;;  %vm321_vm15 = vcmp.gt.f32.partialorder %v237_v60, 0.0  ;;  %v405_v7 = vmul.f32 0.1, %v237_v60 }
  0xc5   :  { %vm322_vm0 = vcmp.gt.f32.partialorder %v238_v61, 0.0  ;;  %v406_v8 = vmul.f32 0.1, %v238_v61  ;;  %vm323_vm1 = vcmp.gt.f32.partialorder %v239_v62, 0.0  ;;  %v407_v10 = vmul.f32 0.1, %v239_v62 }
  0xc6   :  { %v488_v9 = vsel %vm320_vm14, %v236_v57, %v404_v0  ;;  %v489_v13 = vsel %vm321_vm15, %v237_v60, %v405_v7 }
  0xc7   :  { %v490_v14 = vsel %vm322_vm0, %v238_v61, %v406_v8  ;;  %v491_v16 = vsel %vm323_vm1, %v239_v62, %v407_v10 }
  0xc8   :  { %v64_v46 = vld [vmem:[%s1309_s0 + $0x190] sm:$0xff]  ;;  %v65_v47 = vld [vmem:[%s1309_s0 + $0x198] sm:$0xff] }
  0xc9   :  { %567 = vst [vmem:[%s1312_s3 + $0x148] sm:$0xff] %v483_v43  ;;  %v152_v58 = vmul.f32 %v644_v1, %v64_v46  ;;  %v153_v59 = vmul.f32 %v644_v1, %v65_v47 }
  0xcb   :  { %v240_v3 = vadd.f32 %v649_v2, %v152_v58  ;;  %v241_v4 = vadd.f32 %v649_v2, %v153_v59 }
  0xcd   :  { %vm324_vm2 = vcmp.gt.f32.partialorder %v240_v3, 0.0  ;;  %v408_v15 = vmul.f32 0.1, %v240_v3  ;;  %vm325_vm3 = vcmp.gt.f32.partialorder %v241_v4, 0.0  ;;  %v409_v17 = vmul.f32 0.1, %v241_v4 }
  0xcf   :  { %v492_v21 = vsel %vm324_vm2, %v240_v3, %v408_v15  ;;  %v493_v26 = vsel %vm325_vm3, %v241_v4, %v409_v17 }
  0xd0   :  { %v66_v51 = vld [vmem:[%s1309_s0 + $0x1a0] sm:$0xff] }
  0xd1   :  { %568 = vst [vmem:[%s1312_s3 + $0x150] sm:$0xff] %v484_v44  ;;  %v154_v63 = vmul.f32 %v644_v1, %v66_v51 }
  0xd2   :  { %569 = vst [vmem:[%s1312_s3 + $0x158] sm:$0xff] %v485_v48 }
  0xd3   :  { %570 = vst [vmem:[%s1312_s3 + $0x160] sm:$0xff] %v486_v52  ;;  %v242_v18 = vadd.f32 %v649_v2, %v154_v63 }
  0xd4   :  { %571 = vst [vmem:[%s1312_s3 + $0x168] sm:$0xff] %v487_v56 }
  0xd5   :  { %vm326_vm4 = vcmp.gt.f32.partialorder %v242_v18, 0.0  ;;  %v410_v27 = vmul.f32 0.1, %v242_v18 }
  0xd7   :  { %v494_v33 = vsel %vm326_vm4, %v242_v18, %v410_v27 }
  0xdb   :  { %v67_v5 = vld [vmem:[%s1309_s0 + $0x1a8] sm:$0xff]  ;;  %v68_v6 = vld [vmem:[%s1309_s0 + $0x1b0] sm:$0xff]  ;;  %v69_v11 = vld [vmem:[%s1309_s0 + $0x1b8] sm:$0xff] }
  0xdc   :  { %v70_v12 = vld [vmem:[%s1309_s0 + $0x1c0] sm:$0xff]  ;;  %v155_v19 = vmul.f32 %v644_v1, %v67_v5  ;;  %v156_v22 = vmul.f32 %v644_v1, %v68_v6  ;;  %v157_v23 = vmul.f32 %v644_v1, %v69_v11 }
  0xdd   :  { %572 = vst [vmem:[%s1312_s3 + $0x170] sm:$0xff] %v488_v9  ;;  %v158_v24 = vmul.f32 %v644_v1, %v70_v12 }
  0xde   :  { %573 = vst [vmem:[%s1312_s3 + $0x178] sm:$0xff] %v489_v13  ;;  %v243_v28 = vadd.f32 %v649_v2, %v155_v19  ;;  %v244_v29 = vadd.f32 %v649_v2, %v156_v22  ;;  %v245_v30 = vadd.f32 %v649_v2, %v157_v23 }
  0xdf   :  { %v246_v31 = vadd.f32 %v649_v2, %v158_v24 }
  0xe0   :  { %vm327_vm5 = vcmp.gt.f32.partialorder %v243_v28, 0.0  ;;  %v411_v34 = vmul.f32 0.1, %v243_v28  ;;  %vm328_vm6 = vcmp.gt.f32.partialorder %v244_v29, 0.0  ;;  %v412_v38 = vmul.f32 0.1, %v244_v29 }
  0xe1   :  { %vm329_vm7 = vcmp.gt.f32.partialorder %v245_v30, 0.0  ;;  %vm330_vm8 = vcmp.gt.f32.partialorder %v246_v31, 0.0  ;;  %v413_v40 = vmul.f32 0.1, %v245_v30  ;;  %v414_v41 = vmul.f32 0.1, %v246_v31 }
  0xe2   :  { %v495_v39 = vsel %vm327_vm5, %v243_v28, %v411_v34  ;;  %v496_v43 = vsel %vm328_vm6, %v244_v29, %v412_v38 }
  0xe3   :  { %v497_v50 = vsel %vm329_vm7, %v245_v30, %v413_v40  ;;  %v498_v51 = vsel %vm330_vm8, %v246_v31, %v414_v41 }
  0xe5   :  { %v71_v20 = vld [vmem:[%s1309_s0 + $0x1c8] sm:$0xff] }
  0xe6   :  { %574 = vst [vmem:[%s1312_s3 + $0x180] sm:$0xff] %v490_v14  ;;  %v159_v32 = vmul.f32 %v644_v1, %v71_v20 }
  0xe8   :  { %v247_v42 = vadd.f32 %v649_v2, %v159_v32 }
  0xea   :  { %vm331_vm9 = vcmp.gt.f32.partialorder %v247_v42, 0.0  ;;  %v415_v52 = vmul.f32 0.1, %v247_v42 }
  0xec   :  { %v499_v56 = vsel %vm331_vm9, %v247_v42, %v415_v52 }
  0xed   :  { %v72_v25 = vld [vmem:[%s1309_s0 + $0x1d0] sm:$0xff] }
  0xee   :  { %575 = vst [vmem:[%s1312_s3 + $0x188] sm:$0xff] %v491_v16  ;;  %v160_v35 = vmul.f32 %v644_v1, %v72_v25 }
  0xef   :  { %576 = vst [vmem:[%s1312_s3 + $0x190] sm:$0xff] %v492_v21 }
  0xf0   :  { %577 = vst [vmem:[%s1312_s3 + $0x198] sm:$0xff] %v493_v26  ;;  %v248_v44 = vadd.f32 %v649_v2, %v160_v35 }
  0xf2   :  { %vm332_vm10 = vcmp.gt.f32.partialorder %v248_v44, 0.0  ;;  %v416_v53 = vmul.f32 0.1, %v248_v44 }
  0xf4   :  { %v500_v63 = vsel %vm332_vm10, %v248_v44, %v416_v53 }
  0xf7   :  { %v73_v36 = vld [vmem:[%s1309_s0 + $0x1d8] sm:$0xff]  ;;  %v74_v37 = vld [vmem:[%s1309_s0 + $0x1e0] sm:$0xff] }
  0xf8   :  { %578 = vst [vmem:[%s1312_s3 + $0x1a0] sm:$0xff] %v494_v33  ;;  %v161_v45 = vmul.f32 %v644_v1, %v73_v36  ;;  %v162_v46 = vmul.f32 %v644_v1, %v74_v37 }
  0xf9   :  { %579 = vst [vmem:[%s1312_s3 + $0x1a8] sm:$0xff] %v495_v39 }
  0xfa   :  { %v249_v54 = vadd.f32 %v649_v2, %v161_v45  ;;  %v250_v55 = vadd.f32 %v649_v2, %v162_v46 }
  0xfc   :  { %vm333_vm11 = vcmp.gt.f32.partialorder %v249_v54, 0.0  ;;  %v417_v0 = vmul.f32 0.1, %v249_v54  ;;  %vm334_vm12 = vcmp.gt.f32.partialorder %v250_v55, 0.0  ;;  %v418_v3 = vmul.f32 0.1, %v250_v55 }
  0xfe   :  { %v501_v7 = vsel %vm333_vm11, %v249_v54, %v417_v0  ;;  %v502_v12 = vsel %vm334_vm12, %v250_v55, %v418_v3  ;;  %v616_v0 = vld [vmem:[%s1310_s1] ss:$0 sm:$0xff] }
 0x100   :  { %v75_v47 = vld [vmem:[%s1309_s0 + $0x1e8] sm:$0xff]  ;;  %v76_v48 = vld [vmem:[%s1309_s0 + $0x1f0] sm:$0xff]  ;;  %v77_v49 = vld [vmem:[%s1309_s0 + $0x1f8] sm:$0xff] }
 0x101   :  { %580 = vst [vmem:[%s1312_s3 + $0x1b0] sm:$0xff] %v496_v43  ;;  %v163_v57 = vmul.f32 %v644_v1, %v75_v47  ;;  %v164_v58 = vmul.f32 %v644_v1, %v76_v48  ;;  %v165_v59 = vmul.f32 %v644_v1, %v77_v49 }
 0x102   :  { %581 = vst [vmem:[%s1312_s3 + $0x1b8] sm:$0xff] %v497_v50 }
 0x103   :  { %582 = vst [vmem:[%s1312_s3 + $0x1c0] sm:$0xff] %v498_v51  ;;  %v251_v4 = vadd.f32 %v649_v2, %v163_v57  ;;  %v252_v5 = vadd.f32 %v649_v2, %v164_v58  ;;  %v253_v6 = vadd.f32 %v649_v2, %v165_v59 }
 0x105   :  { %vm335_vm13 = vcmp.gt.f32.partialorder %v251_v4, 0.0  ;;  %v419_v13 = vmul.f32 0.1, %v251_v4  ;;  %vm336_vm14 = vcmp.gt.f32.partialorder %v252_v5, 0.0  ;;  %v420_v14 = vmul.f32 0.1, %v252_v5 }
 0x106   :  { %vm337_vm15 = vcmp.gt.f32.partialorder %v253_v6, 0.0  ;;  %v421_v15 = vmul.f32 0.1, %v253_v6 }
 0x107   :  { %v503_v17 = vsel %vm335_vm13, %v251_v4, %v419_v13  ;;  %v504_v23 = vsel %vm336_vm14, %v252_v5, %v420_v14 }
 0x108   :  { %v505_v24 = vsel %vm337_vm15, %v253_v6, %v421_v15 }
 0x10a   :  { %v78_v60 = vld [vmem:[%s1309_s0 + $0x200] sm:$0xff]  ;;  %v79_v61 = vld [vmem:[%s1309_s0 + $0x208] sm:$0xff]  ;;  %v80_v62 = vld [vmem:[%s1309_s0 + $0x210] sm:$0xff] }
 0x10b   :  { %583 = vst [vmem:[%s1312_s3 + $0x1c8] sm:$0xff] %v499_v56  ;;  %v166_v8 = vmul.f32 %v644_v1, %v78_v60  ;;  %v167_v9 = vmul.f32 %v644_v1, %v79_v61  ;;  %v168_v10 = vmul.f32 %v644_v1, %v80_v62 }
 0x10c   :  { %584 = vst [vmem:[%s1312_s3 + $0x1d0] sm:$0xff] %v500_v63 }
 0x10d   :  { %v254_v16 = vadd.f32 %v649_v2, %v166_v8  ;;  %v255_v18 = vadd.f32 %v649_v2, %v167_v9  ;;  %v256_v19 = vadd.f32 %v649_v2, %v168_v10  ;;  %v617_v10 = vld [vmem:[%s1311_s2] ss:$0 sm:$0xff] }
 0x10f   :  { %vm338_vm0 = vcmp.gt.f32.partialorder %v254_v16, 0.0  ;;  %v422_v25 = vmul.f32 0.1, %v254_v16  ;;  %vm339_vm1 = vcmp.gt.f32.partialorder %v255_v18, 0.0  ;;  %v423_v27 = vmul.f32 0.1, %v255_v18 }
 0x110   :  { %vm340_vm2 = vcmp.gt.f32.partialorder %v256_v19, 0.0  ;;  %v424_v31 = vmul.f32 0.1, %v256_v19 }
 0x111   :  { %v506_v30 = vsel %vm338_vm0, %v254_v16, %v422_v25  ;;  %v507_v36 = vsel %vm339_vm1, %v255_v18, %v423_v27 }
 0x112   :  { %v508_v39 = vsel %vm340_vm2, %v256_v19, %v424_v31 }
 0x113   :  { %v81_v11 = vld [vmem:[%s1309_s0 + $0x218] sm:$0xff] }
 0x114   :  { %585 = vst [vmem:[%s1312_s3 + $0x1d8] sm:$0xff] %v501_v7  ;;  %v169_v20 = vmul.f32 %v644_v1, %v81_v11 }
 0x115   :  { %586 = vst [vmem:[%s1312_s3 + $0x1e0] sm:$0xff] %v502_v12 }
 0x116   :  { %v257_v28 = vadd.f32 %v649_v2, %v169_v20 }
 0x118   :  { %vm341_vm3 = vcmp.gt.f32.partialorder %v257_v28, 0.0  ;;  %v425_v37 = vmul.f32 0.1, %v257_v28 }
 0x11a   :  { %v509_v43 = vsel %vm341_vm3, %v257_v28, %v425_v37 }
 0x11c   :  { %v82_v21 = vld [vmem:[%s1309_s0 + $0x220] sm:$0xff]  ;;  %v83_v22 = vld [vmem:[%s1309_s0 + $0x228] sm:$0xff] }
 0x11d   :  { %587 = vst [vmem:[%s1312_s3 + $0x1e8] sm:$0xff] %v503_v17  ;;  %v170_v32 = vmul.f32 %v644_v1, %v82_v21  ;;  %v171_v33 = vmul.f32 %v644_v1, %v83_v22 }
 0x11f   :  { %v258_v40 = vadd.f32 %v649_v2, %v170_v32  ;;  %v259_v41 = vadd.f32 %v649_v2, %v171_v33 }
 0x121   :  { %vm342_vm4 = vcmp.gt.f32.partialorder %v258_v40, 0.0  ;;  %v426_v47 = vmul.f32 0.1, %v258_v40  ;;  %vm343_vm5 = vcmp.gt.f32.partialorder %v259_v41, 0.0  ;;  %v427_v49 = vmul.f32 0.1, %v259_v41 }
 0x123   :  { %v510_v53 = vsel %vm342_vm4, %v258_v40, %v426_v47  ;;  %v511_v58 = vsel %vm343_vm5, %v259_v41, %v427_v49 }
 0x124   :  { %v84_v26 = vld [vmem:[%s1309_s0 + $0x230] sm:$0xff] }
 0x125   :  { %588 = vst [vmem:[%s1312_s3 + $0x1f0] sm:$0xff] %v504_v23  ;;  %v172_v38 = vmul.f32 %v644_v1, %v84_v26 }
 0x127   :  { %v260_v44 = vadd.f32 %v649_v2, %v172_v38 }
 0x129   :  { %vm344_vm6 = vcmp.gt.f32.partialorder %v260_v44, 0.0  ;;  %v428_v50 = vmul.f32 0.1, %v260_v44 }
 0x12b   :  { %v512_v59 = vsel %vm344_vm6, %v260_v44, %v428_v50 }
 0x12c   :  { %v85_v29 = vld [vmem:[%s1309_s0 + $0x238] sm:$0xff] }
 0x12d   :  { %589 = vst [vmem:[%s1312_s3 + $0x1f8] sm:$0xff] %v505_v24  ;;  %v173_v42 = vmul.f32 %v644_v1, %v85_v29 }
 0x12f   :  { %v261_v48 = vadd.f32 %v649_v2, %v173_v42 }
 0x131   :  { %vm345_vm7 = vcmp.gt.f32.partialorder %v261_v48, 0.0 }
 0x134   :  { %v86_v34 = vld [vmem:[%s1309_s0 + $0x240] sm:$0xff]  ;;  %v87_v35 = vld [vmem:[%s1309_s0 + $0x248] sm:$0xff] }
 0x135   :  { %590 = vst [vmem:[%s1312_s3 + $0x200] sm:$0xff] %v506_v30  ;;  %v174_v45 = vmul.f32 %v644_v1, %v86_v34  ;;  %v175_v46 = vmul.f32 %v644_v1, %v87_v35  ;;  %v429_v1 = vmul.f32 0.1, %v261_v48 }
 0x136   :  { %591 = vst [vmem:[%s1312_s3 + $0x208] sm:$0xff] %v507_v36 }
 0x137   :  { %592 = vst [vmem:[%s1312_s3 + $0x210] sm:$0xff] %v508_v39  ;;  %v262_v51 = vadd.f32 %v649_v2, %v174_v45  ;;  %v263_v54 = vadd.f32 %v649_v2, %v175_v46  ;;  %v513_v62 = vsel %vm345_vm7, %v261_v48, %v429_v1 }
 0x138   :  { %593 = vst [vmem:[%s1312_s3 + $0x218] sm:$0xff] %v509_v43 }
 0x139   :  { %vm346_vm8 = vcmp.gt.f32.partialorder %v262_v51, 0.0  ;;  %v430_v2 = vmul.f32 0.1, %v262_v51  ;;  %vm347_vm9 = vcmp.gt.f32.partialorder %v263_v54, 0.0  ;;  %v431_v63 = vmul.f32 0.1, %v263_v54 }
 0x13b   :  { %v514_v5 = vsel %vm346_vm8, %v262_v51, %v430_v2  ;;  %v515_v9 = vsel %vm347_vm9, %v263_v54, %v431_v63 }
 0x13f   :  { %v88_v52 = vld [vmem:[%s1309_s0 + $0x250] sm:$0xff]  ;;  %v89_v55 = vld [vmem:[%s1309_s0 + $0x258] sm:$0xff]  ;;  %v90_v56 = vld [vmem:[%s1309_s0 + $0x260] sm:$0xff] }
 0x140   :  { %v91_v57 = vld [vmem:[%s1309_s0 + $0x268] sm:$0xff]  ;;  %v176_v3 = vmul.f32 %v616_v0, %v88_v52  ;;  %v177_v6 = vmul.f32 %v616_v0, %v89_v55  ;;  %v178_v7 = vmul.f32 %v616_v0, %v90_v56 }
 0x141   :  { %594 = vst [vmem:[%s1312_s3 + $0x220] sm:$0xff] %v510_v53  ;;  %v179_v8 = vmul.f32 %v616_v0, %v91_v57 }
 0x142   :  { %v264_v11 = vadd.f32 %v617_v10, %v176_v3  ;;  %v265_v14 = vadd.f32 %v617_v10, %v177_v6  ;;  %v266_v15 = vadd.f32 %v617_v10, %v178_v7 }
 0x143   :  { %v267_v16 = vadd.f32 %v617_v10, %v179_v8 }
 0x144   :  { %vm348_vm10 = vcmp.gt.f32.partialorder %v264_v11, 0.0  ;;  %v432_v18 = vmul.f32 0.1, %v264_v11  ;;  %vm349_vm11 = vcmp.gt.f32.partialorder %v265_v14, 0.0  ;;  %v433_v22 = vmul.f32 0.1, %v265_v14 }
 0x145   :  { %vm350_vm12 = vcmp.gt.f32.partialorder %v266_v15, 0.0  ;;  %v434_v23 = vmul.f32 0.1, %v266_v15  ;;  %vm351_vm13 = vcmp.gt.f32.partialorder %v267_v16, 0.0  ;;  %v435_v25 = vmul.f32 0.1, %v267_v16 }
 0x146   :  { %v516_v24 = vsel %vm348_vm10, %v264_v11, %v432_v18  ;;  %v517_v28 = vsel %vm349_vm11, %v265_v14, %v433_v22 }
 0x147   :  { %v518_v29 = vsel %vm350_vm12, %v266_v15, %v434_v23  ;;  %v519_v31 = vsel %vm351_vm13, %v267_v16, %v435_v25 }
 0x148   :  { %v92_v60 = vld [vmem:[%s1309_s0 + $0x270] sm:$0xff]  ;;  %v93_v61 = vld [vmem:[%s1309_s0 + $0x278] sm:$0xff] }
 0x149   :  { %595 = vst [vmem:[%s1312_s3 + $0x228] sm:$0xff] %v511_v58  ;;  %v180_v12 = vmul.f32 %v616_v0, %v92_v60  ;;  %v181_v13 = vmul.f32 %v616_v0, %v93_v61 }
 0x14b   :  { %v268_v19 = vadd.f32 %v617_v10, %v180_v12  ;;  %v269_v20 = vadd.f32 %v617_v10, %v181_v13 }
 0x14d   :  { %vm352_vm14 = vcmp.gt.f32.partialorder %v268_v19, 0.0  ;;  %v436_v30 = vmul.f32 0.1, %v268_v19  ;;  %vm353_vm15 = vcmp.gt.f32.partialorder %v269_v20, 0.0  ;;  %v437_v32 = vmul.f32 0.1, %v269_v20 }
 0x14f   :  { %v520_v35 = vsel %vm352_vm14, %v268_v19, %v436_v30  ;;  %v521_v38 = vsel %vm353_vm15, %v269_v20, %v437_v32 }
 0x150   :  { %v94_v4 = vld [vmem:[%s1309_s0 + $0x280] sm:$0xff] }
 0x151   :  { %596 = vst [vmem:[%s1312_s3 + $0x230] sm:$0xff] %v512_v59  ;;  %v182_v17 = vmul.f32 %v616_v0, %v94_v4 }
 0x152   :  { %597 = vst [vmem:[%s1312_s3 + $0x238] sm:$0xff] %v513_v62 }
 0x153   :  { %598 = vst [vmem:[%s1312_s3 + $0x240] sm:$0xff] %v514_v5  ;;  %v270_v33 = vadd.f32 %v617_v10, %v182_v17 }
 0x154   :  { %599 = vst [vmem:[%s1312_s3 + $0x248] sm:$0xff] %v515_v9 }
 0x155   :  { %vm354_vm0 = vcmp.gt.f32.partialorder %v270_v33, 0.0  ;;  %v438_v39 = vmul.f32 0.1, %v270_v33 }
 0x157   :  { %v522_v43 = vsel %vm354_vm0, %v270_v33, %v438_v39 }
 0x15b   :  { %v95_v21 = vld [vmem:[%s1309_s0 + $0x288] sm:$0xff]  ;;  %v96_v26 = vld [vmem:[%s1309_s0 + $0x290] sm:$0xff]  ;;  %v97_v27 = vld [vmem:[%s1309_s0 + $0x298] sm:$0xff] }
 0x15c   :  { %600 = vst [vmem:[%s1312_s3 + $0x250] sm:$0xff] %v516_v24  ;;  %v183_v34 = vmul.f32 %v616_v0, %v95_v21  ;;  %v184_v36 = vmul.f32 %v616_v0, %v96_v26  ;;  %v185_v37 = vmul.f32 %v616_v0, %v97_v27 }
 0x15d   :  { %601 = vst [vmem:[%s1312_s3 + $0x258] sm:$0xff] %v517_v28 }
 0x15e   :  { %602 = vst [vmem:[%s1312_s3 + $0x260] sm:$0xff] %v518_v29  ;;  %v271_v40 = vadd.f32 %v617_v10, %v183_v34  ;;  %v272_v41 = vadd.f32 %v617_v10, %v184_v36  ;;  %v273_v42 = vadd.f32 %v617_v10, %v185_v37 }
 0x15f   :  { %603 = vst [vmem:[%s1312_s3 + $0x268] sm:$0xff] %v519_v31 }
 0x160   :  { %604 = vst [vmem:[%s1312_s3 + $0x270] sm:$0xff] %v520_v35  ;;  %vm355_vm1 = vcmp.gt.f32.partialorder %v271_v40, 0.0  ;;  %v439_v44 = vmul.f32 0.1, %v271_v40  ;;  %vm356_vm2 = vcmp.gt.f32.partialorder %v272_v41, 0.0  ;;  %vm357_vm3 = vcmp.gt.f32.partialorder %v273_v42, 0.0 }
 0x161   :  { %605 = vst [vmem:[%s1312_s3 + $0x278] sm:$0xff] %v521_v38  ;;  %v440_v45 = vmul.f32 0.1, %v272_v41  ;;  %v441_v47 = vmul.f32 0.1, %v273_v42 }
 0x162   :  { %606 = vst [vmem:[%s1312_s3 + $0x280] sm:$0xff] %v522_v43  ;;  %v523_v46 = vsel %vm355_vm1, %v271_v40, %v439_v44 }
 0x163   :  { %607 = vst [vmem:[%s1312_s3 + $0x288] sm:$0xff] %v523_v46  ;;  %v524_v48 = vsel %vm356_vm2, %v272_v41, %v440_v45  ;;  %v525_v49 = vsel %vm357_vm3, %v273_v42, %v441_v47 }
 0x164   :  { %608 = vst [vmem:[%s1312_s3 + $0x290] sm:$0xff] %v524_v48 }
 0x165   :  { %609 = vst [vmem:[%s1312_s3 + $0x298] sm:$0xff] %v525_v49 }

// kernel: cnn_block.2
= control target key start
LH: loop header
LB: loop body
LE: loop exit
PB: predicated region body
PF: predicated region fallthrough
CT: control target
= control target key end

     0   :  { %vm451_vm0 = vcmask 1041408   ;;  %vm214_vm1 = vsmask.f32 7424  ;;  %vm387_vm2 = vcmask 31744   ;;  %vm734_vm3 = vcmask 1046528   ;;  %s11566_s1 = inlined_call_operand.vmem [shape: bf16[9,4,128], index: 1, kind: input, shape index: {}]   ;;  %s11567_s0 = inlined_call_operand.vmem [shape: bf16[2,374,4], index: 0, kind: input, shape index: {}]   ;;  %s11568_s2 = inlined_call_operand.vmem [shape: f32[336,1], index: 2, kind: input, shape index: {}]   ;;  %s11569_s3 = inlined_call_operand.vmem [shape: f32[2,336,128], index: 3, kind: output, shape index: {0}]   ;;  %s11570_s4 = inlined_call_operand.vmem [shape: f32[8,128], index: 4, kind: output, shape index: {1}]   ;;  %s11571_s5 = inlined_call_operand.vmem [shape: f32[8,128], index: 5, kind: output, shape index: {2}]  }
   0x1   :  { %v102_v0 = vld [vmem:[%s11566_s1] sm:$0x3]  ;;  %v7058_v1 = vld [vmem:[%s11566_s1 + $0x2] sm:$0x3]  ;;  %v8339_v7 = vld [vmem:[%s11567_s0 + $0x8] sm:$0xff]  ;;  %vm1850_vm4 = vcmask 1045504  }
   0x2   :  { %v8229_v2 = vld [vmem:[%s11567_s0] sm:$0xff]   ;;  %v612_v3 = vsel %vm451_vm0, %v102_v0, 0  ;;  %v453_v4 = vsel %vm451_vm0, %v7058_v1, 0  ;;  %v8118_v8 = vld [vmem:[%s11567_s0 + $0x58] sm:$0xff]  ;;  %v7305_v9 = vld [vmem:[%s11566_s1 + $0x8] sm:$0x3] }
   0x3   :  { %v216_v5 = vshrl.u32 %v8229_v2, 16  ;;  %v218_v6 = vshll.u32 %v8229_v2, 16  ;;  %621 = vmatpush.bf16.msra.mxu1 %v612_v3  ;;  %462 = vmatpush.bf16.msra.mxu0 %v453_v4  ;;  %v8119_v10 = vld [vmem:[%s11567_s0 + $0x60] sm:$0xff]  ;;  %v7327_v11 = vld [vmem:[%s11566_s1 + $0xa] sm:$0x3]  ;;  %v223_v13 = vshll.u32 %v8339_v7, 16 }
   0x4   :  { %8236 = vmatpush.bf16.msra.mxu3 %v612_v3  ;;  %8235 = vmatpush.bf16.msra.mxu2 %v453_v4  ;;  %v1686_v14 = vsel %vm451_vm0, %v7305_v9, 0  ;;  %v303_v15 = vshll.u32 %v8118_v8, 16  ;;  %v7181_v16 = vld [vmem:[%s11566_s1 + $0x4] sm:$0x3]  ;;  %v307_v17 = vshrl.u32 %v8118_v8, 16  ;;  %v311_v18 = vshll.u32 %v8119_v10, 16 }
   0x5   :  { %v220_v12 = vrot.slane %v218_v6, 1  ;;  %v1958_v19 = vsel %vm451_vm0, %v7327_v11, 0  ;;  %v842_v20 = vsel %vm451_vm0, %v7181_v16, 0  ;;  %v7203_v21 = vld [vmem:[%s11566_s1 + $0x6] sm:$0x3]  ;;  %v225_v23 = vrot.slane %v223_v13, 1 }
   0x6   :  { %7160 = vmatmul.msk.bf16.vlgmr.msra.gmra.mxu1 %vm387_vm2, %v8229_v2  ;;  %v8364_v24 = vrot.slane %v303_v15, 1  ;;  %v1260_v25 = vsel %vm451_vm0, %v7203_v21, 0  ;;  %v313_v26 = vrot.slane %v311_v18, 1  ;;  %v8375_v30 = vld [vmem:[%s11567_s0 + $0x10] sm:$0xff]  ;;  %v8120_v31 = vld [vmem:[%s11567_s0 + $0x68] sm:$0xff]  ;;  %v227_v32 = vshrl.u32 %v8339_v7, 16 }
   0x7   :  { %1695 = vmatpush.bf16.msrb.mxu0 %v1686_v14  ;;  %v221_v22 = vor.u32 %v220_v12, %v216_v5  ;;  %7171 = vmatmul.msk.bf16.vlgmr.msra.gmra.mxu3 %vm387_vm2, %v8118_v8  ;;  %v231_v33 = vshll.u32 %v8375_v30, 16  ;;  %v315_v34 = vshrl.u32 %v8119_v10, 16  ;;  %v319_v35 = vshll.u32 %v8120_v31, 16  ;;  %v8392_v42 = vld [vmem:[%s11567_s0 + $0x18] sm:$0xff]  ;;  %v8121_v43 = vld [vmem:[%s11567_s0 + $0x70] sm:$0xff]  ;;  %v8409_v54 = vld [vmem:[%s11567_s0 + $0x20] sm:$0xff] }
   0x8   :  { %851 = vmatpush.bf16.msrb.mxu2 %v842_v20  ;;  %1967 = vmatpush.bf16.msrb.mxu1 %v1958_v19  ;;  %v309_v28 = vor.u32 %v307_v17, %v8364_v24  ;;  %v229_v36 = vor.u32 %v227_v32, %v225_v23  ;;  %v235_v44 = vshrl.u32 %v8375_v30, 16  ;;  %v239_v45 = vshll.u32 %v8392_v42, 16  ;;  %v8122_v55 = vld [vmem:[%s11567_s0 + $0x78] sm:$0xff]  ;;  %v8426_v2 = vld [vmem:[%s11567_s0 + $0x28] sm:$0xff]  ;;  %v8123_v3 = vld [vmem:[%s11567_s0 + $0x80] sm:$0xff] }
   0x9   :  { %v226_v27 = vsel %vm214_vm1, %v221_v22, %v225_v23  ;;  %1269 = vmatpush.bf16.msrb.mxu3 %v1260_v25  ;;  %v233_v37 = vrot.slane %v231_v33, 1  ;;  %v317_v38 = vor.u32 %v315_v34, %v313_v26  ;;  %v321_v39 = vrot.slane %v319_v35, 1  ;;  %v8443_v15 = vld [vmem:[%s11567_s0 + $0x30] sm:$0xff]  ;;  %v8124_v16 = vld [vmem:[%s11567_s0 + $0x88] sm:$0xff] }
   0xa   :  { %7139 = vmatmul.msk.bf16.vlgmr.msra.gmra.mxu0 %vm387_vm2, %v226_v27  ;;  %v314_v29 = vsel %vm214_vm1, %v309_v28, %v313_v26  ;;  %v323_v46 = vshrl.u32 %v8120_v31, 16  ;;  %v327_v47 = vshll.u32 %v8121_v43, 16  ;;  %v241_v49 = vrot.slane %v239_v45, 1  ;;  %v8460_v28 = vld [vmem:[%s11567_s0 + $0x38] sm:$0xff] }
   0xb   :  { %7150 = vmatmul.msk.bf16.vlgmr.msra.gmra.mxu2 %vm387_vm2, %v314_v29  ;;  %v234_v40 = vsel %vm214_vm1, %v229_v36, %v233_v37  ;;  %v322_v41 = vsel %vm214_vm1, %v317_v38, %v321_v39  ;;  %v237_v48 = vor.u32 %v235_v44, %v233_v37  ;;  %v243_v56 = vshrl.u32 %v8392_v42, 16  ;;  %v8125_v29 = vld [vmem:[%s11567_s0 + $0x90] sm:$0xff] }
   0xc   :  { %v325_v50 = vor.u32 %v323_v46, %v321_v39  ;;  %v329_v51 = vrot.slane %v327_v47, 1  ;;  %v247_v57 = vshll.u32 %v8409_v54, 16  ;;  %v331_v58 = vshrl.u32 %v8121_v43, 16 }
   0xd   :  { %v242_v52 = vsel %vm214_vm1, %v237_v48, %v241_v49  ;;  %v335_v59 = vshll.u32 %v8122_v55, 16  ;;  %v245_v60 = vor.u32 %v243_v56, %v241_v49  ;;  %v251_v4 = vshrl.u32 %v8409_v54, 16  ;;  %v8127_v56 = vld [vmem:[%s11567_s0 + $0xa0] sm:$0xff] }
   0xe   :  { %v330_v53 = vsel %vm214_vm1, %v325_v50, %v329_v51  ;;  %v249_v61 = vrot.slane %v247_v57, 1  ;;  %v333_v62 = vor.u32 %v331_v58, %v329_v51  ;;  %v255_v5 = vshll.u32 %v8426_v2, 16 }
   0xf   :  { %v337_v63 = vrot.slane %v335_v59, 1  ;;  %v339_v6 = vshrl.u32 %v8122_v55, 16  ;;  %v343_v8 = vshll.u32 %v8123_v3, 16  ;;  %v259_v17 = vshrl.u32 %v8426_v2, 16 }
  0x10   :  { %v250_v0 = vsel %vm214_vm1, %v245_v60, %v249_v61  ;;  %v253_v9 = vor.u32 %v251_v4, %v249_v61  ;;  %v263_v18 = vshll.u32 %v8443_v15, 16  ;;  %v347_v19 = vshrl.u32 %v8123_v3, 16 }
  0x11   :  { %v338_v1 = vsel %vm214_vm1, %v333_v62, %v337_v63  ;;  %v341_v11 = vor.u32 %v339_v6, %v337_v63  ;;  %v345_v12 = vrot.slane %v343_v8, 1  ;;  %v351_v20 = vshll.u32 %v8124_v16, 16 }
  0x12   :  { %v265_v22 = vrot.slane %v263_v18, 1  ;;  %v271_v32 = vshll.u32 %v8460_v28, 16  ;;  %v355_v33 = vshrl.u32 %v8124_v16, 16  ;;  %v359_v34 = vshll.u32 %v8125_v29, 16 }
  0x13   :  { %v346_v14 = vsel %vm214_vm1, %v341_v11, %v345_v12  ;;  %v349_v23 = vor.u32 %v347_v19, %v345_v12  ;;  %v353_v25 = vrot.slane %v351_v20, 1  ;;  %v275_v44 = vshrl.u32 %v8460_v28, 16  ;;  %v8516_v11 = vld [vmem:[%s11567_s0 + $0x50] sm:$0xff] }
  0x14   :  { %v273_v36 = vrot.slane %v271_v32, 1  ;;  %v361_v38 = vrot.slane %v359_v34, 1  ;;  %v363_v46 = vshrl.u32 %v8125_v29, 16  ;;  %v375_v60 = vshll.u32 %v8127_v56, 16 }
  0x15   :  { %v354_v27 = vsel %vm214_vm1, %v349_v23, %v353_v25  ;;  %v357_v37 = vor.u32 %v355_v33, %v353_v25  ;;  %v295_v18 = vshll.u32 %v8516_v11, 16  ;;  %v379_v23 = vshrl.u32 %v8127_v56, 16 }
  0x16   :  { %7161 = vmatmul.msk.bf16.gmra.mxu1 %vm387_vm2, %v8339_v7  ;;  %v277_v48 = vor.u32 %v275_v44, %v273_v36  ;;  %v365_v50 = vor.u32 %v363_v46, %v361_v38  ;;  %vm1424_vm5 = vsmask.f32 6400  ;;  %vm2540_vm6 = vsmask.f32 5376 }
  0x17   :  { %7172 = vmatmul.msk.bf16.gmra.mxu3 %vm387_vm2, %v8119_v10  ;;  %v257_v10 = vrot.slane %v255_v5, 1  ;;  %v297_v32 = vrot.slane %v295_v18, 1  ;;  %vm2966_vm7 = vcmask 1044480  }
  0x19   :  { %v258_v13 = vsel %vm214_vm1, %v253_v9, %v257_v10  ;;  %v261_v21 = vor.u32 %v259_v17, %v257_v10 }
  0x1a   :  { %7140 = vmatmul.msk.bf16.gmra.mxu0 %vm387_vm2, %v234_v40  ;;  %v362_v40 = vsel %vm214_vm1, %v357_v37, %v361_v38  ;;  %v1001_v37 = vld [vmem:[%s11567_s0 + $0xc] sm:$0xf] }
  0x1b   :  { %7151 = vmatmul.msk.bf16.gmra.mxu2 %vm387_vm2, %v322_v41  ;;  %v266_v26 = vsel %vm214_vm1, %v261_v21, %v265_v22  ;;  %v8477_v41 = vld [vmem:[%s11567_s0 + $0x40] sm:$0xff]  ;;  %v7349_v21 = vld [vmem:[%s11566_s1 + $0xc] sm:$0x3] }
  0x1c   :  { %v279_v45 = vshll.u32 %v8477_v41, 16  ;;  %v283_v57 = vshrl.u32 %v8477_v41, 16 }
  0x1e   :  { %v281_v49 = vrot.slane %v279_v45, 1 }
  0x20   :  { %v285_v61 = vor.u32 %v283_v57, %v281_v49 }
  0x26   :  { %7162 = vmatmul.msk.bf16.gmra.mxu1 %vm387_vm2, %v8375_v30 }
  0x27   :  { %7173 = vmatmul.msk.bf16.gmra.mxu3 %vm387_vm2, %v8120_v31  ;;  %v267_v31 = vshrl.u32 %v8443_v15, 16 }
  0x29   :  { %v269_v35 = vor.u32 %v267_v31, %v265_v22  ;;  %v7451_v22 = vld [vmem:[%s11566_s1 + $0xe] sm:$0x3] }
  0x2a   :  { %7141 = vmatmul.msk.bf16.gmra.mxu0 %vm387_vm2, %v242_v52  ;;  %v282_v52 = vsel %vm214_vm1, %v277_v48, %v281_v49  ;;  %v7473_v48 = vld [vmem:[%s11566_s1 + $0x10] sm:$0x3] }
  0x2b   :  { %7152 = vmatmul.msk.bf16.gmra.mxu2 %vm387_vm2, %v330_v53  ;;  %v274_v39 = vsel %vm214_vm1, %v269_v35, %v273_v36  ;;  %v1000_v36 = vld [vmem:[%s11567_s0 + $0x8] sm:$0xe] }
  0x2c   :  { %v1088_v46 = vunpack.c.l.b16 %v1000_v36 }
  0x36   :  { %7163 = vmatmul.msk.bf16.gmra.mxu1 %vm387_vm2, %v8392_v42 }
  0x37   :  { %7174 = vmatmul.msk.bf16.gmra.mxu3 %vm387_vm2, %v8121_v43  ;;  %v8126_v43 = vld [vmem:[%s11567_s0 + $0x98] sm:$0xff] }
  0x38   :  { %v367_v47 = vshll.u32 %v8126_v43, 16  ;;  %v371_v59 = vshrl.u32 %v8126_v43, 16 }
  0x3a   :  { %7142 = vmatmul.msk.bf16.gmra.mxu0 %vm387_vm2, %v250_v0  ;;  %v369_v51 = vrot.slane %v367_v47, 1  ;;  %v1089_v47 = vunpack.c.l.b16 %v1001_v37 }
  0x3b   :  { %7153 = vmatmul.msk.bf16.gmra.mxu2 %vm387_vm2, %v338_v1  ;;  %v377_v1 = vrot.slane %v375_v60, 1 }
  0x3c   :  { %v370_v53 = vsel %vm214_vm1, %v365_v50, %v369_v51  ;;  %v373_v0 = vor.u32 %v371_v59, %v369_v51  ;;  %v3074_v50 = vsel %vm451_vm0, %v7473_v48, 0  ;;  %v8233_v59 = vld [vmem:[%s11567_s0] sm:$0xe] }
  0x3d   :  { %v381_v34 = vor.u32 %v379_v23, %v377_v1  ;;  %3083 = vmatpush.bf16.msra.mxu0 %v3074_v50 }
  0x3e   :  { %v378_v8 = vsel %vm214_vm1, %v373_v0, %v377_v1 }
  0x46   :  { %7164 = vmatmul.msk.bf16.gmra.mxu1 %vm387_vm2, %v8409_v54 }
  0x47   :  { %7175 = vmatmul.msk.bf16.gmra.mxu3 %vm387_vm2, %v8122_v55  ;;  %v8494_v55 = vld [vmem:[%s11567_s0 + $0x48] sm:$0xff] }
  0x48   :  { %v287_v58 = vshll.u32 %v8494_v55, 16  ;;  %v291_v17 = vshrl.u32 %v8494_v55, 16 }
  0x4a   :  { %7143 = vmatmul.msk.bf16.gmra.mxu0 %vm387_vm2, %v258_v13  ;;  %v289_v62 = vrot.slane %v287_v58, 1  ;;  %v8232_v58 = vld [vmem:[%s11567_s0] sm:$0xf0] }
  0x4b   :  { %7154 = vmatmul.msk.bf16.gmra.mxu2 %vm387_vm2, %v346_v14 }
  0x4c   :  { %v290_v5 = vsel %vm214_vm1, %v285_v61, %v289_v62  ;;  %v293_v31 = vor.u32 %v291_v17, %v289_v62  ;;  %v299_v62 = vshrl.u32 %v8516_v11, 16 }
  0x56   :  { %7165 = vmatmul.msk.bf16.gmra.mxu1 %vm387_vm2, %v8426_v2 }
  0x57   :  { %7176 = vmatmul.msk.bf16.gmra.mxu3 %vm387_vm2, %v8123_v3  ;;  %v103_v3 = vld [vmem:[%s11567_s0 + $0xa8] sm:$0x1] }
  0x58   :  { %v191_v9 = vunpack.c.l.b16 %v103_v3 }
  0x5a   :  { %7144 = vmatmul.msk.bf16.gmra.mxu0 %vm387_vm2, %v266_v26  ;;  %v8519_v13 = vpack.c.b16 %v191_v9, %v191_v9  ;;  %v2376_v26 = vsel %vm451_vm0, %v7349_v21, 0 }
  0x5b   :  { %7155 = vmatmul.msk.bf16.gmra.mxu2 %vm387_vm2, %v354_v27  ;;  %v2802_v27 = vsel %vm451_vm0, %v7451_v22, 0 }
  0x5c   :  { %v383_v25 = vshll.u32 %v8519_v13, 16  ;;  %2385 = vmatpush.bf16.msra.mxu2 %v2376_v26  ;;  %2811 = vmatpush.bf16.msra.mxu3 %v2802_v27 }
  0x5e   :  { %v385_v35 = vrot.slane %v383_v25, 1 }
  0x60   :  { %v386_v45 = vsel %vm214_vm1, %v381_v34, %v385_v35  ;;  %v8600_v34 = vld [vmem:[%s11567_s0 + $0x18] sm:$0xff] }
  0x66   :  { %7166 = vmatmul.msk.bf16.gmra.mxu1 %vm387_vm2, %v8443_v15 }
  0x67   :  { %7177 = vmatmul.msk.bf16.gmra.mxu3 %vm387_vm2, %v8124_v16 }
  0x6a   :  { %7145 = vmatmul.msk.bf16.gmra.mxu0 %vm387_vm2, %v274_v39 }
  0x6b   :  { %7156 = vmatmul.msk.bf16.gmra.mxu2 %vm387_vm2, %v362_v40  ;;  %v298_v40 = vsel %vm214_vm1, %v293_v31, %v297_v32 }
  0x76   :  { %7167 = vmatmul.msk.bf16.gmra.mxu1 %vm387_vm2, %v8460_v28 }
  0x77   :  { %7178 = vmatmul.msk.bf16.gmra.mxu3 %vm387_vm2, %v8125_v29 }
  0x7a   :  { %7146 = vmatmul.msk.bf16.gmra.mxu0 %vm387_vm2, %v282_v52  ;;  %v7538_v52 = vld [vmem:[%s11566_s1 + $0x2] sm:$0x3] }
  0x7b   :  { %7157 = vmatmul.msk.bf16.gmra.mxu2 %vm387_vm2, %v370_v53  ;;  %v8563_v53 = vld [vmem:[%s11567_s0 + $0x10] sm:$0xff]  ;;  %v4054_v57 = vsel %vm451_vm0, %v7538_v52, 0 }
  0x7c   :  { %4063 = vmatpush.bf16.msra.mxu1 %v4054_v57  ;;  %v1154_v3 = vrot.slane %v8563_v53, 1  ;;  %v1434_v31 = vshrl.u32 %v8563_v53, 16 }
  0x83   :  { %v623_v63 = vpop.f32.mrf.mxu1 }
  0x86   :  { %7168 = vmatmul.msk.bf16.gmra.mxu1 %vm387_vm2, %v8477_v41 }
  0x87   :  { %v464_v4 = vpop.f32.mrf.mxu0  ;;  %7179 = vmatmul.msk.bf16.gmra.mxu3 %vm387_vm2, %v8126_v43 }
  0x88   :  { %v8508_v6 = vadd.f32 %v623_v63, %v464_v4  ;;  %v8234_v4 = vor.u32 %v8233_v59, %v8232_v58  ;;  %v738_v59 = vrot.slane %v8375_v30, 1  ;;  %v1446_v30 = vshll.u32 %v8600_v34, 16 }
  0x8a   :  { %7147 = vmatmul.msk.bf16.gmra.mxu0 %vm387_vm2, %v290_v5  ;;  %v678_v10 = vpop.f32.mrf.mxu3 }
  0x8b   :  { %7158 = vmatmul.msk.bf16.gmra.mxu2 %vm387_vm2, %v378_v8  ;;  %v625_v12 = vpop.f32.mrf.mxu1  ;;  %v301_v8 = vor.u32 %v299_v62, %v297_v32  ;;  %v1437_v32 = vshll.u32 %v8563_v53, 16 }
  0x8d   :  { %v306_v21 = vsel %vm214_vm1, %v301_v8, %v8364_v24 }
  0x8e   :  { %v519_v16 = vpop.f32.mrf.mxu2 }
  0x8f   :  { %v466_v14 = vpop.f32.mrf.mxu0  ;;  %v8525_v20 = vadd.f32 %v678_v10, %v519_v16  ;;  %v1844_v16 = vld [vmem:[%s11567_s0 + $0x8] sm:$0xc] }
  0x90   :  { %v8523_v19 = vadd.f32 %v625_v12, %v466_v14  ;;  %v735_v12 = vrot.slane %v8234_v4, 1  ;;  %v736_v14 = vrot.slane %v8339_v7, 1  ;;  %v1848_v25 = vunpack.c.l.b16 %v1844_v16 }
  0x92   :  { %v680_v29 = vpop.f32.mrf.mxu3  ;;  %v737_v7 = vsel %vm734_vm3, %v735_v12, %v736_v14  ;;  %v1849_v24 = vpack.c.b16 %v1089_v47, %v1848_v25  ;;  %v739_v4 = vsel %vm734_vm3, %v736_v14, %v738_v59 }
  0x93   :  { %v628_v33 = vpop.f32.mrf.mxu1 }
  0x94   :  { %v1851_v48 = vrot.slane %v1849_v24, 2 }
  0x96   :  { %v521_v39 = vpop.f32.mrf.mxu2  ;;  %7169 = vmatmul.msk.bf16.gmra.mxu1 %vm387_vm2, %v8494_v55 }
  0x97   :  { %v469_v38 = vpop.f32.mrf.mxu0  ;;  %v8547_v44 = vadd.f32 %v680_v29, %v521_v39  ;;  %7180 = vmatmul.msk.bf16.gmra.mxu3 %vm387_vm2, %v8127_v56  ;;  %v1131_v56 = vpack.c.b16 %v1089_v47, %v1088_v46  ;;  %v1436_v39 = vrot.slane %v1434_v31, 1  ;;  %v1156_v47 = vrot.slane %v8600_v34, 1 }
  0x98   :  { %v8545_v43 = vadd.f32 %v628_v33, %v469_v38 }
  0x99   :  { %v1153_v1 = vrot.slane %v1131_v56, 1  ;;  %v1426_v27 = vshrl.u32 %v1131_v56, 16  ;;  %v1429_v29 = vshll.u32 %v1131_v56, 16  ;;  %v1157_v58 = vsel %vm734_vm3, %v1154_v3, %v1156_v47 }
  0x9a   :  { %7148 = vmatmul.msk.bf16.gmra.mxu0 %vm387_vm2, %v298_v40  ;;  %v683_v49 = vpop.f32.mrf.mxu3  ;;  %v1439_v40 = vrot.slane %v1437_v32, 2  ;;  %v740_v32 = vrot.slane %v8392_v42, 1 }
  0x9b   :  { %7159 = vmatmul.msk.bf16.gmra.mxu2 %vm387_vm2, %v386_v45  ;;  %v630_v51 = vpop.f32.mrf.mxu1  ;;  %v1155_v10 = vsel %vm734_vm3, %v1153_v1, %v1154_v3  ;;  %v1428_v37 = vrot.slane %v1426_v27, 1  ;;  %v1431_v38 = vrot.slane %v1429_v29, 2  ;;  %v1443_v3 = vshrl.u32 %v8600_v34, 16 }
  0x9c   :  { %v1440_v52 = vor.u32 %v1439_v40, %v1436_v39 }
  0x9d   :  { %v1445_v16 = vrot.slane %v1443_v3, 1 }
  0x9e   :  { %v524_v61 = vpop.f32.mrf.mxu2 }
  0x9f   :  { %v471_v60 = vpop.f32.mrf.mxu0  ;;  %v8575_v0 = vadd.f32 %v683_v49, %v524_v61  ;;  %v1852_v49 = vrot.slane %v8563_v53, 2 }
  0xa0   :  { %v8573_v63 = vadd.f32 %v630_v51, %v471_v60  ;;  %v1432_v51 = vor.u32 %v1431_v38, %v1428_v37  ;;  %v741_v37 = vsel %vm734_vm3, %v738_v59, %v740_v32 }
  0xa1   :  { %v1853_v57 = vsel %vm1850_vm4, %v1851_v48, %v1852_v49  ;;  %v8652_v48 = vld [vmem:[%s11567_s0 + $0x28] sm:$0xff] }
  0xa2   :  { %v685_v5 = vpop.f32.mrf.mxu3  ;;  %v1441_v53 = vsel %vm1424_vm5, %v1432_v51, %v1440_v52 }
  0xa3   :  { %v633_v9 = vpop.f32.mrf.mxu1 }
  0xa6   :  { %v526_v18 = vpop.f32.mrf.mxu2  ;;  %7170 = vmatmul.msk.bf16.gmra.mxu1 %vm387_vm2, %v8516_v11 }
  0xa7   :  { %v474_v17 = vpop.f32.mrf.mxu0  ;;  %v8589_v23 = vadd.f32 %v685_v5, %v526_v18  ;;  %7284 = vmatmul.msk.bf16.vlgmr.msrb.gmra.mxu3 %vm387_vm2, %v1155_v10 }
  0xa8   :  { %v8587_v22 = vadd.f32 %v633_v9, %v474_v17  ;;  %v8626_v9 = vld [vmem:[%s11567_s0 + $0x20] sm:$0xff]  ;;  %v1448_v17 = vrot.slane %v1446_v30, 2 }
  0xa9   :  { %v1158_v25 = vrot.slane %v8626_v9, 1  ;;  %v1452_v39 = vshrl.u32 %v8626_v9, 16  ;;  %v1455_v42 = vshll.u32 %v8626_v9, 16 }
  0xaa   :  { %7149 = vmatmul.msk.bf16.gmra.mxu0 %vm387_vm2, %v306_v21  ;;  %v688_v26 = vpop.f32.mrf.mxu3  ;;  %v1854_v21 = vrot.slane %v8600_v34, 2 }
  0xab   :  { %v635_v33 = vpop.f32.mrf.mxu1  ;;  %7182 = vmatmul.msk.bf16.vlgmr.msrb.gmra.mxu2 %vm387_vm2, %v737_v7  ;;  %v1159_v31 = vsel %vm734_vm3, %v1156_v47, %v1158_v25  ;;  %v1457_v51 = vrot.slane %v1455_v42, 2 }
  0xac   :  { %v1855_v29 = vsel %vm1850_vm4, %v1852_v49, %v1854_v21 }
  0xae   :  { %v529_v36 = vpop.f32.mrf.mxu2 }
  0xaf   :  { %v476_v35 = vpop.f32.mrf.mxu0  ;;  %v8604_v46 = vadd.f32 %v688_v26, %v529_v36  ;;  %v1449_v26 = vor.u32 %v1448_v17, %v1445_v16  ;;  %v1461_v17 = vshrl.u32 %v8652_v48, 16 }
  0xb0   :  { %v8602_v45 = vadd.f32 %v635_v33, %v476_v35 }
  0xb1   :  { %v1450_v35 = vsel %vm1424_vm5, %v1440_v52, %v1449_v26 }
  0xb2   :  { %v690_v50 = vpop.f32.mrf.mxu3 }
  0xb3   :  { %v638_v56 = vpop.f32.mrf.mxu1 }
  0xb6   :  { %v531_v61 = vpop.f32.mrf.mxu2  ;;  %7328 = vmatmul.msk.bf16.vlgmr.msrb.gmra.mxu1 %vm387_vm2, %v1853_v57  ;;  %v1856_v57 = vrot.slane %v8626_v9, 2 }
  0xb7   :  { %v479_v60 = vpop.f32.mrf.mxu0  ;;  %v8615_v1 = vadd.f32 %v690_v50, %v531_v61  ;;  %7285 = vmatmul.msk.bf16.gmra.mxu3 %vm387_vm2, %v1157_v58  ;;  %v1454_v50 = vrot.slane %v1452_v39, 1  ;;  %v1160_v58 = vrot.slane %v8652_v48, 1 }
  0xb8   :  { %v8613_v62 = vadd.f32 %v638_v56, %v479_v60 }
  0xb9   :  { %v1458_v60 = vor.u32 %v1457_v51, %v1454_v50 }
  0xba   :  { %7306 = vmatmul.msk.bf16.vlgmr.msrb.gmra.mxu0 %vm387_vm2, %v1441_v53  ;;  %v693_v5 = vpop.f32.mrf.mxu3  ;;  %v1857_v53 = vsel %vm1850_vm4, %v1854_v21, %v1856_v57 }
  0xbb   :  { %v640_v8 = vpop.f32.mrf.mxu1  ;;  %7183 = vmatmul.msk.bf16.gmra.mxu2 %vm387_vm2, %v739_v4  ;;  %v1161_v4 = vsel %vm734_vm3, %v1158_v25, %v1160_v58  ;;  %v8678_v25 = vld [vmem:[%s11567_s0 + $0x30] sm:$0xff] }
  0xbe   :  { %v534_v12 = vpop.f32.mrf.mxu2 }
  0xbf   :  { %v481_v10 = vpop.f32.mrf.mxu0  ;;  %v8630_v18 = vadd.f32 %v693_v5, %v534_v12  ;;  %v742_v5 = vrot.slane %v8409_v54, 1  ;;  %v1464_v54 = vshll.u32 %v8652_v48, 16 }
  0xc0   :  { %v8628_v14 = vadd.f32 %v640_v8, %v481_v10  ;;  %v1459_v8 = vsel %vm1424_vm5, %v1449_v26, %v1458_v60 }
  0xc1   :  { %v743_v12 = vsel %vm734_vm3, %v740_v32, %v742_v5 }
  0xc2   :  { %v695_v7 = vpop.f32.mrf.mxu3 }
  0xc3   :  { %v643_v27 = vpop.f32.mrf.mxu1 }
  0xc6   :  { %v536_v24 = vpop.f32.mrf.mxu2  ;;  %7329 = vmatmul.msk.bf16.gmra.mxu1 %vm387_vm2, %v1855_v29  ;;  %v1466_v29 = vrot.slane %v1464_v54, 2 }
  0xc7   :  { %v484_v33 = vpop.f32.mrf.mxu0  ;;  %v8641_v34 = vadd.f32 %v695_v7, %v536_v24  ;;  %7286 = vmatmul.msk.bf16.gmra.mxu3 %vm387_vm2, %v1159_v31  ;;  %v1162_v24 = vrot.slane %v8678_v25, 1 }
  0xc8   :  { %v8639_v36 = vadd.f32 %v643_v27, %v484_v33  ;;  %v1463_v27 = vrot.slane %v1461_v17, 1  ;;  %v1858_v33 = vrot.slane %v8652_v48, 2 }
  0xc9   :  { %v1163_v42 = vsel %vm734_vm3, %v1160_v58, %v1162_v24  ;;  %v1470_v58 = vshrl.u32 %v8678_v25, 16 }
  0xca   :  { %7307 = vmatmul.msk.bf16.gmra.mxu0 %vm387_vm2, %v1450_v35  ;;  %v698_v38 = vpop.f32.mrf.mxu3  ;;  %v1859_v39 = vsel %vm1850_vm4, %v1856_v57, %v1858_v33 }
  0xcb   :  { %v645_v40 = vpop.f32.mrf.mxu1  ;;  %7184 = vmatmul.msk.bf16.gmra.mxu2 %vm387_vm2, %v741_v37  ;;  %v1467_v37 = vor.u32 %v1466_v29, %v1463_v27  ;;  %v746_v27 = vrot.slane %v8443_v15, 1 }
  0xcd   :  { %v1468_v50 = vsel %vm1424_vm5, %v1458_v60, %v1467_v37  ;;  %v8704_v60 = vld [vmem:[%s11567_s0 + $0x38] sm:$0xff] }
  0xce   :  { %v539_v47 = vpop.f32.mrf.mxu2  ;;  %v1482_v15 = vshll.u32 %v8704_v60, 16 }
  0xcf   :  { %v486_v49 = vpop.f32.mrf.mxu0  ;;  %v8656_v56 = vadd.f32 %v698_v38, %v539_v47 }
  0xd0   :  { %v8654_v52 = vadd.f32 %v645_v40, %v486_v49  ;;  %v744_v40 = vrot.slane %v8426_v2, 1  ;;  %v1473_v2 = vshll.u32 %v8678_v25, 16 }
  0xd2   :  { %v700_v59 = vpop.f32.mrf.mxu3 }
  0xd3   :  { %v648_v61 = vpop.f32.mrf.mxu1 }
  0xd6   :  { %v541_v30 = vpop.f32.mrf.mxu2  ;;  %7330 = vmatmul.msk.bf16.gmra.mxu1 %vm387_vm2, %v1857_v53 }
  0xd7   :  { %v489_v3 = vpop.f32.mrf.mxu0  ;;  %v8667_v9 = vadd.f32 %v700_v59, %v541_v30  ;;  %7287 = vmatmul.msk.bf16.gmra.mxu3 %vm387_vm2, %v1161_v4  ;;  %v745_v59 = vsel %vm734_vm3, %v742_v5, %v744_v40  ;;  %v1475_v30 = vrot.slane %v1473_v2, 2  ;;  %v1862_v2 = vrot.slane %v8704_v60, 2 }
  0xd8   :  { %v8665_v10 = vadd.f32 %v648_v61, %v489_v3  ;;  %v1472_v3 = vrot.slane %v1470_v58, 1 }
  0xda   :  { %7308 = vmatmul.msk.bf16.gmra.mxu0 %vm387_vm2, %v1459_v8  ;;  %v703_v16 = vpop.f32.mrf.mxu3  ;;  %v1476_v54 = vor.u32 %v1475_v30, %v1472_v3 }
  0xdb   :  { %v650_v21 = vpop.f32.mrf.mxu1  ;;  %7185 = vmatmul.msk.bf16.gmra.mxu2 %vm387_vm2, %v743_v12  ;;  %v1860_v12 = vrot.slane %v8678_v25, 2 }
  0xdd   :  { %v1863_v30 = vsel %vm1850_vm4, %v1860_v12, %v1862_v2 }
  0xde   :  { %v544_v26 = vpop.f32.mrf.mxu2 }
  0xdf   :  { %v491_v7 = vpop.f32.mrf.mxu0  ;;  %v8682_v32 = vadd.f32 %v703_v16, %v544_v26  ;;  %v1164_v16 = vrot.slane %v8704_v60, 1 }
  0xe0   :  { %v8680_v31 = vadd.f32 %v650_v21, %v491_v7  ;;  %v1861_v7 = vsel %vm1850_vm4, %v1858_v33, %v1860_v12 }
  0xe1   :  { %v1165_v26 = vsel %vm734_vm3, %v1162_v24, %v1164_v16  ;;  %v1479_v24 = vshrl.u32 %v8704_v60, 16 }
  0xe2   :  { %v705_v35 = vpop.f32.mrf.mxu3 }
  0xe3   :  { %v653_v38 = vpop.f32.mrf.mxu1 }
  0xe6   :  { %v546_v47 = vpop.f32.mrf.mxu2  ;;  %7331 = vmatmul.msk.bf16.gmra.mxu1 %vm387_vm2, %v1859_v39 }
  0xe7   :  { %v494_v49 = vpop.f32.mrf.mxu0  ;;  %v8693_v48 = vadd.f32 %v705_v35, %v546_v47  ;;  %7288 = vmatmul.msk.bf16.gmra.mxu3 %vm387_vm2, %v1163_v42  ;;  %v747_v42 = vsel %vm734_vm3, %v744_v40, %v746_v27 }
  0xe8   :  { %v8691_v51 = vadd.f32 %v653_v38, %v494_v49  ;;  %v1477_v38 = vsel %vm1424_vm5, %v1467_v37, %v1476_v54  ;;  %v8730_v37 = vld [vmem:[%s11567_s0 + $0x40] sm:$0xff] }
  0xea   :  { %7309 = vmatmul.msk.bf16.gmra.mxu0 %vm387_vm2, %v1468_v50  ;;  %v708_v57 = vpop.f32.mrf.mxu3 }
  0xeb   :  { %v655_v61 = vpop.f32.mrf.mxu1  ;;  %7186 = vmatmul.msk.bf16.gmra.mxu2 %vm387_vm2, %v745_v59  ;;  %v1481_v59 = vrot.slane %v1479_v24, 1 }
  0xee   :  { %v549_v4 = vpop.f32.mrf.mxu2 }
  0xef   :  { %v496_v53 = vpop.f32.mrf.mxu0  ;;  %v8708_v8 = vadd.f32 %v708_v57, %v549_v4  ;;  %v1484_v57 = vrot.slane %v1482_v15, 2 }
  0xf0   :  { %v8706_v5 = vadd.f32 %v655_v61, %v496_v53  ;;  %v1166_v61 = vrot.slane %v8730_v37, 1 }
  0xf1   :  { %v1485_v4 = vor.u32 %v1484_v57, %v1481_v59 }
  0xf2   :  { %v710_v17 = vpop.f32.mrf.mxu3 }
  0xf3   :  { %v658_v21 = vpop.f32.mrf.mxu1 }
  0xf6   :  { %v551_v35 = vpop.f32.mrf.mxu2  ;;  %7332 = vmatmul.msk.bf16.gmra.mxu1 %vm387_vm2, %v1861_v7 }
  0xf7   :  { %v499_v29 = vpop.f32.mrf.mxu0  ;;  %v8719_v25 = vadd.f32 %v710_v17, %v551_v35  ;;  %7289 = vmatmul.msk.bf16.gmra.mxu3 %vm387_vm2, %v1165_v26  ;;  %v1167_v17 = vsel %vm734_vm3, %v1164_v16, %v1166_v61  ;;  %v1488_v16 = vshrl.u32 %v8730_v37, 16 }
  0xf8   :  { %v8717_v39 = vadd.f32 %v658_v21, %v499_v29  ;;  %v748_v21 = vrot.slane %v8460_v28, 1  ;;  %v1486_v29 = vsel %vm1424_vm5, %v1476_v54, %v1485_v4  ;;  %v1491_v28 = vshll.u32 %v8730_v37, 16  ;;  %v8756_v54 = vld [vmem:[%s11567_s0 + $0x48] sm:$0xff] }
  0xf9   :  { %v1490_v15 = vrot.slane %v1488_v16, 1  ;;  %v1168_v59 = vrot.slane %v8756_v54, 1 }
  0xfa   :  { %7310 = vmatmul.msk.bf16.gmra.mxu0 %vm387_vm2, %v1477_v38  ;;  %v713_v33 = vpop.f32.mrf.mxu3  ;;  %v749_v38 = vsel %vm734_vm3, %v746_v27, %v748_v21 }
  0xfb   :  { %v660_v49 = vpop.f32.mrf.mxu1  ;;  %7187 = vmatmul.msk.bf16.gmra.mxu2 %vm387_vm2, %v747_v42 }
  0xfe   :  { %v554_v50 = vpop.f32.mrf.mxu2 }
  0xff   :  { %v501_v47 = vpop.f32.mrf.mxu0  ;;  %v8734_v58 = vadd.f32 %v713_v33, %v554_v50  ;;  %v1864_v50 = vrot.slane %v8730_v37, 2 }
 0x100   :  { %v8732_v40 = vadd.f32 %v660_v49, %v501_v47  ;;  %v1493_v49 = vrot.slane %v1491_v28, 2 }
 0x102   :  { %v715_v53 = vpop.f32.mrf.mxu3 }
 0x103   :  { %v663_v3 = vpop.f32.mrf.mxu1 }
 0x106   :  { %v556_v26 = vpop.f32.mrf.mxu2  ;;  %7333 = vmatmul.msk.bf16.gmra.mxu1 %vm387_vm2, %v1863_v30  ;;  %v1865_v30 = vsel %vm1850_vm4, %v1862_v2, %v1864_v50 }
 0x107   :  { %v504_v7 = vpop.f32.mrf.mxu0  ;;  %v8745_v60 = vadd.f32 %v715_v53, %v556_v26  ;;  %7290 = vmatmul.msk.bf16.gmra.mxu3 %vm387_vm2, %v1167_v17  ;;  %v1494_v53 = vor.u32 %v1493_v49, %v1490_v15  ;;  %v1169_v17 = vsel %vm734_vm3, %v1166_v61, %v1168_v59  ;;  %v1497_v61 = vshrl.u32 %v8756_v54, 16 }
 0x108   :  { %v8743_v35 = vadd.f32 %v663_v3, %v504_v7  ;;  %v750_v7 = vrot.slane %v8477_v41, 1  ;;  %v1500_v41 = vshll.u32 %v8756_v54, 16 }
 0x10a   :  { %7311 = vmatmul.msk.bf16.gmra.mxu0 %vm387_vm2, %v1486_v29  ;;  %v718_v12 = vpop.f32.mrf.mxu3  ;;  %v751_v16 = vsel %vm734_vm3, %v748_v21, %v750_v7  ;;  %v1502_v15 = vrot.slane %v1500_v41, 2 }
 0x10b   :  { %v665_v42 = vpop.f32.mrf.mxu1  ;;  %7188 = vmatmul.msk.bf16.gmra.mxu2 %vm387_vm2, %v749_v38  ;;  %v1495_v38 = vsel %vm1424_vm5, %v1485_v4, %v1494_v53  ;;  %v8782_v4 = vld [vmem:[%s11567_s0 + $0x50] sm:$0xff] }
 0x10e   :  { %v559_v24 = vpop.f32.mrf.mxu2 }
 0x10f   :  { %v506_v33 = vpop.f32.mrf.mxu0  ;;  %v8760_v47 = vadd.f32 %v718_v12, %v559_v24  ;;  %v1499_v24 = vrot.slane %v1497_v61, 1 }
 0x110   :  { %v8758_v27 = vadd.f32 %v665_v42, %v506_v33 }
 0x111   :  { %11642 = vst [vmem:[#allocation2_spill] sm:$0xff] %v8760_v47  ;;  %v754_v47 = vrot.slane %v8516_v11, 1 }
 0x112   :  { %v720_v57 = vpop.f32.mrf.mxu3 }
 0x113   :  { %v668_v3 = vpop.f32.mrf.mxu1 }
 0x116   :  { %v561_v29 = vpop.f32.mrf.mxu2  ;;  %7334 = vmatmul.msk.bf16.gmra.mxu1 %vm387_vm2, %v1865_v30 }
 0x117   :  { %v509_v26 = vpop.f32.mrf.mxu0  ;;  %v8771_v37 = vadd.f32 %v720_v57, %v561_v29  ;;  %7291 = vmatmul.msk.bf16.gmra.mxu3 %vm387_vm2, %v1169_v17  ;;  %v1866_v57 = vrot.slane %v8756_v54, 2  ;;  %v1503_v17 = vor.u32 %v1502_v15, %v1499_v24 }
 0x118   :  { %v8769_v12 = vadd.f32 %v668_v3, %v509_v26  ;;  %v1170_v3 = vrot.slane %v8782_v4, 1 }
 0x119   :  { %11643 = vst [vmem:[#allocation3_spill] sm:$0xff] %v8771_v37  ;;  %v1867_v29 = vsel %vm1850_vm4, %v1864_v50, %v1866_v57 }
 0x11a   :  { %7312 = vmatmul.msk.bf16.gmra.mxu0 %vm387_vm2, %v1495_v38  ;;  %v723_v2 = vpop.f32.mrf.mxu3  ;;  %v1171_v38 = vsel %vm734_vm3, %v1168_v59, %v1170_v3  ;;  %v1506_v59 = vshrl.u32 %v8782_v4, 16 }
 0x11b   :  { %v670_v28 = vpop.f32.mrf.mxu1  ;;  %7189 = vmatmul.msk.bf16.gmra.mxu2 %vm387_vm2, %v751_v16  ;;  %v752_v16 = vrot.slane %v8494_v55, 1  ;;  %v1509_v55 = vshll.u32 %v8782_v4, 16 }
 0x11c   :  { %v1508_v24 = vrot.slane %v1506_v59, 1 }
 0x11d   :  { %v1511_v15 = vrot.slane %v1509_v55, 2 }
 0x11e   :  { %v564_v33 = vpop.f32.mrf.mxu2 }
 0x11f   :  { %v511_v42 = vpop.f32.mrf.mxu0  ;;  %v8786_v49 = vadd.f32 %v723_v2, %v564_v33  ;;  %v1504_v2 = vsel %vm1424_vm5, %v1494_v53, %v1503_v17  ;;  %v8808_v53 = vld [vmem:[%s11567_s0 + $0x58] sm:$0xff] }
 0x120   :  { %v8784_v21 = vadd.f32 %v670_v28, %v511_v42  ;;  %v753_v28 = vsel %vm734_vm3, %v750_v7, %v752_v16  ;;  %v1515_v11 = vshrl.u32 %v8808_v53, 16 }
 0x121   :  { %11644 = vst [vmem:[#allocation4_spill] sm:$0xff] %v8786_v49 }
 0x122   :  { %v725_v30 = vpop.f32.mrf.mxu3 }
 0x123   :  { %v673_v26 = vpop.f32.mrf.mxu1 }
 0x126   :  { %v566_v61 = vpop.f32.mrf.mxu2  ;;  %7335 = vmatmul.msk.bf16.gmra.mxu1 %vm387_vm2, %v1867_v29  ;;  %v1172_v29 = vrot.slane %v8808_v53, 1 }
 0x127   :  { %v514_v37 = vpop.f32.mrf.mxu0  ;;  %v8797_v54 = vadd.f32 %v725_v30, %v566_v61  ;;  %7292 = vmatmul.msk.bf16.gmra.mxu3 %vm387_vm2, %v1171_v38 }
 0x128   :  { %v8795_v41 = vadd.f32 %v673_v26, %v514_v37  ;;  %v1868_v26 = vrot.slane %v8782_v4, 2  ;;  %v1173_v49 = vsel %vm734_vm3, %v1170_v3, %v1172_v29 }
 0x129   :  { %11645 = vst [vmem:[#allocation5_spill] sm:$0xff] %v8797_v54 }
 0x12a   :  { %7313 = vmatmul.msk.bf16.gmra.mxu0 %vm387_vm2, %v1504_v2  ;;  %v1271_v50 = vpop.f32.mrf.mxu3  ;;  %v1512_v2 = vor.u32 %v1511_v15, %v1508_v24  ;;  %v1869_v54 = vsel %vm1850_vm4, %v1866_v57, %v1868_v26 }
 0x12b   :  { %v675_v42 = vpop.f32.mrf.mxu1  ;;  %7190 = vmatmul.msk.bf16.gmra.mxu2 %vm387_vm2, %v753_v28 }
 0x12e   :  { %v853_v33 = vpop.f32.mrf.mxu2 }
 0x12f   :  { %v516_v37 = vpop.f32.mrf.mxu0  ;;  %v958_v30 = vadd.f32 %v853_v33, %v8508_v6  ;;  %v1513_v6 = vsel %vm1424_vm5, %v1503_v17, %v1512_v2  ;;  %v1518_v33 = vshll.u32 %v8808_v53, 16 }
 0x130   :  { %v8810_v7 = vadd.f32 %v675_v42, %v516_v37 }
 0x131   :  { %v1376_v38 = vadd.f32 %v1271_v50, %v958_v30  ;;  %v755_v50 = vsel %vm734_vm3, %v752_v16, %v754_v47  ;;  %v1520_v24 = vrot.slane %v1518_v33, 2 }
 0x132   :  { %v1273_v61 = vpop.f32.mrf.mxu3 }
 0x133   :  { %v1969_v28 = vpop.f32.mrf.mxu1 }
 0x136   :  { %v855_v59 = vpop.f32.mrf.mxu2  ;;  %7336 = vmatmul.msk.bf16.gmra.mxu1 %vm387_vm2, %v1869_v54  ;;  %v1517_v54 = vrot.slane %v1515_v11, 1  ;;  %v8241_v11 = vld [vmem:[%s11567_s0 + $0x58] sm:$0xff] }
 0x137   :  { %v1697_v55 = vpop.f32.mrf.mxu0  ;;  %v959_v4 = vadd.f32 %v855_v59, %v8523_v19  ;;  %7293 = vmatmul.msk.bf16.gmra.mxu3 %vm387_vm2, %v1173_v49  ;;  %v8832_v19 = vld [vmem:[%s11567_s0 + $0x60] sm:$0xff] }
 0x138   :  { %v1802_v42 = vadd.f32 %v1697_v55, %v1376_v38  ;;  %v1870_v38 = vrot.slane %v8808_v53, 2 }
 0x139   :  { %v1377_v57 = vadd.f32 %v1273_v61, %v959_v4  ;;  %v1174_v61 = vrot.slane %v8832_v19, 1 }
 0x13a   :  { %7314 = vmatmul.msk.bf16.gmra.mxu0 %vm387_vm2, %v1513_v6  ;;  %v8824_v37 = vadd.f32 %v1969_v28, %v1802_v42  ;;  %v1276_v3 = vpop.f32.mrf.mxu3  ;;  %v1521_v6 = vor.u32 %v1520_v24, %v1517_v54  ;;  %v1871_v42 = vsel %vm1850_vm4, %v1868_v26, %v1870_v38  ;;  %v1524_v54 = vshrl.u32 %v8832_v19, 16 }
 0x13b   :  { %7191 = vmatmul.msk.bf16.gmra.mxu2 %vm387_vm2, %v755_v50  ;;  %v1971_v17 = vpop.f32.mrf.mxu1  ;;  %v1175_v50 = vsel %vm734_vm3, %v1172_v29, %v1174_v61  ;;  %v1527_v24 = vshll.u32 %v8832_v19, 16 }
 0x13c   :  { %v1522_v53 = vsel %vm1424_vm5, %v1512_v2, %v1521_v6 }
 0x13e   :  { %v858_v49 = vpop.f32.mrf.mxu2 }
 0x13f   :  { %v1699_v16 = vpop.f32.mrf.mxu0  ;;  %v960_v15 = vadd.f32 %v858_v49, %v8545_v43  ;;  %v756_v43 = vrot.slane %v8241_v11, 1 }
 0x140   :  { %v1803_v30 = vadd.f32 %v1699_v16, %v1377_v57 }
 0x141   :  { %v1378_v28 = vadd.f32 %v1276_v3, %v960_v15  ;;  %v757_v26 = vsel %vm734_vm3, %v754_v47, %v756_v43 }
 0x142   :  { %v8837_v59 = vadd.f32 %v1971_v17, %v1803_v30  ;;  %v1278_v55 = vpop.f32.mrf.mxu3  ;;  %v1526_v30 = vrot.slane %v1524_v54, 1  ;;  %v8242_v54 = vld [vmem:[%s11567_s0 + $0x60] sm:$0xff] }
 0x143   :  { %v1974_v4 = vpop.f32.mrf.mxu1 }
 0x146   :  { %v860_v57 = vpop.f32.mrf.mxu2  ;;  %7337 = vmatmul.msk.bf16.gmra.mxu1 %vm387_vm2, %v1871_v42  ;;  %v1872_v42 = vrot.slane %v8832_v19, 2 }
 0x147   :  { %v1702_v33 = vpop.f32.mrf.mxu0  ;;  %v961_v3 = vadd.f32 %v860_v57, %v8573_v63  ;;  %7294 = vmatmul.msk.bf16.gmra.mxu3 %vm387_vm2, %v1175_v50  ;;  %v8858_v63 = vld [vmem:[%s11567_s0 + $0x68] sm:$0xff] }
 0x148   :  { %v1804_v17 = vadd.f32 %v1702_v33, %v1378_v28  ;;  %v1529_v28 = vrot.slane %v1527_v24, 2  ;;  %v1176_v50 = vrot.slane %v8858_v63, 1 }
 0x149   :  { %v1379_v29 = vadd.f32 %v1278_v55, %v961_v3 }
 0x14a   :  { %7315 = vmatmul.msk.bf16.gmra.mxu0 %vm387_vm2, %v1522_v53  ;;  %v8850_v49 = vadd.f32 %v1974_v4, %v1804_v17  ;;  %v1281_v16 = vpop.f32.mrf.mxu3  ;;  %v1530_v53 = vor.u32 %v1529_v28, %v1526_v30  ;;  %v1873_v17 = vsel %vm1850_vm4, %v1870_v38, %v1872_v42  ;;  %v1533_v30 = vshrl.u32 %v8858_v63, 16 }
 0x14b   :  { %7192 = vmatmul.msk.bf16.gmra.mxu2 %vm387_vm2, %v757_v26  ;;  %v1976_v2 = vpop.f32.mrf.mxu1  ;;  %v1177_v26 = vsel %vm734_vm3, %v1174_v61, %v1176_v50  ;;  %v1536_v28 = vshll.u32 %v8858_v63, 16 }
 0x14c   :  { %v1531_v19 = vsel %vm1424_vm5, %v1521_v6, %v1530_v53 }
 0x14e   :  { %v863_v15 = vpop.f32.mrf.mxu2 }
 0x14f   :  { %v1704_v47 = vpop.f32.mrf.mxu0  ;;  %v962_v55 = vadd.f32 %v863_v15, %v8587_v22  ;;  %v758_v22 = vrot.slane %v8242_v54, 1 }
 0x150   :  { %v1805_v4 = vadd.f32 %v1704_v47, %v1379_v29 }
 0x151   :  { %v1380_v11 = vadd.f32 %v1281_v16, %v962_v55  ;;  %v759_v38 = vsel %vm734_vm3, %v756_v43, %v758_v22 }
 0x152   :  { %v8863_v57 = vadd.f32 %v1976_v2, %v1805_v4  ;;  %v1283_v33 = vpop.f32.mrf.mxu3  ;;  %v1535_v4 = vrot.slane %v1533_v30, 1  ;;  %v8243_v30 = vld [vmem:[%s11567_s0 + $0x68] sm:$0xff] }
 0x153   :  { %v1979_v3 = vpop.f32.mrf.mxu1 }
 0x156   :  { %v865_v29 = vpop.f32.mrf.mxu2  ;;  %7338 = vmatmul.msk.bf16.gmra.mxu1 %vm387_vm2, %v1873_v17  ;;  %v1874_v17 = vrot.slane %v8858_v63, 2 }
 0x157   :  { %v1707_v24 = vpop.f32.mrf.mxu0  ;;  %v963_v16 = vadd.f32 %v865_v29, %v8602_v45  ;;  %7295 = vmatmul.msk.bf16.gmra.mxu3 %vm387_vm2, %v1177_v26  ;;  %v8884_v45 = vld [vmem:[%s11567_s0 + $0x70] sm:$0xff] }
 0x158   :  { %v1806_v2 = vadd.f32 %v1707_v24, %v1380_v11  ;;  %v1538_v11 = vrot.slane %v1536_v28, 2  ;;  %v1178_v26 = vrot.slane %v8884_v45, 1 }
 0x159   :  { %v1381_v61 = vadd.f32 %v1283_v33, %v963_v16 }
 0x15a   :  { %7316 = vmatmul.msk.bf16.gmra.mxu0 %vm387_vm2, %v1531_v19  ;;  %v8876_v15 = vadd.f32 %v1979_v3, %v1806_v2  ;;  %v1286_v47 = vpop.f32.mrf.mxu3  ;;  %v1539_v19 = vor.u32 %v1538_v11, %v1535_v4  ;;  %v1875_v2 = vsel %vm1850_vm4, %v1872_v42, %v1874_v17  ;;  %v1542_v4 = vshrl.u32 %v8884_v45, 16 }
 0x15b   :  { %7193 = vmatmul.msk.bf16.gmra.mxu2 %vm387_vm2, %v759_v38  ;;  %v1981_v6 = vpop.f32.mrf.mxu1  ;;  %v1179_v38 = vsel %vm734_vm3, %v1176_v50, %v1178_v26  ;;  %v1545_v11 = vshll.u32 %v8884_v45, 16 }
 0x15c   :  { %v1540_v63 = vsel %vm1424_vm5, %v1530_v53, %v1539_v19 }
 0x15e   :  { %v868_v55 = vpop.f32.mrf.mxu2 }
 0x15f   :  { %v1709_v43 = vpop.f32.mrf.mxu0  ;;  %v964_v33 = vadd.f32 %v868_v55, %v8613_v62  ;;  %v760_v62 = vrot.slane %v8243_v30, 1 }
 0x160   :  { %v1807_v3 = vadd.f32 %v1709_v43, %v1381_v61 }
 0x161   :  { %v1382_v54 = vadd.f32 %v1286_v47, %v964_v33  ;;  %v761_v42 = vsel %vm734_vm3, %v758_v22, %v760_v62 }
 0x162   :  { %v8889_v29 = vadd.f32 %v1981_v6, %v1807_v3  ;;  %v1288_v24 = vpop.f32.mrf.mxu3  ;;  %v1544_v3 = vrot.slane %v1542_v4, 1  ;;  %v8244_v4 = vld [vmem:[%s11567_s0 + $0x70] sm:$0xff] }
 0x163   :  { %v1984_v16 = vpop.f32.mrf.mxu1 }
 0x166   :  { %v870_v61 = vpop.f32.mrf.mxu2  ;;  %7339 = vmatmul.msk.bf16.gmra.mxu1 %vm387_vm2, %v1875_v2  ;;  %v1876_v2 = vrot.slane %v8884_v45, 2 }
 0x167   :  { %v1712_v28 = vpop.f32.mrf.mxu0  ;;  %v965_v47 = vadd.f32 %v870_v61, %v8628_v14  ;;  %7296 = vmatmul.msk.bf16.gmra.mxu3 %vm387_vm2, %v1179_v38  ;;  %v8910_v14 = vld [vmem:[%s11567_s0 + $0x78] sm:$0xff] }
 0x168   :  { %v1808_v6 = vadd.f32 %v1712_v28, %v1382_v54  ;;  %v1547_v54 = vrot.slane %v1545_v11, 2  ;;  %v1180_v38 = vrot.slane %v8910_v14, 1 }
 0x169   :  { %v1383_v50 = vadd.f32 %v1288_v24, %v965_v47 }
 0x16a   :  { %7317 = vmatmul.msk.bf16.gmra.mxu0 %vm387_vm2, %v1540_v63  ;;  %v8902_v55 = vadd.f32 %v1984_v16, %v1808_v6  ;;  %v1291_v43 = vpop.f32.mrf.mxu3  ;;  %v1548_v63 = vor.u32 %v1547_v54, %v1544_v3  ;;  %v1877_v6 = vsel %vm1850_vm4, %v1874_v17, %v1876_v2  ;;  %v1551_v3 = vshrl.u32 %v8910_v14, 16 }
 0x16b   :  { %7194 = vmatmul.msk.bf16.gmra.mxu2 %vm387_vm2, %v761_v42  ;;  %v1986_v53 = vpop.f32.mrf.mxu1  ;;  %v1181_v42 = vsel %vm734_vm3, %v1178_v26, %v1180_v38  ;;  %v1554_v54 = vshll.u32 %v8910_v14, 16 }
 0x16c   :  { %v1549_v45 = vsel %vm1424_vm5, %v1539_v19, %v1548_v63 }
 0x16e   :  { %v873_v33 = vpop.f32.mrf.mxu2 }
 0x16f   :  { %v1714_v22 = vpop.f32.mrf.mxu0  ;;  %v966_v24 = vadd.f32 %v873_v33, %v8639_v36  ;;  %v762_v36 = vrot.slane %v8244_v4, 1 }
 0x170   :  { %v1809_v16 = vadd.f32 %v1714_v22, %v1383_v50 }
 0x171   :  { %v1384_v30 = vadd.f32 %v1291_v43, %v966_v24  ;;  %v763_v17 = vsel %vm734_vm3, %v760_v62, %v762_v36 }
 0x172   :  { %v8915_v61 = vadd.f32 %v1986_v53, %v1809_v16  ;;  %v1293_v28 = vpop.f32.mrf.mxu3  ;;  %v1553_v16 = vrot.slane %v1551_v3, 1  ;;  %v8245_v3 = vld [vmem:[%s11567_s0 + $0x78] sm:$0xff] }
 0x173   :  { %v1989_v47 = vpop.f32.mrf.mxu1 }
 0x176   :  { %v875_v50 = vpop.f32.mrf.mxu2  ;;  %7340 = vmatmul.msk.bf16.gmra.mxu1 %vm387_vm2, %v1877_v6  ;;  %v1878_v6 = vrot.slane %v8910_v14, 2 }
 0x177   :  { %v1717_v11 = vpop.f32.mrf.mxu0  ;;  %v967_v43 = vadd.f32 %v875_v50, %v8654_v52  ;;  %7297 = vmatmul.msk.bf16.gmra.mxu3 %vm387_vm2, %v1181_v42  ;;  %v8936_v52 = vld [vmem:[%s11567_s0 + $0x80] sm:$0xff] }
 0x178   :  { %v1810_v53 = vadd.f32 %v1717_v11, %v1384_v30  ;;  %v1556_v30 = vrot.slane %v1554_v54, 2  ;;  %v1182_v42 = vrot.slane %v8936_v52, 1 }
 0x179   :  { %v1385_v26 = vadd.f32 %v1293_v28, %v967_v43 }
 0x17a   :  { %7318 = vmatmul.msk.bf16.gmra.mxu0 %vm387_vm2, %v1549_v45  ;;  %v8928_v33 = vadd.f32 %v1989_v47, %v1810_v53  ;;  %v1296_v22 = vpop.f32.mrf.mxu3  ;;  %v1557_v45 = vor.u32 %v1556_v30, %v1553_v16  ;;  %v1879_v53 = vsel %vm1850_vm4, %v1876_v2, %v1878_v6  ;;  %v1560_v16 = vshrl.u32 %v8936_v52, 16 }
 0x17b   :  { %7195 = vmatmul.msk.bf16.gmra.mxu2 %vm387_vm2, %v763_v17  ;;  %v1991_v19 = vpop.f32.mrf.mxu1  ;;  %v1183_v17 = vsel %vm734_vm3, %v1180_v38, %v1182_v42  ;;  %v1563_v30 = vshll.u32 %v8936_v52, 16 }
 0x17c   :  { %v1558_v14 = vsel %vm1424_vm5, %v1548_v63, %v1557_v45 }
 0x17e   :  { %v878_v24 = vpop.f32.mrf.mxu2 }
 0x17f   :  { %v1719_v62 = vpop.f32.mrf.mxu0  ;;  %v968_v28 = vadd.f32 %v878_v24, %v8665_v10  ;;  %v764_v10 = vrot.slane %v8245_v3, 1 }
 0x180   :  { %v1811_v47 = vadd.f32 %v1719_v62, %v1385_v26 }
 0x181   :  { %v1386_v4 = vadd.f32 %v1296_v22, %v968_v28  ;;  %v765_v2 = vsel %vm734_vm3, %v762_v36, %v764_v10 }
 0x182   :  { %v8941_v50 = vadd.f32 %v1991_v19, %v1811_v47  ;;  %v1298_v11 = vpop.f32.mrf.mxu3  ;;  %v1562_v47 = vrot.slane %v1560_v16, 1  ;;  %v8246_v16 = vld [vmem:[%s11567_s0 + $0x80] sm:$0xff] }
 0x183   :  { %v1994_v43 = vpop.f32.mrf.mxu1 }
 0x186   :  { %v880_v26 = vpop.f32.mrf.mxu2  ;;  %7341 = vmatmul.msk.bf16.gmra.mxu1 %vm387_vm2, %v1879_v53  ;;  %v1880_v53 = vrot.slane %v8936_v52, 2 }
 0x187   :  { %v1722_v54 = vpop.f32.mrf.mxu0  ;;  %v969_v22 = vadd.f32 %v880_v26, %v8680_v31  ;;  %7298 = vmatmul.msk.bf16.gmra.mxu3 %vm387_vm2, %v1183_v17  ;;  %v8962_v31 = vld [vmem:[%s11567_s0 + $0x88] sm:$0xff] }
 0x188   :  { %v1812_v19 = vadd.f32 %v1722_v54, %v1386_v4  ;;  %v1565_v4 = vrot.slane %v1563_v30, 2  ;;  %v1184_v17 = vrot.slane %v8962_v31, 1 }
 0x189   :  { %v1387_v38 = vadd.f32 %v1298_v11, %v969_v22 }
 0x18a   :  { %7319 = vmatmul.msk.bf16.gmra.mxu0 %vm387_vm2, %v1558_v14  ;;  %v8954_v24 = vadd.f32 %v1994_v43, %v1812_v19  ;;  %v1301_v62 = vpop.f32.mrf.mxu3  ;;  %v1566_v14 = vor.u32 %v1565_v4, %v1562_v47  ;;  %v1881_v19 = vsel %vm1850_vm4, %v1878_v6, %v1880_v53  ;;  %v1569_v47 = vshrl.u32 %v8962_v31, 16 }
 0x18b   :  { %7196 = vmatmul.msk.bf16.gmra.mxu2 %vm387_vm2, %v765_v2  ;;  %v1996_v63 = vpop.f32.mrf.mxu1  ;;  %v1185_v2 = vsel %vm734_vm3, %v1182_v42, %v1184_v17  ;;  %v1572_v4 = vshll.u32 %v8962_v31, 16 }
 0x18c   :  { %v1567_v52 = vsel %vm1424_vm5, %v1557_v45, %v1566_v14 }
 0x18e   :  { %v883_v28 = vpop.f32.mrf.mxu2 }
 0x18f   :  { %v1724_v36 = vpop.f32.mrf.mxu0  ;;  %v970_v11 = vadd.f32 %v883_v28, %v8691_v51  ;;  %v766_v51 = vrot.slane %v8246_v16, 1 }
 0x190   :  { %v1813_v43 = vadd.f32 %v1724_v36, %v1387_v38 }
 0x191   :  { %v1388_v3 = vadd.f32 %v1301_v62, %v970_v11  ;;  %v767_v6 = vsel %vm734_vm3, %v764_v10, %v766_v51 }
 0x192   :  { %v8967_v26 = vadd.f32 %v1996_v63, %v1813_v43  ;;  %v1303_v54 = vpop.f32.mrf.mxu3  ;;  %v1571_v43 = vrot.slane %v1569_v47, 1  ;;  %v8247_v47 = vld [vmem:[%s11567_s0 + $0x88] sm:$0xff] }
 0x193   :  { %v1999_v22 = vpop.f32.mrf.mxu1 }
 0x196   :  { %v885_v38 = vpop.f32.mrf.mxu2  ;;  %7342 = vmatmul.msk.bf16.gmra.mxu1 %vm387_vm2, %v1881_v19  ;;  %v1882_v19 = vrot.slane %v8962_v31, 2 }
 0x197   :  { %v1727_v30 = vpop.f32.mrf.mxu0  ;;  %v971_v62 = vadd.f32 %v885_v38, %v8706_v5  ;;  %7299 = vmatmul.msk.bf16.gmra.mxu3 %vm387_vm2, %v1185_v2  ;;  %v8988_v5 = vld [vmem:[%s11567_s0 + $0x90] sm:$0xff] }
 0x198   :  { %v1814_v63 = vadd.f32 %v1727_v30, %v1388_v3  ;;  %v1574_v3 = vrot.slane %v1572_v4, 2  ;;  %v1186_v2 = vrot.slane %v8988_v5, 1 }
 0x199   :  { %v1389_v42 = vadd.f32 %v1303_v54, %v971_v62 }
 0x19a   :  { %7320 = vmatmul.msk.bf16.gmra.mxu0 %vm387_vm2, %v1567_v52  ;;  %v8980_v28 = vadd.f32 %v1999_v22, %v1814_v63  ;;  %v1306_v36 = vpop.f32.mrf.mxu3  ;;  %v1575_v52 = vor.u32 %v1574_v3, %v1571_v43  ;;  %v1883_v63 = vsel %vm1850_vm4, %v1880_v53, %v1882_v19  ;;  %v1578_v43 = vshrl.u32 %v8988_v5, 16 }
 0x19b   :  { %7197 = vmatmul.msk.bf16.gmra.mxu2 %vm387_vm2, %v767_v6  ;;  %v2001_v45 = vpop.f32.mrf.mxu1  ;;  %v1187_v6 = vsel %vm734_vm3, %v1184_v17, %v1186_v2  ;;  %v1581_v3 = vshll.u32 %v8988_v5, 16 }
 0x19c   :  { %v1576_v31 = vsel %vm1424_vm5, %v1566_v14, %v1575_v52 }
 0x19e   :  { %v888_v11 = vpop.f32.mrf.mxu2 }
 0x19f   :  { %v1729_v10 = vpop.f32.mrf.mxu0  ;;  %v972_v54 = vadd.f32 %v888_v11, %v8717_v39  ;;  %v768_v39 = vrot.slane %v8247_v47, 1 }
 0x1a0   :  { %v1815_v22 = vadd.f32 %v1729_v10, %v1389_v42 }
 0x1a1   :  { %v1390_v16 = vadd.f32 %v1306_v36, %v972_v54  ;;  %v769_v53 = vsel %vm734_vm3, %v766_v51, %v768_v39 }
 0x1a2   :  { %v8993_v38 = vadd.f32 %v2001_v45, %v1815_v22  ;;  %v1308_v30 = vpop.f32.mrf.mxu3  ;;  %v1580_v22 = vrot.slane %v1578_v43, 1  ;;  %v8248_v43 = vld [vmem:[%s11567_s0 + $0x90] sm:$0xff] }
 0x1a3   :  { %v2004_v62 = vpop.f32.mrf.mxu1 }
 0x1a6   :  { %v890_v42 = vpop.f32.mrf.mxu2  ;;  %7343 = vmatmul.msk.bf16.gmra.mxu1 %vm387_vm2, %v1883_v63  ;;  %v1884_v63 = vrot.slane %v8988_v5, 2 }
 0x1a7   :  { %v1732_v4 = vpop.f32.mrf.mxu0  ;;  %v973_v36 = vadd.f32 %v890_v42, %v8732_v40  ;;  %7300 = vmatmul.msk.bf16.gmra.mxu3 %vm387_vm2, %v1187_v6  ;;  %v9014_v40 = vld [vmem:[%s11567_s0 + $0x98] sm:$0xff] }
 0x1a8   :  { %v1816_v45 = vadd.f32 %v1732_v4, %v1390_v16  ;;  %v1583_v16 = vrot.slane %v1581_v3, 2  ;;  %v1188_v6 = vrot.slane %v9014_v40, 1 }
 0x1a9   :  { %v1391_v17 = vadd.f32 %v1308_v30, %v973_v36 }
 0x1aa   :  { %7321 = vmatmul.msk.bf16.gmra.mxu0 %vm387_vm2, %v1576_v31  ;;  %v9006_v11 = vadd.f32 %v2004_v62, %v1816_v45  ;;  %v1311_v10 = vpop.f32.mrf.mxu3  ;;  %v1584_v31 = vor.u32 %v1583_v16, %v1580_v22  ;;  %v1885_v45 = vsel %vm1850_vm4, %v1882_v19, %v1884_v63  ;;  %v1587_v22 = vshrl.u32 %v9014_v40, 16 }
 0x1ab   :  { %7198 = vmatmul.msk.bf16.gmra.mxu2 %vm387_vm2, %v769_v53  ;;  %v2006_v14 = vpop.f32.mrf.mxu1  ;;  %v1189_v53 = vsel %vm734_vm3, %v1186_v2, %v1188_v6  ;;  %v1590_v16 = vshll.u32 %v9014_v40, 16 }
 0x1ac   :  { %v1585_v5 = vsel %vm1424_vm5, %v1575_v52, %v1584_v31 }
 0x1ae   :  { %v893_v54 = vpop.f32.mrf.mxu2 }
 0x1af   :  { %v1734_v51 = vpop.f32.mrf.mxu0  ;;  %v974_v30 = vadd.f32 %v893_v54, %v8743_v35  ;;  %v770_v35 = vrot.slane %v8248_v43, 1 }
 0x1b0   :  { %v1817_v62 = vadd.f32 %v1734_v51, %v1391_v17 }
 0x1b1   :  { %v1392_v47 = vadd.f32 %v1311_v10, %v974_v30  ;;  %v771_v19 = vsel %vm734_vm3, %v768_v39, %v770_v35 }
 0x1b2   :  { %v9019_v42 = vadd.f32 %v2006_v14, %v1817_v62  ;;  %v1313_v4 = vpop.f32.mrf.mxu3  ;;  %v1589_v62 = vrot.slane %v1587_v22, 1  ;;  %v8249_v22 = vld [vmem:[%s11567_s0 + $0x98] sm:$0xff] }
 0x1b3   :  { %v2009_v36 = vpop.f32.mrf.mxu1 }
 0x1b6   :  { %v895_v17 = vpop.f32.mrf.mxu2  ;;  %7344 = vmatmul.msk.bf16.gmra.mxu1 %vm387_vm2, %v1885_v45  ;;  %v1886_v45 = vrot.slane %v9014_v40, 2 }
 0x1b7   :  { %v1737_v3 = vpop.f32.mrf.mxu0  ;;  %v975_v10 = vadd.f32 %v895_v17, %v8758_v27  ;;  %7301 = vmatmul.msk.bf16.gmra.mxu3 %vm387_vm2, %v1189_v53  ;;  %v9040_v27 = vld [vmem:[%s11567_s0 + $0xa0] sm:$0xff] }
 0x1b8   :  { %v1818_v14 = vadd.f32 %v1737_v3, %v1392_v47  ;;  %v1592_v47 = vrot.slane %v1590_v16, 2  ;;  %v1190_v53 = vrot.slane %v9040_v27, 1 }
 0x1b9   :  { %v1393_v2 = vadd.f32 %v1313_v4, %v975_v10 }
 0x1ba   :  { %7322 = vmatmul.msk.bf16.gmra.mxu0 %vm387_vm2, %v1585_v5  ;;  %v9032_v54 = vadd.f32 %v2009_v36, %v1818_v14  ;;  %v1316_v51 = vpop.f32.mrf.mxu3  ;;  %v1593_v5 = vor.u32 %v1592_v47, %v1589_v62  ;;  %v1887_v14 = vsel %vm1850_vm4, %v1884_v63, %v1886_v45  ;;  %v1596_v62 = vshrl.u32 %v9040_v27, 16 }
 0x1bb   :  { %7199 = vmatmul.msk.bf16.gmra.mxu2 %vm387_vm2, %v771_v19  ;;  %v2011_v52 = vpop.f32.mrf.mxu1  ;;  %v1191_v19 = vsel %vm734_vm3, %v1188_v6, %v1190_v53  ;;  %v1599_v47 = vshll.u32 %v9040_v27, 16 }
 0x1bc   :  { %v1594_v40 = vsel %vm1424_vm5, %v1584_v31, %v1593_v5 }
 0x1be   :  { %v898_v30 = vpop.f32.mrf.mxu2 }
 0x1bf   :  { %v1739_v39 = vpop.f32.mrf.mxu0  ;;  %v976_v4 = vadd.f32 %v898_v30, %v8769_v12  ;;  %v772_v12 = vrot.slane %v8249_v22, 1 }
 0x1c0   :  { %v1819_v36 = vadd.f32 %v1739_v39, %v1393_v2 }
 0x1c1   :  { %v1394_v43 = vadd.f32 %v1316_v51, %v976_v4  ;;  %v773_v63 = vsel %vm734_vm3, %v770_v35, %v772_v12 }
 0x1c2   :  { %v9045_v17 = vadd.f32 %v2011_v52, %v1819_v36  ;;  %v1318_v3 = vpop.f32.mrf.mxu3  ;;  %v1598_v36 = vrot.slane %v1596_v62, 1 }
 0x1c3   :  { %v2014_v10 = vpop.f32.mrf.mxu1 }
 0x1c6   :  { %v900_v2 = vpop.f32.mrf.mxu2  ;;  %7345 = vmatmul.msk.bf16.gmra.mxu1 %vm387_vm2, %v1887_v14  ;;  %v1888_v14 = vrot.slane %v9040_v27, 2 }
 0x1c7   :  { %v1742_v16 = vpop.f32.mrf.mxu0  ;;  %v977_v51 = vadd.f32 %v900_v2, %v8784_v21  ;;  %7302 = vmatmul.msk.bf16.gmra.mxu3 %vm387_vm2, %v1191_v19  ;;  %v9066_v21 = vld [vmem:[%s11567_s0 + $0xa8] sm:$0xff] }
 0x1c8   :  { %v1820_v52 = vadd.f32 %v1742_v16, %v1394_v43  ;;  %v1601_v43 = vrot.slane %v1599_v47, 2  ;;  %v1192_v19 = vrot.slane %v9066_v21, 1 }
 0x1c9   :  { %v1395_v6 = vadd.f32 %v1318_v3, %v977_v51 }
 0x1ca   :  { %7323 = vmatmul.msk.bf16.gmra.mxu0 %vm387_vm2, %v1594_v40  ;;  %v9058_v30 = vadd.f32 %v2014_v10, %v1820_v52  ;;  %v1321_v39 = vpop.f32.mrf.mxu3  ;;  %v1602_v40 = vor.u32 %v1601_v43, %v1598_v36  ;;  %v1889_v52 = vsel %vm1850_vm4, %v1886_v45, %v1888_v14  ;;  %v1193_v62 = vsel %vm734_vm3, %v1190_v53, %v1192_v19 }
 0x1cb   :  { %7200 = vmatmul.msk.bf16.gmra.mxu2 %vm387_vm2, %v773_v63  ;;  %v2016_v31 = vpop.f32.mrf.mxu1  ;;  %v1042_v63 = vld [vmem:[%s11567_s0 + $0xb0] sm:$0x1] }
 0x1cc   :  { %11646 = vst [vmem:[#allocation6_spill] sm:$0xff] %v9058_v30  ;;  %v1603_v47 = vsel %vm1424_vm5, %v1593_v5, %v1602_v40 }
 0x1ce   :  { %v903_v4 = vpop.f32.mrf.mxu2 }
 0x1cf   :  { %v1744_v35 = vpop.f32.mrf.mxu0  ;;  %v978_v3 = vadd.f32 %v903_v4, %v8795_v41  ;;  %v8250_v41 = vld [vmem:[%s11567_s0 + $0xa0] sm:$0xff] }
 0x1d0   :  { %v1821_v10 = vadd.f32 %v1744_v35, %v1395_v6  ;;  %v774_v27 = vrot.slane %v8250_v41, 1 }
 0x1d1   :  { %v1396_v22 = vadd.f32 %v1321_v39, %v978_v3 }
 0x1d2   :  { %v9071_v2 = vadd.f32 %v2016_v31, %v1821_v10  ;;  %v1323_v16 = vpop.f32.mrf.mxu3  ;;  %v1130_v31 = vunpack.c.l.b16 %v1042_v63  ;;  %v775_v35 = vsel %vm734_vm3, %v772_v12, %v774_v27  ;;  %v1605_v10 = vshrl.u32 %v9066_v21, 16  ;;  %v9098_v12 = vld [vmem:[%s11567_s0 + $0x14] sm:$0xf] }
 0x1d3   :  { %v2019_v51 = vpop.f32.mrf.mxu1 }
 0x1d4   :  { %11647 = vst [vmem:[#allocation7_spill] sm:$0xff] %v9071_v2  ;;  %v1152_v3 = vpack.c.b16 %v1130_v31, %v1130_v31  ;;  %v3707_v31 = vld [vmem:[%s11566_s1] sm:$0x3] }
 0x1d6   :  { %v905_v6 = vpop.f32.mrf.mxu2  ;;  %7346 = vmatmul.msk.bf16.gmra.mxu1 %vm387_vm2, %v1889_v52  ;;  %v1608_v52 = vshll.u32 %v9066_v21, 16  ;;  %v1194_v63 = vrot.slane %v1152_v3, 1  ;;  %v4213_v3 = vsel %vm451_vm0, %v3707_v31, 0  ;;  %v9124_v31 = vld [vmem:[%s11567_s0 + $0x18] sm:$0xff] }
 0x1d7   :  { %v1747_v39 = vpop.f32.mrf.mxu0  ;;  %v979_v45 = vadd.f32 %v905_v6, %v8810_v7  ;;  %7303 = vmatmul.msk.bf16.gmra.mxu3 %vm387_vm2, %v1193_v62  ;;  %v2116_v7 = vld [vmem:[%s11567_s0 + $0x10] sm:$0xc]  ;;  %v1607_v62 = vrot.slane %v1605_v10, 1  ;;  %4222 = vmatpush.bf16.msrb.mxu2 %v4213_v3 }
 0x1d8   :  { %v1822_v4 = vadd.f32 %v1747_v39, %v1396_v22  ;;  %v1610_v41 = vrot.slane %v1608_v52, 2 }
 0x1d9   :  { %v1397_v53 = vadd.f32 %v1323_v16, %v979_v45  ;;  %v7662_v45 = vld [vmem:[%s11566_s1 + $0x4] sm:$0x3] }
 0x1da   :  { %7324 = vmatmul.msk.bf16.gmra.mxu0 %vm387_vm2, %v1603_v47  ;;  %v9087_v36 = vadd.f32 %v2019_v51, %v1822_v4  ;;  %v1326_v43 = vpop.f32.mrf.mxu3  ;;  %v1418_v47 = vld [vmem:[%s11567_s0 + $0xb0] sm:$0x3]  ;;  %v2204_v4 = vunpack.c.l.b16 %v2116_v7 }
 0x1db   :  { %7201 = vmatmul.msk.bf16.gmra.mxu2 %vm387_vm2, %v775_v35  ;;  %v2021_v5 = vpop.f32.mrf.mxu1  ;;  %v11572_v35 = vunpack.c.l.b16 %v9098_v12 }
 0x1dc   :  { %11648 = vst [vmem:[#allocation8_spill] sm:$0xff] %v9087_v36  ;;  %v11650_v36 = vrot.slane %v9066_v21, 2 }
 0x1de   :  { %v908_v22 = vpop.f32.mrf.mxu2  ;;  %v1891_v7 = vsel %vm1850_vm4, %v1888_v14, %v11650_v36 }
 0x1df   :  { %v1749_v16 = vpop.f32.mrf.mxu0  ;;  %v980_v6 = vadd.f32 %v908_v22, %v8525_v20  ;;  %v4441_v20 = vsel %vm451_vm0, %v7662_v45, 0  ;;  %v9116_v22 = vor.u32 %v1610_v41, %v1607_v62 }
 0x1e0   :  { %v1823_v39 = vadd.f32 %v1749_v16, %v1397_v53  ;;  %4450 = vmatpush.bf16.msrb.mxu3 %v4441_v20  ;;  %v1422_v16 = vunpack.c.l.b16 %v1418_v47 }
 0x1e1   :  { %v1398_v53 = vadd.f32 %v1326_v43, %v980_v6  ;;  %v1195_v43 = vsel %vm734_vm3, %v1192_v19, %v1194_v63  ;;  %v776_v6 = vrot.slane %v8519_v13, 1  ;;  %v1612_v14 = vsel %vm1424_vm5, %v1602_v40, %v9116_v22 }
 0x1e2   :  { %v9114_v10 = vadd.f32 %v2021_v5, %v1823_v39  ;;  %v1328_v52 = vpop.f32.mrf.mxu3  ;;  %v9130_v5 = vpack.c.b16 %v11572_v35, %v2204_v4  ;;  %v1423_v36 = vpack.c.b16 %v1422_v16, %v1422_v16  ;;  %v2550_v19 = vshrl.u32 %v9124_v31, 16 }
 0x1e3   :  { %v2024_v51 = vpop.f32.mrf.mxu1  ;;  %v777_v13 = vsel %vm734_vm3, %v774_v27, %v776_v6  ;;  %v2553_v4 = vshll.u32 %v9124_v31, 16 }
 0x1e4   :  { %11649 = vst [vmem:[#allocation9_spill] sm:$0xff] %v9114_v10  ;;  %v2542_v63 = vshrl.u32 %v9130_v5, 16  ;;  %v2545_v45 = vshll.u32 %v9130_v5, 16  ;;  %v1617_v16 = vshll.u32 %v1423_v36, 16 }
 0x1e6   :  { %v910_v62 = vpop.f32.mrf.mxu2  ;;  %7347 = vmatmul.msk.bf16.gmra.mxu1 %vm387_vm2, %v1891_v7  ;;  %v2544_v6 = vrot.slane %v2542_v63, 2  ;;  %v1619_v63 = vrot.slane %v1617_v16, 2  ;;  %v8294_v16 = vmov 0  }
 0x1e7   :  { %v1752_v41 = vpop.f32.mrf.mxu0  ;;  %v981_v39 = vadd.f32 %v910_v62, %v8547_v44  ;;  %7304 = vmatmul.msk.bf16.gmra.mxu3 %vm387_vm2, %v1195_v43  ;;  %v7727_v44 = vld [vmem:[%s11566_s1 + $0x6] sm:$0x3]  ;;  %v2552_v43 = vrot.slane %v2550_v19, 2  ;;  %v2547_v62 = vrot.slane %v2545_v45, 3  ;;  %8238 = vset.pattern.permute.xlu0 %v8294_v16 }
 0x1e8   :  { %v1824_v47 = vadd.f32 %v1752_v41, %v1398_v53  ;;  %v1614_v53 = vshrl.u32 %v1423_v36, 16  ;;  %v4858_v27 = vsel %vm451_vm0, %v7727_v44, 0  ;;  %v2555_v41 = vrot.slane %v2553_v4, 3  ;;  %8239 = vset.pattern.permute.xlu1 %v8294_v16  ;;  %8240 = vset.pattern.permute.xlu2 %v8294_v16 }
 0x1e9   :  { %v1399_v3 = vadd.f32 %v1328_v52, %v981_v39  ;;  %4867 = vmatpush.bf16.msrb.mxu0 %v4858_v27  ;;  %v7830_v52 = vld [vmem:[%s11566_s1 + $0x8] sm:$0x3]  ;;  %v2548_v27 = vor.u32 %v2547_v62, %v2544_v6 }
 0x1ea   :  { %7325 = vmatmul.msk.bf16.gmra.mxu0 %vm387_vm2, %v1612_v14  ;;  %v9146_v40 = vadd.f32 %v2024_v51, %v1824_v47  ;;  %v1331_v20 = vpop.f32.mrf.mxu3  ;;  %v9156_v51 = vld [vmem:[%s11567_s0 + $0xbc] sm:$0xff]   ;;  %v5282_v39 = vsel %vm451_vm0, %v7830_v52, 0  ;;  %v1616_v44 = vrot.slane %v1614_v53, 1  ;;  %v9165_v35 = vor.u32 %v2555_v41, %v2552_v43  ;;  %v9192_v62 = vld [vmem:[%s11567_s0 + $0xc4] sm:$0xff] }
 0x1eb   :  { %7202 = vmatmul.msk.bf16.gmra.mxu2 %vm387_vm2, %v777_v13  ;;  %v2026_v7 = vpop.f32.mrf.mxu1  ;;  %v9161_v14 = vld [vmem:[%s11567_s0 + $0xbc] sm:$0xf0]  ;;  %5291 = vmatpush.bf16.msrb.mxu1 %v5282_v39  ;;  %v1892_v13 = vrot.slane %v1423_v36, 2  ;;  %v11653_v52 = vrot.slane %v9066_v21, 2  ;;  %v3821_v41 = vshll.u32 %v9156_v51, 16 }
 0x1ec   :  { %11651 = vst [vmem:[#allocation10_spill] sm:$0xff] %v9146_v40  ;;  %v18_v36 = vld [vmem:[%s11568_s2] sm:$0xff] }
 0x1ed   :  { %11652 = vst [vmem:[#allocation11_spill] sm:$0xff] %v9161_v14  ;;  %v1620_v14 = vor.u32 %v1619_v63, %v1616_v44  ;;  %v1893_v39 = vsel %vm1850_vm4, %v11653_v52, %v1892_v13  ;;  %v9182_v53 = vld [vmem:[%s11567_s0 + $0x20] sm:$0xff]  ;;  %3276 = vperm.xlu0 %8238, %v18_v36   ;;  %v19_v52 = vld [vmem:[%s11568_s2 + $0x8] sm:$0xff] }
 0x1ee   :  { %v913_v47 = vpop.f32.mrf.mxu2 }
 0x1ef   :  { %v1754_v19 = vpop.f32.mrf.mxu0  ;;  %v982_v45 = vadd.f32 %v913_v47, %v8575_v0  ;;  %v2557_v0 = vsel %vm2540_vm6, %v2548_v27, %v9165_v35  ;;  %v1621_v43 = vsel %vm1424_vm5, %v9116_v22, %v1620_v14  ;;  %v2960_v47 = vld [vmem:[%s11567_s0 + $0x10] sm:$0x8]  ;;  %v3826_v27 = vshll.u32 %v9192_v62, 16 }
 0x1f0   :  { %v1825_v4 = vadd.f32 %v1754_v19, %v1399_v3  ;;  %v2269_v3 = vrot.slane %v9130_v5, 2  ;;  %v2964_v44 = vunpack.c.l.b16 %v2960_v47 }
 0x1f1   :  { %v1400_v40 = vadd.f32 %v1331_v20, %v982_v45  ;;  %v2270_v20 = vrot.slane %v9124_v31, 2  ;;  %v3819_v45 = vshrl.u32 %v9156_v51, 16 }
 0x1f2   :  { %v9167_v10 = vadd.f32 %v2026_v7, %v1825_v4  ;;  %v1333_v2 = vpop.f32.mrf.mxu3  ;;  %v3823_v4 = vrot.slane %v3821_v41, 1 }
 0x1f3   :  { %v2029_v30 = vpop.f32.mrf.mxu1  ;;  %v2271_v22 = vsel %vm1850_vm4, %v2269_v3, %v2270_v20 }
 0x1f5   :  { %3281 = vperm.xlu0 %8238, %v19_v52  }
 0x1f6   :  { %v915_v21 = vpop.f32.mrf.mxu2  ;;  %7348 = vmatmul.msk.bf16.gmra.mxu1 %vm387_vm2, %v1893_v39 }
 0x1f7   :  { %v1757_v7 = vpop.f32.mrf.mxu0  ;;  %v983_v5 = vadd.f32 %v915_v21, %v8589_v23  ;;  %7452 = vmatmul.msk.bf16.vlgmr.msra.gmra.mxu3 %vm387_vm2, %v2557_v0  ;;  %v2559_v23 = vshrl.u32 %v9182_v53, 16  ;;  %v11654_v0 = vunpack.c.l.b16 %v9098_v12  ;;  %v20_v12 = vld [vmem:[%s11568_s2 + $0x10] sm:$0xff] }
 0x1f8   :  { %v1826_v6 = vadd.f32 %v1757_v7, %v1400_v40  ;;  %v2562_v40 = vshll.u32 %v9182_v53, 16  ;;  %v3824_v7 = vor.u32 %v3823_v4, %v3819_v45  ;;  %3286 = vperm.xlu1 %8239, %v20_v12  }
 0x1f9   :  { %v1401_v14 = vadd.f32 %v1333_v2, %v983_v5  ;;  %v2561_v39 = vrot.slane %v2559_v23, 2  ;;  %v2965_v3 = vpack.c.b16 %v11654_v0, %v2964_v44  ;;  %v2968_v23 = vrot.slane %v9124_v31, 3  ;;  %v21_v31 = vld [vmem:[%s11568_s2 + $0x18] sm:$0xff] }
 0x1fa   :  { %7326 = vmatmul.msk.bf16.gmra.mxu0 %vm387_vm2, %v1621_v43  ;;  %v9204_v19 = vadd.f32 %v2029_v30, %v1826_v6  ;;  %v1336_v13 = vpop.f32.mrf.mxu3  ;;  %v2564_v36 = vrot.slane %v2562_v40, 3  ;;  %v3828_v43 = vrot.slane %v3826_v27, 1 }
 0x1fb   :  { %v2031_v63 = vpop.f32.mrf.mxu1  ;;  %7430 = vmatmul.msk.bf16.vlgmr.msra.gmra.mxu2 %vm387_vm2, %v2271_v22  ;;  %v2967_v22 = vrot.slane %v2965_v3, 3 }
 0x1fc   :  { %v2565_v5 = vor.u32 %v2564_v36, %v2561_v39  ;;  %v3829_v52 = vsel %vm214_vm1, %v3824_v7, %v3828_v43 }
 0x1fd   :  { %v2969_v45 = vsel %vm2966_vm7, %v2967_v22, %v2968_v23 }
 0x1fe   :  { %v918_v2 = vpop.f32.mrf.mxu2 }
 0x1ff   :  { %v1759_v30 = vpop.f32.mrf.mxu0  ;;  %v984_v16 = vadd.f32 %v918_v2, %v8604_v46  ;;  %v2566_v46 = vsel %vm2540_vm6, %v9165_v35, %v2565_v5  ;;  %v8169_v35 = vld [vmem:[%s11567_s0 + $0xcc] sm:$0xff] }
 0x200   :  { %v1827_v21 = vadd.f32 %v1759_v30, %v1401_v14  ;;  %v2272_v14 = vrot.slane %v9182_v53, 2  ;;  %3291 = vperm.xlu1 %8239, %v21_v31  }
 0x201   :  { %v1402_v6 = vadd.f32 %v1336_v13, %v984_v16  ;;  %v9228_v13 = vld [vmem:[%s11567_s0 + $0x28] sm:$0xff]  ;;  %v3830_v16 = vshrl.u32 %v9192_v62, 16 }
 0x202   :  { %v9215_v41 = vadd.f32 %v2031_v63, %v1827_v21  ;;  %v1338_v47 = vpop.f32.mrf.mxu3  ;;  %v2273_v39 = vsel %vm1850_vm4, %v2270_v20, %v2272_v14  ;;  %v2568_v36 = vshrl.u32 %v9228_v13, 16  ;;  %v2571_v2 = vshll.u32 %v9228_v13, 16 }
 0x203   :  { %v2034_v40 = vpop.f32.mrf.mxu1  ;;  %v3834_v21 = vshll.u32 %v8169_v35, 16 }
 0x204   :  { %v2570_v20 = vrot.slane %v2568_v36, 2  ;;  %v2573_v7 = vrot.slane %v2571_v2, 3  ;;  %v2274_v36 = vrot.slane %v9228_v13, 2 }
 0x205   :  { %v3836_v12 = vrot.slane %v3834_v21, 1 }
 0x206   :  { %v920_v44 = vpop.f32.mrf.mxu2  ;;  %7619 = vmatmul.msk.bf16.vlgmr.msra.gmra.mxu1 %vm387_vm2, %v3829_v52  ;;  %v3832_v52 = vor.u32 %v3830_v16, %v3828_v43 }
 0x207   :  { %v1762_v63 = vpop.f32.mrf.mxu0  ;;  %v985_v4 = vadd.f32 %v920_v44, %v8615_v1  ;;  %7453 = vmatmul.msk.bf16.gmra.mxu3 %vm387_vm2, %v2566_v46  ;;  %v2574_v46 = vor.u32 %v2573_v7, %v2570_v20  ;;  %v3838_v7 = vshrl.u32 %v8169_v35, 16 }
 0x208   :  { %v1828_v27 = vadd.f32 %v1762_v63, %v1402_v6 }
 0x209   :  { %v1403_v30 = vadd.f32 %v1338_v47, %v985_v4 }
 0x20a   :  { %7474 = vmatmul.msk.bf16.vlgmr.msra.gmra.mxu0 %vm387_vm2, %v2969_v45  ;;  %v9243_v0 = vadd.f32 %v2034_v40, %v1828_v27  ;;  %v1341_v1 = vpop.f32.mrf.mxu3  ;;  %v2970_v45 = vrot.slane %v9182_v53, 3  ;;  %v3837_v27 = vsel %vm214_vm1, %v3832_v52, %v3836_v12 }
 0x20b   :  { %v2036_v3 = vpop.f32.mrf.mxu1  ;;  %7431 = vmatmul.msk.bf16.gmra.mxu2 %vm387_vm2, %v2273_v39  ;;  %v2575_v39 = vsel %vm2540_vm6, %v2565_v5, %v2574_v46  ;;  %v8170_v5 = vld [vmem:[%s11567_s0 + $0xd4] sm:$0xff] }
 0x20e   :  { %v923_v6 = vpop.f32.mrf.mxu2 }
 0x20f   :  { %v1764_v22 = vpop.f32.mrf.mxu0  ;;  %v986_v47 = vadd.f32 %v923_v6, %v8630_v18  ;;  %v9260_v18 = vld [vmem:[%s11567_s0 + $0x30] sm:$0xff]  ;;  %v3842_v6 = vshll.u32 %v8170_v5, 16 }
 0x210   :  { %v1829_v40 = vadd.f32 %v1764_v22, %v1403_v30  ;;  %v2971_v30 = vsel %vm2966_vm7, %v2968_v23, %v2970_v45  ;;  %v2577_v16 = vshrl.u32 %v9260_v18, 16  ;;  %v2580_v21 = vshll.u32 %v9260_v18, 16 }
 0x211   :  { %v1404_v44 = vadd.f32 %v1341_v1, %v986_v47 }
 0x212   :  { %v9251_v63 = vadd.f32 %v2036_v3, %v1829_v40  ;;  %v1343_v62 = vpop.f32.mrf.mxu3  ;;  %v2275_v3 = vsel %vm1850_vm4, %v2272_v14, %v2274_v36  ;;  %v2579_v22 = vrot.slane %v2577_v16, 2  ;;  %v2582_v47 = vrot.slane %v2580_v21, 3 }
 0x213   :  { %v2039_v4 = vpop.f32.mrf.mxu1 }
 0x216   :  { %v925_v43 = vpop.f32.mrf.mxu2  ;;  %7620 = vmatmul.msk.bf16.gmra.mxu1 %vm387_vm2, %v3837_v27  ;;  %v3840_v27 = vor.u32 %v3838_v7, %v3836_v12  ;;  %v9289_v12 = vld [vmem:[%s11567_s0 + $0x38] sm:$0xff] }
 0x217   :  { %v1767_v2 = vpop.f32.mrf.mxu0  ;;  %v987_v53 = vadd.f32 %v925_v43, %v8641_v34  ;;  %7454 = vmatmul.msk.bf16.gmra.mxu3 %vm387_vm2, %v2575_v39  ;;  %v3844_v39 = vrot.slane %v3842_v6, 1  ;;  %v2583_v43 = vor.u32 %v2582_v47, %v2579_v22  ;;  %v2586_v7 = vshrl.u32 %v9289_v12, 16 }
 0x218   :  { %v1830_v1 = vadd.f32 %v1767_v2, %v1404_v44  ;;  %v2589_v6 = vshll.u32 %v9289_v12, 16 }
 0x219   :  { %v1405_v31 = vadd.f32 %v1343_v62, %v987_v53  ;;  %v3845_v35 = vsel %vm214_vm1, %v3840_v27, %v3844_v39 }
 0x21a   :  { %7475 = vmatmul.msk.bf16.gmra.mxu0 %vm387_vm2, %v2971_v30  ;;  %v9273_v20 = vadd.f32 %v2039_v4, %v1830_v1  ;;  %v1346_v23 = vpop.f32.mrf.mxu3  ;;  %v2972_v30 = vrot.slane %v9228_v13, 3  ;;  %v24_v1 = vld [vmem:[%s11568_s2 + $0x30] sm:$0xff]  ;;  %v2591_v27 = vrot.slane %v2589_v6, 3 }
 0x21b   :  { %v2041_v34 = vpop.f32.mrf.mxu1  ;;  %7432 = vmatmul.msk.bf16.gmra.mxu2 %vm387_vm2, %v2275_v3  ;;  %v2584_v3 = vsel %vm2540_vm6, %v2574_v46, %v2583_v43  ;;  %3306 = vperm.xlu0 %8238, %v24_v1   ;;  %v9298_v46 = vld [vmem:[%s11567_s0 + $0xdc] sm:$0xff] }
 0x21c   :  { %v2973_v13 = vsel %vm2966_vm7, %v2970_v45, %v2972_v30 }
 0x21e   :  { %v928_v40 = vpop.f32.mrf.mxu2 }
 0x21f   :  { %v1769_v52 = vpop.f32.mrf.mxu0  ;;  %v988_v14 = vadd.f32 %v928_v40, %v8656_v56  ;;  %v2276_v56 = vrot.slane %v9260_v18, 2  ;;  %v3846_v40 = vshrl.u32 %v8170_v5, 16 }
 0x220   :  { %v1831_v44 = vadd.f32 %v1769_v52, %v1405_v31  ;;  %v3850_v52 = vshll.u32 %v9298_v46, 16 }
 0x221   :  { %v1406_v2 = vadd.f32 %v1346_v23, %v988_v14  ;;  %v25_v14 = vld [vmem:[%s11568_s2 + $0x38] sm:$0xff]  ;;  %v3848_v5 = vor.u32 %v3846_v40, %v3844_v39  ;;  %v9327_v39 = vld [vmem:[%s11567_s0 + $0x40] sm:$0xff] }
 0x222   :  { %v9277_v62 = vadd.f32 %v2041_v34, %v1831_v44  ;;  %v1348_v4 = vpop.f32.mrf.mxu3  ;;  %v2277_v34 = vsel %vm1850_vm4, %v2274_v36, %v2276_v56  ;;  %v22_v36 = vld [vmem:[%s11568_s2 + $0x20] sm:$0xff]  ;;  %v2588_v44 = vrot.slane %v2586_v7, 2  ;;  %3311 = vperm.xlu1 %8239, %v25_v14   ;;  %v3852_v1 = vrot.slane %v3850_v52, 1  ;;  %v23_v7 = vld [vmem:[%s11568_s2 + $0x28] sm:$0xff] }
 0x223   :  { %v2044_v53 = vpop.f32.mrf.mxu1  ;;  %3296 = vperm.xlu2 %8240, %v22_v36   ;;  %v2595_v36 = vshrl.u32 %v9327_v39, 16  ;;  %v2598_v14 = vshll.u32 %v9327_v39, 16 }
 0x226   :  { %v930_v16 = vpop.f32.mrf.mxu2  ;;  %7621 = vmatmul.msk.bf16.gmra.mxu1 %vm387_vm2, %v3845_v35 }
 0x227   :  { %v1772_v21 = vpop.f32.mrf.mxu0  ;;  %v989_v31 = vadd.f32 %v930_v16, %v8667_v9  ;;  %7455 = vmatmul.msk.bf16.gmra.mxu3 %vm387_vm2, %v2584_v3  ;;  %v2592_v3 = vor.u32 %v2591_v27, %v2588_v44 }
 0x228   :  { %v1832_v23 = vadd.f32 %v1772_v21, %v1406_v2 }
 0x229   :  { %v1407_v22 = vadd.f32 %v1348_v4, %v989_v31  ;;  %v2974_v31 = vrot.slane %v9260_v18, 3  ;;  %v2593_v6 = vsel %vm2540_vm6, %v2583_v43, %v2592_v3  ;;  %v8172_v43 = vld [vmem:[%s11567_s0 + $0xe4] sm:$0xff] }
 0x22a   :  { %7476 = vmatmul.msk.bf16.gmra.mxu0 %vm387_vm2, %v2973_v13  ;;  %v9304_v45 = vadd.f32 %v2044_v53, %v1832_v23  ;;  %v1351_v9 = vpop.f32.mrf.mxu3 }
 0x22b   :  { %v2046_v47 = vpop.f32.mrf.mxu1  ;;  %7433 = vmatmul.msk.bf16.gmra.mxu2 %vm387_vm2, %v2277_v34  ;;  %v3853_v34 = vsel %vm214_vm1, %v3848_v5, %v3852_v1  ;;  %3301 = vperm.xlu2 %8240, %v23_v7   ;;  %v2975_v18 = vsel %vm2966_vm7, %v2972_v30, %v2974_v31 }
 0x22e   :  { %v933_v2 = vpop.f32.mrf.mxu2 }
 0x22f   :  { %v1774_v4 = vpop.f32.mrf.mxu0  ;;  %v990_v53 = vadd.f32 %v933_v2, %v8682_v32  ;;  %v2278_v32 = vrot.slane %v9289_v12, 2  ;;  %v3854_v2 = vshrl.u32 %v9298_v46, 16 }
 0x230   :  { %v1833_v35 = vadd.f32 %v1774_v4, %v1407_v22  ;;  %v3858_v4 = vshll.u32 %v8172_v43, 16 }
 0x231   :  { %v1408_v16 = vadd.f32 %v1351_v9, %v990_v53  ;;  %v2279_v52 = vsel %vm1850_vm4, %v2276_v56, %v2278_v32  ;;  %v27_v56 = vld [vmem:[%s11568_s2 + $0x48] sm:$0xff]  ;;  %v2597_v53 = vrot.slane %v2595_v36, 2 }
 0x232   :  { %v9315_v21 = vadd.f32 %v2046_v47, %v1833_v35  ;;  %v1353_v13 = vpop.f32.mrf.mxu3  ;;  %v2600_v35 = vrot.slane %v2598_v14, 3  ;;  %3321 = vperm.xlu0 %8238, %v27_v56   ;;  %v3860_v7 = vrot.slane %v3858_v4, 1 }
 0x233   :  { %v2049_v23 = vpop.f32.mrf.mxu1 }
 0x236   :  { %v935_v22 = vpop.f32.mrf.mxu2  ;;  %7622 = vmatmul.msk.bf16.gmra.mxu1 %vm387_vm2, %v3853_v34  ;;  %v3856_v34 = vor.u32 %v3854_v2, %v3852_v1  ;;  %v9360_v1 = vld [vmem:[%s11567_s0 + $0x48] sm:$0xff] }
 0x237   :  { %v1777_v9 = vpop.f32.mrf.mxu0  ;;  %v991_v47 = vadd.f32 %v935_v22, %v8693_v48  ;;  %7456 = vmatmul.msk.bf16.gmra.mxu3 %vm387_vm2, %v2593_v6  ;;  %v2601_v6 = vor.u32 %v2600_v35, %v2597_v53  ;;  %v2604_v4 = vshrl.u32 %v9360_v1, 16  ;;  %v2607_v56 = vshll.u32 %v9360_v1, 16 }
 0x238   :  { %v1834_v40 = vadd.f32 %v1777_v9, %v1408_v16 }
 0x239   :  { %v1409_v44 = vadd.f32 %v1353_v13, %v991_v47  ;;  %v2602_v36 = vsel %vm2540_vm6, %v2592_v3, %v2601_v6  ;;  %v8173_v3 = vld [vmem:[%s11567_s0 + $0xec] sm:$0xff] }
 0x23a   :  { %7477 = vmatmul.msk.bf16.gmra.mxu0 %vm387_vm2, %v2975_v18  ;;  %v9340_v27 = vadd.f32 %v2049_v23, %v1834_v40  ;;  %v1356_v30 = vpop.f32.mrf.mxu3  ;;  %v2976_v18 = vrot.slane %v9289_v12, 3  ;;  %v3861_v40 = vsel %vm214_vm1, %v3856_v34, %v3860_v7 }
 0x23b   :  { %v2051_v48 = vpop.f32.mrf.mxu1  ;;  %7434 = vmatmul.msk.bf16.gmra.mxu2 %vm387_vm2, %v2279_v52  ;;  %v28_v52 = vld [vmem:[%s11568_s2 + $0x50] sm:$0xff] }
 0x23c   :  { %3326 = vperm.xlu1 %8239, %v28_v52   ;;  %v2977_v12 = vsel %vm2966_vm7, %v2974_v31, %v2976_v18 }
 0x23e   :  { %v938_v5 = vpop.f32.mrf.mxu2 }
 0x23f   :  { %v1779_v16 = vpop.f32.mrf.mxu0  ;;  %v992_v13 = vadd.f32 %v938_v5, %v8708_v8  ;;  %v2280_v8 = vrot.slane %v9327_v39, 2  ;;  %v3862_v5 = vshrl.u32 %v8172_v43, 16 }
 0x240   :  { %v1835_v23 = vadd.f32 %v1779_v16, %v1409_v44  ;;  %v3866_v16 = vshll.u32 %v8173_v3, 16 }
 0x241   :  { %v1410_v22 = vadd.f32 %v1356_v30, %v992_v13  ;;  %v2281_v2 = vsel %vm1850_vm4, %v2278_v32, %v2280_v8  ;;  %v26_v13 = vld [vmem:[%s11568_s2 + $0x40] sm:$0xff]  ;;  %v2606_v32 = vrot.slane %v2604_v4, 2 }
 0x242   :  { %v9348_v9 = vadd.f32 %v2051_v48, %v1835_v23  ;;  %v1358_v46 = vpop.f32.mrf.mxu3  ;;  %v2609_v23 = vrot.slane %v2607_v56, 3  ;;  %3316 = vperm.xlu2 %8240, %v26_v13   ;;  %v3868_v52 = vrot.slane %v3866_v16, 1 }
 0x243   :  { %v2054_v47 = vpop.f32.mrf.mxu1 }
 0x246   :  { %v940_v14 = vpop.f32.mrf.mxu2  ;;  %7623 = vmatmul.msk.bf16.gmra.mxu1 %vm387_vm2, %v3861_v40 }
 0x247   :  { %v1782_v44 = vpop.f32.mrf.mxu0  ;;  %v993_v30 = vadd.f32 %v940_v14, %v8719_v25  ;;  %7457 = vmatmul.msk.bf16.gmra.mxu3 %vm387_vm2, %v2602_v36  ;;  %v2610_v36 = vor.u32 %v2609_v23, %v2606_v32 }
 0x248   :  { %v1836_v48 = vadd.f32 %v1782_v44, %v1410_v22 }
 0x249   :  { %v1411_v53 = vadd.f32 %v1358_v46, %v993_v30  ;;  %v2611_v4 = vsel %vm2540_vm6, %v2601_v6, %v2610_v36  ;;  %v8174_v6 = vld [vmem:[%s11567_s0 + $0xf4] sm:$0xff] }
 0x24a   :  { %7478 = vmatmul.msk.bf16.gmra.mxu0 %vm387_vm2, %v2977_v12  ;;  %v9373_v35 = vadd.f32 %v2054_v47, %v1836_v48  ;;  %v1361_v31 = vpop.f32.mrf.mxu3  ;;  %v3864_v47 = vor.u32 %v3862_v5, %v3860_v7  ;;  %v2978_v12 = vrot.slane %v9327_v39, 3  ;;  %v9392_v7 = vld [vmem:[%s11567_s0 + $0x50] sm:$0xff] }
 0x24b   :  { %v2056_v25 = vpop.f32.mrf.mxu1  ;;  %7435 = vmatmul.msk.bf16.gmra.mxu2 %vm387_vm2, %v2281_v2  ;;  %v30_v2 = vld [vmem:[%s11568_s2 + $0x60] sm:$0xff]  ;;  %v2613_v16 = vshrl.u32 %v9392_v7, 16  ;;  %v2616_v13 = vshll.u32 %v9392_v7, 16 }
 0x24c   :  { %v3869_v48 = vsel %vm214_vm1, %v3864_v47, %v3868_v52  ;;  %3336 = vperm.xlu0 %8238, %v30_v2   ;;  %v2979_v39 = vsel %vm2966_vm7, %v2976_v18, %v2978_v12 }
 0x24e   :  { %v943_v34 = vpop.f32.mrf.mxu2 }
 0x24f   :  { %v1784_v22 = vpop.f32.mrf.mxu0  ;;  %v994_v40 = vadd.f32 %v943_v34, %v8734_v58  ;;  %v2282_v58 = vrot.slane %v9360_v1, 2  ;;  %v3870_v34 = vshrl.u32 %v8173_v3, 16 }
 0x250   :  { %v1837_v46 = vadd.f32 %v1784_v22, %v1411_v53  ;;  %v3874_v22 = vshll.u32 %v8174_v6, 16 }
 0x251   :  { %v1412_v14 = vadd.f32 %v1361_v31, %v994_v40  ;;  %v2283_v5 = vsel %vm1850_vm4, %v2280_v8, %v2282_v58  ;;  %v31_v40 = vld [vmem:[%s11568_s2 + $0x68] sm:$0xff]  ;;  %v2615_v8 = vrot.slane %v2613_v16, 2  ;;  %v29_v16 = vld [vmem:[%s11568_s2 + $0x58] sm:$0xff] }
 0x252   :  { %v9380_v44 = vadd.f32 %v2056_v25, %v1837_v46  ;;  %v1363_v43 = vpop.f32.mrf.mxu3  ;;  %v2618_v46 = vrot.slane %v2616_v13, 3  ;;  %3341 = vperm.xlu1 %8239, %v31_v40   ;;  %3331 = vperm.xlu2 %8240, %v29_v16  }
 0x253   :  { %v2059_v30 = vpop.f32.mrf.mxu1 }
 0x256   :  { %v945_v56 = vpop.f32.mrf.mxu2  ;;  %7624 = vmatmul.msk.bf16.gmra.mxu1 %vm387_vm2, %v3869_v48  ;;  %v11655_v48 = vld [vmem:[#allocation2_spill] sm:$0xff] }
 0x257   :  { %v1787_v53 = vpop.f32.mrf.mxu0  ;;  %v995_v31 = vadd.f32 %v945_v56, %v8745_v60  ;;  %7458 = vmatmul.msk.bf16.gmra.mxu3 %vm387_vm2, %v2611_v4  ;;  %v3876_v4 = vrot.slane %v3874_v22, 1  ;;  %v2619_v56 = vor.u32 %v2618_v46, %v2615_v8 }
 0x258   :  { %v1838_v25 = vadd.f32 %v1787_v53, %v1412_v14 }
 0x259   :  { %v1413_v32 = vadd.f32 %v1363_v43, %v995_v31  ;;  %v2980_v31 = vrot.slane %v9360_v1, 3  ;;  %v2620_v13 = vsel %vm2540_vm6, %v2610_v36, %v2619_v56  ;;  %v8175_v36 = vld [vmem:[%s11567_s0 + $0xfc] sm:$0xff] }
 0x25a   :  { %7479 = vmatmul.msk.bf16.gmra.mxu0 %vm387_vm2, %v2979_v39  ;;  %v9405_v23 = vadd.f32 %v2059_v30, %v1838_v25  ;;  %v1366_v18 = vpop.f32.mrf.mxu3  ;;  %v3872_v30 = vor.u32 %v3870_v34, %v3868_v52  ;;  %v9424_v52 = vld [vmem:[%s11567_s0 + $0x58] sm:$0xff]  ;;  %v11657_v34 = vld [vmem:[#allocation3_spill] sm:$0xff] }
 0x25b   :  { %v2061_v60 = vpop.f32.mrf.mxu1  ;;  %7436 = vmatmul.msk.bf16.gmra.mxu2 %vm387_vm2, %v2283_v5  ;;  %v2981_v1 = vsel %vm2966_vm7, %v2978_v12, %v2980_v31  ;;  %v2622_v46 = vshrl.u32 %v9424_v52, 16 }
 0x25c   :  { %v3877_v5 = vsel %vm214_vm1, %v3872_v30, %v3876_v4  ;;  %v3882_v30 = vshll.u32 %v8175_v36, 16 }
 0x25e   :  { %v948_v47 = vpop.f32.mrf.mxu2 }
 0x25f   :  { %v1789_v14 = vpop.f32.mrf.mxu0  ;;  %v996_v2 = vadd.f32 %v948_v47, %v11655_v48  ;;  %v2625_v47 = vshll.u32 %v9424_v52, 16 }
 0x260   :  { %v1839_v43 = vadd.f32 %v1789_v14, %v1413_v32  ;;  %v2284_v32 = vrot.slane %v9392_v7, 2 }
 0x261   :  { %v1414_v53 = vadd.f32 %v1366_v18, %v996_v2 }
 0x262   :  { %v9412_v39 = vadd.f32 %v2061_v60, %v1839_v43  ;;  %v1368_v3 = vpop.f32.mrf.mxu3  ;;  %v2285_v8 = vsel %vm1850_vm4, %v2282_v58, %v2284_v32  ;;  %v3878_v43 = vshrl.u32 %v8174_v6, 16  ;;  %v2624_v58 = vrot.slane %v2622_v46, 2 }
 0x263   :  { %v2064_v25 = vpop.f32.mrf.mxu1 }
 0x264   :  { %11656 = vst [vmem:[#allocation2_spill] sm:$0xff] %v9412_v39 }
 0x266   :  { %v950_v18 = vpop.f32.mrf.mxu2  ;;  %7625 = vmatmul.msk.bf16.gmra.mxu1 %vm387_vm2, %v3877_v5  ;;  %v2627_v5 = vrot.slane %v2625_v47, 3  ;;  %v2286_v47 = vrot.slane %v9424_v52, 2 }
 0x267   :  { %v1792_v60 = vpop.f32.mrf.mxu0  ;;  %v997_v22 = vadd.f32 %v950_v18, %v11657_v34  ;;  %7459 = vmatmul.msk.bf16.gmra.mxu3 %vm387_vm2, %v2620_v13  ;;  %v11659_v18 = vld [vmem:[#allocation4_spill] sm:$0xff] }
 0x268   :  { %v1840_v40 = vadd.f32 %v1792_v60, %v1414_v53  ;;  %v33_v53 = vld [vmem:[%s11568_s2 + $0x78] sm:$0xff]  ;;  %v2628_v34 = vor.u32 %v2627_v5, %v2624_v58  ;;  %v2287_v58 = vsel %vm1850_vm4, %v2284_v32, %v2286_v47  ;;  %v32_v32 = vld [vmem:[%s11568_s2 + $0x70] sm:$0xff] }
 0x269   :  { %v1415_v14 = vadd.f32 %v1368_v3, %v997_v22  ;;  %3351 = vperm.xlu0 %8238, %v33_v53   ;;  %v9465_v53 = vld [vmem:[%s11567_s0 + $0x104] sm:$0xff]  ;;  %3346 = vperm.xlu2 %8240, %v32_v32  }
 0x26a   :  { %7480 = vmatmul.msk.bf16.gmra.mxu0 %vm387_vm2, %v2981_v1  ;;  %v9437_v48 = vadd.f32 %v2064_v25, %v1840_v40  ;;  %v1371_v12 = vpop.f32.mrf.mxu3  ;;  %v3880_v25 = vor.u32 %v3878_v43, %v3876_v4  ;;  %v3884_v1 = vrot.slane %v3882_v30, 1  ;;  %v2629_v46 = vsel %vm2540_vm6, %v2619_v56, %v2628_v34  ;;  %v34_v4 = vld [vmem:[%s11568_s2 + $0x80] sm:$0xff]  ;;  %v11660_v43 = vld [vmem:[#allocation5_spill] sm:$0xff] }
 0x26b   :  { %v2066_v2 = vpop.f32.mrf.mxu1  ;;  %7437 = vmatmul.msk.bf16.gmra.mxu2 %vm387_vm2, %v2285_v8  ;;  %v2982_v8 = vrot.slane %v9392_v7, 3  ;;  %3356 = vperm.xlu1 %8239, %v34_v4  }
 0x26c   :  { %11658 = vst [vmem:[#allocation3_spill] sm:$0xff] %v9437_v48  ;;  %v3885_v39 = vsel %vm214_vm1, %v3880_v25, %v3884_v1 }
 0x26d   :  { %v2983_v7 = vsel %vm2966_vm7, %v2980_v31, %v2982_v8 }
 0x26e   :  { %v953_v16 = vpop.f32.mrf.mxu2 }
 0x26f   :  { %v1794_v13 = vpop.f32.mrf.mxu0  ;;  %v998_v60 = vadd.f32 %v953_v16, %v11659_v18 }
 0x270   :  { %v1841_v3 = vadd.f32 %v1794_v13, %v1415_v14  ;;  %v9453_v14 = vld [vmem:[%s11567_s0 + $0x60] sm:$0xff] }
 0x271   :  { %v1416_v22 = vadd.f32 %v1371_v12, %v998_v60  ;;  %v2631_v5 = vshrl.u32 %v9453_v14, 16  ;;  %v2634_v16 = vshll.u32 %v9453_v14, 16  ;;  %v3886_v60 = vshrl.u32 %v8175_v36, 16 }
 0x272   :  { %v9444_v40 = vadd.f32 %v2066_v2, %v1841_v3  ;;  %v1373_v6 = vpop.f32.mrf.mxu3  ;;  %v3890_v3 = vshll.u32 %v9465_v53, 16 }
 0x273   :  { %v2069_v48 = vpop.f32.mrf.mxu1  ;;  %v2633_v25 = vrot.slane %v2631_v5, 2  ;;  %v9485_v5 = vpop.permute.xlu0 %3276 }
 0x274   :  { %11661 = vst [vmem:[#allocation4_spill] sm:$0xff] %v9485_v5 }
 0x276   :  { %v955_v12 = vpop.f32.mrf.mxu2  ;;  %7626 = vmatmul.msk.bf16.gmra.mxu1 %vm387_vm2, %v3885_v39 }
 0x277   :  { %v1797_v2 = vpop.f32.mrf.mxu0  ;;  %v999_v56 = vadd.f32 %v955_v12, %v11660_v43  ;;  %7460 = vmatmul.msk.bf16.gmra.mxu3 %vm387_vm2, %v2629_v46 }
 0x278   :  { %v1842_v30 = vadd.f32 %v1797_v2, %v1416_v22  ;;  %v2636_v22 = vrot.slane %v2634_v16, 3 }
 0x279   :  { %v1417_v39 = vadd.f32 %v1373_v6, %v999_v56  ;;  %v3888_v6 = vor.u32 %v3886_v60, %v3884_v1  ;;  %v11574_v56 = vrot.slane %v9424_v52, 3  ;;  %v9492_v1 = vld [vmem:[%s11567_s0 + $0x68] sm:$0xff] }
 0x27a   :  { %7481 = vmatmul.msk.bf16.gmra.mxu0 %vm387_vm2, %v2983_v7  ;;  %v9471_v31 = vadd.f32 %v2069_v48, %v1842_v30  ;;  %v2813_v13 = vpop.f32.mrf.mxu3  ;;  %v3892_v48 = vrot.slane %v3890_v3, 1  ;;  %v2637_v2 = vor.u32 %v2636_v22, %v2633_v25  ;;  %v2640_v32 = vshrl.u32 %v9492_v1, 16 }
 0x27b   :  { %v2071_v18 = vpop.f32.mrf.mxu1  ;;  %7438 = vmatmul.msk.bf16.gmra.mxu2 %vm387_vm2, %v2287_v58 }
 0x27c   :  { %v3893_v58 = vsel %vm214_vm1, %v3888_v6, %v3892_v48  ;;  %v2638_v16 = vsel %vm2540_vm6, %v2628_v34, %v2637_v2  ;;  %v2985_v34 = vsel %vm2966_vm7, %v2982_v8, %v11574_v56  ;;  %v3894_v6 = vshrl.u32 %v9465_v53, 16 }
 0x27e   :  { %v2387_v4 = vpop.f32.mrf.mxu2 }
 0x27f   :  { %v1799_v46 = vpop.f32.mrf.mxu0  ;;  %v2492_v7 = vadd.f32 %v2387_v4, %v8824_v37 }
 0x280   :  { %v1843_v12 = vadd.f32 %v1799_v46, %v1417_v39  ;;  %v11573_v39 = vrot.slane %v9453_v14, 2  ;;  %v2643_v46 = vshll.u32 %v9492_v1, 16 }
 0x281   :  { %v2918_v37 = vadd.f32 %v2813_v13, %v2492_v7  ;;  %v9505_v13 = vld [vmem:[%s11567_s0 + $0x10c] sm:$0xff]  ;;  %v2642_v7 = vrot.slane %v2640_v32, 2 }
 0x282   :  { %v9479_v43 = vadd.f32 %v2071_v18, %v1843_v12  ;;  %v2815_v36 = vpop.f32.mrf.mxu3  ;;  %v36_v18 = vld [vmem:[%s11568_s2 + $0x90] sm:$0xff]  ;;  %v2289_v22 = vsel %vm1850_vm4, %v2286_v47, %v11573_v39  ;;  %v3898_v47 = vshll.u32 %v9505_v13, 16 }
 0x283   :  { %v9482_v30 = vpop.f32.mrf.mxu1  ;;  %3366 = vperm.xlu0 %8238, %v36_v18  }
 0x284   :  { %v3900_v39 = vrot.slane %v3898_v47, 1  ;;  %v11576_v47 = vrot.slane %v9492_v1, 2 }
 0x286   :  { %v2389_v60 = vpop.f32.mrf.mxu2  ;;  %7627 = vmatmul.msk.bf16.gmra.mxu1 %vm387_vm2, %v3893_v58  ;;  %v2645_v58 = vrot.slane %v2643_v46, 3 }
 0x287   :  { %v3085_v3 = vpop.f32.mrf.mxu0  ;;  %7461 = vmatmul.msk.bf16.gmra.mxu3 %vm387_vm2, %v2638_v16  ;;  %v2493_v4 = vadd.f32 %v2389_v60, %v8837_v59  ;;  %v37_v59 = vld [vmem:[%s11568_s2 + $0x98] sm:$0xff] }
 0x288   :  { %v3190_v25 = vadd.f32 %v3085_v3, %v2918_v37  ;;  %v9522_v37 = vpop.permute.xlu0 %3281  ;;  %3371 = vperm.xlu1 %8239, %v37_v59   ;;  %v9528_v53 = vor.u32 %v2645_v58, %v2642_v7  ;;  %v9547_v7 = vld [vmem:[%s11567_s0 + $0x70] sm:$0xff] }
 0x289   :  { %v2919_v16 = vadd.f32 %v2815_v36, %v2493_v4  ;;  %11663 = vst [vmem:[#allocation12_spill] sm:$0xff] %v9522_v37  ;;  %v11577_v4 = vrot.slane %v9453_v14, 3 }
 0x28a   :  { %3232 = vst [vmem:[%s11569_s3] sm:$0xff] %v3190_v25  ;;  %7482 = vmatmul.msk.bf16.gmra.mxu0 %vm387_vm2, %v2985_v34  ;;  %v2818_v8 = vpop.f32.mrf.mxu3  ;;  %v3484_v3 = vmul.f32 %v9485_v5, %v3190_v25 }
 0x28b   :  { %7439 = vmatmul.msk.bf16.gmra.mxu2 %vm387_vm2, %v2289_v22  ;;  %v9518_v12 = vpop.f32.mrf.mxu1  ;;  %v3896_v22 = vor.u32 %v3894_v6, %v3892_v48  ;;  %v9539_v6 = vpop.permute.xlu1 %3286 }
 0x28c   :  { %11662 = vst [vmem:[#allocation5_spill] sm:$0xff] %v9518_v12  ;;  %v3574_v56 = vmul.f32 %v3484_v3, %v3190_v25 }
 0x28d   :  { %v3901_v48 = vsel %vm214_vm1, %v3896_v22, %v3900_v39  ;;  %11664 = vst [vmem:[#allocation13_spill] sm:$0xff] %v9539_v6  ;;  %v2649_v22 = vshrl.u32 %v9547_v7, 16 }
 0x28e   :  { %v2392_v18 = vpop.f32.mrf.mxu2 }
 0x28f   :  { %v3087_v60 = vpop.f32.mrf.mxu0  ;;  %v2494_v32 = vadd.f32 %v2392_v18, %v8850_v49  ;;  %v2647_v49 = vsel %vm2540_vm6, %v2637_v2, %v9528_v53  ;;  %v11665_v2 = vrot.slane %v9424_v52, 3  ;;  %v2652_v52 = vshll.u32 %v9547_v7, 16 }
 0x290   :  { %v3191_v34 = vadd.f32 %v3087_v60, %v2919_v16  ;;  %v35_v16 = vld [vmem:[%s11568_s2 + $0x88] sm:$0xff] }
 0x291   :  { %v2920_v25 = vadd.f32 %v2818_v8, %v2494_v32  ;;  %3361 = vperm.xlu2 %8240, %v35_v16   ;;  %v11666_v8 = vrot.slane %v9453_v14, 2 }
 0x292   :  { %3233 = vst [vmem:[%s11569_s3 + $0x8] sm:$0xff] %v3191_v34  ;;  %v3485_v36 = vmul.f32 %v9522_v37, %v3191_v34  ;;  %v2820_v46 = vpop.f32.mrf.mxu3 }
 0x293   :  { %v9536_v5 = vpop.f32.mrf.mxu1 }
 0x294   :  { %v3526_v59 = vadd.f32 %v3485_v36, %v3484_v3  ;;  %v3575_v12 = vmul.f32 %v3485_v36, %v3191_v34  ;;  %v2987_v3 = vsel %vm2966_vm7, %v11665_v2, %v11577_v4  ;;  %v9582_v4 = vpop.permute.xlu1 %3291 }
 0x295   :  { %11667 = vst [vmem:[#allocation14_spill] sm:$0xff] %v9582_v4 }
 0x296   :  { %v3616_v58 = vadd.f32 %v3575_v12, %v3574_v56  ;;  %v2394_v18 = vpop.f32.mrf.mxu2  ;;  %7628 = vmatmul.msk.bf16.gmra.mxu1 %vm387_vm2, %v3901_v48  ;;  %v9562_v56 = vld [vmem:[%s11567_s0 + $0x114] sm:$0xff]  ;;  %v2291_v12 = vsel %vm1850_vm4, %v11666_v8, %v11576_v47 }
 0x297   :  { %v3090_v60 = vpop.f32.mrf.mxu0  ;;  %7462 = vmatmul.msk.bf16.gmra.mxu3 %vm387_vm2, %v2647_v49  ;;  %v2495_v32 = vadd.f32 %v2394_v18, %v8863_v57  ;;  %v3906_v2 = vshll.u32 %v9562_v56, 16  ;;  %v2651_v57 = vrot.slane %v2649_v22, 2  ;;  %v2654_v18 = vrot.slane %v2652_v52, 3 }
 0x298   :  { %v3192_v34 = vadd.f32 %v3090_v60, %v2920_v25  ;;  %v3902_v60 = vshrl.u32 %v9505_v13, 16  ;;  %v11581_v22 = vrot.slane %v9492_v1, 3 }
 0x299   :  { %v2921_v47 = vadd.f32 %v2820_v46, %v2495_v32  ;;  %v2655_v37 = vor.u32 %v2654_v18, %v2651_v57 }
 0x29a   :  { %3234 = vst [vmem:[%s11569_s3 + $0x10] sm:$0xff] %v3192_v34  ;;  %v3486_v36 = vmul.f32 %v9539_v6, %v3192_v34  ;;  %7483 = vmatmul.msk.bf16.gmra.mxu0 %vm387_vm2, %v2987_v3  ;;  %v2823_v48 = vpop.f32.mrf.mxu3  ;;  %v39_v3 = vld [vmem:[%s11568_s2 + $0xa8] sm:$0xff]  ;;  %v3908_v6 = vrot.slane %v3906_v2, 1  ;;  %v9604_v2 = vld [vmem:[%s11567_s0 + $0x78] sm:$0xff] }
 0x29b   :  { %7440 = vmatmul.msk.bf16.gmra.mxu2 %vm387_vm2, %v2291_v12  ;;  %v9578_v16 = vpop.f32.mrf.mxu1  ;;  %3381 = vperm.xlu0 %8238, %v39_v3  }
 0x29c   :  { %v3527_v49 = vadd.f32 %v3526_v59, %v3486_v36  ;;  %v3576_v25 = vmul.f32 %v3486_v36, %v3192_v34  ;;  %v3904_v36 = vor.u32 %v3902_v60, %v3900_v39  ;;  %v9596_v39 = vpop.permute.xlu2 %3296  ;;  %v11580_v60 = vrot.slane %v9547_v7, 2 }
 0x29d   :  { %11668 = vst [vmem:[#allocation15_spill] sm:$0xff] %v9596_v39 }
 0x29e   :  { %v3617_v8 = vadd.f32 %v3616_v58, %v3576_v25  ;;  %v2397_v59 = vpop.f32.mrf.mxu2 }
 0x29f   :  { %v3092_v34 = vpop.f32.mrf.mxu0  ;;  %v2496_v13 = vadd.f32 %v2397_v59, %v8876_v15  ;;  %v2656_v15 = vsel %vm2540_vm6, %v9528_v53, %v2655_v37  ;;  %v11669_v53 = vrot.slane %v9453_v14, 3  ;;  %v2661_v14 = vshll.u32 %v9604_v2, 16 }
 0x2a0   :  { %v3193_v12 = vadd.f32 %v3092_v34, %v2921_v47  ;;  %v3909_v47 = vsel %vm214_vm1, %v3904_v36, %v3908_v6 }
 0x2a1   :  { %v2922_v18 = vadd.f32 %v2823_v48, %v2496_v13  ;;  %v2989_v34 = vsel %vm2966_vm7, %v11669_v53, %v11581_v22  ;;  %v9619_v48 = vld [vmem:[%s11567_s0 + $0x11c] sm:$0xff]  ;;  %v2658_v13 = vshrl.u32 %v9604_v2, 16 }
 0x2a2   :  { %3235 = vst [vmem:[%s11569_s3 + $0x18] sm:$0xff] %v3193_v12  ;;  %v3487_v46 = vmul.f32 %v9582_v4, %v3193_v12  ;;  %v2825_v58 = vpop.f32.mrf.mxu3  ;;  %v3914_v53 = vshll.u32 %v9619_v48, 16 }
 0x2a3   :  { %v9593_v25 = vpop.f32.mrf.mxu1 }
 0x2a4   :  { %v3528_v52 = vadd.f32 %v3527_v49, %v3487_v46  ;;  %v3577_v32 = vmul.f32 %v3487_v46, %v3193_v12  ;;  %v40_v49 = vld [vmem:[%s11568_s2 + $0xb0] sm:$0xff]  ;;  %v9639_v22 = vpop.permute.xlu2 %3301 }
 0x2a5   :  { %3386 = vperm.xlu1 %8239, %v40_v49   ;;  %11671 = vst [vmem:[#allocation16_spill] sm:$0xff] %v9639_v22 }
 0x2a6   :  { %v3618_v57 = vadd.f32 %v3617_v8, %v3577_v32  ;;  %v2399_v3 = vpop.f32.mrf.mxu2  ;;  %7629 = vmatmul.msk.bf16.gmra.mxu1 %vm387_vm2, %v3909_v47  ;;  %v11670_v8 = vrot.slane %v9492_v1, 2 }
 0x2a7   :  { %v3095_v59 = vpop.f32.mrf.mxu0  ;;  %7463 = vmatmul.msk.bf16.gmra.mxu3 %vm387_vm2, %v2656_v15  ;;  %v2497_v46 = vadd.f32 %v2399_v3, %v8889_v29  ;;  %v2660_v29 = vrot.slane %v2658_v13, 2  ;;  %v2663_v3 = vrot.slane %v2661_v14, 3  ;;  %v11585_v13 = vrot.slane %v9547_v7, 3 }
 0x2a8   :  { %v3194_v12 = vadd.f32 %v3095_v59, %v2922_v18  ;;  %v2293_v36 = vsel %vm1850_vm4, %v11670_v8, %v11580_v60  ;;  %v3910_v59 = vshrl.u32 %v9562_v56, 16 }
 0x2a9   :  { %v2923_v60 = vadd.f32 %v2825_v58, %v2497_v46  ;;  %v2664_v4 = vor.u32 %v2663_v3, %v2660_v29  ;;  %v9660_v3 = vpop.permute.xlu0 %3306 }
 0x2aa   :  { %3236 = vst [vmem:[%s11569_s3 + $0x20] sm:$0xff] %v3194_v12  ;;  %v3488_v32 = vmul.f32 %v9596_v39, %v3194_v12  ;;  %7484 = vmatmul.msk.bf16.gmra.mxu0 %vm387_vm2, %v2989_v34  ;;  %v2828_v47 = vpop.f32.mrf.mxu3  ;;  %v38_v34 = vld [vmem:[%s11568_s2 + $0xa0] sm:$0xff]  ;;  %v3916_v39 = vrot.slane %v3914_v53, 1 }
 0x2ab   :  { %7441 = vmatmul.msk.bf16.gmra.mxu2 %vm387_vm2, %v2293_v36  ;;  %v9635_v49 = vpop.f32.mrf.mxu1  ;;  %3376 = vperm.xlu2 %8240, %v38_v34   ;;  %11672 = vst [vmem:[#allocation17_spill] sm:$0xff] %v9660_v3 }
 0x2ac   :  { %v3529_v15 = vadd.f32 %v3528_v52, %v3488_v32  ;;  %v3578_v18 = vmul.f32 %v3488_v32, %v3194_v12  ;;  %v3912_v32 = vor.u32 %v3910_v59, %v3908_v6  ;;  %v2665_v6 = vsel %vm2540_vm6, %v2655_v37, %v2664_v4 }
 0x2ad   :  { %v11584_v59 = vrot.slane %v9604_v2, 2  ;;  %v11673_v37 = vrot.slane %v9492_v1, 3 }
 0x2ae   :  { %v3619_v8 = vadd.f32 %v3618_v57, %v3578_v18  ;;  %v2402_v52 = vpop.f32.mrf.mxu2 }
 0x2af   :  { %v3097_v12 = vpop.f32.mrf.mxu0  ;;  %v2498_v56 = vadd.f32 %v2402_v52, %v8902_v55  ;;  %v9658_v55 = vld [vmem:[%s11567_s0 + $0x80] sm:$0xff] }
 0x2b0   :  { %v3195_v36 = vadd.f32 %v3097_v12, %v2923_v60  ;;  %v3917_v60 = vsel %vm214_vm1, %v3912_v32, %v3916_v39  ;;  %v2991_v12 = vsel %vm2966_vm7, %v11673_v37, %v11585_v13  ;;  %v2670_v1 = vshll.u32 %v9658_v55, 16  ;;  %v9695_v13 = vpop.permute.xlu1 %3311 }
 0x2b1   :  { %v2924_v29 = vadd.f32 %v2828_v47, %v2498_v56  ;;  %v9675_v47 = vld [vmem:[%s11567_s0 + $0x124] sm:$0xff]  ;;  %v2667_v56 = vshrl.u32 %v9658_v55, 16  ;;  %11675 = vst [vmem:[#allocation18_spill] sm:$0xff] %v9695_v13 }
 0x2b2   :  { %3237 = vst [vmem:[%s11569_s3 + $0x28] sm:$0xff] %v3195_v36  ;;  %v3489_v58 = vmul.f32 %v9639_v22, %v3195_v36  ;;  %v2830_v57 = vpop.f32.mrf.mxu3  ;;  %v3922_v37 = vshll.u32 %v9675_v47, 16 }
 0x2b3   :  { %v9650_v18 = vpop.f32.mrf.mxu1 }
 0x2b4   :  { %v3530_v14 = vadd.f32 %v3529_v15, %v3489_v58  ;;  %v3579_v46 = vmul.f32 %v3489_v58, %v3195_v36  ;;  %v42_v15 = vld [vmem:[%s11568_s2 + $0xc0] sm:$0xff] }
 0x2b5   :  { %3396 = vperm.xlu0 %8238, %v42_v15  }
 0x2b6   :  { %v3620_v53 = vadd.f32 %v3619_v8, %v3579_v46  ;;  %v2404_v34 = vpop.f32.mrf.mxu2  ;;  %7630 = vmatmul.msk.bf16.gmra.mxu1 %vm387_vm2, %v3917_v60  ;;  %v11674_v8 = vrot.slane %v9547_v7, 2 }
 0x2b7   :  { %v3100_v52 = vpop.f32.mrf.mxu0  ;;  %7464 = vmatmul.msk.bf16.gmra.mxu3 %vm387_vm2, %v2665_v6  ;;  %v2499_v58 = vadd.f32 %v2404_v34, %v8915_v61  ;;  %v2669_v61 = vrot.slane %v2667_v56, 2  ;;  %v2672_v34 = vrot.slane %v2670_v1, 3  ;;  %v11589_v56 = vrot.slane %v9604_v2, 3 }
 0x2b8   :  { %v3196_v36 = vadd.f32 %v3100_v52, %v2924_v29  ;;  %v2295_v32 = vsel %vm1850_vm4, %v11674_v8, %v11584_v59  ;;  %v3918_v52 = vshrl.u32 %v9619_v48, 16 }
 0x2b9   :  { %v2925_v59 = vadd.f32 %v2830_v57, %v2499_v58  ;;  %v2673_v22 = vor.u32 %v2672_v34, %v2669_v61  ;;  %v9716_v34 = vpop.permute.xlu2 %3316 }
 0x2ba   :  { %3238 = vst [vmem:[%s11569_s3 + $0x30] sm:$0xff] %v3196_v36  ;;  %v3490_v46 = vmul.f32 %v9660_v3, %v3196_v36  ;;  %7485 = vmatmul.msk.bf16.gmra.mxu0 %vm387_vm2, %v2991_v12  ;;  %v2833_v60 = vpop.f32.mrf.mxu3  ;;  %v43_v12 = vld [vmem:[%s11568_s2 + $0xc8] sm:$0xff]  ;;  %v3924_v3 = vrot.slane %v3922_v37, 1 }
 0x2bb   :  { %7442 = vmatmul.msk.bf16.gmra.mxu2 %vm387_vm2, %v2295_v32  ;;  %v9691_v15 = vpop.f32.mrf.mxu1  ;;  %3401 = vperm.xlu1 %8239, %v43_v12   ;;  %11676 = vst [vmem:[#allocation19_spill] sm:$0xff] %v9716_v34 }
 0x2bc   :  { %v3531_v6 = vadd.f32 %v3530_v14, %v3490_v46  ;;  %v3580_v29 = vmul.f32 %v3490_v46, %v3196_v36  ;;  %v3920_v46 = vor.u32 %v3918_v52, %v3916_v39  ;;  %v2674_v39 = vsel %vm2540_vm6, %v2664_v4, %v2673_v22 }
 0x2bd   :  { %v11588_v52 = vrot.slane %v9658_v55, 2  ;;  %v11677_v4 = vrot.slane %v9547_v7, 3 }
 0x2be   :  { %v3621_v8 = vadd.f32 %v3620_v53, %v3580_v29  ;;  %v2407_v14 = vpop.f32.mrf.mxu2 }
 0x2bf   :  { %v3102_v36 = vpop.f32.mrf.mxu0  ;;  %v2500_v48 = vadd.f32 %v2407_v14, %v8928_v33  ;;  %v9714_v33 = vld [vmem:[%s11567_s0 + $0x88] sm:$0xff] }
 0x2c0   :  { %v3197_v32 = vadd.f32 %v3102_v36, %v2925_v59  ;;  %v3925_v59 = vsel %vm214_vm1, %v3920_v46, %v3924_v3  ;;  %v2993_v36 = vsel %vm2966_vm7, %v11677_v4, %v11589_v56  ;;  %v2679_v7 = vshll.u32 %v9714_v33, 16  ;;  %v9751_v56 = vpop.permute.xlu0 %3321 }
 0x2c1   :  { %v2926_v61 = vadd.f32 %v2833_v60, %v2500_v48  ;;  %v9731_v60 = vld [vmem:[%s11567_s0 + $0x12c] sm:$0xff]  ;;  %v2676_v48 = vshrl.u32 %v9714_v33, 16  ;;  %11679 = vst [vmem:[#allocation20_spill] sm:$0xff] %v9751_v56 }
 0x2c2   :  { %3239 = vst [vmem:[%s11569_s3 + $0x38] sm:$0xff] %v3197_v32  ;;  %v3491_v57 = vmul.f32 %v9695_v13, %v3197_v32  ;;  %v2835_v53 = vpop.f32.mrf.mxu3  ;;  %v3930_v4 = vshll.u32 %v9731_v60, 16 }
 0x2c3   :  { %v9706_v29 = vpop.f32.mrf.mxu1 }
 0x2c4   :  { %v3532_v1 = vadd.f32 %v3531_v6, %v3491_v57  ;;  %v3581_v58 = vmul.f32 %v3491_v57, %v3197_v32  ;;  %v41_v6 = vld [vmem:[%s11568_s2 + $0xb8] sm:$0xff] }
 0x2c5   :  { %3391 = vperm.xlu2 %8240, %v41_v6  }
 0x2c6   :  { %v3622_v37 = vadd.f32 %v3621_v8, %v3581_v58  ;;  %v2409_v12 = vpop.f32.mrf.mxu2  ;;  %7631 = vmatmul.msk.bf16.gmra.mxu1 %vm387_vm2, %v3925_v59  ;;  %v11678_v8 = vrot.slane %v9604_v2, 2 }
 0x2c7   :  { %v3105_v14 = vpop.f32.mrf.mxu0  ;;  %7465 = vmatmul.msk.bf16.gmra.mxu3 %vm387_vm2, %v2674_v39  ;;  %v2501_v57 = vadd.f32 %v2409_v12, %v8941_v50  ;;  %v2678_v50 = vrot.slane %v2676_v48, 2  ;;  %v2681_v12 = vrot.slane %v2679_v7, 3  ;;  %v11593_v48 = vrot.slane %v9658_v55, 3 }
 0x2c8   :  { %v3198_v32 = vadd.f32 %v3105_v14, %v2926_v61  ;;  %v2297_v46 = vsel %vm1850_vm4, %v11678_v8, %v11588_v52  ;;  %v3926_v14 = vshrl.u32 %v9675_v47, 16 }
 0x2c9   :  { %v2927_v52 = vadd.f32 %v2835_v53, %v2501_v57  ;;  %v2682_v13 = vor.u32 %v2681_v12, %v2678_v50  ;;  %v9772_v12 = vpop.permute.xlu1 %3326 }
 0x2ca   :  { %3240 = vst [vmem:[%s11569_s3 + $0x40] sm:$0xff] %v3198_v32  ;;  %v3492_v58 = vmul.f32 %v9716_v34, %v3198_v32  ;;  %7486 = vmatmul.msk.bf16.gmra.mxu0 %vm387_vm2, %v2993_v36  ;;  %v2838_v59 = vpop.f32.mrf.mxu3  ;;  %v45_v36 = vld [vmem:[%s11568_s2 + $0xd8] sm:$0xff]  ;;  %v3932_v34 = vrot.slane %v3930_v4, 1 }
 0x2cb   :  { %7443 = vmatmul.msk.bf16.gmra.mxu2 %vm387_vm2, %v2297_v46  ;;  %v9747_v6 = vpop.f32.mrf.mxu1  ;;  %3411 = vperm.xlu0 %8238, %v45_v36   ;;  %11680 = vst [vmem:[#allocation21_spill] sm:$0xff] %v9772_v12 }
 0x2cc   :  { %v3533_v39 = vadd.f32 %v3532_v1, %v3492_v58  ;;  %v3582_v61 = vmul.f32 %v3492_v58, %v3198_v32  ;;  %v3928_v58 = vor.u32 %v3926_v14, %v3924_v3  ;;  %v2683_v3 = vsel %vm2540_vm6, %v2673_v22, %v2682_v13 }
 0x2cd   :  { %v11592_v14 = vrot.slane %v9714_v33, 2  ;;  %v11681_v22 = vrot.slane %v9604_v2, 3 }
 0x2ce   :  { %v3623_v8 = vadd.f32 %v3622_v37, %v3582_v61  ;;  %v2412_v1 = vpop.f32.mrf.mxu2 }
 0x2cf   :  { %v3107_v32 = vpop.f32.mrf.mxu0  ;;  %v2502_v47 = vadd.f32 %v2412_v1, %v8954_v24  ;;  %v9770_v24 = vld [vmem:[%s11567_s0 + $0x90] sm:$0xff] }
 0x2d0   :  { %v3199_v46 = vadd.f32 %v3107_v32, %v2927_v52  ;;  %v3933_v52 = vsel %vm214_vm1, %v3928_v58, %v3932_v34  ;;  %v2995_v32 = vsel %vm2966_vm7, %v11681_v22, %v11593_v48  ;;  %v2688_v2 = vshll.u32 %v9770_v24, 16  ;;  %v9807_v48 = vpop.permute.xlu2 %3331 }
 0x2d1   :  { %v2928_v50 = vadd.f32 %v2838_v59, %v2502_v47  ;;  %v9787_v59 = vld [vmem:[%s11567_s0 + $0x134] sm:$0xff]  ;;  %v2685_v47 = vshrl.u32 %v9770_v24, 16  ;;  %11683 = vst [vmem:[#allocation22_spill] sm:$0xff] %v9807_v48 }
 0x2d2   :  { %3241 = vst [vmem:[%s11569_s3 + $0x48] sm:$0xff] %v3199_v46  ;;  %v3493_v53 = vmul.f32 %v9751_v56, %v3199_v46  ;;  %v2840_v37 = vpop.f32.mrf.mxu3  ;;  %v3938_v22 = vshll.u32 %v9787_v59, 16 }
 0x2d3   :  { %v9762_v61 = vpop.f32.mrf.mxu1 }
 0x2d4   :  { %v3534_v7 = vadd.f32 %v3533_v39, %v3493_v53  ;;  %v3583_v57 = vmul.f32 %v3493_v53, %v3199_v46  ;;  %v46_v39 = vld [vmem:[%s11568_s2 + $0xe0] sm:$0xff] }
 0x2d5   :  { %3416 = vperm.xlu1 %8239, %v46_v39  }
 0x2d6   :  { %v3624_v4 = vadd.f32 %v3623_v8, %v3583_v57  ;;  %v2414_v36 = vpop.f32.mrf.mxu2  ;;  %7632 = vmatmul.msk.bf16.gmra.mxu1 %vm387_vm2, %v3933_v52  ;;  %v11682_v8 = vrot.slane %v9658_v55, 2 }
 0x2d7   :  { %v3110_v1 = vpop.f32.mrf.mxu0  ;;  %7466 = vmatmul.msk.bf16.gmra.mxu3 %vm387_vm2, %v2683_v3  ;;  %v2503_v53 = vadd.f32 %v2414_v36, %v8967_v26  ;;  %v2687_v26 = vrot.slane %v2685_v47, 2  ;;  %v2690_v36 = vrot.slane %v2688_v2, 3  ;;  %v11597_v47 = vrot.slane %v9714_v33, 3 }
 0x2d8   :  { %v3200_v46 = vadd.f32 %v3110_v1, %v2928_v50  ;;  %v2299_v58 = vsel %vm1850_vm4, %v11682_v8, %v11592_v14  ;;  %v3934_v1 = vshrl.u32 %v9731_v60, 16 }
 0x2d9   :  { %v2929_v14 = vadd.f32 %v2840_v37, %v2503_v53  ;;  %v2691_v56 = vor.u32 %v2690_v36, %v2687_v26  ;;  %v9828_v36 = vpop.permute.xlu0 %3336 }
 0x2da   :  { %3242 = vst [vmem:[%s11569_s3 + $0x50] sm:$0xff] %v3200_v46  ;;  %v3494_v57 = vmul.f32 %v9772_v12, %v3200_v46  ;;  %7487 = vmatmul.msk.bf16.gmra.mxu0 %vm387_vm2, %v2995_v32  ;;  %v2843_v52 = vpop.f32.mrf.mxu3  ;;  %v44_v32 = vld [vmem:[%s11568_s2 + $0xd0] sm:$0xff]  ;;  %v3940_v12 = vrot.slane %v3938_v22, 1 }
 0x2db   :  { %7444 = vmatmul.msk.bf16.gmra.mxu2 %vm387_vm2, %v2299_v58  ;;  %v9803_v39 = vpop.f32.mrf.mxu1  ;;  %3406 = vperm.xlu2 %8240, %v44_v32   ;;  %11684 = vst [vmem:[#allocation23_spill] sm:$0xff] %v9828_v36 }
 0x2dc   :  { %v3535_v3 = vadd.f32 %v3534_v7, %v3494_v57  ;;  %v3584_v50 = vmul.f32 %v3494_v57, %v3200_v46  ;;  %v3936_v57 = vor.u32 %v3934_v1, %v3932_v34  ;;  %v2692_v34 = vsel %vm2540_vm6, %v2682_v13, %v2691_v56 }
 0x2dd   :  { %v11596_v1 = vrot.slane %v9770_v24, 2  ;;  %v11685_v13 = vrot.slane %v9658_v55, 3 }
 0x2de   :  { %v3625_v8 = vadd.f32 %v3624_v4, %v3584_v50  ;;  %v2417_v7 = vpop.f32.mrf.mxu2 }
 0x2df   :  { %v3112_v46 = vpop.f32.mrf.mxu0  ;;  %v2504_v60 = vadd.f32 %v2417_v7, %v8980_v28  ;;  %v9826_v28 = vld [vmem:[%s11567_s0 + $0x98] sm:$0xff] }
 0x2e0   :  { %v3201_v58 = vadd.f32 %v3112_v46, %v2929_v14  ;;  %v3941_v14 = vsel %vm214_vm1, %v3936_v57, %v3940_v12  ;;  %v2997_v46 = vsel %vm2966_vm7, %v11685_v13, %v11597_v47  ;;  %v2697_v55 = vshll.u32 %v9826_v28, 16  ;;  %v9863_v47 = vpop.permute.xlu1 %3341 }
 0x2e1   :  { %v2930_v26 = vadd.f32 %v2843_v52, %v2504_v60  ;;  %v9843_v52 = vld [vmem:[%s11567_s0 + $0x13c] sm:$0xff]  ;;  %v2694_v60 = vshrl.u32 %v9826_v28, 16  ;;  %11687 = vst [vmem:[#allocation24_spill] sm:$0xff] %v9863_v47 }
 0x2e2   :  { %3243 = vst [vmem:[%s11569_s3 + $0x58] sm:$0xff] %v3201_v58  ;;  %v3495_v37 = vmul.f32 %v9807_v48, %v3201_v58  ;;  %v2845_v4 = vpop.f32.mrf.mxu3  ;;  %v3946_v13 = vshll.u32 %v9843_v52, 16 }
 0x2e3   :  { %v9818_v50 = vpop.f32.mrf.mxu1 }
 0x2e4   :  { %v3536_v2 = vadd.f32 %v3535_v3, %v3495_v37  ;;  %v3585_v53 = vmul.f32 %v3495_v37, %v3201_v58  ;;  %v48_v3 = vld [vmem:[%s11568_s2 + $0xf0] sm:$0xff] }
 0x2e5   :  { %3426 = vperm.xlu0 %8238, %v48_v3  }
 0x2e6   :  { %v3626_v22 = vadd.f32 %v3625_v8, %v3585_v53  ;;  %v2419_v32 = vpop.f32.mrf.mxu2  ;;  %7633 = vmatmul.msk.bf16.gmra.mxu1 %vm387_vm2, %v3941_v14  ;;  %v11686_v8 = vrot.slane %v9714_v33, 2 }
 0x2e7   :  { %v3115_v7 = vpop.f32.mrf.mxu0  ;;  %7467 = vmatmul.msk.bf16.gmra.mxu3 %vm387_vm2, %v2692_v34  ;;  %v2505_v37 = vadd.f32 %v2419_v32, %v8993_v38  ;;  %v2696_v38 = vrot.slane %v2694_v60, 2  ;;  %v2699_v32 = vrot.slane %v2697_v55, 3  ;;  %v11601_v60 = vrot.slane %v9770_v24, 3 }
 0x2e8   :  { %v3202_v58 = vadd.f32 %v3115_v7, %v2930_v26  ;;  %v2301_v57 = vsel %vm1850_vm4, %v11686_v8, %v11596_v1  ;;  %v3942_v7 = vshrl.u32 %v9787_v59, 16 }
 0x2e9   :  { %v2931_v1 = vadd.f32 %v2845_v4, %v2505_v37  ;;  %v2700_v48 = vor.u32 %v2699_v32, %v2696_v38  ;;  %v9884_v32 = vpop.permute.xlu2 %3346 }
 0x2ea   :  { %3244 = vst [vmem:[%s11569_s3 + $0x60] sm:$0xff] %v3202_v58  ;;  %v3496_v53 = vmul.f32 %v9828_v36, %v3202_v58  ;;  %7488 = vmatmul.msk.bf16.gmra.mxu0 %vm387_vm2, %v2997_v46  ;;  %v2848_v14 = vpop.f32.mrf.mxu3  ;;  %v49_v46 = vld [vmem:[%s11568_s2 + $0xf8] sm:$0xff]  ;;  %v3948_v36 = vrot.slane %v3946_v13, 1 }
 0x2eb   :  { %7445 = vmatmul.msk.bf16.gmra.mxu2 %vm387_vm2, %v2301_v57  ;;  %v9859_v3 = vpop.f32.mrf.mxu1  ;;  %3431 = vperm.xlu1 %8239, %v49_v46   ;;  %11688 = vst [vmem:[#allocation25_spill] sm:$0xff] %v9884_v32 }
 0x2ec   :  { %v3537_v34 = vadd.f32 %v3536_v2, %v3496_v53  ;;  %v3586_v26 = vmul.f32 %v3496_v53, %v3202_v58  ;;  %v3944_v53 = vor.u32 %v3942_v7, %v3940_v12  ;;  %v2701_v12 = vsel %vm2540_vm6, %v2691_v56, %v2700_v48 }
 0x2ed   :  { %v11600_v7 = vrot.slane %v9826_v28, 2  ;;  %v11689_v56 = vrot.slane %v9714_v33, 3 }
 0x2ee   :  { %v3627_v8 = vadd.f32 %v3626_v22, %v3586_v26  ;;  %v2422_v2 = vpop.f32.mrf.mxu2 }
 0x2ef   :  { %v3117_v58 = vpop.f32.mrf.mxu0  ;;  %v2506_v59 = vadd.f32 %v2422_v2, %v9006_v11  ;;  %v9882_v11 = vld [vmem:[%s11567_s0 + $0xa0] sm:$0xff] }
 0x2f0   :  { %v3203_v57 = vadd.f32 %v3117_v58, %v2931_v1  ;;  %v3949_v1 = vsel %vm214_vm1, %v3944_v53, %v3948_v36  ;;  %v2999_v58 = vsel %vm2966_vm7, %v11689_v56, %v11601_v60  ;;  %v2706_v33 = vshll.u32 %v9882_v11, 16  ;;  %v9919_v60 = vpop.permute.xlu0 %3351 }
 0x2f1   :  { %v2932_v38 = vadd.f32 %v2848_v14, %v2506_v59  ;;  %v9899_v14 = vld [vmem:[%s11567_s0 + $0x144] sm:$0xff]  ;;  %v2703_v59 = vshrl.u32 %v9882_v11, 16  ;;  %11691 = vst [vmem:[#allocation26_spill] sm:$0xff] %v9919_v60 }
 0x2f2   :  { %3245 = vst [vmem:[%s11569_s3 + $0x68] sm:$0xff] %v3203_v57  ;;  %v3497_v4 = vmul.f32 %v9863_v47, %v3203_v57  ;;  %v2850_v22 = vpop.f32.mrf.mxu3  ;;  %v3954_v56 = vshll.u32 %v9899_v14, 16 }
 0x2f3   :  { %v9874_v26 = vpop.f32.mrf.mxu1 }
 0x2f4   :  { %v3538_v55 = vadd.f32 %v3537_v34, %v3497_v4  ;;  %v3587_v37 = vmul.f32 %v3497_v4, %v3203_v57  ;;  %v47_v34 = vld [vmem:[%s11568_s2 + $0xe8] sm:$0xff] }
 0x2f5   :  { %3421 = vperm.xlu2 %8240, %v47_v34  }
 0x2f6   :  { %v3628_v13 = vadd.f32 %v3627_v8, %v3587_v37  ;;  %v2424_v46 = vpop.f32.mrf.mxu2  ;;  %7634 = vmatmul.msk.bf16.gmra.mxu1 %vm387_vm2, %v3949_v1  ;;  %v11690_v8 = vrot.slane %v9770_v24, 2 }
 0x2f7   :  { %v3120_v2 = vpop.f32.mrf.mxu0  ;;  %7468 = vmatmul.msk.bf16.gmra.mxu3 %vm387_vm2, %v2701_v12  ;;  %v2507_v4 = vadd.f32 %v2424_v46, %v9019_v42  ;;  %v2705_v42 = vrot.slane %v2703_v59, 2  ;;  %v2708_v46 = vrot.slane %v2706_v33, 3  ;;  %v11605_v59 = vrot.slane %v9826_v28, 3 }
 0x2f8   :  { %v3204_v57 = vadd.f32 %v3120_v2, %v2932_v38  ;;  %v2303_v53 = vsel %vm1850_vm4, %v11690_v8, %v11600_v7  ;;  %v3950_v2 = vshrl.u32 %v9843_v52, 16 }
 0x2f9   :  { %v2933_v7 = vadd.f32 %v2850_v22, %v2507_v4  ;;  %v2709_v47 = vor.u32 %v2708_v46, %v2705_v42  ;;  %v9940_v46 = vpop.permute.xlu1 %3356 }
 0x2fa   :  { %3246 = vst [vmem:[%s11569_s3 + $0x70] sm:$0xff] %v3204_v57  ;;  %v3498_v37 = vmul.f32 %v9884_v32, %v3204_v57  ;;  %7489 = vmatmul.msk.bf16.gmra.mxu0 %vm387_vm2, %v2999_v58  ;;  %v2853_v1 = vpop.f32.mrf.mxu3  ;;  %v51_v58 = vld [vmem:[%s11568_s2 + $0x108] sm:$0xff]  ;;  %v3956_v32 = vrot.slane %v3954_v56, 1 }
 0x2fb   :  { %7446 = vmatmul.msk.bf16.gmra.mxu2 %vm387_vm2, %v2303_v53  ;;  %v9915_v34 = vpop.f32.mrf.mxu1  ;;  %3441 = vperm.xlu0 %8238, %v51_v58   ;;  %11693 = vst [vmem:[#allocation28_spill] sm:$0xff] %v9940_v46 }
 0x2fc   :  { %v3539_v12 = vadd.f32 %v3538_v55, %v3498_v37  ;;  %v3588_v38 = vmul.f32 %v3498_v37, %v3204_v57  ;;  %v3952_v37 = vor.u32 %v3950_v2, %v3948_v36  ;;  %v2710_v36 = vsel %vm2540_vm6, %v2700_v48, %v2709_v47 }
 0x2fd   :  { %v11604_v2 = vrot.slane %v9882_v11, 2  ;;  %v11694_v48 = vrot.slane %v9770_v24, 3 }
 0x2fe   :  { %v3629_v8 = vadd.f32 %v3628_v13, %v3588_v38  ;;  %v2427_v55 = vpop.f32.mrf.mxu2 }
 0x2ff   :  { %v3122_v57 = vpop.f32.mrf.mxu0  ;;  %v2508_v52 = vadd.f32 %v2427_v55, %v9032_v54  ;;  %v9938_v54 = vld [vmem:[%s11567_s0 + $0xa8] sm:$0xff] }
 0x300   :  { %v3205_v53 = vadd.f32 %v3122_v57, %v2933_v7  ;;  %v3957_v7 = vsel %vm214_vm1, %v3952_v37, %v3956_v32  ;;  %v3001_v57 = vsel %vm2966_vm7, %v11694_v48, %v11605_v59  ;;  %v2715_v24 = vshll.u32 %v9938_v54, 16  ;;  %v9975_v59 = vpop.permute.xlu2 %3361 }
 0x301   :  { %v2934_v42 = vadd.f32 %v2853_v1, %v2508_v52  ;;  %v9955_v1 = vld [vmem:[%s11567_s0 + $0x14c] sm:$0xff]  ;;  %v2712_v52 = vshrl.u32 %v9938_v54, 16  ;;  %11697 = vst [vmem:[#allocation30_spill] sm:$0xff] %v9975_v59 }
 0x302   :  { %3247 = vst [vmem:[%s11569_s3 + $0x78] sm:$0xff] %v3205_v53  ;;  %v3499_v22 = vmul.f32 %v9919_v60, %v3205_v53  ;;  %v2855_v13 = vpop.f32.mrf.mxu3  ;;  %v3962_v48 = vshll.u32 %v9955_v1, 16 }
 0x303   :  { %v9930_v38 = vpop.f32.mrf.mxu1 }
 0x304   :  { %v3540_v33 = vadd.f32 %v3539_v12, %v3499_v22  ;;  %v3589_v4 = vmul.f32 %v3499_v22, %v3205_v53  ;;  %11692 = vst [vmem:[#allocation27_spill] sm:$0xff] %v9930_v38  ;;  %v52_v12 = vld [vmem:[%s11568_s2 + $0x110] sm:$0xff] }
 0x305   :  { %3446 = vperm.xlu1 %8239, %v52_v12  }
 0x306   :  { %v3630_v56 = vadd.f32 %v3629_v8, %v3589_v4  ;;  %v2429_v58 = vpop.f32.mrf.mxu2  ;;  %7635 = vmatmul.msk.bf16.gmra.mxu1 %vm387_vm2, %v3957_v7  ;;  %v11695_v8 = vrot.slane %v9826_v28, 2 }
 0x307   :  { %v3125_v55 = vpop.f32.mrf.mxu0  ;;  %7469 = vmatmul.msk.bf16.gmra.mxu3 %vm387_vm2, %v2710_v36  ;;  %v2509_v22 = vadd.f32 %v2429_v58, %v9045_v17  ;;  %v2714_v17 = vrot.slane %v2712_v52, 2  ;;  %v2717_v58 = vrot.slane %v2715_v24, 3  ;;  %v11609_v52 = vrot.slane %v9882_v11, 3 }
 0x308   :  { %v3206_v53 = vadd.f32 %v3125_v55, %v2934_v42  ;;  %v2305_v37 = vsel %vm1850_vm4, %v11695_v8, %v11604_v2  ;;  %v3958_v55 = vshrl.u32 %v9899_v14, 16  ;;  %v11698_v14 = vld [vmem:[#allocation6_spill] sm:$0xff] }
 0x309   :  { %v2935_v2 = vadd.f32 %v2855_v13, %v2509_v22  ;;  %v9980_v60 = vor.u32 %v2717_v58, %v2714_v17 }
 0x30a   :  { %3248 = vst [vmem:[%s11569_s3 + $0x80] sm:$0xff] %v3206_v53  ;;  %v3500_v4 = vmul.f32 %v9940_v46, %v3206_v53  ;;  %7490 = vmatmul.msk.bf16.gmra.mxu0 %vm387_vm2, %v3001_v57  ;;  %v2858_v7 = vpop.f32.mrf.mxu3  ;;  %v50_v57 = vld [vmem:[%s11568_s2 + $0x100] sm:$0xff]  ;;  %v3964_v46 = vrot.slane %v3962_v48, 1  ;;  %v9997_v48 = vld [vmem:[%s11567_s0 + $0xb0] sm:$0xff] }
 0x30b   :  { %7447 = vmatmul.msk.bf16.gmra.mxu2 %vm387_vm2, %v2305_v37  ;;  %v9971_v12 = vpop.f32.mrf.mxu1  ;;  %3436 = vperm.xlu2 %8240, %v50_v57   ;;  %v9999_v57 = vpop.permute.xlu0 %3366 }
 0x30c   :  { %v3541_v36 = vadd.f32 %v3540_v33, %v3500_v4  ;;  %v3590_v42 = vmul.f32 %v3500_v4, %v3206_v53  ;;  %11696 = vst [vmem:[#allocation29_spill] sm:$0xff] %v9971_v12  ;;  %v3960_v4 = vor.u32 %v3958_v55, %v3956_v32  ;;  %v11608_v55 = vrot.slane %v9938_v54, 2 }
 0x30d   :  { %11700 = vst [vmem:[#allocation31_spill] sm:$0xff] %v9999_v57 }
 0x30e   :  { %v3631_v8 = vadd.f32 %v3630_v56, %v3590_v42  ;;  %v2432_v33 = vpop.f32.mrf.mxu2  ;;  %v3965_v32 = vsel %vm214_vm1, %v3960_v4, %v3964_v46 }
 0x30f   :  { %v3127_v53 = vpop.f32.mrf.mxu0  ;;  %v2510_v12 = vadd.f32 %v2432_v33, %v11698_v14  ;;  %v2721_v14 = vshrl.u32 %v9997_v48, 16 }
 0x310   :  { %v3207_v37 = vadd.f32 %v3127_v53, %v2935_v2  ;;  %v2719_v2 = vsel %vm2540_vm6, %v2709_v47, %v9980_v60  ;;  %v11701_v47 = vrot.slane %v9826_v28, 3  ;;  %v2724_v28 = vshll.u32 %v9997_v48, 16 }
 0x311   :  { %v2936_v58 = vadd.f32 %v2858_v7, %v2510_v12  ;;  %v10014_v7 = vld [vmem:[%s11567_s0 + $0x154] sm:$0xff]  ;;  %v11702_v12 = vrot.slane %v9882_v11, 2 }
 0x312   :  { %3249 = vst [vmem:[%s11569_s3 + $0x88] sm:$0xff] %v3207_v37  ;;  %v3501_v13 = vmul.f32 %v9975_v59, %v3207_v37  ;;  %v2860_v56 = vpop.f32.mrf.mxu3  ;;  %v10034_v59 = vpop.permute.xlu1 %3371 }
 0x313   :  { %v9988_v42 = vpop.f32.mrf.mxu1  ;;  %11705 = vst [vmem:[#allocation32_spill] sm:$0xff] %v10034_v59 }
 0x314   :  { %v3542_v24 = vadd.f32 %v3541_v36, %v3501_v13  ;;  %v3591_v22 = vmul.f32 %v3501_v13, %v3207_v37  ;;  %11699 = vst [vmem:[#allocation6_spill] sm:$0xff] %v9988_v42  ;;  %v54_v36 = vld [vmem:[%s11568_s2 + $0x120] sm:$0xff]  ;;  %v3003_v37 = vsel %vm2966_vm7, %v11701_v47, %v11609_v52  ;;  %v11703_v13 = vld [vmem:[#allocation7_spill] sm:$0xff]  ;;  %v3966_v47 = vshrl.u32 %v9955_v1, 16 }
 0x315   :  { %3456 = vperm.xlu0 %8238, %v54_v36  }
 0x316   :  { %v3632_v17 = vadd.f32 %v3631_v8, %v3591_v22  ;;  %v2434_v33 = vpop.f32.mrf.mxu2  ;;  %7636 = vmatmul.msk.bf16.gmra.mxu1 %vm387_vm2, %v3965_v32  ;;  %v2307_v8 = vsel %vm1850_vm4, %v11702_v12, %v11608_v55  ;;  %v3970_v12 = vshll.u32 %v10014_v7, 16 }
 0x317   :  { %v3130_v53 = vpop.f32.mrf.mxu0  ;;  %7470 = vmatmul.msk.bf16.gmra.mxu3 %vm387_vm2, %v2719_v2  ;;  %v2511_v22 = vadd.f32 %v2434_v33, %v11703_v13  ;;  %v2723_v33 = vrot.slane %v2721_v14, 2  ;;  %v2726_v13 = vrot.slane %v2724_v28, 3 }
 0x318   :  { %v3208_v4 = vadd.f32 %v3130_v53, %v2936_v58 }
 0x319   :  { %v2937_v52 = vadd.f32 %v2860_v56, %v2511_v22  ;;  %v10042_v14 = vor.u32 %v2726_v13, %v2723_v33  ;;  %v11706_v56 = vld [vmem:[#allocation8_spill] sm:$0xff] }
 0x31a   :  { %3250 = vst [vmem:[%s11569_s3 + $0x90] sm:$0xff] %v3208_v4  ;;  %v3502_v32 = vmul.f32 %v9999_v57, %v3208_v4  ;;  %7491 = vmatmul.msk.bf16.gmra.mxu0 %vm387_vm2, %v3003_v37  ;;  %v2863_v2 = vpop.f32.mrf.mxu3  ;;  %v2534_v37 = vld [vmem:[%s11567_s0 + $0xb8] sm:$0x7]  ;;  %v3972_v57 = vrot.slane %v3970_v12, 1 }
 0x31b   :  { %7448 = vmatmul.msk.bf16.gmra.mxu2 %vm387_vm2, %v2307_v8  ;;  %v10030_v53 = vpop.f32.mrf.mxu1 }
 0x31c   :  { %v3543_v58 = vadd.f32 %v3542_v24, %v3502_v32  ;;  %v3592_v36 = vmul.f32 %v3502_v32, %v3208_v4  ;;  %11704 = vst [vmem:[#allocation7_spill] sm:$0xff] %v10030_v53  ;;  %v55_v24 = vld [vmem:[%s11568_s2 + $0x128] sm:$0xff]  ;;  %v3968_v32 = vor.u32 %v3966_v47, %v3964_v46  ;;  %v11613_v53 = vrot.slane %v9938_v54, 3 }
 0x31d   :  { %3461 = vperm.xlu1 %8239, %v55_v24   ;;  %v11612_v47 = vrot.slane %v9997_v48, 2 }
 0x31e   :  { %v3633_v55 = vadd.f32 %v3632_v17, %v3592_v36  ;;  %v2437_v4 = vpop.f32.mrf.mxu2  ;;  %v2538_v17 = vunpack.c.l.b16 %v2534_v37  ;;  %v3973_v46 = vsel %vm214_vm1, %v3968_v32, %v3972_v57  ;;  %v10059_v37 = vpop.permute.xlu2 %3376 }
 0x31f   :  { %v3132_v8 = vpop.f32.mrf.mxu0  ;;  %v2512_v28 = vadd.f32 %v2437_v4, %v11706_v56  ;;  %11708 = vst [vmem:[#allocation33_spill] sm:$0xff] %v10059_v37  ;;  %v11711_v56 = vld [vmem:[#allocation9_spill] sm:$0xff] }
 0x320   :  { %v3209_v1 = vadd.f32 %v3132_v8, %v2937_v52  ;;  %v2728_v52 = vsel %vm2540_vm6, %v9980_v60, %v10042_v14  ;;  %v10057_v12 = vpack.c.b16 %v2538_v17, %v2538_v17  ;;  %v11709_v60 = vrot.slane %v9882_v11, 3 }
 0x321   :  { %v2938_v13 = vadd.f32 %v2863_v2, %v2512_v28 }
 0x322   :  { %3251 = vst [vmem:[%s11569_s3 + $0x98] sm:$0xff] %v3209_v1  ;;  %v3503_v22 = vmul.f32 %v10034_v59, %v3209_v1  ;;  %v2865_v36 = vpop.f32.mrf.mxu3  ;;  %v2730_v17 = vshrl.u32 %v10057_v12, 16  ;;  %v2733_v11 = vshll.u32 %v10057_v12, 16 }
 0x323   :  { %v10050_v24 = vpop.f32.mrf.mxu1 }
 0x324   :  { %v3544_v42 = vadd.f32 %v3543_v58, %v3503_v22  ;;  %v3593_v38 = vmul.f32 %v3503_v22, %v3209_v1  ;;  %11707 = vst [vmem:[#allocation8_spill] sm:$0xff] %v10050_v24  ;;  %v53_v58 = vld [vmem:[%s11568_s2 + $0x118] sm:$0xff]  ;;  %v3005_v1 = vsel %vm2966_vm7, %v11709_v60, %v11613_v53 }
 0x325   :  { %3451 = vperm.xlu2 %8240, %v53_v58  }
 0x326   :  { %v3634_v33 = vadd.f32 %v3633_v55, %v3593_v38  ;;  %v2439_v4 = vpop.f32.mrf.mxu2  ;;  %7637 = vmatmul.msk.bf16.gmra.mxu1 %vm387_vm2, %v3973_v46  ;;  %v10074_v38 = vld [vmem:[%s11567_s0 + $0x15c] sm:$0xff]  ;;  %v11710_v55 = vrot.slane %v9938_v54, 2  ;;  %v2158_v46 = vld [vmem:[%s11567_s0 + $0xb8] sm:$0x3] }
 0x327   :  { %v3135_v8 = vpop.f32.mrf.mxu0  ;;  %7471 = vmatmul.msk.bf16.gmra.mxu3 %vm387_vm2, %v2728_v52  ;;  %v2513_v28 = vadd.f32 %v2439_v4, %v11711_v56  ;;  %v3974_v4 = vshrl.u32 %v10014_v7, 16  ;;  %v3978_v60 = vshll.u32 %v10074_v38, 16  ;;  %v2735_v56 = vrot.slane %v2733_v11, 3 }
 0x328   :  { %v3210_v32 = vadd.f32 %v3135_v8, %v2938_v13  ;;  %v2309_v2 = vsel %vm1850_vm4, %v11710_v55, %v11612_v47  ;;  %v2732_v55 = vrot.slane %v2730_v17, 2  ;;  %v2246_v47 = vunpack.c.l.b16 %v2158_v46 }
 0x329   :  { %v3976_v59 = vor.u32 %v3974_v4, %v3972_v57  ;;  %v7853_v57 = vld [vmem:[%s11566_s1 + $0xa] sm:$0x3]  ;;  %v11616_v46 = vrot.slane %v9997_v48, 3 }
 0x32a   :  { %3252 = vst [vmem:[%s11569_s3 + $0xa0] sm:$0xff] %v3210_v32  ;;  %v3504_v22 = vmul.f32 %v10059_v37, %v3210_v32  ;;  %7492 = vmatmul.msk.bf16.gmra.mxu0 %vm387_vm2, %v3005_v1  ;;  %v2868_v52 = vpop.f32.mrf.mxu3  ;;  %v2939_v1 = vadd.f32 %v2865_v36, %v2513_v28  ;;  %v10097_v37 = vpop.permute.xlu0 %3381  ;;  %v2736_v7 = vor.u32 %v2735_v56, %v2732_v55  ;;  %v11714_v36 = vld [vmem:[#allocation10_spill] sm:$0xff] }
 0x32b   :  { %7449 = vmatmul.msk.bf16.gmra.mxu2 %vm387_vm2, %v2309_v2  ;;  %v10093_v8 = vpop.f32.mrf.mxu1  ;;  %11713 = vst [vmem:[#allocation34_spill] sm:$0xff] %v10097_v37  ;;  %v2268_v24 = vpack.c.b16 %v2246_v47, %v2246_v47  ;;  %v5552_v47 = vsel %vm451_vm0, %v7853_v57, 0 }
 0x32c   :  { %v3545_v13 = vadd.f32 %v3544_v42, %v3504_v22  ;;  %v3594_v58 = vmul.f32 %v3504_v22, %v3210_v32  ;;  %11712 = vst [vmem:[#allocation9_spill] sm:$0xff] %v10093_v8  ;;  %v57_v42 = vld [vmem:[%s11568_s2 + $0x138] sm:$0xff]  ;;  %v10102_v8 = vrot.slane %v3978_v60, 1  ;;  %5561 = vmatpush.bf16.msra.mxu2 %v5552_v47 }
 0x32d   :  { %3471 = vperm.xlu0 %8238, %v57_v42   ;;  %v2310_v42 = vrot.slane %v2268_v24, 2 }
 0x32e   :  { %v3635_v53 = vadd.f32 %v3634_v33, %v3594_v58  ;;  %v2442_v32 = vpop.f32.mrf.mxu2  ;;  %v7537_v33 = vld [vmem:[%s11567_s0 + $0x164] sm:$0x1]  ;;  %v3981_v55 = vsel %vm214_vm1, %v3976_v59, %v10102_v8 }
 0x32f   :  { %v3137_v22 = vpop.f32.mrf.mxu0  ;;  %v2514_v17 = vadd.f32 %v2442_v32, %v11714_v36  ;;  %v3795_v56 = vunpack.c.l.b16 %v7537_v33  ;;  %v10123_v36 = vpop.permute.xlu1 %3386  ;;  %v58_v59 = vld [vmem:[%s11568_s2 + $0x140] sm:$0xff] }
 0x330   :  { %v3211_v2 = vadd.f32 %v3137_v22, %v2939_v1  ;;  %v2737_v1 = vsel %vm2540_vm6, %v10042_v14, %v2736_v7  ;;  %11715 = vst [vmem:[#allocation10_spill] sm:$0xff] %v10123_v36  ;;  %3476 = vperm.xlu1 %8239, %v58_v59   ;;  %v11719_v59 = vld [vmem:[#allocation11_spill] sm:$0xff] }
 0x331   :  { %v2940_v22 = vadd.f32 %v2868_v52, %v2514_v17  ;;  %v10142_v7 = vpack.c.b16 %v3795_v56, %v3795_v56  ;;  %v11717_v17 = vrot.slane %v9997_v48, 2 }
 0x332   :  { %3253 = vst [vmem:[%s11569_s3 + $0xa8] sm:$0xff] %v3211_v2  ;;  %v3505_v11 = vmul.f32 %v10097_v37, %v3211_v2  ;;  %v2870_v28 = vpop.f32.mrf.mxu3 }
 0x333   :  { %v10117_v60 = vpop.f32.mrf.mxu1  ;;  %v2311_v57 = vsel %vm1850_vm4, %v11717_v17, %v2310_v42  ;;  %v3982_v42 = vshrl.u32 %v10074_v38, 16  ;;  %v8021_v38 = vld [vmem:[%s11566_s1 + $0xe] sm:$0x3] }
 0x334   :  { %v3546_v58 = vadd.f32 %v3545_v13, %v3505_v11  ;;  %v3595_v4 = vmul.f32 %v3505_v11, %v3211_v2  ;;  %v8292_v13 = vld [vmem:[%s11567_s0 + $0xbc] sm:$0xe]  ;;  %v7918_v2 = vld [vmem:[%s11566_s1 + $0xc] sm:$0x3] }
 0x335   :  { %v5969_v24 = vsel %vm451_vm0, %v7918_v2, 0  ;;  %v10164_v2 = vld [vmem:[%s11567_s0 + $0xc8] sm:$0xf] }
 0x336   :  { %v3636_v32 = vadd.f32 %v3635_v53, %v3595_v4  ;;  %v2444_v33 = vpop.f32.mrf.mxu2  ;;  %7638 = vmatmul.msk.bf16.gmra.mxu1 %vm387_vm2, %v3981_v55  ;;  %v11716_v53 = vrot.slane %v9938_v54, 3  ;;  %5978 = vmatpush.bf16.msra.mxu3 %v5969_v24  ;;  %11718 = vst [vmem:[#allocation35_spill] sm:$0xff] %v10164_v2  ;;  %v56_v24 = vld [vmem:[%s11568_s2 + $0x130] sm:$0xff] }
 0x337   :  { %v3140_v11 = vpop.f32.mrf.mxu0  ;;  %7472 = vmatmul.msk.bf16.gmra.mxu3 %vm387_vm2, %v2737_v1  ;;  %v2515_v47 = vadd.f32 %v2444_v33, %v9167_v10  ;;  %v7684_v10 = vld [vmem:[%s11567_s0 + $0xc4] sm:$0xe]  ;;  %3466 = vperm.xlu2 %8240, %v56_v24  }
 0x338   :  { %v3007_v14 = vsel %vm2966_vm7, %v11716_v53, %v11616_v46  ;;  %v3212_v52 = vadd.f32 %v3140_v11, %v2940_v22  ;;  %v3986_v22 = vshll.u32 %v10142_v7, 16  ;;  %v10167_v53 = vpop.permute.xlu2 %3391  ;;  %v10185_v46 = vld [vmem:[%s11567_s0 + $0xc4] sm:$0xff] }
 0x339   :  { %v2941_v11 = vadd.f32 %v2870_v28, %v2515_v47  ;;  %11720 = vst [vmem:[#allocation11_spill] sm:$0xff] %v10167_v53  ;;  %v6393_v28 = vsel %vm451_vm0, %v8021_v38, 0 }
 0x33a   :  { %3254 = vst [vmem:[%s11569_s3 + $0xb0] sm:$0xff] %v3212_v52  ;;  %v3506_v54 = vmul.f32 %v10123_v36, %v3212_v52  ;;  %7493 = vmatmul.msk.bf16.gmra.mxu0 %vm387_vm2, %v3007_v14  ;;  %v2873_v4 = vpop.f32.mrf.mxu3  ;;  %v8044_v14 = vld [vmem:[%s11566_s1 + $0x10] sm:$0x3] }
 0x33b   :  { %7450 = vmatmul.msk.bf16.gmra.mxu2 %vm387_vm2, %v2311_v57  ;;  %v10154_v56 = vpop.f32.mrf.mxu1  ;;  %v4686_v57 = vunpack.c.l.b16 %v7684_v10  ;;  %6402 = vmatpush.bf16.msra.mxu0 %v6393_v28  ;;  %v4335_v10 = vrot.slane %v10185_v46, 1 }
 0x33c   :  { %v3547_v55 = vadd.f32 %v3546_v58, %v3506_v54  ;;  %v3596_v1 = vmul.f32 %v3506_v54, %v3212_v52  ;;  %v8293_v58 = vor.u32 %v8292_v13, %v11719_v59  ;;  %v6663_v13 = vsel %vm451_vm0, %v8044_v14, 0 }
 0x33d   :  { %v3984_v54 = vor.u32 %v3982_v42, %v10102_v8  ;;  %6672 = vmatpush.bf16.msra.mxu1 %v6663_v13  ;;  %v3008_v42 = vrot.slane %v10057_v12, 3  ;;  %v10207_v12 = vpop.permute.xlu0 %3396 }
 0x33e   :  { %v3637_v33 = vadd.f32 %v3636_v32, %v3596_v1  ;;  %v2447_v52 = vpop.f32.mrf.mxu2  ;;  %v3988_v1 = vrot.slane %v3986_v22, 1  ;;  %v4334_v59 = vrot.slane %v8293_v58, 1  ;;  %v11721_v22 = vunpack.c.l.b16 %v10164_v2  ;;  %11722 = vst [vmem:[#allocation36_spill] sm:$0xff] %v10207_v12 }
 0x33f   :  { %v3142_v17 = vpop.f32.mrf.mxu0  ;;  %v2516_v32 = vadd.f32 %v2447_v52, %v9204_v19  ;;  %v10204_v19 = vld [vmem:[%s11567_s0 + $0xcc] sm:$0xff] }
 0x340   :  { %v3213_v47 = vadd.f32 %v3142_v17, %v2941_v11  ;;  %v10196_v58 = vpack.c.b16 %v11721_v22, %v4686_v57  ;;  %v3989_v17 = vsel %vm214_vm1, %v3984_v54, %v3988_v1  ;;  %v4336_v52 = vsel %vm734_vm3, %v4334_v59, %v4335_v10 }
 0x341   :  { %v2942_v13 = vadd.f32 %v2873_v4, %v2516_v32  ;;  %v5033_v4 = vshll.u32 %v10204_v19, 16 }
 0x342   :  { %3255 = vst [vmem:[%s11569_s3 + $0xb8] sm:$0xff] %v3213_v47  ;;  %v3507_v11 = vmul.f32 %v10167_v53, %v3213_v47  ;;  %v2875_v8 = vpop.f32.mrf.mxu3  ;;  %v5022_v54 = vshrl.u32 %v10196_v58, 16  ;;  %v5025_v1 = vshll.u32 %v10196_v58, 16 }
 0x343   :  { %v10198_v24 = vpop.f32.mrf.mxu1 }
 0x344   :  { %v3548_v38 = vadd.f32 %v3547_v55, %v3507_v11  ;;  %v3597_v14 = vmul.f32 %v3507_v11, %v3213_v47  ;;  %v11723_v55 = vrot.slane %v9997_v48, 3  ;;  %v5027_v22 = vrot.slane %v5025_v1, 2 }
 0x345   :  { %v4752_v1 = vrot.slane %v10204_v19, 1 }
 0x346   :  { %v3638_v28 = vadd.f32 %v3637_v33, %v3597_v14  ;;  %v2449_v53 = vpop.f32.mrf.mxu2  ;;  %7639 = vmatmul.msk.bf16.gmra.mxu1 %vm387_vm2, %v3989_v17  ;;  %v3009_v47 = vsel %vm2966_vm7, %v11723_v55, %v3008_v42  ;;  %v5030_v33 = vshrl.u32 %v10204_v19, 16  ;;  %v5024_v42 = vrot.slane %v5022_v54, 1  ;;  %v10228_v55 = vpop.permute.xlu1 %3401 }
 0x347   :  { %v3145_v57 = vpop.f32.mrf.mxu0  ;;  %7663 = vmatmul.msk.bf16.vlgmr.msrb.gmra.mxu3 %vm387_vm2, %v4336_v52  ;;  %v2517_v32 = vadd.f32 %v2449_v53, %v9215_v41  ;;  %v5035_v41 = vrot.slane %v5033_v4, 2  ;;  %11724 = vst [vmem:[#allocation37_spill] sm:$0xff] %v10228_v55 }
 0x348   :  { %v3214_v11 = vadd.f32 %v3145_v57, %v2942_v13  ;;  %v5032_v13 = vrot.slane %v5030_v33, 1 }
 0x349   :  { %v2943_v57 = vadd.f32 %v2875_v8, %v2517_v32 }
 0x34a   :  { %3256 = vst [vmem:[%s11569_s3 + $0xc0] sm:$0xff] %v3214_v11  ;;  %v3508_v48 = vmul.f32 %v10207_v12, %v3214_v11  ;;  %7494 = vmatmul.msk.bf16.gmra.mxu0 %vm387_vm2, %v3009_v47  ;;  %v2878_v59 = vpop.f32.mrf.mxu3  ;;  %v5028_v47 = vor.u32 %v5027_v22, %v5024_v42  ;;  %v5036_v2 = vor.u32 %v5035_v41, %v5032_v13  ;;  %v10252_v22 = vpop.permute.xlu2 %3406 }
 0x34b   :  { %v10224_v52 = vpop.f32.mrf.mxu1  ;;  %7640 = vmatmul.msk.bf16.vlgmr.msrb.gmra.mxu2 %vm387_vm2, %v9156_v51  ;;  %11725 = vst [vmem:[#allocation38_spill] sm:$0xff] %v10252_v22 }
 0x34c   :  { %v3549_v14 = vadd.f32 %v3548_v38, %v3508_v48  ;;  %v3598_v17 = vmul.f32 %v3508_v48, %v3214_v11  ;;  %v10233_v38 = vld [vmem:[%s11567_s0 + $0xcc] sm:$0xff]  ;;  %v5037_v32 = vsel %vm1424_vm5, %v5028_v47, %v5036_v2 }
 0x34d   :  { %v4337_v54 = vrot.slane %v10233_v38, 1 }
 0x34e   :  { %v3639_v53 = vadd.f32 %v3638_v28, %v3598_v17  ;;  %v2452_v36 = vpop.f32.mrf.mxu2 }
 0x34f   :  { %v3147_v12 = vpop.f32.mrf.mxu0  ;;  %v2518_v51 = vadd.f32 %v2452_v36, %v9243_v0  ;;  %v10249_v0 = vld [vmem:[%s11567_s0 + $0xd4] sm:$0xff]  ;;  %v4338_v36 = vsel %vm734_vm3, %v4335_v10, %v4337_v54 }
 0x350   :  { %v3215_v37 = vadd.f32 %v3147_v12, %v2943_v57  ;;  %v4751_v12 = vrot.slane %v10196_v58, 1  ;;  %v59_v58 = vld [vmem:[%s11568_s2 + $0x148] sm:$0xff]  ;;  %v5039_v10 = vshrl.u32 %v10249_v0, 16 }
 0x351   :  { %v2944_v42 = vadd.f32 %v2878_v59, %v2518_v51  ;;  %3481 = vperm.xlu2 %8240, %v59_v58   ;;  %v5042_v59 = vshll.u32 %v10249_v0, 16 }
 0x352   :  { %3257 = vst [vmem:[%s11569_s3 + $0xc8] sm:$0xff] %v3215_v37  ;;  %v3509_v8 = vmul.f32 %v10228_v55, %v3215_v37  ;;  %v2880_v28 = vpop.f32.mrf.mxu3 }
 0x353   :  { %v10243_v4 = vpop.f32.mrf.mxu1 }
 0x354   :  { %v3550_v11 = vadd.f32 %v3549_v14, %v3509_v8  ;;  %v3599_v33 = vmul.f32 %v3509_v8, %v3215_v37  ;;  %v4753_v14 = vsel %vm734_vm3, %v4751_v12, %v4752_v1  ;;  %v5041_v8 = vrot.slane %v5039_v10, 1 }
 0x355   :  { %v5044_v12 = vrot.slane %v5042_v59, 2 }
 0x356   :  { %v3640_v48 = vadd.f32 %v3639_v53, %v3599_v33  ;;  %v2454_v37 = vpop.f32.mrf.mxu2  ;;  %7831 = vmatmul.msk.bf16.vlgmr.msrb.gmra.mxu1 %vm387_vm2, %v5037_v32  ;;  %v10272_v32 = vpop.permute.xlu0 %3411 }
 0x357   :  { %v3150_v19 = vpop.f32.mrf.mxu0  ;;  %7664 = vmatmul.msk.bf16.gmra.mxu3 %vm387_vm2, %v4338_v36  ;;  %v2519_v13 = vadd.f32 %v2454_v37, %v9251_v63  ;;  %11726 = vst [vmem:[#allocation39_spill] sm:$0xff] %v10272_v32  ;;  %v5045_v37 = vor.u32 %v5044_v12, %v5041_v8  ;;  %v10295_v12 = vpop.permute.xlu1 %3416 }
 0x358   :  { %v3216_v17 = vadd.f32 %v3150_v19, %v2944_v42  ;;  %11727 = vst [vmem:[#allocation40_spill] sm:$0xff] %v10295_v12 }
 0x359   :  { %v2945_v63 = vadd.f32 %v2880_v28, %v2519_v13  ;;  %v5046_v13 = vsel %vm1424_vm5, %v5036_v2, %v5045_v37 }
 0x35a   :  { %3258 = vst [vmem:[%s11569_s3 + $0xd0] sm:$0xff] %v3216_v17  ;;  %v3510_v41 = vmul.f32 %v10252_v22, %v3216_v17  ;;  %7808 = vmatmul.msk.bf16.vlgmr.msrb.gmra.mxu0 %vm387_vm2, %v4753_v14  ;;  %v2883_v53 = vpop.f32.mrf.mxu3 }
 0x35b   :  { %v10268_v51 = vpop.f32.mrf.mxu1  ;;  %7641 = vmatmul.msk.bf16.gmra.mxu2 %vm387_vm2, %v10185_v46 }
 0x35c   :  { %v3551_v57 = vadd.f32 %v3550_v11, %v3510_v41  ;;  %v3600_v47 = vmul.f32 %v3510_v41, %v3216_v17  ;;  %v10277_v11 = vld [vmem:[%s11567_s0 + $0xd4] sm:$0xff]  ;;  %v10292_v41 = vld [vmem:[%s11567_s0 + $0xdc] sm:$0xff] }
 0x35d   :  { %v4339_v19 = vrot.slane %v10277_v11, 1  ;;  %v5048_v2 = vshrl.u32 %v10292_v41, 16 }
 0x35e   :  { %v3641_v33 = vadd.f32 %v3640_v48, %v3600_v47  ;;  %v2457_v36 = vpop.f32.mrf.mxu2  ;;  %v4754_v48 = vrot.slane %v10249_v0, 1 }
 0x35f   :  { %v3152_v42 = vpop.f32.mrf.mxu0  ;;  %v2520_v14 = vadd.f32 %v2457_v36, %v9273_v20  ;;  %v4340_v20 = vsel %vm734_vm3, %v4337_v54, %v4339_v19 }
 0x360   :  { %v3217_v58 = vadd.f32 %v3152_v42, %v2945_v63  ;;  %v4755_v0 = vsel %vm734_vm3, %v4752_v1, %v4754_v48  ;;  %v5051_v42 = vshll.u32 %v10292_v41, 16 }
 0x361   :  { %v2946_v8 = vadd.f32 %v2883_v53, %v2520_v14 }
 0x362   :  { %3259 = vst [vmem:[%s11569_s3 + $0xd8] sm:$0xff] %v3217_v58  ;;  %v3511_v46 = vmul.f32 %v10272_v32, %v3217_v58  ;;  %v2885_v28 = vpop.f32.mrf.mxu3 }
 0x363   :  { %v10286_v59 = vpop.f32.mrf.mxu1 }
 0x364   :  { %v3552_v17 = vadd.f32 %v3551_v57, %v3511_v46  ;;  %v3601_v10 = vmul.f32 %v3511_v46, %v3217_v58  ;;  %v5050_v46 = vrot.slane %v5048_v2, 1 }
 0x366   :  { %v3642_v47 = vadd.f32 %v3641_v33, %v3601_v10  ;;  %v2459_v63 = vpop.f32.mrf.mxu2  ;;  %7832 = vmatmul.msk.bf16.gmra.mxu1 %vm387_vm2, %v5046_v13  ;;  %v5053_v10 = vrot.slane %v5051_v42, 2 }
 0x367   :  { %v3155_v36 = vpop.f32.mrf.mxu0  ;;  %7665 = vmatmul.msk.bf16.gmra.mxu3 %vm387_vm2, %v4340_v20  ;;  %v2521_v58 = vadd.f32 %v2459_v63, %v9277_v62  ;;  %v10312_v20 = vpop.permute.xlu2 %3421 }
 0x368   :  { %v3218_v57 = vadd.f32 %v3155_v36, %v2946_v8  ;;  %11728 = vst [vmem:[#allocation41_spill] sm:$0xff] %v10312_v20 }
 0x369   :  { %v2947_v62 = vadd.f32 %v2885_v28, %v2521_v58 }
 0x36a   :  { %3260 = vst [vmem:[%s11569_s3 + $0xe0] sm:$0xff] %v3218_v57  ;;  %v3512_v54 = vmul.f32 %v10295_v12, %v3218_v57  ;;  %7809 = vmatmul.msk.bf16.gmra.mxu0 %vm387_vm2, %v4755_v0  ;;  %v2888_v53 = vpop.f32.mrf.mxu3  ;;  %v5054_v12 = vor.u32 %v5053_v10, %v5050_v46 }
 0x36b   :  { %v10308_v14 = vpop.f32.mrf.mxu1  ;;  %7642 = vmatmul.msk.bf16.gmra.mxu2 %vm387_vm2, %v10233_v38 }
 0x36c   :  { %v3553_v33 = vadd.f32 %v3552_v17, %v3512_v54  ;;  %v3602_v1 = vmul.f32 %v3512_v54, %v3218_v57  ;;  %v10317_v17 = vld [vmem:[%s11567_s0 + $0xdc] sm:$0xff]  ;;  %v5055_v54 = vsel %vm1424_vm5, %v5045_v37, %v5054_v12 }
 0x36d   :  { %v4341_v0 = vrot.slane %v10317_v17, 1 }
 0x36e   :  { %v3643_v13 = vadd.f32 %v3642_v47, %v3602_v1  ;;  %v2462_v8 = vpop.f32.mrf.mxu2  ;;  %v4756_v47 = vrot.slane %v10292_v41, 1  ;;  %v10332_v1 = vld [vmem:[%s11567_s0 + $0xe4] sm:$0xff] }
 0x36f   :  { %v3157_v63 = vpop.f32.mrf.mxu0  ;;  %v2522_v57 = vadd.f32 %v2462_v8, %v9304_v45  ;;  %v4342_v45 = vsel %vm734_vm3, %v4339_v19, %v4341_v0  ;;  %v5057_v37 = vshrl.u32 %v10332_v1, 16 }
 0x370   :  { %v3219_v36 = vadd.f32 %v3157_v63, %v2947_v62  ;;  %v10335_v62 = vpop.permute.xlu0 %3426  ;;  %v4757_v41 = vsel %vm734_vm3, %v4754_v48, %v4756_v47 }
 0x371   :  { %v2948_v10 = vadd.f32 %v2888_v53, %v2522_v57  ;;  %11729 = vst [vmem:[#allocation42_spill] sm:$0xff] %v10335_v62 }
 0x372   :  { %3261 = vst [vmem:[%s11569_s3 + $0xe8] sm:$0xff] %v3219_v36  ;;  %v3513_v38 = vmul.f32 %v10312_v20, %v3219_v36  ;;  %v2890_v28 = vpop.f32.mrf.mxu3 }
 0x373   :  { %v10326_v58 = vpop.f32.mrf.mxu1 }
 0x374   :  { %v3554_v2 = vadd.f32 %v3553_v33, %v3513_v38  ;;  %v3603_v42 = vmul.f32 %v3513_v38, %v3219_v36  ;;  %v5060_v36 = vshll.u32 %v10332_v1, 16 }
 0x376   :  { %v3644_v46 = vadd.f32 %v3643_v13, %v3603_v42  ;;  %v2464_v8 = vpop.f32.mrf.mxu2  ;;  %7833 = vmatmul.msk.bf16.gmra.mxu1 %vm387_vm2, %v5055_v54  ;;  %v5059_v42 = vrot.slane %v5057_v37, 1  ;;  %v5062_v54 = vrot.slane %v5060_v36, 2 }
 0x377   :  { %v3160_v63 = vpop.f32.mrf.mxu0  ;;  %7666 = vmatmul.msk.bf16.gmra.mxu3 %vm387_vm2, %v4342_v45  ;;  %v2523_v38 = vadd.f32 %v2464_v8, %v9315_v21 }
 0x378   :  { %v3220_v33 = vadd.f32 %v3160_v63, %v2948_v10  ;;  %v10352_v10 = vpop.permute.xlu1 %3431 }
 0x379   :  { %v2949_v21 = vadd.f32 %v2890_v28, %v2523_v38  ;;  %11730 = vst [vmem:[#allocation43_spill] sm:$0xff] %v10352_v10 }
 0x37a   :  { %3262 = vst [vmem:[%s11569_s3 + $0xf0] sm:$0xff] %v3220_v33  ;;  %v3514_v19 = vmul.f32 %v10335_v62, %v3220_v33  ;;  %7810 = vmatmul.msk.bf16.gmra.mxu0 %vm387_vm2, %v4757_v41  ;;  %v2893_v53 = vpop.f32.mrf.mxu3  ;;  %v5063_v62 = vor.u32 %v5062_v54, %v5059_v42 }
 0x37b   :  { %v10348_v57 = vpop.f32.mrf.mxu1  ;;  %7643 = vmatmul.msk.bf16.gmra.mxu2 %vm387_vm2, %v10277_v11 }
 0x37c   :  { %v3555_v13 = vadd.f32 %v3554_v2, %v3514_v19  ;;  %v3604_v48 = vmul.f32 %v3514_v19, %v3220_v33  ;;  %v10357_v2 = vld [vmem:[%s11567_s0 + $0xe4] sm:$0xff]  ;;  %v5064_v19 = vsel %vm1424_vm5, %v5054_v12, %v5063_v62 }
 0x37d   :  { %v4343_v41 = vrot.slane %v10357_v2, 1 }
 0x37e   :  { %v3645_v45 = vadd.f32 %v3644_v46, %v3604_v48  ;;  %v2467_v8 = vpop.f32.mrf.mxu2  ;;  %v4758_v46 = vrot.slane %v10332_v1, 1  ;;  %v10372_v48 = vld [vmem:[%s11567_s0 + $0xec] sm:$0xff] }
 0x37f   :  { %v3162_v63 = vpop.f32.mrf.mxu0  ;;  %v2524_v33 = vadd.f32 %v2467_v8, %v9340_v27  ;;  %v4344_v27 = vsel %vm734_vm3, %v4341_v0, %v4343_v41  ;;  %v5066_v12 = vshrl.u32 %v10372_v48, 16 }
 0x380   :  { %v3221_v20 = vadd.f32 %v3162_v63, %v2949_v21  ;;  %v10375_v21 = vpop.permute.xlu2 %3436 }
 0x381   :  { %v2950_v54 = vadd.f32 %v2893_v53, %v2524_v33  ;;  %11731 = vst [vmem:[#allocation44_spill] sm:$0xff] %v10375_v21 }
 0x382   :  { %3263 = vst [vmem:[%s11569_s3 + $0xf8] sm:$0xff] %v3221_v20  ;;  %v3515_v11 = vmul.f32 %v10352_v10, %v3221_v20  ;;  %v2895_v28 = vpop.f32.mrf.mxu3 }
 0x383   :  { %v10366_v38 = vpop.f32.mrf.mxu1 }
 0x384   :  { %v3556_v37 = vadd.f32 %v3555_v13, %v3515_v11  ;;  %v3605_v36 = vmul.f32 %v3515_v11, %v3221_v20  ;;  %v4759_v20 = vsel %vm734_vm3, %v4756_v47, %v4758_v46  ;;  %v5069_v13 = vshll.u32 %v10372_v48, 16 }
 0x386   :  { %v3646_v42 = vadd.f32 %v3645_v45, %v3605_v36  ;;  %v2469_v8 = vpop.f32.mrf.mxu2  ;;  %7834 = vmatmul.msk.bf16.gmra.mxu1 %vm387_vm2, %v5064_v19  ;;  %v5068_v36 = vrot.slane %v5066_v12, 1  ;;  %v5071_v19 = vrot.slane %v5069_v13, 2 }
 0x387   :  { %v3165_v63 = vpop.f32.mrf.mxu0  ;;  %7667 = vmatmul.msk.bf16.gmra.mxu3 %vm387_vm2, %v4344_v27  ;;  %v2525_v11 = vadd.f32 %v2469_v8, %v9348_v9 }
 0x388   :  { %v3222_v1 = vadd.f32 %v3165_v63, %v2950_v54  ;;  %v10392_v54 = vpop.permute.xlu0 %3441 }
 0x389   :  { %v2951_v9 = vadd.f32 %v2895_v28, %v2525_v11  ;;  %11732 = vst [vmem:[#allocation45_spill] sm:$0xff] %v10392_v54 }
 0x38a   :  { %3264 = vst [vmem:[%s11569_s3 + $0x100] sm:$0xff] %v3222_v1  ;;  %v3516_v0 = vmul.f32 %v10375_v21, %v3222_v1  ;;  %7811 = vmatmul.msk.bf16.gmra.mxu0 %vm387_vm2, %v4759_v20  ;;  %v2898_v53 = vpop.f32.mrf.mxu3  ;;  %v5072_v21 = vor.u32 %v5071_v19, %v5068_v36 }
 0x38b   :  { %v10388_v33 = vpop.f32.mrf.mxu1  ;;  %7644 = vmatmul.msk.bf16.gmra.mxu2 %vm387_vm2, %v10317_v17 }
 0x38c   :  { %v3557_v45 = vadd.f32 %v3556_v37, %v3516_v0  ;;  %v3606_v47 = vmul.f32 %v3516_v0, %v3222_v1  ;;  %v10397_v37 = vld [vmem:[%s11567_s0 + $0xec] sm:$0xff]  ;;  %v5073_v0 = vsel %vm1424_vm5, %v5063_v62, %v5072_v21 }
 0x38d   :  { %v4345_v20 = vrot.slane %v10397_v37, 1 }
 0x38e   :  { %v3647_v27 = vadd.f32 %v3646_v42, %v3606_v47  ;;  %v2472_v8 = vpop.f32.mrf.mxu2  ;;  %v4760_v42 = vrot.slane %v10372_v48, 1  ;;  %v10412_v47 = vld [vmem:[%s11567_s0 + $0xf4] sm:$0xff] }
 0x38f   :  { %v3167_v63 = vpop.f32.mrf.mxu0  ;;  %v2526_v1 = vadd.f32 %v2472_v8, %v9373_v35  ;;  %v4346_v35 = vsel %vm734_vm3, %v4343_v41, %v4345_v20  ;;  %v5075_v62 = vshrl.u32 %v10412_v47, 16 }
 0x390   :  { %v3223_v10 = vadd.f32 %v3167_v63, %v2951_v9  ;;  %v10415_v9 = vpop.permute.xlu1 %3446 }
 0x391   :  { %v2952_v19 = vadd.f32 %v2898_v53, %v2526_v1  ;;  %11733 = vst [vmem:[#allocation46_spill] sm:$0xff] %v10415_v9 }
 0x392   :  { %3265 = vst [vmem:[%s11569_s3 + $0x108] sm:$0xff] %v3223_v10  ;;  %v3517_v17 = vmul.f32 %v10392_v54, %v3223_v10  ;;  %v2900_v28 = vpop.f32.mrf.mxu3 }
 0x393   :  { %v10406_v11 = vpop.f32.mrf.mxu1 }
 0x394   :  { %v3558_v12 = vadd.f32 %v3557_v45, %v3517_v17  ;;  %v3607_v13 = vmul.f32 %v3517_v17, %v3223_v10  ;;  %v4761_v10 = vsel %vm734_vm3, %v4758_v46, %v4760_v42  ;;  %v5078_v45 = vshll.u32 %v10412_v47, 16 }
 0x396   :  { %v3648_v36 = vadd.f32 %v3647_v27, %v3607_v13  ;;  %v2474_v8 = vpop.f32.mrf.mxu2  ;;  %7835 = vmatmul.msk.bf16.gmra.mxu1 %vm387_vm2, %v5073_v0  ;;  %v5077_v13 = vrot.slane %v5075_v62, 1  ;;  %v5080_v0 = vrot.slane %v5078_v45, 2 }
 0x397   :  { %v3170_v63 = vpop.f32.mrf.mxu0  ;;  %7668 = vmatmul.msk.bf16.gmra.mxu3 %vm387_vm2, %v4346_v35  ;;  %v2527_v17 = vadd.f32 %v2474_v8, %v9380_v44 }
 0x398   :  { %v3224_v48 = vadd.f32 %v3170_v63, %v2952_v19  ;;  %v10432_v19 = vpop.permute.xlu2 %3451 }
 0x399   :  { %v2953_v44 = vadd.f32 %v2900_v28, %v2527_v17  ;;  %11734 = vst [vmem:[#allocation47_spill] sm:$0xff] %v10432_v19 }
 0x39a   :  { %3266 = vst [vmem:[%s11569_s3 + $0x110] sm:$0xff] %v3224_v48  ;;  %v3518_v41 = vmul.f32 %v10415_v9, %v3224_v48  ;;  %7812 = vmatmul.msk.bf16.gmra.mxu0 %vm387_vm2, %v4761_v10  ;;  %v2903_v53 = vpop.f32.mrf.mxu3  ;;  %v5081_v9 = vor.u32 %v5080_v0, %v5077_v13 }
 0x39b   :  { %v10428_v1 = vpop.f32.mrf.mxu1  ;;  %7645 = vmatmul.msk.bf16.gmra.mxu2 %vm387_vm2, %v10357_v2 }
 0x39c   :  { %v3559_v27 = vadd.f32 %v3558_v12, %v3518_v41  ;;  %v3608_v46 = vmul.f32 %v3518_v41, %v3224_v48  ;;  %v10437_v12 = vld [vmem:[%s11567_s0 + $0xf4] sm:$0xff]  ;;  %v5082_v41 = vsel %vm1424_vm5, %v5072_v21, %v5081_v9 }
 0x39d   :  { %v4347_v10 = vrot.slane %v10437_v12, 1 }
 0x39e   :  { %v3649_v35 = vadd.f32 %v3648_v36, %v3608_v46  ;;  %v2477_v8 = vpop.f32.mrf.mxu2  ;;  %v4762_v36 = vrot.slane %v10412_v47, 1  ;;  %v10452_v46 = vld [vmem:[%s11567_s0 + $0xfc] sm:$0xff] }
 0x39f   :  { %v3172_v63 = vpop.f32.mrf.mxu0  ;;  %v2528_v48 = vadd.f32 %v2477_v8, %v9405_v23  ;;  %v4348_v23 = vsel %vm734_vm3, %v4345_v20, %v4347_v10  ;;  %v5084_v21 = vshrl.u32 %v10452_v46, 16 }
 0x3a0   :  { %v3225_v54 = vadd.f32 %v3172_v63, %v2953_v44  ;;  %v10455_v44 = vpop.permute.xlu0 %3456 }
 0x3a1   :  { %v2954_v0 = vadd.f32 %v2903_v53, %v2528_v48  ;;  %11735 = vst [vmem:[#allocation48_spill] sm:$0xff] %v10455_v44 }
 0x3a2   :  { %3267 = vst [vmem:[%s11569_s3 + $0x118] sm:$0xff] %v3225_v54  ;;  %v3519_v2 = vmul.f32 %v10432_v19, %v3225_v54  ;;  %v2905_v28 = vpop.f32.mrf.mxu3 }
 0x3a3   :  { %v10446_v17 = vpop.f32.mrf.mxu1 }
 0x3a4   :  { %v3560_v62 = vadd.f32 %v3559_v27, %v3519_v2  ;;  %v3609_v45 = vmul.f32 %v3519_v2, %v3225_v54  ;;  %v4763_v54 = vsel %vm734_vm3, %v4760_v42, %v4762_v36  ;;  %v5087_v27 = vshll.u32 %v10452_v46, 16  ;;  %v11736_v2 = vld [vmem:[#allocation2_spill] sm:$0xff] }
 0x3a6   :  { %v3650_v13 = vadd.f32 %v3649_v35, %v3609_v45  ;;  %v2479_v8 = vpop.f32.mrf.mxu2  ;;  %7836 = vmatmul.msk.bf16.gmra.mxu1 %vm387_vm2, %v5082_v41  ;;  %v5086_v45 = vrot.slane %v5084_v21, 1  ;;  %v5089_v41 = vrot.slane %v5087_v27, 2 }
 0x3a7   :  { %v3175_v63 = vpop.f32.mrf.mxu0  ;;  %7669 = vmatmul.msk.bf16.gmra.mxu3 %vm387_vm2, %v4348_v23  ;;  %v2529_v19 = vadd.f32 %v2479_v8, %v11736_v2  ;;  %v10472_v8 = vpop.permute.xlu1 %3461 }
 0x3a8   :  { %v3226_v47 = vadd.f32 %v3175_v63, %v2954_v0  ;;  %11737 = vst [vmem:[#allocation2_spill] sm:$0xff] %v10472_v8 }
 0x3a9   :  { %v2955_v0 = vadd.f32 %v2905_v28, %v2529_v19  ;;  %v4764_v28 = vrot.slane %v10452_v46, 1 }
 0x3aa   :  { %3268 = vst [vmem:[%s11569_s3 + $0x120] sm:$0xff] %v3226_v47  ;;  %v3520_v20 = vmul.f32 %v10455_v44, %v3226_v47  ;;  %7813 = vmatmul.msk.bf16.gmra.mxu0 %vm387_vm2, %v4763_v54  ;;  %v2908_v53 = vpop.f32.mrf.mxu3  ;;  %v5090_v44 = vor.u32 %v5089_v41, %v5086_v45  ;;  %v10492_v45 = vld [vmem:[%s11567_s0 + $0x104] sm:$0xff] }
 0x3ab   :  { %v10468_v48 = vpop.f32.mrf.mxu1  ;;  %7646 = vmatmul.msk.bf16.gmra.mxu2 %vm387_vm2, %v10397_v37 }
 0x3ac   :  { %v3561_v35 = vadd.f32 %v3560_v62, %v3520_v20  ;;  %v3610_v42 = vmul.f32 %v3520_v20, %v3226_v47  ;;  %v10477_v62 = vld [vmem:[%s11567_s0 + $0xfc] sm:$0xff]  ;;  %v11738_v47 = vld [vmem:[#allocation3_spill] sm:$0xff] }
 0x3ad   :  { %v4349_v54 = vrot.slane %v10477_v62, 1 }
 0x3ae   :  { %v3651_v23 = vadd.f32 %v3650_v13, %v3610_v42  ;;  %v2482_v63 = vpop.f32.mrf.mxu2  ;;  %v5091_v42 = vsel %vm1424_vm5, %v5081_v9, %v5090_v44  ;;  %v5093_v9 = vshrl.u32 %v10492_v45, 16 }
 0x3af   :  { %v3177_v2 = vpop.f32.mrf.mxu0  ;;  %v2530_v20 = vadd.f32 %v2482_v63, %v11738_v47  ;;  %v4350_v41 = vsel %vm734_vm3, %v4347_v10, %v4349_v54 }
 0x3b0   :  { %v3227_v32 = vadd.f32 %v3177_v2, %v2955_v0  ;;  %v10495_v2 = vpop.permute.xlu2 %3466 }
 0x3b1   :  { %v2956_v63 = vadd.f32 %v2908_v53, %v2530_v20  ;;  %11739 = vst [vmem:[#allocation3_spill] sm:$0xff] %v10495_v2  ;;  %v5095_v20 = vrot.slane %v5093_v9, 1 }
 0x3b2   :  { %3269 = vst [vmem:[%s11569_s3 + $0x128] sm:$0xff] %v3227_v32  ;;  %v3521_v37 = vmul.f32 %v10472_v8, %v3227_v32  ;;  %v2910_v19 = vpop.f32.mrf.mxu3 }
 0x3b3   :  { %v10486_v27 = vpop.f32.mrf.mxu1 }
 0x3b4   :  { %v3562_v13 = vadd.f32 %v3561_v35, %v3521_v37  ;;  %v3611_v21 = vmul.f32 %v3521_v37, %v3227_v32  ;;  %v4765_v32 = vsel %vm734_vm3, %v4762_v36, %v4764_v28  ;;  %v5096_v35 = vshll.u32 %v10492_v45, 16 }
 0x3b6   :  { %v3652_v0 = vadd.f32 %v3651_v23, %v3611_v21  ;;  %v2484_v47 = vpop.f32.mrf.mxu2  ;;  %7837 = vmatmul.msk.bf16.gmra.mxu1 %vm387_vm2, %v5091_v42  ;;  %v5098_v21 = vrot.slane %v5096_v35, 2 }
 0x3b7   :  { %v3180_v8 = vpop.f32.mrf.mxu0  ;;  %7670 = vmatmul.msk.bf16.gmra.mxu3 %vm387_vm2, %v4350_v41  ;;  %v2531_v37 = vadd.f32 %v2484_v47, %v9444_v40  ;;  %v10512_v41 = vpop.permute.xlu0 %3471 }
 0x3b8   :  { %v3228_v46 = vadd.f32 %v3180_v8, %v2956_v63  ;;  %11740 = vst [vmem:[#allocation49_spill] sm:$0xff] %v10512_v41 }
 0x3b9   :  { %v2957_v40 = vadd.f32 %v2910_v19, %v2531_v37 }
 0x3ba   :  { %3270 = vst [vmem:[%s11569_s3 + $0x130] sm:$0xff] %v3228_v46  ;;  %v3522_v10 = vmul.f32 %v10495_v2, %v3228_v46  ;;  %7814 = vmatmul.msk.bf16.gmra.mxu0 %vm387_vm2, %v4765_v32  ;;  %v2913_v53 = vpop.f32.mrf.mxu3  ;;  %v5099_v2 = vor.u32 %v5098_v21, %v5095_v20 }
 0x3bb   :  { %v10508_v8 = vpop.f32.mrf.mxu1  ;;  %7647 = vmatmul.msk.bf16.gmra.mxu2 %vm387_vm2, %v10437_v12 }
 0x3bc   :  { %v3563_v23 = vadd.f32 %v3562_v13, %v3522_v10  ;;  %v3612_v36 = vmul.f32 %v3522_v10, %v3228_v46  ;;  %v10517_v13 = vld [vmem:[%s11567_s0 + $0x104] sm:$0xff]  ;;  %v5100_v10 = vsel %vm1424_vm5, %v5090_v44, %v5099_v2 }
 0x3bd   :  { %v4351_v32 = vrot.slane %v10517_v13, 1 }
 0x3be   :  { %v3653_v42 = vadd.f32 %v3652_v0, %v3612_v36  ;;  %v2487_v63 = vpop.f32.mrf.mxu2  ;;  %v4766_v0 = vrot.slane %v10492_v45, 1  ;;  %v10532_v36 = vld [vmem:[%s11567_s0 + $0x10c] sm:$0xff] }
 0x3bf   :  { %v3182_v47 = vpop.f32.mrf.mxu0  ;;  %v2532_v46 = vadd.f32 %v2487_v63, %v9471_v31  ;;  %v4352_v31 = vsel %vm734_vm3, %v4349_v54, %v4351_v32  ;;  %v5102_v44 = vshrl.u32 %v10532_v36, 16 }
 0x3c0   :  { %v3229_v22 = vadd.f32 %v3182_v47, %v2957_v40  ;;  %v10535_v40 = vpop.permute.xlu1 %3476 }
 0x3c1   :  { %v2958_v21 = vadd.f32 %v2913_v53, %v2532_v46  ;;  %11741 = vst [vmem:[#allocation50_spill] sm:$0xff] %v10535_v40 }
 0x3c2   :  { %3271 = vst [vmem:[%s11569_s3 + $0x138] sm:$0xff] %v3229_v22  ;;  %v3523_v12 = vmul.f32 %v10512_v41, %v3229_v22  ;;  %v2915_v19 = vpop.f32.mrf.mxu3 }
 0x3c3   :  { %v10526_v37 = vpop.f32.mrf.mxu1 }
 0x3c4   :  { %v3564_v9 = vadd.f32 %v3563_v23, %v3523_v12  ;;  %v3613_v35 = vmul.f32 %v3523_v12, %v3229_v22  ;;  %v4767_v22 = vsel %vm734_vm3, %v4764_v28, %v4766_v0  ;;  %v5105_v23 = vshll.u32 %v10532_v36, 16 }
 0x3c6   :  { %v3654_v20 = vadd.f32 %v3653_v42, %v3613_v35  ;;  %v2489_v63 = vpop.f32.mrf.mxu2  ;;  %7838 = vmatmul.msk.bf16.gmra.mxu1 %vm387_vm2, %v5100_v10  ;;  %v5104_v35 = vrot.slane %v5102_v44, 1  ;;  %v5107_v10 = vrot.slane %v5105_v23, 2  ;;  %v4768_v44 = vrot.slane %v10532_v36, 1 }
 0x3c7   :  { %v3185_v47 = vpop.f32.mrf.mxu0  ;;  %7671 = vmatmul.msk.bf16.gmra.mxu3 %vm387_vm2, %v4352_v31  ;;  %v2533_v12 = vadd.f32 %v2489_v63, %v9479_v43 }
 0x3c8   :  { %v3230_v45 = vadd.f32 %v3185_v47, %v2958_v21  ;;  %v10552_v21 = vpop.permute.xlu2 %3481  ;;  %v4769_v36 = vsel %vm734_vm3, %v4766_v0, %v4768_v44 }
 0x3c9   :  { %v2959_v43 = vadd.f32 %v2915_v19, %v2533_v12  ;;  %11742 = vst [vmem:[#allocation51_spill] sm:$0xff] %v10552_v21 }
 0x3ca   :  { %3272 = vst [vmem:[%s11569_s3 + $0x140] sm:$0xff] %v3230_v45  ;;  %v3524_v54 = vmul.f32 %v10535_v40, %v3230_v45  ;;  %7815 = vmatmul.msk.bf16.gmra.mxu0 %vm387_vm2, %v4767_v22  ;;  %v4452_v53 = vpop.f32.mrf.mxu3  ;;  %v5108_v22 = vor.u32 %v5107_v10, %v5104_v35 }
 0x3cb   :  { %v10548_v46 = vpop.f32.mrf.mxu1  ;;  %7648 = vmatmul.msk.bf16.gmra.mxu2 %vm387_vm2, %v10477_v62 }
 0x3cc   :  { %v3565_v42 = vadd.f32 %v3564_v9, %v3524_v54  ;;  %v3614_v28 = vmul.f32 %v3524_v54, %v3230_v45  ;;  %v8260_v9 = vld [vmem:[%s11567_s0 + $0x10c] sm:$0xff]  ;;  %v5109_v54 = vsel %vm1424_vm5, %v5099_v2, %v5108_v22 }
 0x3cd   :  { %v4353_v45 = vrot.slane %v8260_v9, 1 }
 0x3ce   :  { %v3655_v31 = vadd.f32 %v3654_v20, %v3614_v28  ;;  %v4224_v47 = vpop.f32.mrf.mxu2  ;;  %v10569_v28 = vld [vmem:[%s11567_s0 + $0x114] sm:$0xff] }
 0x3cf   :  { %v3187_v63 = vpop.f32.mrf.mxu0  ;;  %v4225_v40 = vadd.f32 %v4224_v47, %v9482_v30  ;;  %v4354_v35 = vsel %vm734_vm3, %v4351_v32, %v4353_v45  ;;  %v5111_v2 = vshrl.u32 %v10569_v28, 16 }
 0x3d0   :  { %v3231_v41 = vadd.f32 %v3187_v63, %v2959_v43  ;;  %v5114_v63 = vshll.u32 %v10569_v28, 16 }
 0x3d1   :  { %v4557_v19 = vadd.f32 %v4452_v53, %v4225_v40  ;;  %v11745_v53 = vld [vmem:[#allocation5_spill] sm:$0xff]  ;;  %v5113_v0 = vrot.slane %v5111_v2, 1 }
 0x3d2   :  { %3273 = vst [vmem:[%s11569_s3 + $0x148] sm:$0xff] %v3231_v41  ;;  %v3525_v62 = vmul.f32 %v10552_v21, %v3231_v41  ;;  %v4454_v20 = vpop.f32.mrf.mxu3  ;;  %v8268_v21 = vld [vmem:[%s11567_s0 + $0x14c] sm:$0xff] }
 0x3d3   :  { %v5293_v30 = vpop.f32.mrf.mxu1 }
 0x3d4   :  { %v10563_v23 = vadd.f32 %v3565_v42, %v3525_v62  ;;  %v3615_v12 = vmul.f32 %v3525_v62, %v3231_v41 }
 0x3d6   :  { %11743 = vst [vmem:[#allocation52_spill] sm:$0xff] %v10563_v23  ;;  %v10572_v10 = vadd.f32 %v3655_v31, %v3615_v12  ;;  %v4226_v43 = vpop.f32.mrf.mxu2  ;;  %7839 = vmatmul.msk.bf16.gmra.mxu1 %vm387_vm2, %v5109_v54  ;;  %v5116_v12 = vrot.slane %v5114_v63, 2  ;;  %v8269_v23 = vld [vmem:[%s11567_s0 + $0x154] sm:$0xff] }
 0x3d7   :  { %v4869_v40 = vpop.f32.mrf.mxu0  ;;  %v4227_v41 = vadd.f32 %v4226_v43, %v11745_v53  ;;  %7672 = vmatmul.msk.bf16.gmra.mxu3 %vm387_vm2, %v4354_v35 }
 0x3d8   :  { %11744 = vst [vmem:[#allocation53_spill] sm:$0xff] %v10572_v10  ;;  %v4974_v42 = vadd.f32 %v4869_v40, %v4557_v19  ;;  %v5117_v40 = vor.u32 %v5116_v12, %v5113_v0 }
 0x3d9   :  { %v4558_v32 = vadd.f32 %v4454_v20, %v4227_v41 }
 0x3da   :  { %7816 = vmatmul.msk.bf16.gmra.mxu0 %vm387_vm2, %v4769_v36  ;;  %v10581_v31 = vadd.f32 %v5293_v30, %v4974_v42  ;;  %v4457_v47 = vpop.f32.mrf.mxu3  ;;  %v8261_v36 = vld [vmem:[%s11567_s0 + $0x114] sm:$0xff]  ;;  %v5118_v2 = vsel %vm1424_vm5, %v5108_v22, %v5117_v40 }
 0x3db   :  { %7649 = vmatmul.msk.bf16.gmra.mxu2 %vm387_vm2, %v10517_v13  ;;  %v5295_v62 = vpop.f32.mrf.mxu1  ;;  %v4355_v20 = vrot.slane %v8261_v36, 1  ;;  %v4770_v13 = vrot.slane %v10569_v28, 1 }
 0x3dd   :  { %v4356_v63 = vsel %vm734_vm3, %v4353_v45, %v4355_v20 }
 0x3de   :  { %v4229_v54 = vpop.f32.mrf.mxu2 }
 0x3df   :  { %v4871_v19 = vpop.f32.mrf.mxu0  ;;  %v4230_v35 = vadd.f32 %v4229_v54, %v9536_v5  ;;  %v10596_v5 = vld [vmem:[%s11567_s0 + $0x11c] sm:$0xff] }
 0x3e0   :  { %v4975_v43 = vadd.f32 %v4871_v19, %v4558_v32  ;;  %v5120_v22 = vshrl.u32 %v10596_v5, 16  ;;  %v5123_v28 = vshll.u32 %v10596_v5, 16 }
 0x3e1   :  { %v4559_v30 = vadd.f32 %v4457_v47, %v4230_v35  ;;  %v4771_v47 = vsel %vm734_vm3, %v4768_v44, %v4770_v13 }
 0x3e2   :  { %v10589_v53 = vadd.f32 %v5295_v62, %v4975_v43  ;;  %v4459_v41 = vpop.f32.mrf.mxu3  ;;  %v5122_v43 = vrot.slane %v5120_v22, 1  ;;  %v5125_v44 = vrot.slane %v5123_v28, 2 }
 0x3e3   :  { %v5298_v42 = vpop.f32.mrf.mxu1 }
 0x3e6   :  { %v4231_v32 = vpop.f32.mrf.mxu2  ;;  %7840 = vmatmul.msk.bf16.gmra.mxu1 %vm387_vm2, %v5118_v2 }
 0x3e7   :  { %v4874_v0 = vpop.f32.mrf.mxu0  ;;  %v4232_v62 = vadd.f32 %v4231_v32, %v9578_v16  ;;  %7673 = vmatmul.msk.bf16.gmra.mxu3 %vm387_vm2, %v4356_v63  ;;  %v5126_v32 = vor.u32 %v5125_v44, %v5122_v43 }
 0x3e8   :  { %v4976_v12 = vadd.f32 %v4874_v0, %v4559_v30  ;;  %v8262_v0 = vld [vmem:[%s11567_s0 + $0x11c] sm:$0xff] }
 0x3e9   :  { %v4560_v54 = vadd.f32 %v4459_v41, %v4232_v62  ;;  %v5127_v22 = vsel %vm1424_vm5, %v5117_v40, %v5126_v32 }
 0x3ea   :  { %7817 = vmatmul.msk.bf16.gmra.mxu0 %vm387_vm2, %v4771_v47  ;;  %v10606_v19 = vadd.f32 %v5298_v42, %v4976_v12  ;;  %v4462_v45 = vpop.f32.mrf.mxu3  ;;  %v4357_v47 = vrot.slane %v8262_v0, 1 }
 0x3eb   :  { %7650 = vmatmul.msk.bf16.gmra.mxu2 %vm387_vm2, %v8260_v9  ;;  %v5300_v35 = vpop.f32.mrf.mxu1  ;;  %v4772_v9 = vrot.slane %v10596_v5, 1 }
 0x3ec   :  { %v4358_v28 = vsel %vm734_vm3, %v4355_v20, %v4357_v47 }
 0x3ee   :  { %v4234_v2 = vpop.f32.mrf.mxu2 }
 0x3ef   :  { %v4876_v16 = vpop.f32.mrf.mxu0  ;;  %v4235_v30 = vadd.f32 %v4234_v2, %v9593_v25  ;;  %v10620_v25 = vld [vmem:[%s11567_s0 + $0x124] sm:$0xff] }
 0x3f0   :  { %v4977_v63 = vadd.f32 %v4876_v16, %v4560_v54  ;;  %v5129_v40 = vshrl.u32 %v10620_v25, 16  ;;  %v5132_v5 = vshll.u32 %v10620_v25, 16 }
 0x3f1   :  { %v4561_v41 = vadd.f32 %v4462_v45, %v4235_v30  ;;  %v4773_v45 = vsel %vm734_vm3, %v4770_v13, %v4772_v9 }
 0x3f2   :  { %v10613_v42 = vadd.f32 %v5300_v35, %v4977_v63  ;;  %v4464_v62 = vpop.f32.mrf.mxu3  ;;  %v5131_v63 = vrot.slane %v5129_v40, 1  ;;  %v5134_v13 = vrot.slane %v5132_v5, 2 }
 0x3f3   :  { %v5303_v12 = vpop.f32.mrf.mxu1 }
 0x3f6   :  { %v4236_v54 = vpop.f32.mrf.mxu2  ;;  %7841 = vmatmul.msk.bf16.gmra.mxu1 %vm387_vm2, %v5127_v22 }
 0x3f7   :  { %v4879_v43 = vpop.f32.mrf.mxu0  ;;  %v4237_v35 = vadd.f32 %v4236_v54, %v9635_v49  ;;  %7674 = vmatmul.msk.bf16.gmra.mxu3 %vm387_vm2, %v4358_v28  ;;  %v5135_v54 = vor.u32 %v5134_v13, %v5131_v63 }
 0x3f8   :  { %v4978_v44 = vadd.f32 %v4879_v43, %v4561_v41  ;;  %v8263_v43 = vld [vmem:[%s11567_s0 + $0x124] sm:$0xff] }
 0x3f9   :  { %v4562_v2 = vadd.f32 %v4464_v62, %v4237_v35  ;;  %v5136_v40 = vsel %vm1424_vm5, %v5126_v32, %v5135_v54 }
 0x3fa   :  { %7818 = vmatmul.msk.bf16.gmra.mxu0 %vm387_vm2, %v4773_v45  ;;  %v10630_v16 = vadd.f32 %v5303_v12, %v4978_v44  ;;  %v4467_v20 = vpop.f32.mrf.mxu3  ;;  %v4359_v45 = vrot.slane %v8263_v43, 1 }
 0x3fb   :  { %7651 = vmatmul.msk.bf16.gmra.mxu2 %vm387_vm2, %v8261_v36  ;;  %v5305_v30 = vpop.f32.mrf.mxu1  ;;  %v4774_v36 = vrot.slane %v10620_v25, 1 }
 0x3fc   :  { %v4360_v5 = vsel %vm734_vm3, %v4357_v47, %v4359_v45 }
 0x3fe   :  { %v4239_v22 = vpop.f32.mrf.mxu2 }
 0x3ff   :  { %v4881_v49 = vpop.f32.mrf.mxu0  ;;  %v4240_v41 = vadd.f32 %v4239_v22, %v9650_v18  ;;  %v10644_v18 = vld [vmem:[%s11567_s0 + $0x12c] sm:$0xff] }
 0x400   :  { %v4979_v28 = vadd.f32 %v4881_v49, %v4562_v2  ;;  %v5138_v32 = vshrl.u32 %v10644_v18, 16  ;;  %v5141_v25 = vshll.u32 %v10644_v18, 16 }
 0x401   :  { %v4563_v62 = vadd.f32 %v4467_v20, %v4240_v41  ;;  %v4775_v20 = vsel %vm734_vm3, %v4772_v9, %v4774_v36 }
 0x402   :  { %v10637_v12 = vadd.f32 %v5305_v30, %v4979_v28  ;;  %v4469_v35 = vpop.f32.mrf.mxu3  ;;  %v5140_v28 = vrot.slane %v5138_v32, 1  ;;  %v5143_v9 = vrot.slane %v5141_v25, 2 }
 0x403   :  { %v5308_v44 = vpop.f32.mrf.mxu1 }
 0x406   :  { %v4241_v2 = vpop.f32.mrf.mxu2  ;;  %7842 = vmatmul.msk.bf16.gmra.mxu1 %vm387_vm2, %v5136_v40 }
 0x407   :  { %v4884_v63 = vpop.f32.mrf.mxu0  ;;  %v4242_v30 = vadd.f32 %v4241_v2, %v9691_v15  ;;  %7675 = vmatmul.msk.bf16.gmra.mxu3 %vm387_vm2, %v4360_v5  ;;  %v5144_v2 = vor.u32 %v5143_v9, %v5140_v28 }
 0x408   :  { %v4980_v13 = vadd.f32 %v4884_v63, %v4563_v62  ;;  %v8264_v63 = vld [vmem:[%s11567_s0 + $0x12c] sm:$0xff] }
 0x409   :  { %v4564_v22 = vadd.f32 %v4469_v35, %v4242_v30  ;;  %v5145_v32 = vsel %vm1424_vm5, %v5135_v54, %v5144_v2 }
 0x40a   :  { %7819 = vmatmul.msk.bf16.gmra.mxu0 %vm387_vm2, %v4775_v20  ;;  %v10654_v49 = vadd.f32 %v5308_v44, %v4980_v13  ;;  %v4472_v47 = vpop.f32.mrf.mxu3  ;;  %v4361_v20 = vrot.slane %v8264_v63, 1 }
 0x40b   :  { %7652 = vmatmul.msk.bf16.gmra.mxu2 %vm387_vm2, %v8262_v0  ;;  %v5310_v41 = vpop.f32.mrf.mxu1  ;;  %v4776_v0 = vrot.slane %v10644_v18, 1 }
 0x40c   :  { %v4362_v25 = vsel %vm734_vm3, %v4359_v45, %v4361_v20 }
 0x40e   :  { %v4244_v40 = vpop.f32.mrf.mxu2 }
 0x40f   :  { %v4886_v15 = vpop.f32.mrf.mxu0  ;;  %v4245_v62 = vadd.f32 %v4244_v40, %v9706_v29  ;;  %v10668_v29 = vld [vmem:[%s11567_s0 + $0x134] sm:$0xff] }
 0x410   :  { %v4981_v5 = vadd.f32 %v4886_v15, %v4564_v22  ;;  %v5147_v54 = vshrl.u32 %v10668_v29, 16  ;;  %v5150_v18 = vshll.u32 %v10668_v29, 16 }
 0x411   :  { %v4565_v35 = vadd.f32 %v4472_v47, %v4245_v62  ;;  %v4777_v47 = vsel %vm734_vm3, %v4774_v36, %v4776_v0 }
 0x412   :  { %v10661_v44 = vadd.f32 %v5310_v41, %v4981_v5  ;;  %v4474_v30 = vpop.f32.mrf.mxu3  ;;  %v5149_v5 = vrot.slane %v5147_v54, 1  ;;  %v5152_v36 = vrot.slane %v5150_v18, 2 }
 0x413   :  { %v5313_v13 = vpop.f32.mrf.mxu1 }
 0x416   :  { %v4246_v22 = vpop.f32.mrf.mxu2  ;;  %7843 = vmatmul.msk.bf16.gmra.mxu1 %vm387_vm2, %v5145_v32 }
 0x417   :  { %v4889_v28 = vpop.f32.mrf.mxu0  ;;  %v4247_v41 = vadd.f32 %v4246_v22, %v9747_v6  ;;  %7676 = vmatmul.msk.bf16.gmra.mxu3 %vm387_vm2, %v4362_v25  ;;  %v5153_v22 = vor.u32 %v5152_v36, %v5149_v5 }
 0x418   :  { %v4982_v9 = vadd.f32 %v4889_v28, %v4565_v35  ;;  %v8265_v28 = vld [vmem:[%s11567_s0 + $0x134] sm:$0xff] }
 0x419   :  { %v4566_v40 = vadd.f32 %v4474_v30, %v4247_v41  ;;  %v5154_v54 = vsel %vm1424_vm5, %v5144_v2, %v5153_v22 }
 0x41a   :  { %7820 = vmatmul.msk.bf16.gmra.mxu0 %vm387_vm2, %v4777_v47  ;;  %v10678_v15 = vadd.f32 %v5313_v13, %v4982_v9  ;;  %v4477_v45 = vpop.f32.mrf.mxu3  ;;  %v4363_v47 = vrot.slane %v8265_v28, 1 }
 0x41b   :  { %7653 = vmatmul.msk.bf16.gmra.mxu2 %vm387_vm2, %v8263_v43  ;;  %v5315_v62 = vpop.f32.mrf.mxu1  ;;  %v4778_v43 = vrot.slane %v10668_v29, 1 }
 0x41c   :  { %v4364_v18 = vsel %vm734_vm3, %v4361_v20, %v4363_v47 }
 0x41e   :  { %v4249_v32 = vpop.f32.mrf.mxu2 }
 0x41f   :  { %v4891_v6 = vpop.f32.mrf.mxu0  ;;  %v4250_v35 = vadd.f32 %v4249_v32, %v9762_v61  ;;  %v10692_v61 = vld [vmem:[%s11567_s0 + $0x13c] sm:$0xff] }
 0x420   :  { %v4983_v25 = vadd.f32 %v4891_v6, %v4566_v40  ;;  %v5156_v2 = vshrl.u32 %v10692_v61, 16  ;;  %v5159_v29 = vshll.u32 %v10692_v61, 16 }
 0x421   :  { %v4567_v30 = vadd.f32 %v4477_v45, %v4250_v35  ;;  %v4779_v45 = vsel %vm734_vm3, %v4776_v0, %v4778_v43 }
 0x422   :  { %v10685_v13 = vadd.f32 %v5315_v62, %v4983_v25  ;;  %v4479_v41 = vpop.f32.mrf.mxu3  ;;  %v5158_v25 = vrot.slane %v5156_v2, 1  ;;  %v5161_v0 = vrot.slane %v5159_v29, 2 }
 0x423   :  { %v5318_v9 = vpop.f32.mrf.mxu1 }
 0x426   :  { %v4251_v40 = vpop.f32.mrf.mxu2  ;;  %7844 = vmatmul.msk.bf16.gmra.mxu1 %vm387_vm2, %v5154_v54 }
 0x427   :  { %v4894_v5 = vpop.f32.mrf.mxu0  ;;  %v4252_v62 = vadd.f32 %v4251_v40, %v9803_v39  ;;  %7677 = vmatmul.msk.bf16.gmra.mxu3 %vm387_vm2, %v4364_v18  ;;  %v5162_v40 = vor.u32 %v5161_v0, %v5158_v25 }
 0x428   :  { %v4984_v36 = vadd.f32 %v4894_v5, %v4567_v30  ;;  %v8266_v5 = vld [vmem:[%s11567_s0 + $0x13c] sm:$0xff] }
 0x429   :  { %v4568_v32 = vadd.f32 %v4479_v41, %v4252_v62  ;;  %v5163_v2 = vsel %vm1424_vm5, %v5153_v22, %v5162_v40 }
 0x42a   :  { %7821 = vmatmul.msk.bf16.gmra.mxu0 %vm387_vm2, %v4779_v45  ;;  %v10702_v6 = vadd.f32 %v5318_v9, %v4984_v36  ;;  %v4482_v20 = vpop.f32.mrf.mxu3  ;;  %v4365_v45 = vrot.slane %v8266_v5, 1 }
 0x42b   :  { %7654 = vmatmul.msk.bf16.gmra.mxu2 %vm387_vm2, %v8264_v63  ;;  %v5320_v35 = vpop.f32.mrf.mxu1  ;;  %v4780_v63 = vrot.slane %v10692_v61, 1 }
 0x42c   :  { %v4366_v29 = vsel %vm734_vm3, %v4363_v47, %v4365_v45 }
 0x42e   :  { %v4254_v54 = vpop.f32.mrf.mxu2 }
 0x42f   :  { %v4896_v39 = vpop.f32.mrf.mxu0  ;;  %v4255_v30 = vadd.f32 %v4254_v54, %v9818_v50  ;;  %v10716_v50 = vld [vmem:[%s11567_s0 + $0x144] sm:$0xff] }
 0x430   :  { %v4985_v18 = vadd.f32 %v4896_v39, %v4568_v32  ;;  %v5165_v22 = vshrl.u32 %v10716_v50, 16  ;;  %v5168_v61 = vshll.u32 %v10716_v50, 16 }
 0x431   :  { %v4569_v41 = vadd.f32 %v4482_v20, %v4255_v30  ;;  %v4781_v20 = vsel %vm734_vm3, %v4778_v43, %v4780_v63 }
 0x432   :  { %v10709_v9 = vadd.f32 %v5320_v35, %v4985_v18  ;;  %v4484_v62 = vpop.f32.mrf.mxu3  ;;  %v5167_v18 = vrot.slane %v5165_v22, 1  ;;  %v5170_v43 = vrot.slane %v5168_v61, 2 }
 0x433   :  { %v5323_v36 = vpop.f32.mrf.mxu1 }
 0x436   :  { %v4256_v32 = vpop.f32.mrf.mxu2  ;;  %7845 = vmatmul.msk.bf16.gmra.mxu1 %vm387_vm2, %v5163_v2 }
 0x437   :  { %v4899_v25 = vpop.f32.mrf.mxu0  ;;  %v4257_v35 = vadd.f32 %v4256_v32, %v9859_v3  ;;  %7678 = vmatmul.msk.bf16.gmra.mxu3 %vm387_vm2, %v4366_v29  ;;  %v5171_v32 = vor.u32 %v5170_v43, %v5167_v18 }
 0x438   :  { %v4986_v0 = vadd.f32 %v4899_v25, %v4569_v41  ;;  %v8267_v25 = vld [vmem:[%s11567_s0 + $0x144] sm:$0xff] }
 0x439   :  { %v4570_v54 = vadd.f32 %v4484_v62, %v4257_v35  ;;  %v5172_v22 = vsel %vm1424_vm5, %v5162_v40, %v5171_v32 }
 0x43a   :  { %7822 = vmatmul.msk.bf16.gmra.mxu0 %vm387_vm2, %v4781_v20  ;;  %v10726_v39 = vadd.f32 %v5323_v36, %v4986_v0  ;;  %v4487_v47 = vpop.f32.mrf.mxu3  ;;  %v4367_v20 = vrot.slane %v8267_v25, 1 }
 0x43b   :  { %7655 = vmatmul.msk.bf16.gmra.mxu2 %vm387_vm2, %v8265_v28  ;;  %v5325_v30 = vpop.f32.mrf.mxu1  ;;  %v4782_v28 = vrot.slane %v10716_v50, 1 }
 0x43c   :  { %v4368_v61 = vsel %vm734_vm3, %v4365_v45, %v4367_v20 }
 0x43e   :  { %v4259_v2 = vpop.f32.mrf.mxu2 }
 0x43f   :  { %v4901_v3 = vpop.f32.mrf.mxu0  ;;  %v4260_v41 = vadd.f32 %v4259_v2, %v9874_v26  ;;  %v10740_v26 = vld [vmem:[%s11567_s0 + $0x14c] sm:$0xff] }
 0x440   :  { %v4987_v29 = vadd.f32 %v4901_v3, %v4570_v54  ;;  %v5174_v40 = vshrl.u32 %v10740_v26, 16  ;;  %v5177_v50 = vshll.u32 %v10740_v26, 16 }
 0x441   :  { %v4571_v62 = vadd.f32 %v4487_v47, %v4260_v41  ;;  %v4783_v47 = vsel %vm734_vm3, %v4780_v63, %v4782_v28 }
 0x442   :  { %v10733_v36 = vadd.f32 %v5325_v30, %v4987_v29  ;;  %v4489_v35 = vpop.f32.mrf.mxu3  ;;  %v5176_v29 = vrot.slane %v5174_v40, 1  ;;  %v5179_v63 = vrot.slane %v5177_v50, 2  ;;  %v10764_v50 = vld [vmem:[%s11567_s0 + $0x154] sm:$0xff] }
 0x443   :  { %v5328_v0 = vpop.f32.mrf.mxu1 }
 0x446   :  { %v4261_v54 = vpop.f32.mrf.mxu2  ;;  %7846 = vmatmul.msk.bf16.gmra.mxu1 %vm387_vm2, %v5172_v22 }
 0x447   :  { %v4904_v18 = vpop.f32.mrf.mxu0  ;;  %v4262_v30 = vadd.f32 %v4261_v54, %v9915_v34  ;;  %7679 = vmatmul.msk.bf16.gmra.mxu3 %vm387_vm2, %v4368_v61 }
 0x448   :  { %v4988_v43 = vadd.f32 %v4904_v18, %v4571_v62  ;;  %v11746_v62 = vld [vmem:[#allocation27_spill] sm:$0xff]  ;;  %v5180_v18 = vor.u32 %v5179_v63, %v5176_v29 }
 0x449   :  { %v4572_v2 = vadd.f32 %v4489_v35, %v4262_v30 }
 0x44a   :  { %7823 = vmatmul.msk.bf16.gmra.mxu0 %vm387_vm2, %v4783_v47  ;;  %v10750_v3 = vadd.f32 %v5328_v0, %v4988_v43  ;;  %v4492_v45 = vpop.f32.mrf.mxu3  ;;  %v4369_v47 = vrot.slane %v8268_v21, 1  ;;  %v5181_v40 = vsel %vm1424_vm5, %v5171_v32, %v5180_v18  ;;  %v5183_v32 = vshrl.u32 %v10764_v50, 16 }
 0x44b   :  { %7656 = vmatmul.msk.bf16.gmra.mxu2 %vm387_vm2, %v8266_v5  ;;  %v5330_v41 = vpop.f32.mrf.mxu1  ;;  %v4784_v5 = vrot.slane %v10740_v26, 1  ;;  %v5186_v26 = vshll.u32 %v10764_v50, 16 }
 0x44e   :  { %v4264_v22 = vpop.f32.mrf.mxu2 }
 0x44f   :  { %v4906_v34 = vpop.f32.mrf.mxu0  ;;  %v4265_v54 = vadd.f32 %v4264_v22, %v11746_v62 }
 0x450   :  { %v4989_v61 = vadd.f32 %v4906_v34, %v4572_v2  ;;  %v4370_v2 = vsel %vm734_vm3, %v4367_v20, %v4369_v47 }
 0x451   :  { %v4573_v35 = vadd.f32 %v4492_v45, %v4265_v54  ;;  %v4785_v45 = vsel %vm734_vm3, %v4782_v28, %v4784_v5  ;;  %v5188_v28 = vrot.slane %v5186_v26, 2 }
 0x452   :  { %v10757_v0 = vadd.f32 %v5330_v41, %v4989_v61  ;;  %v4494_v30 = vpop.f32.mrf.mxu3  ;;  %v11747_v41 = vld [vmem:[#allocation29_spill] sm:$0xff] }
 0x453   :  { %v5333_v43 = vpop.f32.mrf.mxu1 }
 0x456   :  { %v4266_v29 = vpop.f32.mrf.mxu2  ;;  %7847 = vmatmul.msk.bf16.gmra.mxu1 %vm387_vm2, %v5181_v40  ;;  %v5185_v40 = vrot.slane %v5183_v32, 1 }
 0x457   :  { %v4909_v63 = vpop.f32.mrf.mxu0  ;;  %v4267_v22 = vadd.f32 %v4266_v29, %v11747_v41  ;;  %7680 = vmatmul.msk.bf16.gmra.mxu3 %vm387_vm2, %v4370_v2 }
 0x458   :  { %v4990_v34 = vadd.f32 %v4909_v63, %v4573_v35  ;;  %v11749_v35 = vld [vmem:[#allocation6_spill] sm:$0xff]  ;;  %v5189_v41 = vor.u32 %v5188_v28, %v5185_v40 }
 0x459   :  { %v4574_v62 = vadd.f32 %v4494_v30, %v4267_v22 }
 0x45a   :  { %7824 = vmatmul.msk.bf16.gmra.mxu0 %vm387_vm2, %v4785_v45  ;;  %v10774_v54 = vadd.f32 %v5333_v43, %v4990_v34  ;;  %v4497_v20 = vpop.f32.mrf.mxu3  ;;  %v4371_v45 = vrot.slane %v8269_v23, 1  ;;  %v5190_v32 = vsel %vm1424_vm5, %v5180_v18, %v5189_v41 }
 0x45b   :  { %7657 = vmatmul.msk.bf16.gmra.mxu2 %vm387_vm2, %v8267_v25  ;;  %v5335_v61 = vpop.f32.mrf.mxu1  ;;  %v4786_v25 = vrot.slane %v10764_v50, 1 }
 0x45c   :  { %11748 = vst [vmem:[#allocation5_spill] sm:$0xff] %v10774_v54  ;;  %v4372_v26 = vsel %vm734_vm3, %v4369_v47, %v4371_v45 }
 0x45e   :  { %v4269_v10 = vpop.f32.mrf.mxu2 }
 0x45f   :  { %v4911_v29 = vpop.f32.mrf.mxu0  ;;  %v4270_v63 = vadd.f32 %v4269_v10, %v11749_v35  ;;  %v10788_v10 = vld [vmem:[%s11567_s0 + $0x15c] sm:$0xff] }
 0x460   :  { %v4991_v2 = vadd.f32 %v4911_v29, %v4574_v62  ;;  %v5192_v18 = vshrl.u32 %v10788_v10, 16  ;;  %v5195_v50 = vshll.u32 %v10788_v10, 16 }
 0x461   :  { %v4575_v30 = vadd.f32 %v4497_v20, %v4270_v63  ;;  %v4787_v20 = vsel %vm734_vm3, %v4784_v5, %v4786_v25 }
 0x462   :  { %v10781_v43 = vadd.f32 %v5335_v61, %v4991_v2  ;;  %v4499_v22 = vpop.f32.mrf.mxu3  ;;  %v11751_v61 = vld [vmem:[#allocation7_spill] sm:$0xff]  ;;  %v5197_v5 = vrot.slane %v5195_v50, 2 }
 0x463   :  { %v5338_v34 = vpop.f32.mrf.mxu1 }
 0x464   :  { %11750 = vst [vmem:[#allocation27_spill] sm:$0xff] %v10781_v43  ;;  %v10805_v43 = vld [vmem:[%s11567_s0 + $0x15c] sm:$0xff] }
 0x466   :  { %v4271_v62 = vpop.f32.mrf.mxu2  ;;  %7848 = vmatmul.msk.bf16.gmra.mxu1 %vm387_vm2, %v5190_v32  ;;  %v5194_v32 = vrot.slane %v5192_v18, 1 }
 0x467   :  { %v4914_v40 = vpop.f32.mrf.mxu0  ;;  %v4272_v28 = vadd.f32 %v4271_v62, %v11751_v61  ;;  %7681 = vmatmul.msk.bf16.gmra.mxu3 %vm387_vm2, %v4372_v26 }
 0x468   :  { %v4992_v29 = vadd.f32 %v4914_v40, %v4575_v30  ;;  %v11753_v30 = vld [vmem:[#allocation8_spill] sm:$0xff]  ;;  %v5198_v61 = vor.u32 %v5197_v5, %v5194_v32 }
 0x469   :  { %v4576_v35 = vadd.f32 %v4499_v22, %v4272_v28  ;;  %v4373_v22 = vrot.slane %v10805_v43, 1  ;;  %v4788_v28 = vrot.slane %v10788_v10, 1 }
 0x46a   :  { %7825 = vmatmul.msk.bf16.gmra.mxu0 %vm387_vm2, %v4787_v20  ;;  %v10798_v63 = vadd.f32 %v5338_v34, %v4992_v29  ;;  %v4502_v47 = vpop.f32.mrf.mxu3  ;;  %v5199_v18 = vsel %vm1424_vm5, %v5189_v41, %v5198_v61 }
 0x46b   :  { %7658 = vmatmul.msk.bf16.gmra.mxu2 %vm387_vm2, %v8268_v21  ;;  %v5340_v2 = vpop.f32.mrf.mxu1  ;;  %v4374_v50 = vsel %vm734_vm3, %v4371_v45, %v4373_v22 }
 0x46c   :  { %11752 = vst [vmem:[#allocation29_spill] sm:$0xff] %v10798_v63 }
 0x46e   :  { %v4274_v55 = vpop.f32.mrf.mxu2 }
 0x46f   :  { %v4916_v62 = vpop.f32.mrf.mxu0  ;;  %v4275_v40 = vadd.f32 %v4274_v55, %v11753_v30  ;;  %v10815_v55 = vld [vmem:[%s11567_s0 + $0x164] sm:$0xff] }
 0x470   :  { %v4993_v26 = vadd.f32 %v4916_v62, %v4576_v35  ;;  %v5201_v41 = vshrl.u32 %v10815_v55, 16  ;;  %v5204_v10 = vshll.u32 %v10815_v55, 16 }
 0x471   :  { %v4577_v34 = vadd.f32 %v4502_v47, %v4275_v40  ;;  %v4789_v47 = vsel %vm734_vm3, %v4786_v25, %v4788_v28 }
 0x472   :  { %v10808_v20 = vadd.f32 %v5340_v2, %v4993_v26  ;;  %v4504_v21 = vpop.f32.mrf.mxu3  ;;  %v11755_v2 = vld [vmem:[#allocation9_spill] sm:$0xff]  ;;  %v5206_v25 = vrot.slane %v5204_v10, 2 }
 0x473   :  { %v5343_v29 = vpop.f32.mrf.mxu1 }
 0x474   :  { %11754 = vst [vmem:[#allocation6_spill] sm:$0xff] %v10808_v20 }
 0x476   :  { %v4276_v35 = vpop.f32.mrf.mxu2  ;;  %7849 = vmatmul.msk.bf16.gmra.mxu1 %vm387_vm2, %v5199_v18  ;;  %v5203_v18 = vrot.slane %v5201_v41, 1 }
 0x477   :  { %v4919_v32 = vpop.f32.mrf.mxu0  ;;  %v4277_v5 = vadd.f32 %v4276_v35, %v11755_v2  ;;  %7682 = vmatmul.msk.bf16.gmra.mxu3 %vm387_vm2, %v4374_v50 }
 0x478   :  { %v4994_v62 = vadd.f32 %v4919_v32, %v4577_v34  ;;  %v7829_v34 = vld [vmem:[%s11567_s0 + $0x16c] sm:$0x3]  ;;  %v5207_v20 = vor.u32 %v5206_v25, %v5203_v18 }
 0x479   :  { %v4578_v30 = vadd.f32 %v4504_v21, %v4277_v5  ;;  %v4375_v21 = vrot.slane %v10142_v7, 1  ;;  %v10846_v7 = vld [vmem:[%s11567_s0 + $0xd0] sm:$0xf]  ;;  %v7726_v25 = vld [vmem:[%s11567_s0 + $0x16c] sm:$0x1] }
 0x47a   :  { %7826 = vmatmul.msk.bf16.gmra.mxu0 %vm387_vm2, %v4789_v47  ;;  %v10825_v40 = vadd.f32 %v5343_v29, %v4994_v62  ;;  %v4507_v45 = vpop.f32.mrf.mxu3  ;;  %v5019_v47 = vunpack.c.l.b16 %v7829_v34  ;;  %v4790_v62 = vrot.slane %v10815_v55, 1  ;;  %v5208_v10 = vsel %vm1424_vm5, %v5198_v61, %v5207_v20 }
 0x47b   :  { %7659 = vmatmul.msk.bf16.gmra.mxu2 %vm387_vm2, %v8269_v23  ;;  %v5345_v26 = vpop.f32.mrf.mxu1  ;;  %v4376_v63 = vsel %vm734_vm3, %v4373_v22, %v4375_v21 }
 0x47c   :  { %11756 = vst [vmem:[#allocation7_spill] sm:$0xff] %v10825_v40  ;;  %v10837_v40 = vpack.c.b16 %v5019_v47, %v5019_v47  ;;  %v4791_v55 = vsel %vm734_vm3, %v4788_v28, %v4790_v62 }
 0x47e   :  { %v4279_v50 = vpop.f32.mrf.mxu2  ;;  %11758 = vst [vmem:[#allocation9_spill] sm:$0xff] %v10837_v40  ;;  %v5210_v22 = vshrl.u32 %v10837_v40, 16  ;;  %v5213_v18 = vshll.u32 %v10837_v40, 16 }
 0x47f   :  { %v4921_v35 = vpop.f32.mrf.mxu0  ;;  %v4280_v32 = vadd.f32 %v4279_v50, %v10117_v60  ;;  %v7875_v60 = vld [vmem:[%s11567_s0 + $0xcc] sm:$0xc]  ;;  %v5798_v50 = vunpack.c.l.b16 %v10846_v7 }
 0x480   :  { %v4995_v2 = vadd.f32 %v4921_v35, %v4578_v30  ;;  %v5797_v34 = vunpack.c.l.b16 %v7875_v60  ;;  %v5212_v47 = vrot.slane %v5210_v22, 1  ;;  %v5215_v21 = vrot.slane %v5213_v18, 2 }
 0x481   :  { %v4579_v29 = vadd.f32 %v4507_v45, %v4280_v32  ;;  %v4728_v32 = vunpack.c.l.b16 %v7726_v25 }
 0x482   :  { %v10833_v5 = vadd.f32 %v5345_v26, %v4995_v2  ;;  %v4509_v23 = vpop.f32.mrf.mxu3 }
 0x483   :  { %v5348_v41 = vpop.f32.mrf.mxu1 }
 0x484   :  { %11757 = vst [vmem:[#allocation8_spill] sm:$0xff] %v10833_v5 }
 0x486   :  { %v4281_v30 = vpop.f32.mrf.mxu2  ;;  %7850 = vmatmul.msk.bf16.gmra.mxu1 %vm387_vm2, %v5208_v10 }
 0x487   :  { %v4924_v45 = vpop.f32.mrf.mxu0  ;;  %v4282_v61 = vadd.f32 %v4281_v30, %v10154_v56  ;;  %7683 = vmatmul.msk.bf16.gmra.mxu3 %vm387_vm2, %v4376_v63  ;;  %v7852_v56 = vld [vmem:[%s11567_s0 + $0xc4] sm:$0xc]  ;;  %v4750_v30 = vpack.c.b16 %v4728_v32, %v4728_v32 }
 0x488   :  { %v4996_v26 = vadd.f32 %v4924_v45, %v4579_v29  ;;  %v10869_v29 = vld [vmem:[%s11567_s0 + $0xd4] sm:$0xff]  ;;  %v5443_v10 = vunpack.c.l.b16 %v7852_v56 }
 0x489   :  { %v4580_v35 = vadd.f32 %v4509_v23, %v4282_v61  ;;  %v5840_v23 = vpack.c.b16 %v5798_v50, %v5797_v34  ;;  %v4792_v5 = vrot.slane %v4750_v30, 1 }
 0x48a   :  { %7827 = vmatmul.msk.bf16.gmra.mxu0 %vm387_vm2, %v4791_v55  ;;  %v10862_v28 = vadd.f32 %v5348_v41, %v4996_v26  ;;  %v4512_v63 = vpop.f32.mrf.mxu3  ;;  %v5216_v55 = vor.u32 %v5215_v21, %v5212_v47  ;;  %v11760_v26 = vld [vmem:[#allocation35_spill] sm:$0xff] }
 0x48b   :  { %7660 = vmatmul.msk.bf16.gmra.mxu2 %vm387_vm2, %v10805_v43  ;;  %v5350_v2 = vpop.f32.mrf.mxu1  ;;  %v5862_v61 = vrot.slane %v5840_v23, 2  ;;  %v5863_v43 = vrot.slane %v10869_v29, 2  ;;  %v11761_v22 = vunpack.c.l.b16 %v11760_v26  ;;  %v8043_v47 = vld [vmem:[%s11567_s0 + $0xcc] sm:$0x8]  ;;  %v4793_v21 = vsel %vm734_vm3, %v4790_v62, %v4792_v5 }
 0x48c   :  { %11759 = vst [vmem:[#allocation54_spill] sm:$0xff] %v10862_v28  ;;  %v5217_v56 = vsel %vm1424_vm5, %v5207_v20, %v5216_v55  ;;  %v6133_v55 = vshrl.u32 %v5840_v23, 16  ;;  %v6141_v26 = vshrl.u32 %v10869_v29, 16  ;;  %v6144_v5 = vshll.u32 %v10869_v29, 16 }
 0x48d   :  { %v5444_v18 = vpack.c.b16 %v11761_v22, %v5443_v10  ;;  %v5864_v32 = vsel %vm1850_vm4, %v5862_v61, %v5863_v43  ;;  %v6136_v61 = vshll.u32 %v5840_v23, 16 }
 0x48e   :  { %v4284_v60 = vpop.f32.mrf.mxu2 }
 0x48f   :  { %v4926_v7 = vpop.f32.mrf.mxu0  ;;  %v4285_v41 = vadd.f32 %v4284_v60, %v10198_v24  ;;  %v5445_v54 = vrot.slane %v5444_v18, 2  ;;  %v8271_v24 = vld [vmem:[%s11567_s0 + $0xcc] sm:$0xff]  ;;  %v6554_v60 = vunpack.c.l.b16 %v8043_v47  ;;  %v6135_v18 = vrot.slane %v6133_v55, 2 }
 0x490   :  { %v4997_v45 = vadd.f32 %v4926_v7, %v4580_v35  ;;  %v5446_v35 = vrot.slane %v8271_v24, 2  ;;  %v6557_v47 = vrot.slane %v10869_v29, 3 }
 0x491   :  { %v4581_v25 = vadd.f32 %v4512_v63, %v4285_v41 }
 0x492   :  { %v10875_v40 = vadd.f32 %v5350_v2, %v4997_v45  ;;  %v4514_v28 = vpop.f32.mrf.mxu3  ;;  %v5447_v7 = vsel %vm1850_vm4, %v5445_v54, %v5446_v35  ;;  %v10899_v54 = vld [vmem:[%s11567_s0 + $0xdc] sm:$0xff] }
 0x493   :  { %v5353_v34 = vpop.f32.mrf.mxu1 }
 0x496   :  { %v4286_v63 = vpop.f32.mrf.mxu2  ;;  %7851 = vmatmul.msk.bf16.gmra.mxu1 %vm387_vm2, %v5217_v56  ;;  %v6146_v56 = vrot.slane %v6144_v5, 3 }
 0x497   :  { %v4929_v2 = vpop.f32.mrf.mxu0  ;;  %v4287_v20 = vadd.f32 %v4286_v63, %v10224_v52  ;;  %7999 = vmatmul.msk.bf16.vlgmr.msra.gmra.mxu3 %vm387_vm2, %v5864_v32  ;;  %v6555_v52 = vpack.c.b16 %v5798_v50, %v6554_v60  ;;  %v5865_v63 = vrot.slane %v10899_v54, 2 }
 0x498   :  { %v4998_v10 = vadd.f32 %v4929_v2, %v4581_v25  ;;  %v6138_v25 = vrot.slane %v6136_v61, 3 }
 0x499   :  { %v4582_v30 = vadd.f32 %v4514_v28, %v4287_v20  ;;  %v6556_v24 = vrot.slane %v6555_v52, 3  ;;  %v5866_v55 = vsel %vm1850_vm4, %v5863_v43, %v5865_v63 }
 0x49a   :  { %7828 = vmatmul.msk.bf16.gmra.mxu0 %vm387_vm2, %v4793_v21  ;;  %v10891_v41 = vadd.f32 %v5353_v34, %v4998_v10  ;;  %v4517_v45 = vpop.f32.mrf.mxu3  ;;  %v6143_v34 = vrot.slane %v6141_v26, 2  ;;  %v6139_v20 = vor.u32 %v6138_v25, %v6135_v18  ;;  %v6153_v18 = vshll.u32 %v10899_v54, 16 }
 0x49b   :  { %v5355_v62 = vpop.f32.mrf.mxu1  ;;  %7854 = vmatmul.msk.bf16.vlgmr.msra.gmra.mxu2 %vm387_vm2, %v5447_v7  ;;  %v6558_v7 = vsel %vm2966_vm7, %v6556_v24, %v6557_v47 }
 0x49c   :  { %v6147_v10 = vor.u32 %v6146_v56, %v6143_v34 }
 0x49e   :  { %v4289_v22 = vpop.f32.mrf.mxu2 }
 0x49f   :  { %v4931_v28 = vpop.f32.mrf.mxu0  ;;  %v4290_v23 = vadd.f32 %v4289_v22, %v10243_v4  ;;  %v8272_v4 = vld [vmem:[%s11567_s0 + $0xd4] sm:$0xff] }
 0x4a0   :  { %v4999_v32 = vadd.f32 %v4931_v28, %v4582_v30  ;;  %v5448_v30 = vrot.slane %v8272_v4, 2  ;;  %v6150_v28 = vshrl.u32 %v10899_v54, 16 }
 0x4a1   :  { %v4583_v50 = vadd.f32 %v4517_v45, %v4290_v23  ;;  %v6148_v45 = vsel %vm2540_vm6, %v6139_v20, %v6147_v10  ;;  %v6155_v23 = vrot.slane %v6153_v18, 3 }
 0x4a2   :  { %v10904_v2 = vadd.f32 %v5355_v62, %v4999_v32  ;;  %v4519_v21 = vpop.f32.mrf.mxu3  ;;  %v5449_v62 = vsel %vm1850_vm4, %v5446_v35, %v5448_v30  ;;  %v6152_v56 = vrot.slane %v6150_v28, 2 }
 0x4a3   :  { %v5358_v60 = vpop.f32.mrf.mxu1 }
 0x4a6   :  { %v4291_v61 = vpop.f32.mrf.mxu2  ;;  %8045 = vmatmul.msk.bf16.vlgmr.msra.gmra.mxu1 %vm387_vm2, %v6558_v7 }
 0x4a7   :  { %v4934_v29 = vpop.f32.mrf.mxu0  ;;  %v4292_v26 = vadd.f32 %v4291_v61, %v10268_v51  ;;  %8000 = vmatmul.msk.bf16.gmra.mxu3 %vm387_vm2, %v5866_v55  ;;  %v10925_v51 = vld [vmem:[%s11567_s0 + $0xe4] sm:$0xff]  ;;  %v6156_v55 = vor.u32 %v6155_v23, %v6152_v56 }
 0x4a8   :  { %v5000_v5 = vadd.f32 %v4934_v29, %v4583_v50  ;;  %v6559_v50 = vrot.slane %v10899_v54, 3  ;;  %v6159_v18 = vshrl.u32 %v10925_v51, 16 }
 0x4a9   :  { %v4584_v43 = vadd.f32 %v4519_v21, %v4292_v26  ;;  %v5867_v21 = vrot.slane %v10925_v51, 2  ;;  %v6157_v54 = vsel %vm2540_vm6, %v6147_v10, %v6156_v55 }
 0x4aa   :  { %8022 = vmatmul.msk.bf16.vlgmr.msra.gmra.mxu0 %vm387_vm2, %v6148_v45  ;;  %v10917_v52 = vadd.f32 %v5358_v60, %v5000_v5  ;;  %v4522_v22 = vpop.f32.mrf.mxu3  ;;  %v6560_v61 = vsel %vm2966_vm7, %v6557_v47, %v6559_v50  ;;  %v8273_v45 = vld [vmem:[%s11567_s0 + $0xdc] sm:$0xff] }
 0x4ab   :  { %v5360_v25 = vpop.f32.mrf.mxu1  ;;  %7855 = vmatmul.msk.bf16.gmra.mxu2 %vm387_vm2, %v5449_v62  ;;  %v5868_v29 = vsel %vm1850_vm4, %v5865_v63, %v5867_v21 }
 0x4ae   :  { %v4294_v34 = vpop.f32.mrf.mxu2 }
 0x4af   :  { %v4936_v35 = vpop.f32.mrf.mxu0  ;;  %v4295_v32 = vadd.f32 %v4294_v34, %v10286_v59  ;;  %v5450_v59 = vrot.slane %v8273_v45, 2 }
 0x4b0   :  { %v5001_v24 = vadd.f32 %v4936_v35, %v4584_v43  ;;  %v6161_v35 = vrot.slane %v6159_v18, 2 }
 0x4b1   :  { %v4585_v20 = vadd.f32 %v4522_v22, %v4295_v32  ;;  %v5451_v47 = vsel %vm1850_vm4, %v5448_v30, %v5450_v59 }
 0x4b2   :  { %v10930_v60 = vadd.f32 %v5360_v25, %v5001_v24  ;;  %v4524_v7 = vpop.f32.mrf.mxu3  ;;  %v6162_v25 = vshll.u32 %v10925_v51, 16  ;;  %v6561_v24 = vrot.slane %v10925_v51, 3 }
 0x4b3   :  { %v5363_v4 = vpop.f32.mrf.mxu1 }
 0x4b4   :  { %v6164_v56 = vrot.slane %v6162_v25, 3 }
 0x4b6   :  { %v4296_v26 = vpop.f32.mrf.mxu2  ;;  %8046 = vmatmul.msk.bf16.gmra.mxu1 %vm387_vm2, %v6560_v61 }
 0x4b7   :  { %v4939_v5 = vpop.f32.mrf.mxu0  ;;  %v4297_v62 = vadd.f32 %v4296_v26, %v10308_v14  ;;  %8001 = vmatmul.msk.bf16.gmra.mxu3 %vm387_vm2, %v5868_v29  ;;  %v10951_v14 = vld [vmem:[%s11567_s0 + $0xec] sm:$0xff]  ;;  %v6165_v29 = vor.u32 %v6164_v56, %v6161_v35  ;;  %v6562_v26 = vsel %vm2966_vm7, %v6559_v50, %v6561_v24 }
 0x4b8   :  { %v5002_v43 = vadd.f32 %v4939_v5, %v4585_v20  ;;  %v5869_v20 = vrot.slane %v10951_v14, 2  ;;  %v6168_v25 = vshrl.u32 %v10951_v14, 16 }
 0x4b9   :  { %v4586_v63 = vadd.f32 %v4524_v7, %v4297_v62  ;;  %v6166_v51 = vsel %vm2540_vm6, %v6156_v55, %v6165_v29 }
 0x4ba   :  { %8023 = vmatmul.msk.bf16.gmra.mxu0 %vm387_vm2, %v6157_v54  ;;  %v10943_v22 = vadd.f32 %v5363_v4, %v5002_v43  ;;  %v4527_v28 = vpop.f32.mrf.mxu3  ;;  %v5870_v5 = vsel %vm1850_vm4, %v5867_v21, %v5869_v20  ;;  %v8274_v54 = vld [vmem:[%s11567_s0 + $0xe4] sm:$0xff] }
 0x4bb   :  { %v5365_v34 = vpop.f32.mrf.mxu1  ;;  %7856 = vmatmul.msk.bf16.gmra.mxu2 %vm387_vm2, %v5451_v47 }
 0x4be   :  { %v4299_v10 = vpop.f32.mrf.mxu2 }
 0x4bf   :  { %v4941_v30 = vpop.f32.mrf.mxu0  ;;  %v4300_v23 = vadd.f32 %v4299_v10, %v10326_v58  ;;  %v5452_v58 = vrot.slane %v8274_v54, 2 }
 0x4c0   :  { %v5003_v32 = vadd.f32 %v4941_v30, %v4586_v63  ;;  %v6170_v30 = vrot.slane %v6168_v25, 2 }
 0x4c1   :  { %v4587_v7 = vadd.f32 %v4527_v28, %v4300_v23  ;;  %v5453_v50 = vsel %vm1850_vm4, %v5450_v59, %v5452_v58 }
 0x4c2   :  { %v10956_v4 = vadd.f32 %v5365_v34, %v5003_v32  ;;  %v4529_v61 = vpop.f32.mrf.mxu3  ;;  %v6171_v34 = vshll.u32 %v10951_v14, 16  ;;  %v6563_v32 = vrot.slane %v10951_v14, 3 }
 0x4c3   :  { %v5368_v45 = vpop.f32.mrf.mxu1 }
 0x4c4   :  { %v6173_v35 = vrot.slane %v6171_v34, 3 }
 0x4c6   :  { %v4301_v62 = vpop.f32.mrf.mxu2  ;;  %8047 = vmatmul.msk.bf16.gmra.mxu1 %vm387_vm2, %v6562_v26 }
 0x4c7   :  { %v4944_v43 = vpop.f32.mrf.mxu0  ;;  %v4302_v47 = vadd.f32 %v4301_v62, %v10348_v57  ;;  %8002 = vmatmul.msk.bf16.gmra.mxu3 %vm387_vm2, %v5870_v5  ;;  %v10977_v57 = vld [vmem:[%s11567_s0 + $0xf4] sm:$0xff]  ;;  %v6174_v5 = vor.u32 %v6173_v35, %v6170_v30  ;;  %v6564_v62 = vsel %vm2966_vm7, %v6561_v24, %v6563_v32 }
 0x4c8   :  { %v5004_v63 = vadd.f32 %v4944_v43, %v4587_v7  ;;  %v5871_v7 = vrot.slane %v10977_v57, 2  ;;  %v6177_v34 = vshrl.u32 %v10977_v57, 16 }
 0x4c9   :  { %v4588_v21 = vadd.f32 %v4529_v61, %v4302_v47  ;;  %v6175_v14 = vsel %vm2540_vm6, %v6165_v29, %v6174_v5 }
 0x4ca   :  { %8024 = vmatmul.msk.bf16.gmra.mxu0 %vm387_vm2, %v6166_v51  ;;  %v10969_v28 = vadd.f32 %v5368_v45, %v5004_v63  ;;  %v4532_v18 = vpop.f32.mrf.mxu3  ;;  %v5872_v43 = vsel %vm1850_vm4, %v5869_v20, %v5871_v7  ;;  %v8275_v51 = vld [vmem:[%s11567_s0 + $0xec] sm:$0xff] }
 0x4cb   :  { %v5370_v10 = vpop.f32.mrf.mxu1  ;;  %7857 = vmatmul.msk.bf16.gmra.mxu2 %vm387_vm2, %v5453_v50 }
 0x4ce   :  { %v4304_v55 = vpop.f32.mrf.mxu2 }
 0x4cf   :  { %v4946_v59 = vpop.f32.mrf.mxu0  ;;  %v4305_v56 = vadd.f32 %v4304_v55, %v10366_v38  ;;  %v5454_v38 = vrot.slane %v8275_v51, 2 }
 0x4d0   :  { %v5005_v23 = vadd.f32 %v4946_v59, %v4588_v21  ;;  %v6179_v59 = vrot.slane %v6177_v34, 2 }
 0x4d1   :  { %v4589_v61 = vadd.f32 %v4532_v18, %v4305_v56  ;;  %v5455_v24 = vsel %vm1850_vm4, %v5452_v58, %v5454_v38 }
 0x4d2   :  { %v10982_v45 = vadd.f32 %v5370_v10, %v5005_v23  ;;  %v4534_v26 = vpop.f32.mrf.mxu3  ;;  %v6180_v10 = vshll.u32 %v10977_v57, 16  ;;  %v6565_v23 = vrot.slane %v10977_v57, 3 }
 0x4d3   :  { %v5373_v54 = vpop.f32.mrf.mxu1 }
 0x4d4   :  { %v6182_v30 = vrot.slane %v6180_v10, 3 }
 0x4d6   :  { %v4306_v47 = vpop.f32.mrf.mxu2  ;;  %8048 = vmatmul.msk.bf16.gmra.mxu1 %vm387_vm2, %v6564_v62 }
 0x4d7   :  { %v4949_v63 = vpop.f32.mrf.mxu0  ;;  %v4307_v50 = vadd.f32 %v4306_v47, %v10388_v33  ;;  %8003 = vmatmul.msk.bf16.gmra.mxu3 %vm387_vm2, %v5872_v43  ;;  %v11003_v33 = vld [vmem:[%s11567_s0 + $0xfc] sm:$0xff]  ;;  %v6183_v43 = vor.u32 %v6182_v30, %v6179_v59  ;;  %v6566_v47 = vsel %vm2966_vm7, %v6563_v32, %v6565_v23 }
 0x4d8   :  { %v5006_v21 = vadd.f32 %v4949_v63, %v4589_v61  ;;  %v5873_v61 = vrot.slane %v11003_v33, 2  ;;  %v6186_v10 = vshrl.u32 %v11003_v33, 16 }
 0x4d9   :  { %v4590_v20 = vadd.f32 %v4534_v26, %v4307_v50  ;;  %v6184_v57 = vsel %vm2540_vm6, %v6174_v5, %v6183_v43 }
 0x4da   :  { %8025 = vmatmul.msk.bf16.gmra.mxu0 %vm387_vm2, %v6175_v14  ;;  %v10995_v18 = vadd.f32 %v5373_v54, %v5006_v21  ;;  %v4537_v25 = vpop.f32.mrf.mxu3  ;;  %v5874_v63 = vsel %vm1850_vm4, %v5871_v7, %v5873_v61  ;;  %v8276_v14 = vld [vmem:[%s11567_s0 + $0xf4] sm:$0xff] }
 0x4db   :  { %v5375_v55 = vpop.f32.mrf.mxu1  ;;  %7858 = vmatmul.msk.bf16.gmra.mxu2 %vm387_vm2, %v5455_v24 }
 0x4de   :  { %v4309_v29 = vpop.f32.mrf.mxu2 }
 0x4df   :  { %v4951_v58 = vpop.f32.mrf.mxu0  ;;  %v4310_v35 = vadd.f32 %v4309_v29, %v10406_v11  ;;  %v5456_v11 = vrot.slane %v8276_v14, 2 }
 0x4e0   :  { %v5007_v56 = vadd.f32 %v4951_v58, %v4590_v20  ;;  %v6188_v58 = vrot.slane %v6186_v10, 2 }
 0x4e1   :  { %v4591_v26 = vadd.f32 %v4537_v25, %v4310_v35  ;;  %v5457_v32 = vsel %vm1850_vm4, %v5454_v38, %v5456_v11 }
 0x4e2   :  { %v11008_v54 = vadd.f32 %v5375_v55, %v5007_v56  ;;  %v4539_v62 = vpop.f32.mrf.mxu3  ;;  %v6189_v55 = vshll.u32 %v11003_v33, 16  ;;  %v6567_v56 = vrot.slane %v11003_v33, 3 }
 0x4e3   :  { %v5378_v51 = vpop.f32.mrf.mxu1 }
 0x4e4   :  { %v6191_v59 = vrot.slane %v6189_v55, 3 }
 0x4e6   :  { %v4311_v50 = vpop.f32.mrf.mxu2  ;;  %8049 = vmatmul.msk.bf16.gmra.mxu1 %vm387_vm2, %v6566_v47 }
 0x4e7   :  { %v4954_v21 = vpop.f32.mrf.mxu0  ;;  %v4312_v24 = vadd.f32 %v4311_v50, %v10428_v1  ;;  %8004 = vmatmul.msk.bf16.gmra.mxu3 %vm387_vm2, %v5874_v63  ;;  %v11029_v1 = vld [vmem:[%s11567_s0 + $0x104] sm:$0xff]  ;;  %v6192_v63 = vor.u32 %v6191_v59, %v6188_v58  ;;  %v6568_v50 = vsel %vm2966_vm7, %v6565_v23, %v6567_v56 }
 0x4e8   :  { %v5008_v20 = vadd.f32 %v4954_v21, %v4591_v26  ;;  %v5875_v26 = vrot.slane %v11029_v1, 2  ;;  %v6195_v55 = vshrl.u32 %v11029_v1, 16 }
 0x4e9   :  { %v4592_v7 = vadd.f32 %v4539_v62, %v4312_v24  ;;  %v6193_v33 = vsel %vm2540_vm6, %v6183_v43, %v6192_v63 }
 0x4ea   :  { %8026 = vmatmul.msk.bf16.gmra.mxu0 %vm387_vm2, %v6184_v57  ;;  %v11021_v25 = vadd.f32 %v5378_v51, %v5008_v20  ;;  %v4542_v34 = vpop.f32.mrf.mxu3  ;;  %v5876_v21 = vsel %vm1850_vm4, %v5873_v61, %v5875_v26  ;;  %v8277_v57 = vld [vmem:[%s11567_s0 + $0xfc] sm:$0xff] }
 0x4eb   :  { %v5380_v29 = vpop.f32.mrf.mxu1  ;;  %7859 = vmatmul.msk.bf16.gmra.mxu2 %vm387_vm2, %v5457_v32 }
 0x4ee   :  { %v4314_v5 = vpop.f32.mrf.mxu2 }
 0x4ef   :  { %v4956_v38 = vpop.f32.mrf.mxu0  ;;  %v4315_v30 = vadd.f32 %v4314_v5, %v10446_v17  ;;  %v5458_v17 = vrot.slane %v8277_v57, 2 }
 0x4f0   :  { %v5009_v35 = vadd.f32 %v4956_v38, %v4592_v7  ;;  %v6197_v38 = vrot.slane %v6195_v55, 2 }
 0x4f1   :  { %v4593_v62 = vadd.f32 %v4542_v34, %v4315_v30  ;;  %v5459_v23 = vsel %vm1850_vm4, %v5456_v11, %v5458_v17 }
 0x4f2   :  { %v11034_v51 = vadd.f32 %v5380_v29, %v5009_v35  ;;  %v4544_v47 = vpop.f32.mrf.mxu3  ;;  %v6198_v29 = vshll.u32 %v11029_v1, 16  ;;  %v6569_v35 = vrot.slane %v11029_v1, 3 }
 0x4f3   :  { %v5383_v14 = vpop.f32.mrf.mxu1 }
 0x4f4   :  { %v6200_v58 = vrot.slane %v6198_v29, 3 }
 0x4f6   :  { %v4316_v24 = vpop.f32.mrf.mxu2  ;;  %8050 = vmatmul.msk.bf16.gmra.mxu1 %vm387_vm2, %v6568_v50 }
 0x4f7   :  { %v4959_v20 = vpop.f32.mrf.mxu0  ;;  %v4317_v32 = vadd.f32 %v4316_v24, %v10468_v48  ;;  %8005 = vmatmul.msk.bf16.gmra.mxu3 %vm387_vm2, %v5876_v21  ;;  %v11055_v48 = vld [vmem:[%s11567_s0 + $0x10c] sm:$0xff]  ;;  %v6201_v21 = vor.u32 %v6200_v58, %v6197_v38  ;;  %v6570_v24 = vsel %vm2966_vm7, %v6567_v56, %v6569_v35 }
 0x4f8   :  { %v5010_v7 = vadd.f32 %v4959_v20, %v4593_v62  ;;  %v5877_v62 = vrot.slane %v11055_v48, 2  ;;  %v6204_v29 = vshrl.u32 %v11055_v48, 16 }
 0x4f9   :  { %v4594_v61 = vadd.f32 %v4544_v47, %v4317_v32  ;;  %v6202_v1 = vsel %vm2540_vm6, %v6192_v63, %v6201_v21 }
 0x4fa   :  { %8027 = vmatmul.msk.bf16.gmra.mxu0 %vm387_vm2, %v6193_v33  ;;  %v11047_v34 = vadd.f32 %v5383_v14, %v5010_v7  ;;  %v4547_v10 = vpop.f32.mrf.mxu3  ;;  %v5878_v20 = vsel %vm1850_vm4, %v5875_v26, %v5877_v62  ;;  %v8278_v33 = vld [vmem:[%s11567_s0 + $0x104] sm:$0xff] }
 0x4fb   :  { %v5385_v5 = vpop.f32.mrf.mxu1  ;;  %7860 = vmatmul.msk.bf16.gmra.mxu2 %vm387_vm2, %v5459_v23 }
 0x4fe   :  { %v4319_v43 = vpop.f32.mrf.mxu2 }
 0x4ff   :  { %v4961_v11 = vpop.f32.mrf.mxu0  ;;  %v4320_v59 = vadd.f32 %v4319_v43, %v10486_v27  ;;  %v5460_v27 = vrot.slane %v8278_v33, 2 }
 0x500   :  { %v5011_v30 = vadd.f32 %v4961_v11, %v4594_v61  ;;  %v6206_v11 = vrot.slane %v6204_v29, 2 }
 0x501   :  { %v4595_v47 = vadd.f32 %v4547_v10, %v4320_v59  ;;  %v5461_v56 = vsel %vm1850_vm4, %v5458_v17, %v5460_v27 }
 0x502   :  { %v11060_v14 = vadd.f32 %v5385_v5, %v5011_v30  ;;  %v4549_v50 = vpop.f32.mrf.mxu3  ;;  %v6207_v5 = vshll.u32 %v11055_v48, 16  ;;  %v6571_v30 = vrot.slane %v11055_v48, 3 }
 0x503   :  { %v5388_v57 = vpop.f32.mrf.mxu1 }
 0x504   :  { %v6209_v38 = vrot.slane %v6207_v5, 3 }
 0x506   :  { %v4321_v32 = vpop.f32.mrf.mxu2  ;;  %8051 = vmatmul.msk.bf16.gmra.mxu1 %vm387_vm2, %v6570_v24 }
 0x507   :  { %v4964_v7 = vpop.f32.mrf.mxu0  ;;  %v4322_v23 = vadd.f32 %v4321_v32, %v10508_v8  ;;  %8006 = vmatmul.msk.bf16.gmra.mxu3 %vm387_vm2, %v5878_v20  ;;  %v11081_v8 = vld [vmem:[%s11567_s0 + $0x114] sm:$0xff]  ;;  %v6210_v20 = vor.u32 %v6209_v38, %v6206_v11  ;;  %v6572_v32 = vsel %vm2966_vm7, %v6569_v35, %v6571_v30 }
 0x508   :  { %v5012_v61 = vadd.f32 %v4964_v7, %v4595_v47  ;;  %v5879_v47 = vrot.slane %v11081_v8, 2  ;;  %v6213_v5 = vshrl.u32 %v11081_v8, 16 }
 0x509   :  { %v4596_v26 = vadd.f32 %v4549_v50, %v4322_v23  ;;  %v6211_v48 = vsel %vm2540_vm6, %v6201_v21, %v6210_v20 }
 0x50a   :  { %8028 = vmatmul.msk.bf16.gmra.mxu0 %vm387_vm2, %v6202_v1  ;;  %v11073_v10 = vadd.f32 %v5388_v57, %v5012_v61  ;;  %v4552_v55 = vpop.f32.mrf.mxu3  ;;  %v5880_v7 = vsel %vm1850_vm4, %v5877_v62, %v5879_v47  ;;  %v8279_v1 = vld [vmem:[%s11567_s0 + $0x10c] sm:$0xff] }
 0x50b   :  { %v5390_v43 = vpop.f32.mrf.mxu1  ;;  %7861 = vmatmul.msk.bf16.gmra.mxu2 %vm387_vm2, %v5461_v56 }
 0x50e   :  { %v4324_v63 = vpop.f32.mrf.mxu2 }
 0x50f   :  { %v4966_v17 = vpop.f32.mrf.mxu0  ;;  %v4325_v58 = vadd.f32 %v4324_v63, %v10526_v37  ;;  %v5462_v37 = vrot.slane %v8279_v1, 2 }
 0x510   :  { %v5013_v59 = vadd.f32 %v4966_v17, %v4596_v26  ;;  %v6215_v17 = vrot.slane %v6213_v5, 2 }
 0x511   :  { %v4597_v50 = vadd.f32 %v4552_v55, %v4325_v58  ;;  %v5463_v35 = vsel %vm1850_vm4, %v5460_v27, %v5462_v37  ;;  %v6573_v58 = vrot.slane %v11081_v8, 3 }
 0x512   :  { %v11086_v57 = vadd.f32 %v5390_v43, %v5013_v59  ;;  %v4554_v24 = vpop.f32.mrf.mxu3  ;;  %v6216_v43 = vshll.u32 %v11081_v8, 16 }
 0x513   :  { %v5393_v33 = vpop.f32.mrf.mxu1  ;;  %v6574_v1 = vsel %vm2966_vm7, %v6571_v30, %v6573_v58 }
 0x514   :  { %v6218_v11 = vrot.slane %v6216_v43, 3 }
 0x516   :  { %v4326_v23 = vpop.f32.mrf.mxu2  ;;  %8052 = vmatmul.msk.bf16.gmra.mxu1 %vm387_vm2, %v6572_v32  ;;  %v6219_v32 = vor.u32 %v6218_v11, %v6215_v17 }
 0x517   :  { %v4969_v61 = vpop.f32.mrf.mxu0  ;;  %v4327_v56 = vadd.f32 %v4326_v23, %v10548_v46  ;;  %8007 = vmatmul.msk.bf16.gmra.mxu3 %vm387_vm2, %v5880_v7  ;;  %v11107_v46 = vld [vmem:[%s11567_s0 + $0x11c] sm:$0xff] }
 0x518   :  { %v5014_v26 = vadd.f32 %v4969_v61, %v4597_v50  ;;  %v5881_v59 = vrot.slane %v11107_v46, 2  ;;  %v8280_v61 = vld [vmem:[%s11567_s0 + $0x114] sm:$0xff]  ;;  %v6222_v43 = vshrl.u32 %v11107_v46, 16 }
 0x519   :  { %v4598_v62 = vadd.f32 %v4554_v24, %v4327_v56 }
 0x51a   :  { %8029 = vmatmul.msk.bf16.gmra.mxu0 %vm387_vm2, %v6211_v48  ;;  %v11099_v55 = vadd.f32 %v5393_v33, %v5014_v26  ;;  %v5980_v29 = vpop.f32.mrf.mxu3  ;;  %v5882_v23 = vsel %vm1850_vm4, %v5879_v47, %v5881_v59  ;;  %v5464_v48 = vrot.slane %v8280_v61, 2 }
 0x51b   :  { %v5395_v63 = vpop.f32.mrf.mxu1  ;;  %7862 = vmatmul.msk.bf16.gmra.mxu2 %vm387_vm2, %v5463_v35 }
 0x51e   :  { %v5563_v27 = vpop.f32.mrf.mxu2 }
 0x51f   :  { %v4971_v21 = vpop.f32.mrf.mxu0  ;;  %v5668_v50 = vadd.f32 %v5563_v27, %v10581_v31  ;;  %v6220_v31 = vsel %vm2540_vm6, %v6210_v20, %v6219_v32  ;;  %v6224_v27 = vrot.slane %v6222_v43, 2 }
 0x520   :  { %v5015_v38 = vadd.f32 %v4971_v21, %v4598_v62  ;;  %v5465_v62 = vsel %vm1850_vm4, %v5462_v37, %v5464_v48  ;;  %v11134_v37 = vld [vmem:[%s11567_s0 + $0x124] sm:$0xff] }
 0x521   :  { %v6085_v56 = vadd.f32 %v5980_v29, %v5668_v50  ;;  %v6225_v29 = vshll.u32 %v11107_v46, 16  ;;  %v5883_v50 = vrot.slane %v11134_v37, 2 }
 0x522   :  { %v11112_v24 = vadd.f32 %v5395_v63, %v5015_v38  ;;  %v5982_v33 = vpop.f32.mrf.mxu3  ;;  %v6575_v38 = vrot.slane %v11107_v46, 3 }
 0x523   :  { %v6674_v7 = vpop.f32.mrf.mxu1  ;;  %v6227_v17 = vrot.slane %v6225_v29, 3  ;;  %v5884_v46 = vsel %vm1850_vm4, %v5881_v59, %v5883_v50 }
 0x526   :  { %v5565_v8 = vpop.f32.mrf.mxu2  ;;  %8053 = vmatmul.msk.bf16.gmra.mxu1 %vm387_vm2, %v6574_v1 }
 0x527   :  { %v6404_v26 = vpop.f32.mrf.mxu0  ;;  %8008 = vmatmul.msk.bf16.gmra.mxu3 %vm387_vm2, %v5882_v23  ;;  %v5669_v30 = vadd.f32 %v5565_v8, %v10589_v53  ;;  %v6228_v8 = vor.u32 %v6227_v17, %v6224_v27 }
 0x528   :  { %v6509_v35 = vadd.f32 %v6404_v26, %v6085_v56 }
 0x529   :  { %v6086_v53 = vadd.f32 %v5982_v33, %v5669_v30  ;;  %v11763_v33 = vld [vmem:[#allocation12_spill] sm:$0xff] }
 0x52a   :  { %v6779_v47 = vadd.f32 %v6674_v7, %v6509_v35  ;;  %8030 = vmatmul.msk.bf16.gmra.mxu0 %vm387_vm2, %v6220_v31  ;;  %v5985_v5 = vpop.f32.mrf.mxu3  ;;  %v11762_v7 = vld [vmem:[#allocation4_spill] sm:$0xff]  ;;  %v6576_v35 = vsel %vm2966_vm7, %v6573_v58, %v6575_v38 }
 0x52b   :  { %7863 = vmatmul.msk.bf16.gmra.mxu2 %vm387_vm2, %v5465_v62  ;;  %v6676_v20 = vpop.f32.mrf.mxu1  ;;  %v8281_v62 = vld [vmem:[%s11567_s0 + $0x11c] sm:$0xff] }
 0x52c   :  { %8066 = vst [vmem:[%s11569_s3 + $0x150] sm:$0xff] %v6779_v47  ;;  %v6864_v1 = vmul.f32 %v6779_v47, %v11762_v7  ;;  %v5466_v30 = vrot.slane %v8281_v62, 2  ;;  %v6234_v7 = vshll.u32 %v11134_v37, 16 }
 0x52e   :  { %v5568_v63 = vpop.f32.mrf.mxu2  ;;  %v5467_v58 = vsel %vm1850_vm4, %v5464_v48, %v5466_v30 }
 0x52f   :  { %v6406_v21 = vpop.f32.mrf.mxu0  ;;  %v5670_v23 = vadd.f32 %v5568_v63, %v10606_v19  ;;  %v6954_v19 = vmul.f32 %v6864_v1, %v6779_v47 }
 0x530   :  { %v6510_v11 = vadd.f32 %v6406_v21, %v6086_v53  ;;  %v6229_v21 = vsel %vm2540_vm6, %v6219_v32, %v6228_v8  ;;  %v11764_v32 = vld [vmem:[#allocation13_spill] sm:$0xff] }
 0x532   :  { %v6780_v61 = vadd.f32 %v6676_v20, %v6510_v11  ;;  %v5987_v56 = vpop.f32.mrf.mxu3  ;;  %v6087_v20 = vadd.f32 %v5985_v5, %v5670_v23  ;;  %v6231_v5 = vshrl.u32 %v11134_v37, 16 }
 0x533   :  { %v6679_v31 = vpop.f32.mrf.mxu1 }
 0x534   :  { %8067 = vst [vmem:[%s11569_s3 + $0x158] sm:$0xff] %v6780_v61  ;;  %v6865_v26 = vmul.f32 %v6780_v61, %v11763_v33 }
 0x536   :  { %v6906_v43 = vadd.f32 %v6865_v26, %v6864_v1  ;;  %v6955_v29 = vmul.f32 %v6865_v26, %v6780_v61  ;;  %v5570_v53 = vpop.f32.mrf.mxu2  ;;  %8054 = vmatmul.msk.bf16.gmra.mxu1 %vm387_vm2, %v6576_v35  ;;  %v6233_v35 = vrot.slane %v6231_v5, 2 }
 0x537   :  { %v6409_v63 = vpop.f32.mrf.mxu0  ;;  %8009 = vmatmul.msk.bf16.gmra.mxu3 %vm387_vm2, %v5884_v46  ;;  %v5671_v59 = vadd.f32 %v5570_v53, %v10613_v42  ;;  %v11165_v42 = vld [vmem:[%s11567_s0 + $0x12c] sm:$0xff]  ;;  %v6236_v46 = vrot.slane %v6234_v7, 3 }
 0x538   :  { %v6996_v27 = vadd.f32 %v6955_v29, %v6954_v19  ;;  %v6511_v17 = vadd.f32 %v6409_v63, %v6087_v20  ;;  %v6577_v29 = vrot.slane %v11134_v37, 3  ;;  %v5885_v20 = vrot.slane %v11165_v42, 2  ;;  %v8282_v37 = vld [vmem:[%s11567_s0 + $0x124] sm:$0xff] }
 0x539   :  { %v6088_v33 = vadd.f32 %v5987_v56, %v5671_v59  ;;  %v11765_v56 = vld [vmem:[#allocation14_spill] sm:$0xff] }
 0x53a   :  { %v6781_v11 = vadd.f32 %v6679_v31, %v6511_v17  ;;  %8031 = vmatmul.msk.bf16.gmra.mxu0 %vm387_vm2, %v6229_v21  ;;  %v5990_v47 = vpop.f32.mrf.mxu3  ;;  %v6237_v17 = vor.u32 %v6236_v46, %v6233_v35  ;;  %v6578_v59 = vsel %vm2966_vm7, %v6575_v38, %v6577_v29 }
 0x53b   :  { %7864 = vmatmul.msk.bf16.gmra.mxu2 %vm387_vm2, %v5467_v58  ;;  %v6681_v23 = vpop.f32.mrf.mxu1 }
 0x53c   :  { %8068 = vst [vmem:[%s11569_s3 + $0x160] sm:$0xff] %v6781_v11  ;;  %v6866_v1 = vmul.f32 %v6781_v11, %v11764_v32 }
 0x53e   :  { %v6907_v48 = vadd.f32 %v6906_v43, %v6866_v1  ;;  %v6956_v61 = vmul.f32 %v6866_v1, %v6781_v11  ;;  %v5573_v26 = vpop.f32.mrf.mxu2  ;;  %v5468_v11 = vrot.slane %v8282_v37, 2 }
 0x53f   :  { %v6411_v31 = vpop.f32.mrf.mxu0  ;;  %v5672_v53 = vadd.f32 %v5573_v26, %v10630_v16 }
 0x540   :  { %v6997_v62 = vadd.f32 %v6996_v27, %v6956_v61  ;;  %v6512_v19 = vadd.f32 %v6411_v31, %v6088_v33  ;;  %v5886_v27 = vsel %vm1850_vm4, %v5883_v50, %v5885_v20  ;;  %v5469_v38 = vsel %vm1850_vm4, %v5466_v30, %v5468_v11 }
 0x541   :  { %v6089_v7 = vadd.f32 %v5990_v47, %v5672_v53  ;;  %v6240_v47 = vshrl.u32 %v11165_v42, 16  ;;  %v6243_v31 = vshll.u32 %v11165_v42, 16 }
 0x542   :  { %v6782_v63 = vadd.f32 %v6681_v23, %v6512_v19  ;;  %v5992_v21 = vpop.f32.mrf.mxu3  ;;  %v6238_v23 = vsel %vm2540_vm6, %v6228_v8, %v6237_v17  ;;  %v11766_v8 = vld [vmem:[#allocation15_spill] sm:$0xff] }
 0x543   :  { %v6684_v58 = vpop.f32.mrf.mxu1 }
 0x544   :  { %8069 = vst [vmem:[%s11569_s3 + $0x168] sm:$0xff] %v6782_v63  ;;  %v6867_v43 = vmul.f32 %v6782_v63, %v11765_v56  ;;  %v6242_v56 = vrot.slane %v6240_v47, 2 }
 0x546   :  { %v6908_v16 = vadd.f32 %v6907_v48, %v6867_v43  ;;  %v6957_v5 = vmul.f32 %v6867_v43, %v6782_v63  ;;  %v5575_v32 = vpop.f32.mrf.mxu2  ;;  %8055 = vmatmul.msk.bf16.gmra.mxu1 %vm387_vm2, %v6578_v59  ;;  %v6245_v43 = vrot.slane %v6243_v31, 3 }
 0x547   :  { %v6414_v1 = vpop.f32.mrf.mxu0  ;;  %8010 = vmatmul.msk.bf16.gmra.mxu3 %vm387_vm2, %v5886_v27  ;;  %v5673_v50 = vadd.f32 %v5575_v32, %v10637_v12  ;;  %v11195_v12 = vld [vmem:[%s11567_s0 + $0x134] sm:$0xff]  ;;  %v6579_v27 = vrot.slane %v11165_v42, 3  ;;  %v8283_v42 = vld [vmem:[%s11567_s0 + $0x12c] sm:$0xff] }
 0x548   :  { %v6998_v61 = vadd.f32 %v6997_v62, %v6957_v5  ;;  %v6513_v33 = vadd.f32 %v6414_v1, %v6089_v7  ;;  %v5887_v37 = vrot.slane %v11195_v12, 2  ;;  %v6246_v1 = vor.u32 %v6245_v43, %v6242_v56 }
 0x549   :  { %v6090_v19 = vadd.f32 %v5992_v21, %v5673_v50  ;;  %v11767_v21 = vld [vmem:[#allocation16_spill] sm:$0xff] }
 0x54a   :  { %v6783_v26 = vadd.f32 %v6684_v58, %v6513_v33  ;;  %8032 = vmatmul.msk.bf16.gmra.mxu0 %vm387_vm2, %v6238_v23  ;;  %v5995_v48 = vpop.f32.mrf.mxu3  ;;  %v6580_v33 = vsel %vm2966_vm7, %v6577_v29, %v6579_v27 }
 0x54b   :  { %7865 = vmatmul.msk.bf16.gmra.mxu2 %vm387_vm2, %v5469_v38  ;;  %v6686_v46 = vpop.f32.mrf.mxu1  ;;  %v5470_v38 = vrot.slane %v8283_v42, 2 }
 0x54c   :  { %8070 = vst [vmem:[%s11569_s3 + $0x170] sm:$0xff] %v6783_v26  ;;  %v6868_v35 = vmul.f32 %v6783_v26, %v11766_v8  ;;  %v6247_v8 = vsel %vm2540_vm6, %v6237_v17, %v6246_v1  ;;  %v11768_v17 = vld [vmem:[#allocation17_spill] sm:$0xff] }
 0x54d   :  { %v5471_v29 = vsel %vm1850_vm4, %v5468_v11, %v5470_v38 }
 0x54e   :  { %v6909_v30 = vadd.f32 %v6908_v16, %v6868_v35  ;;  %v6958_v62 = vmul.f32 %v6868_v35, %v6783_v26  ;;  %v5578_v53 = vpop.f32.mrf.mxu2 }
 0x54f   :  { %v6416_v63 = vpop.f32.mrf.mxu0  ;;  %v5674_v5 = vadd.f32 %v5578_v53, %v10654_v49 }
 0x550   :  { %v6999_v58 = vadd.f32 %v6998_v61, %v6958_v62  ;;  %v6514_v59 = vadd.f32 %v6416_v63, %v6090_v19  ;;  %v5888_v61 = vsel %vm1850_vm4, %v5885_v20, %v5887_v37  ;;  %v6252_v19 = vshll.u32 %v11195_v12, 16 }
 0x551   :  { %v6091_v26 = vadd.f32 %v5995_v48, %v5674_v5  ;;  %v6249_v48 = vshrl.u32 %v11195_v12, 16 }
 0x552   :  { %v6784_v7 = vadd.f32 %v6686_v46, %v6514_v59  ;;  %v5997_v32 = vpop.f32.mrf.mxu3 }
 0x553   :  { %v6689_v23 = vpop.f32.mrf.mxu1  ;;  %v6251_v5 = vrot.slane %v6249_v48, 2 }
 0x554   :  { %8071 = vst [vmem:[%s11569_s3 + $0x178] sm:$0xff] %v6784_v7  ;;  %v6869_v16 = vmul.f32 %v6784_v7, %v11767_v21 }
 0x556   :  { %v6910_v49 = vadd.f32 %v6909_v30, %v6869_v16  ;;  %v6959_v50 = vmul.f32 %v6869_v16, %v6784_v7  ;;  %v5580_v47 = vpop.f32.mrf.mxu2  ;;  %8056 = vmatmul.msk.bf16.gmra.mxu1 %vm387_vm2, %v6580_v33  ;;  %v6254_v7 = vrot.slane %v6252_v19, 3 }
 0x557   :  { %v6419_v31 = vpop.f32.mrf.mxu0  ;;  %8011 = vmatmul.msk.bf16.gmra.mxu3 %vm387_vm2, %v5888_v61  ;;  %v5675_v20 = vadd.f32 %v5580_v47, %v10661_v44  ;;  %v11225_v44 = vld [vmem:[%s11567_s0 + $0x13c] sm:$0xff] }
 0x558   :  { %v7000_v35 = vadd.f32 %v6999_v58, %v6959_v50  ;;  %v6515_v46 = vadd.f32 %v6419_v31, %v6091_v26  ;;  %v5889_v33 = vrot.slane %v11225_v44, 2  ;;  %v6255_v26 = vor.u32 %v6254_v7, %v6251_v5 }
 0x559   :  { %v6092_v43 = vadd.f32 %v5997_v32, %v5675_v20  ;;  %v11769_v32 = vld [vmem:[#allocation18_spill] sm:$0xff] }
 0x55a   :  { %v6785_v62 = vadd.f32 %v6689_v23, %v6515_v46  ;;  %8033 = vmatmul.msk.bf16.gmra.mxu0 %vm387_vm2, %v6247_v8  ;;  %v6000_v30 = vpop.f32.mrf.mxu3  ;;  %v6581_v23 = vrot.slane %v11195_v12, 3  ;;  %v5890_v8 = vsel %vm1850_vm4, %v5887_v37, %v5889_v33  ;;  %v8284_v12 = vld [vmem:[%s11567_s0 + $0x134] sm:$0xff]  ;;  %v6256_v48 = vsel %vm2540_vm6, %v6246_v1, %v6255_v26  ;;  %v11770_v1 = vld [vmem:[#allocation19_spill] sm:$0xff] }
 0x55b   :  { %7866 = vmatmul.msk.bf16.gmra.mxu2 %vm387_vm2, %v5471_v29  ;;  %v6691_v63 = vpop.f32.mrf.mxu1 }
 0x55c   :  { %8072 = vst [vmem:[%s11569_s3 + $0x180] sm:$0xff] %v6785_v62  ;;  %v6870_v53 = vmul.f32 %v6785_v62, %v11768_v17  ;;  %v6582_v31 = vsel %vm2966_vm7, %v6579_v27, %v6581_v23 }
 0x55e   :  { %v6911_v11 = vadd.f32 %v6910_v49, %v6870_v53  ;;  %v6960_v56 = vmul.f32 %v6870_v53, %v6785_v62  ;;  %v5583_v58 = vpop.f32.mrf.mxu2 }
 0x55f   :  { %v6421_v59 = vpop.f32.mrf.mxu0  ;;  %v5676_v61 = vadd.f32 %v5583_v58, %v10678_v15 }
 0x560   :  { %v7001_v21 = vadd.f32 %v7000_v35, %v6960_v56  ;;  %v6516_v16 = vadd.f32 %v6421_v59, %v6092_v43  ;;  %v5472_v35 = vrot.slane %v8284_v12, 2 }
 0x561   :  { %v6093_v29 = vadd.f32 %v6000_v30, %v5676_v61  ;;  %v6258_v30 = vshrl.u32 %v11225_v44, 16 }
 0x562   :  { %v6786_v42 = vadd.f32 %v6691_v63, %v6516_v16  ;;  %v6002_v50 = vpop.f32.mrf.mxu3  ;;  %v5473_v27 = vsel %vm1850_vm4, %v5470_v38, %v5472_v35 }
 0x563   :  { %v6694_v47 = vpop.f32.mrf.mxu1 }
 0x564   :  { %8073 = vst [vmem:[%s11569_s3 + $0x188] sm:$0xff] %v6786_v42  ;;  %v6871_v49 = vmul.f32 %v6786_v42, %v11769_v32  ;;  %v6583_v32 = vrot.slane %v11225_v44, 3 }
 0x566   :  { %v6912_v15 = vadd.f32 %v6911_v11, %v6871_v49  ;;  %v6961_v46 = vmul.f32 %v6871_v49, %v6786_v42  ;;  %v5585_v20 = vpop.f32.mrf.mxu2  ;;  %8057 = vmatmul.msk.bf16.gmra.mxu1 %vm387_vm2, %v6582_v31  ;;  %v6261_v11 = vshll.u32 %v11225_v44, 16  ;;  %v8285_v44 = vld [vmem:[%s11567_s0 + $0x13c] sm:$0xff] }
 0x567   :  { %v6424_v62 = vpop.f32.mrf.mxu0  ;;  %8012 = vmatmul.msk.bf16.gmra.mxu3 %vm387_vm2, %v5890_v8  ;;  %v5677_v37 = vadd.f32 %v5585_v20, %v10685_v13  ;;  %v11255_v13 = vld [vmem:[%s11567_s0 + $0x144] sm:$0xff] }
 0x568   :  { %v7002_v19 = vadd.f32 %v7001_v21, %v6961_v46  ;;  %v6517_v17 = vadd.f32 %v6424_v62, %v6093_v29  ;;  %v6260_v21 = vrot.slane %v6258_v30, 2  ;;  %v6263_v16 = vrot.slane %v6261_v11, 3 }
 0x569   :  { %v6094_v59 = vadd.f32 %v6002_v50, %v5677_v37  ;;  %v5891_v49 = vrot.slane %v11255_v13, 2  ;;  %v11771_v50 = vld [vmem:[#allocation20_spill] sm:$0xff]  ;;  %v6584_v29 = vsel %vm2966_vm7, %v6581_v23, %v6583_v32  ;;  %v5474_v62 = vrot.slane %v8285_v44, 2 }
 0x56a   :  { %v6787_v53 = vadd.f32 %v6694_v47, %v6517_v17  ;;  %8034 = vmatmul.msk.bf16.gmra.mxu0 %vm387_vm2, %v6256_v48  ;;  %v6005_v63 = vpop.f32.mrf.mxu3  ;;  %v6264_v12 = vor.u32 %v6263_v16, %v6260_v21 }
 0x56b   :  { %7867 = vmatmul.msk.bf16.gmra.mxu2 %vm387_vm2, %v5473_v27  ;;  %v6696_v43 = vpop.f32.mrf.mxu1  ;;  %v5892_v20 = vsel %vm1850_vm4, %v5889_v33, %v5891_v49  ;;  %v5475_v23 = vsel %vm1850_vm4, %v5472_v35, %v5474_v62 }
 0x56c   :  { %8074 = vst [vmem:[%s11569_s3 + $0x190] sm:$0xff] %v6787_v53  ;;  %v6872_v56 = vmul.f32 %v6787_v53, %v11770_v1  ;;  %v6265_v37 = vsel %vm2540_vm6, %v6255_v26, %v6264_v12  ;;  %v11772_v26 = vld [vmem:[#allocation21_spill] sm:$0xff] }
 0x56e   :  { %v6913_v38 = vadd.f32 %v6912_v15, %v6872_v56  ;;  %v6962_v58 = vmul.f32 %v6872_v56, %v6787_v53  ;;  %v5588_v5 = vpop.f32.mrf.mxu2  ;;  %v6270_v56 = vshll.u32 %v11255_v13, 16 }
 0x56f   :  { %v6426_v7 = vpop.f32.mrf.mxu0  ;;  %v5678_v47 = vadd.f32 %v5588_v5, %v10702_v6 }
 0x570   :  { %v7003_v61 = vadd.f32 %v7002_v19, %v6962_v58  ;;  %v6518_v42 = vadd.f32 %v6426_v7, %v6094_v59  ;;  %v6272_v16 = vrot.slane %v6270_v56, 3 }
 0x571   :  { %v6095_v19 = vadd.f32 %v6005_v63, %v5678_v47  ;;  %v6267_v63 = vshrl.u32 %v11255_v13, 16  ;;  %v6585_v47 = vrot.slane %v11255_v13, 3  ;;  %v8286_v13 = vld [vmem:[%s11567_s0 + $0x144] sm:$0xff] }
 0x572   :  { %v6788_v31 = vadd.f32 %v6696_v43, %v6518_v42  ;;  %v6007_v8 = vpop.f32.mrf.mxu3 }
 0x573   :  { %v6699_v46 = vpop.f32.mrf.mxu1  ;;  %v6269_v21 = vrot.slane %v6267_v63, 2 }
 0x574   :  { %8075 = vst [vmem:[%s11569_s3 + $0x198] sm:$0xff] %v6788_v31  ;;  %v6873_v15 = vmul.f32 %v6788_v31, %v11771_v50 }
 0x576   :  { %v6914_v6 = vadd.f32 %v6913_v38, %v6873_v15  ;;  %v6963_v48 = vmul.f32 %v6873_v15, %v6788_v31  ;;  %v5590_v17 = vpop.f32.mrf.mxu2  ;;  %8058 = vmatmul.msk.bf16.gmra.mxu1 %vm387_vm2, %v6584_v29  ;;  %v6273_v29 = vor.u32 %v6272_v16, %v6269_v21 }
 0x577   :  { %v6429_v27 = vpop.f32.mrf.mxu0  ;;  %8013 = vmatmul.msk.bf16.gmra.mxu3 %vm387_vm2, %v5892_v20  ;;  %v5679_v33 = vadd.f32 %v5590_v17, %v10709_v9  ;;  %v11285_v9 = vld [vmem:[%s11567_s0 + $0x14c] sm:$0xff] }
 0x578   :  { %v7004_v53 = vadd.f32 %v7003_v61, %v6963_v48  ;;  %v6519_v30 = vadd.f32 %v6429_v27, %v6095_v19  ;;  %v5893_v31 = vrot.slane %v11285_v9, 2  ;;  %v5476_v19 = vrot.slane %v8286_v13, 2 }
 0x579   :  { %v6096_v59 = vadd.f32 %v6007_v8, %v5679_v33  ;;  %v11773_v8 = vld [vmem:[#allocation22_spill] sm:$0xff]  ;;  %v6279_v56 = vshll.u32 %v11285_v9, 16 }
 0x57a   :  { %v6789_v11 = vadd.f32 %v6699_v46, %v6519_v30  ;;  %8035 = vmatmul.msk.bf16.gmra.mxu0 %vm387_vm2, %v6265_v37  ;;  %v6010_v1 = vpop.f32.mrf.mxu3  ;;  %v5894_v48 = vsel %vm1850_vm4, %v5891_v49, %v5893_v31  ;;  %v6274_v30 = vsel %vm2540_vm6, %v6264_v12, %v6273_v29  ;;  %v11774_v12 = vld [vmem:[#allocation23_spill] sm:$0xff] }
 0x57b   :  { %7868 = vmatmul.msk.bf16.gmra.mxu2 %vm387_vm2, %v5475_v23  ;;  %v6701_v38 = vpop.f32.mrf.mxu1 }
 0x57c   :  { %8076 = vst [vmem:[%s11569_s3 + $0x1a0] sm:$0xff] %v6789_v11  ;;  %v6874_v43 = vmul.f32 %v6789_v11, %v11772_v26 }
 0x57e   :  { %v6915_v35 = vadd.f32 %v6914_v6, %v6874_v43  ;;  %v6964_v58 = vmul.f32 %v6874_v43, %v6789_v11  ;;  %v5593_v5 = vpop.f32.mrf.mxu2  ;;  %v6586_v6 = vsel %vm2966_vm7, %v6583_v32, %v6585_v47  ;;  %v5477_v32 = vsel %vm1850_vm4, %v5474_v62, %v5476_v19 }
 0x57f   :  { %v6431_v7 = vpop.f32.mrf.mxu0  ;;  %v5680_v50 = vadd.f32 %v5593_v5, %v10726_v39 }
 0x580   :  { %v7005_v61 = vadd.f32 %v7004_v53, %v6964_v58  ;;  %v6520_v42 = vadd.f32 %v6431_v7, %v6096_v59  ;;  %v6281_v7 = vrot.slane %v6279_v56, 3 }
 0x581   :  { %v6097_v27 = vadd.f32 %v6010_v1, %v5680_v50  ;;  %v6276_v1 = vshrl.u32 %v11285_v9, 16 }
 0x582   :  { %v6790_v15 = vadd.f32 %v6701_v38, %v6520_v42  ;;  %v6012_v46 = vpop.f32.mrf.mxu3 }
 0x583   :  { %v6704_v44 = vpop.f32.mrf.mxu1  ;;  %v6278_v5 = vrot.slane %v6276_v1, 2 }
 0x584   :  { %8077 = vst [vmem:[%s11569_s3 + $0x1a8] sm:$0xff] %v6790_v15  ;;  %v6875_v20 = vmul.f32 %v6790_v15, %v11773_v8 }
 0x586   :  { %v6916_v39 = vadd.f32 %v6915_v35, %v6875_v20  ;;  %v6965_v17 = vmul.f32 %v6875_v20, %v6790_v15  ;;  %v5595_v37 = vpop.f32.mrf.mxu2  ;;  %8059 = vmatmul.msk.bf16.gmra.mxu1 %vm387_vm2, %v6586_v6  ;;  %v6282_v20 = vor.u32 %v6281_v7, %v6278_v5 }
 0x587   :  { %v6434_v53 = vpop.f32.mrf.mxu0  ;;  %8014 = vmatmul.msk.bf16.gmra.mxu3 %vm387_vm2, %v5894_v48  ;;  %v5681_v49 = vadd.f32 %v5595_v37, %v10733_v36  ;;  %v11315_v36 = vld [vmem:[%s11567_s0 + $0x154] sm:$0xff] }
 0x588   :  { %v7006_v23 = vadd.f32 %v7005_v61, %v6965_v17  ;;  %v6521_v33 = vadd.f32 %v6434_v53, %v6097_v27  ;;  %v6587_v61 = vrot.slane %v11285_v9, 3  ;;  %v5895_v42 = vrot.slane %v11315_v36, 2  ;;  %v8287_v9 = vld [vmem:[%s11567_s0 + $0x14c] sm:$0xff] }
 0x589   :  { %v6098_v35 = vadd.f32 %v6012_v46, %v5681_v49  ;;  %v11775_v46 = vld [vmem:[#allocation24_spill] sm:$0xff]  ;;  %v6589_v5 = vrot.slane %v11315_v36, 3 }
 0x58a   :  { %v6791_v11 = vadd.f32 %v6704_v44, %v6521_v33  ;;  %8036 = vmatmul.msk.bf16.gmra.mxu0 %vm387_vm2, %v6274_v30  ;;  %v6015_v63 = vpop.f32.mrf.mxu3  ;;  %v6588_v48 = vsel %vm2966_vm7, %v6585_v47, %v6587_v61  ;;  %v5896_v13 = vsel %vm1850_vm4, %v5893_v31, %v5895_v42  ;;  %v6283_v30 = vsel %vm2540_vm6, %v6273_v29, %v6282_v20  ;;  %v11776_v29 = vld [vmem:[#allocation25_spill] sm:$0xff] }
 0x58b   :  { %7869 = vmatmul.msk.bf16.gmra.mxu2 %vm387_vm2, %v5477_v32  ;;  %v6706_v43 = vpop.f32.mrf.mxu1 }
 0x58c   :  { %8078 = vst [vmem:[%s11569_s3 + $0x1b0] sm:$0xff] %v6791_v11  ;;  %v6876_v26 = vmul.f32 %v6791_v11, %v11774_v12 }
 0x58e   :  { %v6917_v62 = vadd.f32 %v6916_v39, %v6876_v26  ;;  %v6966_v38 = vmul.f32 %v6876_v26, %v6791_v11  ;;  %v5598_v58 = vpop.f32.mrf.mxu2  ;;  %v5478_v39 = vrot.slane %v8287_v9, 2  ;;  %v6285_v11 = vshrl.u32 %v11315_v36, 16 }
 0x58f   :  { %v6436_v59 = vpop.f32.mrf.mxu0  ;;  %v5682_v50 = vadd.f32 %v5598_v58, %v10750_v3 }
 0x590   :  { %v7007_v21 = vadd.f32 %v7006_v23, %v6966_v38  ;;  %v6522_v16 = vadd.f32 %v6436_v59, %v6098_v35  ;;  %v5479_v47 = vsel %vm1850_vm4, %v5476_v19, %v5478_v39  ;;  %v6287_v38 = vrot.slane %v6285_v11, 2 }
 0x591   :  { %v6099_v27 = vadd.f32 %v6015_v63, %v5682_v50  ;;  %v6288_v63 = vshll.u32 %v11315_v36, 16  ;;  %v8288_v36 = vld [vmem:[%s11567_s0 + $0x154] sm:$0xff] }
 0x592   :  { %v6792_v15 = vadd.f32 %v6706_v43, %v6522_v16  ;;  %v6017_v8 = vpop.f32.mrf.mxu3  ;;  %v5480_v9 = vrot.slane %v8288_v36, 2 }
 0x593   :  { %v6709_v6 = vpop.f32.mrf.mxu1  ;;  %v6290_v35 = vrot.slane %v6288_v63, 3 }
 0x594   :  { %8079 = vst [vmem:[%s11569_s3 + $0x1b8] sm:$0xff] %v6792_v15  ;;  %v6877_v44 = vmul.f32 %v6792_v15, %v11775_v46 }
 0x595   :  { %v6291_v46 = vor.u32 %v6290_v35, %v6287_v38 }
 0x596   :  { %v6918_v3 = vadd.f32 %v6917_v62, %v6877_v44  ;;  %v6967_v17 = vmul.f32 %v6877_v44, %v6792_v15  ;;  %v5600_v37 = vpop.f32.mrf.mxu2  ;;  %8060 = vmatmul.msk.bf16.gmra.mxu1 %vm387_vm2, %v6588_v48  ;;  %v6590_v48 = vsel %vm2966_vm7, %v6587_v61, %v6589_v5  ;;  %v5481_v61 = vsel %vm1850_vm4, %v5478_v39, %v5480_v9  ;;  %v11375_v39 = vld [vmem:[%s11567_s0 + $0x164] sm:$0xff] }
 0x597   :  { %v6439_v53 = vpop.f32.mrf.mxu0  ;;  %8015 = vmatmul.msk.bf16.gmra.mxu3 %vm387_vm2, %v5896_v13  ;;  %v5683_v31 = vadd.f32 %v5600_v37, %v10757_v0  ;;  %v11345_v0 = vld [vmem:[%s11567_s0 + $0x15c] sm:$0xff] }
 0x598   :  { %v7008_v23 = vadd.f32 %v7007_v21, %v6967_v17  ;;  %v6523_v33 = vadd.f32 %v6439_v53, %v6099_v27  ;;  %v5897_v7 = vrot.slane %v11345_v0, 2  ;;  %v11777_v21 = vld [vmem:[#allocation5_spill] sm:$0xff]  ;;  %v6297_v11 = vshll.u32 %v11345_v0, 16 }
 0x599   :  { %v6100_v26 = vadd.f32 %v6017_v8, %v5683_v31  ;;  %v11778_v8 = vld [vmem:[#allocation26_spill] sm:$0xff] }
 0x59a   :  { %v6793_v32 = vadd.f32 %v6709_v6, %v6523_v33  ;;  %8037 = vmatmul.msk.bf16.gmra.mxu0 %vm387_vm2, %v6283_v30  ;;  %v6020_v49 = vpop.f32.mrf.mxu3  ;;  %v5898_v13 = vsel %vm1850_vm4, %v5895_v42, %v5897_v7  ;;  %v6292_v30 = vsel %vm2540_vm6, %v6282_v20, %v6291_v46  ;;  %v11779_v42 = vld [vmem:[#allocation27_spill] sm:$0xff]  ;;  %v11780_v20 = vld [vmem:[#allocation28_spill] sm:$0xff] }
 0x59b   :  { %7870 = vmatmul.msk.bf16.gmra.mxu2 %vm387_vm2, %v5479_v47  ;;  %v6711_v56 = vpop.f32.mrf.mxu1 }
 0x59c   :  { %8080 = vst [vmem:[%s11569_s3 + $0x1c0] sm:$0xff] %v6793_v32  ;;  %v6878_v1 = vmul.f32 %v6793_v32, %v11776_v29 }
 0x59e   :  { %v6919_v19 = vadd.f32 %v6918_v3, %v6878_v1  ;;  %v6968_v12 = vmul.f32 %v6878_v1, %v6793_v32  ;;  %v5603_v43 = vpop.f32.mrf.mxu2 }
 0x59f   :  { %v6441_v62 = vpop.f32.mrf.mxu0  ;;  %v5684_v16 = vadd.f32 %v5603_v43, %v11777_v21  ;;  %v11781_v21 = vld [vmem:[#allocation29_spill] sm:$0xff] }
 0x5a0   :  { %v7009_v58 = vadd.f32 %v7008_v23, %v6968_v12  ;;  %v6524_v59 = vadd.f32 %v6441_v62, %v6100_v26  ;;  %v6299_v62 = vrot.slane %v6297_v11, 3 }
 0x5a1   :  { %v6101_v27 = vadd.f32 %v6020_v49, %v5684_v16  ;;  %v6294_v49 = vshrl.u32 %v11345_v0, 16 }
 0x5a2   :  { %v6794_v50 = vadd.f32 %v6711_v56, %v6524_v59  ;;  %v6022_v15 = vpop.f32.mrf.mxu3  ;;  %v5899_v59 = vrot.slane %v11375_v39, 2 }
 0x5a3   :  { %v6714_v6 = vpop.f32.mrf.mxu1  ;;  %v6296_v43 = vrot.slane %v6294_v49, 2  ;;  %v6306_v49 = vshll.u32 %v11375_v39, 16 }
 0x5a4   :  { %8081 = vst [vmem:[%s11569_s3 + $0x1c8] sm:$0xff] %v6794_v50  ;;  %v6879_v44 = vmul.f32 %v6794_v50, %v11778_v8  ;;  %v5900_v36 = vsel %vm1850_vm4, %v5897_v7, %v5899_v59  ;;  %v11783_v7 = vld [vmem:[#allocation6_spill] sm:$0xff] }
 0x5a6   :  { %v6920_v3 = vadd.f32 %v6919_v19, %v6879_v44  ;;  %v6969_v17 = vmul.f32 %v6879_v44, %v6794_v50  ;;  %v5605_v37 = vpop.f32.mrf.mxu2  ;;  %8061 = vmatmul.msk.bf16.gmra.mxu1 %vm387_vm2, %v6590_v48  ;;  %v6300_v44 = vor.u32 %v6299_v62, %v6296_v43 }
 0x5a7   :  { %v6444_v53 = vpop.f32.mrf.mxu0  ;;  %8016 = vmatmul.msk.bf16.gmra.mxu3 %vm387_vm2, %v5898_v13  ;;  %v5685_v47 = vadd.f32 %v5605_v37, %v11779_v42 }
 0x5a8   :  { %v7010_v23 = vadd.f32 %v7009_v58, %v6969_v17  ;;  %v6525_v33 = vadd.f32 %v6444_v53, %v6101_v27  ;;  %v6591_v58 = vrot.slane %v11345_v0, 3  ;;  %v8289_v0 = vld [vmem:[%s11567_s0 + $0x15c] sm:$0xff] }
 0x5a9   :  { %v6102_v19 = vadd.f32 %v6022_v15, %v5685_v47  ;;  %v11782_v15 = vld [vmem:[#allocation30_spill] sm:$0xff] }
 0x5aa   :  { %v6795_v31 = vadd.f32 %v6714_v6, %v6525_v33  ;;  %8038 = vmatmul.msk.bf16.gmra.mxu0 %vm387_vm2, %v6292_v30  ;;  %v6025_v32 = vpop.f32.mrf.mxu3  ;;  %v6592_v13 = vsel %vm2966_vm7, %v6589_v5, %v6591_v58 }
 0x5ab   :  { %7871 = vmatmul.msk.bf16.gmra.mxu2 %vm387_vm2, %v5481_v61  ;;  %v6716_v29 = vpop.f32.mrf.mxu1 }
 0x5ac   :  { %8082 = vst [vmem:[%s11569_s3 + $0x1d0] sm:$0xff] %v6795_v31  ;;  %v6880_v63 = vmul.f32 %v6795_v31, %v11780_v20 }
 0x5ae   :  { %v6921_v1 = vadd.f32 %v6920_v3, %v6880_v63  ;;  %v6970_v56 = vmul.f32 %v6880_v63, %v6795_v31  ;;  %v5608_v12 = vpop.f32.mrf.mxu2  ;;  %v5482_v3 = vrot.slane %v8289_v0, 2 }
 0x5af   :  { %v6446_v26 = vpop.f32.mrf.mxu0  ;;  %v5686_v16 = vadd.f32 %v5608_v12, %v11781_v21  ;;  %v11785_v21 = vld [vmem:[#allocation7_spill] sm:$0xff] }
 0x5b0   :  { %v7011_v38 = vadd.f32 %v7010_v23, %v6970_v56  ;;  %v6526_v35 = vadd.f32 %v6446_v26, %v6102_v19  ;;  %v6301_v23 = vsel %vm2540_vm6, %v6291_v46, %v6300_v44  ;;  %v5483_v5 = vsel %vm1850_vm4, %v5480_v9, %v5482_v3  ;;  %v11784_v46 = vld [vmem:[#allocation31_spill] sm:$0xff] }
 0x5b1   :  { %v6103_v37 = vadd.f32 %v6025_v32, %v5686_v16  ;;  %v6303_v32 = vshrl.u32 %v11375_v39, 16  ;;  %v11405_v9 = vld [vmem:[%s11567_s0 + $0x16c] sm:$0xff]  ;;  %v6308_v26 = vrot.slane %v6306_v49, 3 }
 0x5b2   :  { %v6796_v50 = vadd.f32 %v6716_v29, %v6526_v35  ;;  %v6027_v8 = vpop.f32.mrf.mxu3  ;;  %v5901_v35 = vrot.slane %v11405_v9, 2  ;;  %v6312_v49 = vshrl.u32 %v11405_v9, 16 }
 0x5b3   :  { %v6719_v48 = vpop.f32.mrf.mxu1  ;;  %v6305_v12 = vrot.slane %v6303_v32, 2 }
 0x5b4   :  { %8083 = vst [vmem:[%s11569_s3 + $0x1d8] sm:$0xff] %v6796_v50  ;;  %v6881_v6 = vmul.f32 %v6796_v50, %v11782_v15  ;;  %v5902_v0 = vsel %vm1850_vm4, %v5899_v59, %v5901_v35 }
 0x5b6   :  { %v6922_v17 = vadd.f32 %v6921_v1, %v6881_v6  ;;  %v6971_v27 = vmul.f32 %v6881_v6, %v6796_v50  ;;  %v5610_v53 = vpop.f32.mrf.mxu2  ;;  %8062 = vmatmul.msk.bf16.gmra.mxu1 %vm387_vm2, %v6592_v13  ;;  %v6309_v6 = vor.u32 %v6308_v26, %v6305_v12  ;;  %v6314_v12 = vrot.slane %v6312_v49, 2 }
 0x5b7   :  { %v6449_v30 = vpop.f32.mrf.mxu0  ;;  %8017 = vmatmul.msk.bf16.gmra.mxu3 %vm387_vm2, %v5900_v36  ;;  %v5687_v42 = vadd.f32 %v5610_v53, %v11783_v7 }
 0x5b8   :  { %v7012_v33 = vadd.f32 %v7011_v38, %v6971_v27  ;;  %v6527_v61 = vadd.f32 %v6449_v30, %v6103_v37  ;;  %v6593_v38 = vrot.slane %v11375_v39, 3  ;;  %v8290_v39 = vld [vmem:[%s11567_s0 + $0x164] sm:$0xff]  ;;  %v7917_v30 = vld [vmem:[%s11567_s0 + $0x174] sm:$0x3] }
 0x5b9   :  { %v6104_v1 = vadd.f32 %v6027_v8, %v5687_v42  ;;  %v11786_v8 = vld [vmem:[#allocation32_spill] sm:$0xff]  ;;  %v5839_v7 = vunpack.c.l.b16 %v7917_v30  ;;  %v11791_v30 = vld [vmem:[#allocation9_spill] sm:$0xff] }
 0x5ba   :  { %v6797_v47 = vadd.f32 %v6719_v48, %v6527_v61  ;;  %8039 = vmatmul.msk.bf16.gmra.mxu0 %vm387_vm2, %v6301_v23  ;;  %v6030_v31 = vpop.f32.mrf.mxu3  ;;  %v6594_v36 = vsel %vm2966_vm7, %v6591_v58, %v6593_v38  ;;  %v6310_v58 = vsel %vm2540_vm6, %v6300_v44, %v6309_v6  ;;  %v11787_v42 = vld [vmem:[#allocation8_spill] sm:$0xff]  ;;  %v11788_v44 = vld [vmem:[#allocation33_spill] sm:$0xff] }
 0x5bb   :  { %7872 = vmatmul.msk.bf16.gmra.mxu2 %vm387_vm2, %v5483_v5  ;;  %v6721_v20 = vpop.f32.mrf.mxu1 }
 0x5bc   :  { %8084 = vst [vmem:[%s11569_s3 + $0x1e0] sm:$0xff] %v6797_v47  ;;  %v6882_v11 = vmul.f32 %v6797_v47, %v11784_v46  ;;  %v6315_v46 = vshll.u32 %v11405_v9, 16 }
 0x5be   :  { %v6923_v63 = vadd.f32 %v6922_v17, %v6882_v11  ;;  %v6972_v29 = vmul.f32 %v6882_v11, %v6797_v47  ;;  %v5613_v56 = vpop.f32.mrf.mxu2  ;;  %v5484_v17 = vrot.slane %v8290_v39, 2  ;;  %v6317_v26 = vrot.slane %v6315_v46, 3 }
 0x5bf   :  { %v6451_v19 = vpop.f32.mrf.mxu0  ;;  %v5688_v16 = vadd.f32 %v5613_v56, %v11785_v21  ;;  %v6595_v21 = vrot.slane %v11405_v9, 3 }
 0x5c0   :  { %v7013_v43 = vadd.f32 %v7012_v33, %v6972_v29  ;;  %v6528_v62 = vadd.f32 %v6451_v19, %v6104_v1  ;;  %v5485_v5 = vsel %vm1850_vm4, %v5482_v3, %v5484_v17 }
 0x5c1   :  { %v6105_v53 = vadd.f32 %v6030_v31, %v5688_v16  ;;  %v8020_v16 = vld [vmem:[%s11567_s0 + $0x174] sm:$0x7]  ;;  %v6596_v9 = vsel %vm2966_vm7, %v6593_v38, %v6595_v21 }
 0x5c2   :  { %v6798_v50 = vadd.f32 %v6721_v20, %v6528_v62  ;;  %v6032_v15 = vpop.f32.mrf.mxu3  ;;  %v5861_v20 = vpack.c.b16 %v5839_v7, %v5839_v7  ;;  %v6130_v39 = vunpack.c.l.b16 %v8020_v16 }
 0x5c3   :  { %v6724_v13 = vpop.f32.mrf.mxu1 }
 0x5c4   :  { %8085 = vst [vmem:[%s11569_s3 + $0x1e8] sm:$0xff] %v6798_v50  ;;  %v6883_v48 = vmul.f32 %v6798_v50, %v11786_v8  ;;  %v11789_v8 = vld [vmem:[#allocation54_spill] sm:$0xff] }
 0x5c6   :  { %v6924_v27 = vadd.f32 %v6923_v63, %v6883_v48  ;;  %v6973_v37 = vmul.f32 %v6883_v48, %v6798_v50  ;;  %v5615_v23 = vpop.f32.mrf.mxu2  ;;  %8063 = vmatmul.msk.bf16.gmra.mxu1 %vm387_vm2, %v6594_v36  ;;  %v5903_v50 = vrot.slane %v5861_v20, 2 }
 0x5c7   :  { %v6454_v33 = vpop.f32.mrf.mxu0  ;;  %8018 = vmatmul.msk.bf16.gmra.mxu3 %vm387_vm2, %v5902_v0  ;;  %v5689_v47 = vadd.f32 %v5615_v23, %v11787_v42  ;;  %v6318_v0 = vor.u32 %v6317_v26, %v6314_v12  ;;  %v5486_v23 = vrot.slane %v11791_v30, 2  ;;  %v6131_v42 = vpack.c.b16 %v6130_v39, %v6130_v39 }
 0x5c8   :  { %v7014_v61 = vadd.f32 %v7013_v43, %v6973_v37  ;;  %v6529_v59 = vadd.f32 %v6454_v33, %v6105_v53  ;;  %v5904_v53 = vsel %vm1850_vm4, %v5901_v35, %v5903_v50 }
 0x5c9   :  { %v6106_v1 = vadd.f32 %v6032_v15, %v5689_v47  ;;  %v11790_v15 = vld [vmem:[#allocation34_spill] sm:$0xff]  ;;  %v6319_v7 = vsel %vm2540_vm6, %v6309_v6, %v6318_v0  ;;  %v5487_v38 = vsel %vm1850_vm4, %v5484_v17, %v5486_v23  ;;  %v6597_v26 = vrot.slane %v6131_v42, 3 }
 0x5ca   :  { %v6799_v31 = vadd.f32 %v6724_v13, %v6529_v59  ;;  %8040 = vmatmul.msk.bf16.gmra.mxu0 %vm387_vm2, %v6310_v58  ;;  %v6035_v32 = vpop.f32.mrf.mxu3  ;;  %v11792_v6 = vld [vmem:[#allocation10_spill] sm:$0xff] }
 0x5cb   :  { %7873 = vmatmul.msk.bf16.gmra.mxu2 %vm387_vm2, %v5485_v5  ;;  %v6726_v3 = vpop.f32.mrf.mxu1 }
 0x5cc   :  { %8086 = vst [vmem:[%s11569_s3 + $0x1f0] sm:$0xff] %v6799_v31  ;;  %v6884_v11 = vmul.f32 %v6799_v31, %v11788_v44  ;;  %v6324_v44 = vshll.u32 %v6131_v42, 16 }
 0x5ce   :  { %v6925_v63 = vadd.f32 %v6924_v27, %v6884_v11  ;;  %v6974_v29 = vmul.f32 %v6884_v11, %v6799_v31  ;;  %v5618_v56 = vpop.f32.mrf.mxu2 }
 0x5cf   :  { %v6456_v19 = vpop.f32.mrf.mxu0  ;;  %v5690_v48 = vadd.f32 %v5618_v56, %v11789_v8  ;;  %v6326_v56 = vrot.slane %v6324_v44, 3  ;;  %v11793_v8 = vld [vmem:[#allocation11_spill] sm:$0xff] }
 0x5d0   :  { %v7015_v43 = vadd.f32 %v7014_v61, %v6974_v29  ;;  %v6530_v62 = vadd.f32 %v6456_v19, %v6106_v1 }
 0x5d1   :  { %v6107_v61 = vadd.f32 %v6035_v32, %v5690_v48  ;;  %v6321_v32 = vshrl.u32 %v6131_v42, 16 }
 0x5d2   :  { %v6800_v13 = vadd.f32 %v6726_v3, %v6530_v62  ;;  %v6037_v36 = vpop.f32.mrf.mxu3 }
 0x5d3   :  { %v6729_v37 = vpop.f32.mrf.mxu1  ;;  %v6323_v1 = vrot.slane %v6321_v32, 2 }
 0x5d4   :  { %8087 = vst [vmem:[%s11569_s3 + $0x1f8] sm:$0xff] %v6800_v13  ;;  %v6885_v27 = vmul.f32 %v6800_v13, %v11790_v15 }
 0x5d5   :  { %v6327_v50 = vor.u32 %v6326_v56, %v6323_v1  ;;  %v11796_v56 = vld [vmem:[#allocation38_spill] sm:$0xff] }
 0x5d6   :  { %v6926_v33 = vadd.f32 %v6925_v63, %v6885_v27  ;;  %v6975_v58 = vmul.f32 %v6885_v27, %v6800_v13  ;;  %v5620_v59 = vpop.f32.mrf.mxu2  ;;  %8064 = vmatmul.msk.bf16.gmra.mxu1 %vm387_vm2, %v6596_v9 }
 0x5d7   :  { %v6459_v5 = vpop.f32.mrf.mxu0  ;;  %8019 = vmatmul.msk.bf16.gmra.mxu3 %vm387_vm2, %v5904_v53  ;;  %v5691_v35 = vadd.f32 %v5620_v59, %v10875_v40 }
 0x5d8   :  { %v7016_v47 = vadd.f32 %v7015_v43, %v6975_v58  ;;  %v6531_v31 = vadd.f32 %v6459_v5, %v6107_v61 }
 0x5d9   :  { %v6108_v17 = vadd.f32 %v6037_v36, %v5691_v35  ;;  %v6598_v36 = vsel %vm2966_vm7, %v6595_v21, %v6597_v26  ;;  %v11794_v21 = vld [vmem:[#allocation36_spill] sm:$0xff] }
 0x5da   :  { %v6801_v49 = vadd.f32 %v6729_v37, %v6531_v31  ;;  %8041 = vmatmul.msk.bf16.gmra.mxu0 %vm387_vm2, %v6319_v7  ;;  %v6040_v46 = vpop.f32.mrf.mxu3 }
 0x5db   :  { %7874 = vmatmul.msk.bf16.gmra.mxu2 %vm387_vm2, %v5487_v38  ;;  %v6731_v3 = vpop.f32.mrf.mxu1 }
 0x5dc   :  { %8088 = vst [vmem:[%s11569_s3 + $0x200] sm:$0xff] %v6801_v49  ;;  %v6886_v11 = vmul.f32 %v6801_v49, %v11792_v6 }
 0x5de   :  { %v6927_v20 = vadd.f32 %v6926_v33, %v6886_v11  ;;  %v6976_v63 = vmul.f32 %v6886_v11, %v6801_v49  ;;  %v5623_v29 = vpop.f32.mrf.mxu2 }
 0x5df   :  { %v6461_v40 = vpop.f32.mrf.mxu0  ;;  %v5692_v43 = vadd.f32 %v5623_v29, %v10891_v41  ;;  %v6328_v41 = vsel %vm2540_vm6, %v6318_v0, %v6327_v50 }
 0x5e0   :  { %v7017_v19 = vadd.f32 %v7016_v47, %v6976_v63  ;;  %v6532_v12 = vadd.f32 %v6461_v40, %v6108_v17 }
 0x5e1   :  { %v6109_v27 = vadd.f32 %v6040_v46, %v5692_v43  ;;  %v11795_v46 = vld [vmem:[#allocation37_spill] sm:$0xff] }
 0x5e2   :  { %v6802_v62 = vadd.f32 %v6731_v3, %v6532_v12  ;;  %v6042_v16 = vpop.f32.mrf.mxu3 }
 0x5e3   :  { %v6734_v13 = vpop.f32.mrf.mxu1 }
 0x5e4   :  { %8089 = vst [vmem:[%s11569_s3 + $0x208] sm:$0xff] %v6802_v62  ;;  %v6887_v48 = vmul.f32 %v6802_v62, %v11793_v8 }
 0x5e6   :  { %v6928_v39 = vadd.f32 %v6927_v20, %v6887_v48  ;;  %v6977_v15 = vmul.f32 %v6887_v48, %v6802_v62  ;;  %v5625_v37 = vpop.f32.mrf.mxu2  ;;  %8065 = vmatmul.msk.bf16.gmra.mxu1 %vm387_vm2, %v6598_v36 }
 0x5e7   :  { %v6464_v9 = vpop.f32.mrf.mxu0  ;;  %v5693_v23 = vadd.f32 %v5625_v37, %v10904_v2 }
 0x5e8   :  { %v7018_v53 = vadd.f32 %v7017_v19, %v6977_v15  ;;  %v6533_v30 = vadd.f32 %v6464_v9, %v6109_v27 }
 0x5e9   :  { %v6110_v42 = vadd.f32 %v6042_v16, %v5693_v23 }
 0x5ea   :  { %v6803_v33 = vadd.f32 %v6734_v13, %v6533_v30  ;;  %8042 = vmatmul.msk.bf16.gmra.mxu0 %vm387_vm2, %v6328_v41  ;;  %v6045_v58 = vpop.f32.mrf.mxu3 }
 0x5eb   :  { %v6736_v59 = vpop.f32.mrf.mxu1 }
 0x5ec   :  { %8090 = vst [vmem:[%s11569_s3 + $0x210] sm:$0xff] %v6803_v33  ;;  %v6888_v61 = vmul.f32 %v6803_v33, %v11794_v21 }
 0x5ee   :  { %v6929_v5 = vadd.f32 %v6928_v39, %v6888_v61  ;;  %v6978_v7 = vmul.f32 %v6888_v61, %v6803_v33  ;;  %v5628_v47 = vpop.f32.mrf.mxu2  ;;  %v11797_v39 = vld [vmem:[#allocation39_spill] sm:$0xff]  ;;  %v11798_v61 = vld [vmem:[#allocation40_spill] sm:$0xff] }
 0x5ef   :  { %v6466_v0 = vpop.f32.mrf.mxu0  ;;  %v5694_v2 = vadd.f32 %v5628_v47, %v10917_v52 }
 0x5f0   :  { %v7019_v31 = vadd.f32 %v7018_v53, %v6978_v7  ;;  %v6534_v38 = vadd.f32 %v6466_v0, %v6110_v42 }
 0x5f1   :  { %v6111_v3 = vadd.f32 %v6045_v58, %v5694_v2 }
 0x5f2   :  { %v6804_v35 = vadd.f32 %v6736_v59, %v6534_v38  ;;  %v6047_v49 = vpop.f32.mrf.mxu3 }
 0x5f3   :  { %v6739_v44 = vpop.f32.mrf.mxu1 }
 0x5f4   :  { %8091 = vst [vmem:[%s11569_s3 + $0x218] sm:$0xff] %v6804_v35  ;;  %v6889_v32 = vmul.f32 %v6804_v35, %v11795_v46  ;;  %v11799_v46 = vld [vmem:[#allocation41_spill] sm:$0xff] }
 0x5f6   :  { %v6930_v6 = vadd.f32 %v6929_v5, %v6889_v32  ;;  %v6979_v11 = vmul.f32 %v6889_v32, %v6804_v35  ;;  %v5630_v20 = vpop.f32.mrf.mxu2 }
 0x5f7   :  { %v6469_v63 = vpop.f32.mrf.mxu0  ;;  %v5695_v40 = vadd.f32 %v5630_v20, %v10930_v60 }
 0x5f8   :  { %v7020_v17 = vadd.f32 %v7019_v31, %v6979_v11  ;;  %v6535_v29 = vadd.f32 %v6469_v63, %v6111_v3 }
 0x5f9   :  { %v6112_v62 = vadd.f32 %v6047_v49, %v5695_v40 }
 0x5fa   :  { %v6805_v1 = vadd.f32 %v6739_v44, %v6535_v29  ;;  %v6050_v52 = vpop.f32.mrf.mxu3 }
 0x5fb   :  { %v6741_v12 = vpop.f32.mrf.mxu1 }
 0x5fc   :  { %8092 = vst [vmem:[%s11569_s3 + $0x220] sm:$0xff] %v6805_v1  ;;  %v6890_v19 = vmul.f32 %v6805_v1, %v11796_v56 }
 0x5fe   :  { %v6931_v26 = vadd.f32 %v6930_v6, %v6890_v19  ;;  %v6980_v43 = vmul.f32 %v6890_v19, %v6805_v1  ;;  %v5633_v16 = vpop.f32.mrf.mxu2 }
 0x5ff   :  { %v6471_v50 = vpop.f32.mrf.mxu0  ;;  %v5696_v13 = vadd.f32 %v5633_v16, %v10943_v22 }
 0x600   :  { %v7021_v8 = vadd.f32 %v7020_v17, %v6980_v43  ;;  %v6536_v48 = vadd.f32 %v6471_v50, %v6112_v62 }
 0x601   :  { %v6113_v41 = vadd.f32 %v6050_v52, %v5696_v13  ;;  %v11800_v52 = vld [vmem:[#allocation42_spill] sm:$0xff] }
 0x602   :  { %v6806_v36 = vadd.f32 %v6741_v12, %v6536_v48  ;;  %v6052_v60 = vpop.f32.mrf.mxu3 }
 0x603   :  { %v6744_v27 = vpop.f32.mrf.mxu1 }
 0x604   :  { %8093 = vst [vmem:[%s11569_s3 + $0x228] sm:$0xff] %v6806_v36  ;;  %v6891_v15 = vmul.f32 %v6806_v36, %v11797_v39 }
 0x606   :  { %v6932_v37 = vadd.f32 %v6931_v26, %v6891_v15  ;;  %v6981_v9 = vmul.f32 %v6891_v15, %v6806_v36  ;;  %v5635_v53 = vpop.f32.mrf.mxu2  ;;  %v11801_v36 = vld [vmem:[#allocation43_spill] sm:$0xff] }
 0x607   :  { %v6474_v30 = vpop.f32.mrf.mxu0  ;;  %v5697_v58 = vadd.f32 %v5635_v53, %v10956_v4 }
 0x608   :  { %v7022_v23 = vadd.f32 %v7021_v8, %v6981_v9  ;;  %v6537_v33 = vadd.f32 %v6474_v30, %v6113_v41 }
 0x609   :  { %v6114_v47 = vadd.f32 %v6052_v60, %v5697_v58  ;;  %v11802_v58 = vld [vmem:[#allocation44_spill] sm:$0xff] }
 0x60a   :  { %v6807_v21 = vadd.f32 %v6744_v27, %v6537_v33  ;;  %v6055_v22 = vpop.f32.mrf.mxu3 }
 0x60b   :  { %v6746_v5 = vpop.f32.mrf.mxu1 }
 0x60c   :  { %8094 = vst [vmem:[%s11569_s3 + $0x230] sm:$0xff] %v6807_v21  ;;  %v6892_v59 = vmul.f32 %v6807_v21, %v11798_v61 }
 0x60e   :  { %v6933_v7 = vadd.f32 %v6932_v37, %v6892_v59  ;;  %v6982_v42 = vmul.f32 %v6892_v59, %v6807_v21  ;;  %v5638_v0 = vpop.f32.mrf.mxu2 }
 0x60f   :  { %v6476_v31 = vpop.f32.mrf.mxu0  ;;  %v5698_v35 = vadd.f32 %v5638_v0, %v10969_v28 }
 0x610   :  { %v7023_v38 = vadd.f32 %v7022_v23, %v6982_v42  ;;  %v6538_v2 = vadd.f32 %v6476_v31, %v6114_v47 }
 0x611   :  { %v6115_v3 = vadd.f32 %v6055_v22, %v5698_v35 }
 0x612   :  { %v6808_v49 = vadd.f32 %v6746_v5, %v6538_v2  ;;  %v6057_v4 = vpop.f32.mrf.mxu3  ;;  %v11803_v2 = vld [vmem:[#allocation45_spill] sm:$0xff] }
 0x613   :  { %v6749_v44 = vpop.f32.mrf.mxu1 }
 0x614   :  { %8095 = vst [vmem:[%s11569_s3 + $0x238] sm:$0xff] %v6808_v49  ;;  %v6893_v32 = vmul.f32 %v6808_v49, %v11799_v46 }
 0x616   :  { %v6934_v6 = vadd.f32 %v6933_v7, %v6893_v32  ;;  %v6983_v11 = vmul.f32 %v6893_v32, %v6808_v49  ;;  %v5640_v20 = vpop.f32.mrf.mxu2 }
 0x617   :  { %v6479_v63 = vpop.f32.mrf.mxu0  ;;  %v5699_v40 = vadd.f32 %v5640_v20, %v10982_v45 }
 0x618   :  { %v7024_v17 = vadd.f32 %v7023_v38, %v6983_v11  ;;  %v6539_v29 = vadd.f32 %v6479_v63, %v6115_v3 }
 0x619   :  { %v6116_v43 = vadd.f32 %v6057_v4, %v5699_v40 }
 0x61a   :  { %v6809_v1 = vadd.f32 %v6749_v44, %v6539_v29  ;;  %v6060_v28 = vpop.f32.mrf.mxu3 }
 0x61b   :  { %v6751_v19 = vpop.f32.mrf.mxu1 }
 0x61c   :  { %8096 = vst [vmem:[%s11569_s3 + $0x240] sm:$0xff] %v6809_v1  ;;  %v6894_v56 = vmul.f32 %v6809_v1, %v11800_v52 }
 0x61e   :  { %v6935_v12 = vadd.f32 %v6934_v6, %v6894_v56  ;;  %v6984_v26 = vmul.f32 %v6894_v56, %v6809_v1  ;;  %v5643_v62 = vpop.f32.mrf.mxu2 }
 0x61f   :  { %v6481_v16 = vpop.f32.mrf.mxu0  ;;  %v5700_v48 = vadd.f32 %v5643_v62, %v10995_v18 }
 0x620   :  { %v7025_v50 = vadd.f32 %v7024_v17, %v6984_v26  ;;  %v6540_v8 = vadd.f32 %v6481_v16, %v6116_v43  ;;  %v11804_v17 = vld [vmem:[#allocation46_spill] sm:$0xff] }
 0x621   :  { %v6117_v37 = vadd.f32 %v6060_v28, %v5700_v48 }
 0x622   :  { %v6810_v13 = vadd.f32 %v6751_v19, %v6540_v8  ;;  %v6062_v45 = vpop.f32.mrf.mxu3 }
 0x623   :  { %v6754_v39 = vpop.f32.mrf.mxu1 }
 0x624   :  { %8097 = vst [vmem:[%s11569_s3 + $0x248] sm:$0xff] %v6810_v13  ;;  %v6895_v60 = vmul.f32 %v6810_v13, %v11801_v36 }
 0x626   :  { %v6936_v15 = vadd.f32 %v6935_v12, %v6895_v60  ;;  %v6985_v27 = vmul.f32 %v6895_v60, %v6810_v13  ;;  %v5645_v9 = vpop.f32.mrf.mxu2 }
 0x627   :  { %v6484_v41 = vpop.f32.mrf.mxu0  ;;  %v5701_v23 = vadd.f32 %v5645_v9, %v11008_v54 }
 0x628   :  { %v7026_v53 = vadd.f32 %v7025_v50, %v6985_v27  ;;  %v6541_v30 = vadd.f32 %v6484_v41, %v6117_v37 }
 0x629   :  { %v6118_v5 = vadd.f32 %v6062_v45, %v5701_v23 }
 0x62a   :  { %v6811_v33 = vadd.f32 %v6754_v39, %v6541_v30  ;;  %v6065_v18 = vpop.f32.mrf.mxu3 }
 0x62b   :  { %v6756_v22 = vpop.f32.mrf.mxu1 }
 0x62c   :  { %8098 = vst [vmem:[%s11569_s3 + $0x250] sm:$0xff] %v6811_v33  ;;  %v6896_v21 = vmul.f32 %v6811_v33, %v11802_v58 }
 0x62e   :  { %v6937_v61 = vadd.f32 %v6936_v15, %v6896_v21  ;;  %v6986_v59 = vmul.f32 %v6896_v21, %v6811_v33  ;;  %v5648_v7 = vpop.f32.mrf.mxu2 }
 0x62f   :  { %v6486_v42 = vpop.f32.mrf.mxu0  ;;  %v5702_v31 = vadd.f32 %v5648_v7, %v11021_v25 }
 0x630   :  { %v7027_v47 = vadd.f32 %v7026_v53, %v6986_v59  ;;  %v6542_v0 = vadd.f32 %v6486_v42, %v6118_v5 }
 0x631   :  { %v6119_v32 = vadd.f32 %v6065_v18, %v5702_v31 }
 0x632   :  { %v6812_v38 = vadd.f32 %v6756_v22, %v6542_v0  ;;  %v6067_v54 = vpop.f32.mrf.mxu3 }
 0x633   :  { %v6759_v49 = vpop.f32.mrf.mxu1 }
 0x634   :  { %8099 = vst [vmem:[%s11569_s3 + $0x258] sm:$0xff] %v6812_v38  ;;  %v6897_v35 = vmul.f32 %v6812_v38, %v11803_v2 }
 0x636   :  { %v6938_v4 = vadd.f32 %v6937_v61, %v6897_v35  ;;  %v6987_v46 = vmul.f32 %v6897_v35, %v6812_v38  ;;  %v5650_v44 = vpop.f32.mrf.mxu2 }
 0x637   :  { %v6489_v6 = vpop.f32.mrf.mxu0  ;;  %v5703_v20 = vadd.f32 %v5650_v44, %v11034_v51  ;;  %v11805_v51 = vld [vmem:[#allocation47_spill] sm:$0xff] }
 0x638   :  { %v7028_v11 = vadd.f32 %v7027_v47, %v6987_v46  ;;  %v6543_v3 = vadd.f32 %v6489_v6, %v6119_v32 }
 0x639   :  { %v6120_v52 = vadd.f32 %v6067_v54, %v5703_v20 }
 0x63a   :  { %v6813_v63 = vadd.f32 %v6759_v49, %v6543_v3  ;;  %v6070_v25 = vpop.f32.mrf.mxu3 }
 0x63b   :  { %v6761_v40 = vpop.f32.mrf.mxu1 }
 0x63c   :  { %8100 = vst [vmem:[%s11569_s3 + $0x260] sm:$0xff] %v6813_v63  ;;  %v6898_v29 = vmul.f32 %v6813_v63, %v11804_v17 }
 0x63e   :  { %v6939_v1 = vadd.f32 %v6938_v4, %v6898_v29  ;;  %v6988_v28 = vmul.f32 %v6898_v29, %v6813_v63  ;;  %v5653_v56 = vpop.f32.mrf.mxu2 }
 0x63f   :  { %v6491_v19 = vpop.f32.mrf.mxu0  ;;  %v5704_v43 = vadd.f32 %v5653_v56, %v11047_v34  ;;  %v11806_v34 = vld [vmem:[#allocation48_spill] sm:$0xff] }
 0x640   :  { %v7029_v12 = vadd.f32 %v7028_v11, %v6988_v28  ;;  %v6544_v26 = vadd.f32 %v6491_v19, %v6120_v52 }
 0x641   :  { %v6121_v45 = vadd.f32 %v6070_v25, %v5704_v43 }
 0x642   :  { %v6814_v62 = vadd.f32 %v6761_v40, %v6544_v26  ;;  %v6072_v8 = vpop.f32.mrf.mxu3 }
 0x643   :  { %v6764_v50 = vpop.f32.mrf.mxu1 }
 0x644   :  { %8101 = vst [vmem:[%s11569_s3 + $0x268] sm:$0xff] %v6814_v62  ;;  %v6899_v16 = vmul.f32 %v6814_v62, %v11805_v51 }
 0x646   :  { %v6940_v48 = vadd.f32 %v6939_v1, %v6899_v16  ;;  %v6989_v13 = vmul.f32 %v6899_v16, %v6814_v62  ;;  %v5655_v36 = vpop.f32.mrf.mxu2 }
 0x647   :  { %v6494_v60 = vpop.f32.mrf.mxu0  ;;  %v5705_v27 = vadd.f32 %v5655_v36, %v11060_v14  ;;  %v11807_v14 = vld [vmem:[#allocation2_spill] sm:$0xff] }
 0x648   :  { %v7030_v39 = vadd.f32 %v7029_v12, %v6989_v13  ;;  %v6545_v15 = vadd.f32 %v6494_v60, %v6121_v45 }
 0x649   :  { %v6122_v33 = vadd.f32 %v6072_v8, %v5705_v27 }
 0x64a   :  { %v6815_v37 = vadd.f32 %v6764_v50, %v6545_v15  ;;  %v6075_v23 = vpop.f32.mrf.mxu3  ;;  %v11812_v15 = vld [vmem:[#allocation53_spill] sm:$0xff] }
 0x64b   :  { %v6766_v41 = vpop.f32.mrf.mxu1  ;;  %v3657_v27 = vrot.slane %v11812_v15, 4 }
 0x64c   :  { %8102 = vst [vmem:[%s11569_s3 + $0x270] sm:$0xff] %v6815_v37  ;;  %v6900_v9 = vmul.f32 %v6815_v37, %v11806_v34 }
 0x64e   :  { %v6941_v53 = vadd.f32 %v6940_v48, %v6900_v9  ;;  %v6990_v30 = vmul.f32 %v6900_v9, %v6815_v37  ;;  %v5658_v18 = vpop.f32.mrf.mxu2  ;;  %v11811_v48 = vld [vmem:[#allocation52_spill] sm:$0xff] }
 0x64f   :  { %v6496_v58 = vpop.f32.mrf.mxu0  ;;  %v5706_v61 = vadd.f32 %v5658_v18, %v11073_v10  ;;  %v11808_v10 = vld [vmem:[#allocation3_spill] sm:$0xff]  ;;  %v3567_v13 = vrot.slane %v11811_v48, 4 }
 0x650   :  { %v7031_v21 = vadd.f32 %v7030_v39, %v6990_v30  ;;  %v6546_v22 = vadd.f32 %v6496_v58, %v6122_v33  ;;  %v11813_v30 = vld [vmem:[#allocation51_spill] sm:$0xff] }
 0x651   :  { %v6123_v0 = vadd.f32 %v6075_v23, %v5706_v61 }
 0x652   :  { %v6816_v59 = vadd.f32 %v6766_v41, %v6546_v22  ;;  %v6077_v35 = vpop.f32.mrf.mxu3 }
 0x653   :  { %v6769_v7 = vpop.f32.mrf.mxu1 }
 0x654   :  { %8103 = vst [vmem:[%s11569_s3 + $0x278] sm:$0xff] %v6816_v59  ;;  %v6901_v5 = vmul.f32 %v6816_v59, %v11807_v14 }
 0x656   :  { %v6942_v42 = vadd.f32 %v6941_v53, %v6901_v5  ;;  %v6991_v47 = vmul.f32 %v6901_v5, %v6816_v59  ;;  %v5660_v31 = vpop.f32.mrf.mxu2  ;;  %v3658_v53 = vadd.f32 %v3657_v27, %v11812_v15 }
 0x657   :  { %v6499_v38 = vpop.f32.mrf.mxu0  ;;  %v5707_v49 = vadd.f32 %v5660_v31, %v11086_v57  ;;  %v11809_v57 = vld [vmem:[#allocation49_spill] sm:$0xff] }
 0x658   :  { %v7032_v54 = vadd.f32 %v7031_v21, %v6991_v47  ;;  %v6547_v2 = vadd.f32 %v6499_v38, %v6123_v0  ;;  %v3659_v21 = vrot.slane %v3658_v53, 2 }
 0x659   :  { %v6124_v11 = vadd.f32 %v6077_v35, %v5707_v49 }
 0x65a   :  { %v6817_v4 = vadd.f32 %v6769_v7, %v6547_v2  ;;  %v6080_v40 = vpop.f32.mrf.mxu3  ;;  %v3660_v7 = vadd.f32 %v3659_v21, %v3658_v53 }
 0x65b   :  { %v6771_v32 = vpop.f32.mrf.mxu1 }
 0x65c   :  { %8104 = vst [vmem:[%s11569_s3 + $0x280] sm:$0xff] %v6817_v4  ;;  %v6902_v46 = vmul.f32 %v6817_v4, %v11808_v10 }
 0x65e   :  { %v6943_v44 = vadd.f32 %v6942_v42, %v6902_v46  ;;  %v6992_v6 = vmul.f32 %v6902_v46, %v6817_v4  ;;  %v5663_v3 = vpop.f32.mrf.mxu2 }
 0x65f   :  { %v6501_v20 = vpop.f32.mrf.mxu0  ;;  %v5708_v17 = vadd.f32 %v5663_v3, %v11099_v55  ;;  %v11810_v55 = vld [vmem:[#allocation50_spill] sm:$0xff] }
 0x660   :  { %v7033_v63 = vadd.f32 %v7032_v54, %v6992_v6  ;;  %v6548_v25 = vadd.f32 %v6501_v20, %v6124_v11  ;;  %v3661_v54 = vrot.slane %v3660_v7, 1 }
 0x661   :  { %v6125_v19 = vadd.f32 %v6080_v40, %v5708_v17 }
 0x662   :  { %v6818_v29 = vadd.f32 %v6771_v32, %v6548_v25  ;;  %v6082_v8 = vpop.f32.mrf.mxu3  ;;  %v3662_v46 = vadd.f32 %v3661_v54, %v3660_v7 }
 0x663   :  { %v6774_v56 = vpop.f32.mrf.mxu1 }
 0x664   :  { %8105 = vst [vmem:[%s11569_s3 + $0x288] sm:$0xff] %v6818_v29  ;;  %v6903_v1 = vmul.f32 %v6818_v29, %v11809_v57 }
 0x666   :  { %v6944_v28 = vadd.f32 %v6943_v44, %v6903_v1  ;;  %v6993_v52 = vmul.f32 %v6903_v1, %v6818_v29  ;;  %v5665_v12 = vpop.f32.mrf.mxu2 }
 0x667   :  { %v6504_v26 = vpop.f32.mrf.mxu0  ;;  %v5709_v51 = vadd.f32 %v5665_v12, %v11112_v24  ;;  %v3568_v24 = vadd.f32 %v3567_v13, %v11811_v48 }
 0x668   :  { %v7034_v43 = vadd.f32 %v7033_v63, %v6993_v52  ;;  %v6549_v62 = vadd.f32 %v6504_v26, %v6125_v19 }
 0x669   :  { %v6126_v60 = vadd.f32 %v6082_v8, %v5709_v51  ;;  %v3569_v33 = vrot.slane %v3568_v24, 2 }
 0x66a   :  { %v6819_v16 = vadd.f32 %v6774_v56, %v6549_v62 }
 0x66b   :  { %v6776_v9 = vpop.f32.mrf.mxu1  ;;  %v3570_v59 = vadd.f32 %v3569_v33, %v3568_v24 }
 0x66c   :  { %8106 = vst [vmem:[%s11569_s3 + $0x290] sm:$0xff] %v6819_v16  ;;  %v6904_v50 = vmul.f32 %v6819_v16, %v11810_v55 }
 0x66d   :  { %v3571_v0 = vrot.slane %v3570_v59, 1 }
 0x66e   :  { %v6945_v45 = vadd.f32 %v6944_v28, %v6904_v50  ;;  %v6994_v36 = vmul.f32 %v6904_v50, %v6819_v16 }
 0x66f   :  { %v6506_v39 = vpop.f32.mrf.mxu0  ;;  %v3572_v49 = vadd.f32 %v3571_v0, %v3570_v59 }
 0x670   :  { %v7035_v37 = vadd.f32 %v7034_v43, %v6994_v36  ;;  %v6550_v34 = vadd.f32 %v6506_v39, %v6126_v60 }
 0x672   :  { %v6820_v41 = vadd.f32 %v6776_v9, %v6550_v34 }
 0x674   :  { %8107 = vst [vmem:[%s11569_s3 + $0x298] sm:$0xff] %v6820_v41  ;;  %v6905_v23 = vmul.f32 %v6820_v41, %v11813_v30 }
 0x676   :  { %v6946_v18 = vadd.f32 %v6945_v45, %v6905_v23  ;;  %v6995_v58 = vmul.f32 %v6905_v23, %v6820_v41 }
 0x678   :  { %v6947_v22 = vrot.slane %v6946_v18, 4  ;;  %v7036_v61 = vadd.f32 %v7035_v37, %v6995_v58 }
 0x67a   :  { %v6948_v14 = vadd.f32 %v6947_v22, %v6946_v18  ;;  %v7037_v5 = vrot.slane %v7036_v61, 4 }
 0x67c   :  { %v6949_v42 = vrot.slane %v6948_v14, 2  ;;  %v7038_v47 = vadd.f32 %v7037_v5, %v7036_v61 }
 0x67e   :  { %v6950_v31 = vadd.f32 %v6949_v42, %v6948_v14  ;;  %v7039_v38 = vrot.slane %v7038_v47, 2 }
 0x680   :  { %v6951_v2 = vrot.slane %v6950_v31, 1  ;;  %v7040_v35 = vadd.f32 %v7039_v38, %v7038_v47 }
 0x682   :  { %v6952_v4 = vadd.f32 %v6951_v2, %v6950_v31  ;;  %v7041_v10 = vrot.slane %v7040_v35, 1 }
 0x684   :  { %v6953_v32 = vadd.f32 %v6952_v4, %v3572_v49  ;;  %v7042_v44 = vadd.f32 %v7041_v10, %v7040_v35 }
 0x686   :  { %v7043_v6 = vadd.f32 %v7042_v44, %v3662_v46  ;;  %7044 = vst [vmem:[%s11570_s4] sm:$0xff] %v6953_v32 }
 0x688   :  { %7045 = vst [vmem:[%s11571_s5] sm:$0xff] %v7043_v6 }

</bundles_post_ra>
